<compile_context>
chip_gen: v5e
topology: v5e:2x2
jax: 0.10.0
libtpu: 0.0.40
codegen_flags: <defaults>
</compile_context>

<pallas_src>
import functools

import jax
import jax.numpy as jnp
from jax.experimental import pallas as pl
from jax.experimental.pallas import tpu as pltpu


# --------------------------------------------------------------------------
# Kernel
# --------------------------------------------------------------------------
def _basic_block_kernel(x_ref, m1_ref, m2_ref, b1_ref, b2_ref, out_ref,
                        *, nb, H, WC):
    """One grid step = `nb` images, each an (H, W*C) lane-dense matrix.

    x_ref : (nb, H, WC) bf16
    m*_ref: (3*WC, WC)  bf16   fused band matrices (vertical taps stacked on K)
    b*_ref: (1, WC)     f32    folded BN bias
    out_ref: (nb, H, WC) bf16
    """
    M = nb * H

    def conv3x3_fused(act_3d_bf16, m_ref):
        # Per-image vertical shifts (zero row = zero padding at image border).
        zrow = jnp.zeros((nb, 1, WC), jnp.bfloat16)
        up = jnp.concatenate([zrow, act_3d_bf16[:, :-1, :]], axis=1)    # row h-1
        down = jnp.concatenate([act_3d_bf16[:, 1:, :], zrow], axis=1)   # row h+1
        # Lane-concat the 3 vertical taps -> single K = 3*WC matmul.
        lhs = jnp.concatenate([up, act_3d_bf16, down], axis=2).reshape(M, 3 * WC)
        return jnp.dot(lhs, m_ref[...], preferred_element_type=jnp.float32)

    x3 = x_ref[...]                                                # (nb, H, WC) bf16
    # conv1 + bn1 (folded) + relu          (f32 accumulation / bias / relu)
    h1 = jnp.maximum(conv3x3_fused(x3, m1_ref) + b1_ref[...], 0.0)
    # conv2 + bn2 (folded) + residual + relu
    h1_bf16 = h1.astype(jnp.bfloat16).reshape(nb, H, WC)           # single cast
    h2 = conv3x3_fused(h1_bf16, m2_ref) + b2_ref[...]
    # NOTE: residual uses x after bf16 rounding at the kernel boundary (inference-grade).
    out = jnp.maximum(h2 + x3.reshape(M, WC).astype(jnp.float32), 0.0)
    out_ref[...] = out.astype(out_ref.dtype).reshape(nb, H, WC)


# --------------------------------------------------------------------------
# One-time parameter preparation (hoist out of the hot path)
# --------------------------------------------------------------------------
def fold_bn_into_conv(w_oihw, gamma, beta, mean, var, eps=1e-5):
    """Fold eval-mode BatchNorm into a conv weight.

    w_oihw: (Cout, Cin, 3, 3) PyTorch layout.
    Returns (w_hwio, bias) with w_hwio: (3, 3, Cin, Cout), bias: (Cout,).
    """
    scale = gamma / jnp.sqrt(var + eps)
    w_hwio = jnp.transpose(w_oihw, (2, 3, 1, 0)) * scale[None, None, None, :]
    bias = beta - mean * scale
    return w_hwio, bias


def _fused_band_matrix(w_hwio, Wdim):
    """Block-banded matrix for a 3x3 'same' conv along the fused (w, c) lane
    axis, with the 3 vertical taps stacked along the contraction axis.

    w_hwio: (3, 3, Cin, Cout).  Returns (3*Wdim*Cin, Wdim*Cout) where block dh
    has M[dh][wi*Cin + ci, wo*Cout + co] = w_hwio[dh, wi-wo+1, ci, co] if
    |wi - wo| <= 1 else 0.
    """
    KH, KW, Ci, Co = w_hwio.shape
    wi = jnp.arange(Wdim)[:, None]
    wo = jnp.arange(Wdim)[None, :]
    delta = wi - wo + 1                                    # horizontal tap index
    valid = ((delta >= 0) & (delta < KW)).astype(w_hwio.dtype)      # (W, W)
    dcl = jnp.clip(delta, 0, KW - 1)
    mats = []
    for dh in range(KH):                                   # dh=0 -> row h-1 (up)
        blocks = w_hwio[dh][dcl] * valid[..., None, None]  # (W, W, Ci, Co)
        mats.append(blocks.transpose(0, 2, 1, 3).reshape(Wdim * Ci, Wdim * Co))
    return jnp.concatenate(mats, axis=0)                   # (3*W*Ci, W*Co)


def prepare_basic_block_params(w1_oihw, bn1, w2_oihw, bn2, *, width, eps=1e-5):
    """Precompute fused band matrices + folded biases (parameters-only work;
    call once per model, not per forward)."""
    g1, be1, mu1, v1 = bn1
    g2, be2, mu2, v2 = bn2
    w1_hwio, b1 = fold_bn_into_conv(w1_oihw, g1, be1, mu1, v1, eps)
    w2_hwio, b2 = fold_bn_into_conv(w2_oihw, g2, be2, mu2, v2, eps)
    C = w1_oihw.shape[1]
    WC = width * C
    # TODO(synk): W-tiling with halos is required once 6*(W*C)^2 bf16 bytes no
    # longer fit per-core VMEM (v7x: 64 MiB/TC).
    if 2 * 3 * WC * WC * 2 > 48 * 1024 * 1024:
        raise NotImplementedError("band matrices exceed VMEM budget; W-tiling not implemented")
    m1 = _fused_band_matrix(w1_hwio, width).astype(jnp.bfloat16)
    m2 = _fused_band_matrix(w2_hwio, width).astype(jnp.bfloat16)
    b1_row = jnp.tile(b1, width).reshape(1, WC).astype(jnp.float32)
    b2_row = jnp.tile(b2, width).reshape(1, WC).astype(jnp.float32)
    return m1, m2, b1_row, b2_row


# --------------------------------------------------------------------------
# pallas_call wrappers
# --------------------------------------------------------------------------
def _pick_batch_tile(N, H, target_rows=256, min_rows=128):
    """Images per grid step so nb*H ~= target MXU rows, nb | N; prefer >= 2
    grid steps (v7x megacore) when that still keeps >= min_rows per step."""
    nb = max(1, min(N, max(1, target_rows // H)))
    while N % nb:
        nb -= 1
    if nb == N and N > 1:
        half = nb // 2
        while half > 0 and N % half:
            half -= 1
        if half > 0 and half * H >= min_rows:
            nb = half
    return nb


def _derived_vmem_limit(nb, H, WC, single_buffer_weights):
    """Derive the VMEM limit from the actual per-step footprint (+ margin)."""
    w_bytes = 2 * (3 * WC * WC) * 2 * (1 if single_buffer_weights else 2)
    io_bytes = 2 * (nb * H * WC) * 2 * 2          # x + out blocks, double-buffered
    tmp_bytes = (nb * H) * (3 * WC) * 2 * 3 + (nb * H) * WC * 4 * 4
    est = w_bytes + io_bytes + tmp_bytes
    return int(min(max(2 * est, 32 * 1024 * 1024), 64 * 1024 * 1024))


def _basic_block_call(x_flat, m1, m2, b1_row, b2_row, *, nb, H, WC,
                      single_buffer_weights):
    N = x_flat.shape[0]
    kernel = functools.partial(_basic_block_kernel, nb=nb, H=H, WC=WC)

    def weight_spec(shape):
        idx = lambda n: (0,) * len(shape)
        if single_buffer_weights:
            # Grid-invariant operands: no need for double-buffering.
            return pl.BlockSpec(shape, idx, pipeline_mode=pl.Buffered(1))
        return pl.BlockSpec(shape, idx)

    return pl.pallas_call(
        kernel,
        out_shape=jax.ShapeDtypeStruct(x_flat.shape, jnp.bfloat16),
        grid_spec=pltpu.PrefetchScalarGridSpec(
            num_scalar_prefetch=0,
            grid=(N // nb,),
            in_specs=[
                pl.BlockSpec((nb, H, WC), lambda n: (n, 0, 0)),
                weight_spec((3 * WC, WC)),
                weight_spec((3 * WC, WC)),
                weight_spec((1, WC)),
                weight_spec((1, WC)),
            ],
            out_specs=pl.BlockSpec((nb, H, WC), lambda n: (n, 0, 0)),
        ),
        compiler_params=pltpu.CompilerParams(
            dimension_semantics=("parallel",),
            vmem_limit_bytes=_derived_vmem_limit(nb, H, WC,
                                                 single_buffer_weights)),
    )(x_flat, m1, m2, b1_row, b2_row)


def basic_block_pallas_nhwc(x_nhwc, params, *, nb=None):
    """BasicBlock forward on NHWC input (no boundary transposes needed)."""
    m1, m2, b1_row, b2_row = params
    N, H, W, C = x_nhwc.shape
    WC = W * C
    assert m1.shape == (3 * WC, WC) and m2.shape == (3 * WC, WC), \
        "downsample=None / stride=1 requires inplanes == planes"
    if nb is None:
        nb = _pick_batch_tile(N, H)
    assert N % nb == 0, f"nb={nb} must divide N={N}"

    x_flat = x_nhwc.reshape(N, H, WC).astype(jnp.bfloat16)

    last_err = None
    for single_buf in (True, False):   # fall back if pl.Buffered(1) unsupported
        try:
            out_flat = _basic_block_call(x_flat, m1, m2, b1_row, b2_row,
                                         nb=nb, H=H, WC=WC,
                                         single_buffer_weights=single_buf)
            return out_flat.reshape(N, H, W, C)
        except Exception as e:  # noqa: BLE001
            last_err = e
    raise last_err


def basic_block_pallas(x_nchw, params, *, nb=None):
    """PyTorch-compatible NCHW entry point (BasicBlock, eval mode, bf16 out)."""
    x_nhwc = jnp.transpose(x_nchw, (0, 2, 3, 1))
    out_nhwc = basic_block_pallas_nhwc(x_nhwc, params, nb=nb)
    return jnp.transpose(out_nhwc, (0, 3, 1, 2))


# --------------------------------------------------------------------------
# Pure-JAX reference (exact eval-mode module semantics, f32)
# --------------------------------------------------------------------------
def ref_basic_block(x_nchw, w1_oihw, bn1, w2_oihw, bn2, eps=1e-5):
    def conv(x, w):
        return jax.lax.conv_general_dilated(
            x, w, window_strides=(1, 1), padding=((1, 1), (1, 1)),
            dimension_numbers=('NCHW', 'OIHW', 'NCHW'))

    def bn(x, p):
        g, b, m, v = p
        inv = g / jnp.sqrt(v + eps)
        return (x - m[None, :, None, None]) * inv[None, :, None, None] \
            + b[None, :, None, None]

    out = jax.nn.relu(bn(conv(x_nchw, w1_oihw), bn1))
    out = bn(conv(out, w2_oihw), bn2)
    return jax.nn.relu(out + x_nchw)


def _check(out, ref, tag):
    out_f32 = out.astype(jnp.float32)
    max_err = float(jnp.max(jnp.abs(out_f32 - ref)))
    mean_err = float(jnp.mean(jnp.abs(out_f32 - ref)))
    # bf16 MXU operands + bf16 output -> loose tolerance vs. the f32 reference;
    # a genuine layout/shift bug produces O(1) errors, bf16 rounding stays far below.
    assert max_err < 0.3, f"{tag}: max_err={max_err}"
    assert mean_err < 0.04, f"{tag}: mean_err={mean_err}"


if __name__ == "__main__":
    # BasicBlock(inplanes=16, planes=16, stride=1, downsample=None)
    inplanes = planes = 16
    N, H, W = 8, 16, 16

    key = jax.random.PRNGKey(0)
    ks = jax.random.split(key, 5)

    x = jax.random.normal(ks[0], (N, inplanes, H, W), jnp.float32)
    w1 = 0.1 * jax.random.normal(ks[1], (planes, inplanes, 3, 3), jnp.float32)  # OIHW
    w2 = 0.1 * jax.random.normal(ks[2], (planes, planes, 3, 3), jnp.float32)    # OIHW

    def bn_params(k, c):
        kg, kb, km, kv = jax.random.split(k, 4)
        gamma = 1.0 + 0.1 * jax.random.normal(kg, (c,), jnp.float32)
        beta = 0.1 * jax.random.normal(kb, (c,), jnp.float32)
        mean = 0.1 * jax.random.normal(km, (c,), jnp.float32)
        var = jnp.abs(jax.random.normal(kv, (c,), jnp.float32)) + 0.5
        return gamma, beta, mean, var

    bn1 = bn_params(ks[3], planes)
    bn2 = bn_params(ks[4], planes)

    # One-time parameter preparation (hoisted out of the forward path).
    params = jax.block_until_ready(
        prepare_basic_block_params(w1, bn1, w2, bn2, width=W))

    ref = ref_basic_block(x, w1, bn1, w2, bn2)

    # Auto batch-tile (nb=8 -> all 8 images in one grid step, M = 128 rows).
    out = jax.block_until_ready(basic_block_pallas(x, params))
    assert out.shape == (N, inplanes, H, W)
    _check(out, ref, "auto-nb")

    # Forced smaller tile to exercise the multi-step grid path (grid=(4,)).
    out2 = jax.block_until_ready(basic_block_pallas(x, params, nb=2))
    _check(out2, ref, "nb=2")

    print("KERNEL_OK")
</pallas_src>

<mosaic_0001>
module attributes {stable_mosaic.version = 11 : i64} {
  func.func @_basic_block_kernel(%arg0: i32, %arg1: memref<8x16x256xbf16, #tpu.memory_space<vmem>>, %arg2: memref<768x256xbf16, #tpu.memory_space<vmem>>, %arg3: memref<768x256xbf16, #tpu.memory_space<vmem>>, %arg4: memref<1x256xf32, #tpu.memory_space<vmem>>, %arg5: memref<1x256xf32, #tpu.memory_space<vmem>>, %arg6: memref<8x16x256xbf16, #tpu.memory_space<vmem>>) attributes {dimension_semantics = [#tpu.dimension_semantics<parallel>], iteration_bounds = array<i64: 1>, scalar_prefetch = 0 : i64, scratch_operands = 0 : i64, tpu.core_type = #tpu.core_type<tc>, window_params = [{transform_indices = @transform_0, window_bounds = array<i64: 8, 16, 256>}, {pipeline_mode = #tpu.pipeline_mode<synchronous>, transform_indices = @transform_1, window_bounds = array<i64: 768, 256>}, {pipeline_mode = #tpu.pipeline_mode<synchronous>, transform_indices = @transform_2, window_bounds = array<i64: 768, 256>}, {pipeline_mode = #tpu.pipeline_mode<synchronous>, transform_indices = @transform_3, window_bounds = array<i64: 1, 256>}, {pipeline_mode = #tpu.pipeline_mode<synchronous>, transform_indices = @transform_4, window_bounds = array<i64: 1, 256>}, {transform_indices = @transform_5, window_bounds = array<i64: 8, 16, 256>}]} {
    %c0 = arith.constant 0 : index
    %c0_0 = arith.constant 0 : index
    %c0_1 = arith.constant 0 : index
    %0 = vector.load %arg1[%c0, %c0_0, %c0_1] : memref<8x16x256xbf16, #tpu.memory_space<vmem>>, vector<8x16x256xbf16>
    %cst = arith.constant 0.000000e+00 : bf16
    %1 = vector.broadcast %cst : bf16 to vector<8x1x256xbf16>
    %2 = vector.extract_strided_slice %0 {offsets = [0, 0, 0], sizes = [8, 15, 256], strides = [1, 1, 1]} : vector<8x16x256xbf16> to vector<8x15x256xbf16>
    %3 = tpu.concatenate %1, %2 in 1 : vector<8x1x256xbf16>, vector<8x15x256xbf16> -> vector<8x16x256xbf16>
    %4 = vector.extract_strided_slice %0 {offsets = [0, 1, 0], sizes = [8, 15, 256], strides = [1, 1, 1]} : vector<8x16x256xbf16> to vector<8x15x256xbf16>
    %5 = tpu.concatenate %4, %1 in 1 : vector<8x15x256xbf16>, vector<8x1x256xbf16> -> vector<8x16x256xbf16>
    %6 = tpu.concatenate %3, %0, %5 in 2 : vector<8x16x256xbf16>, vector<8x16x256xbf16>, vector<8x16x256xbf16> -> vector<8x16x768xbf16>
    %7 = vector.shape_cast %6 : vector<8x16x768xbf16> to vector<128x768xbf16>
    %c0_2 = arith.constant 0 : index
    %c0_3 = arith.constant 0 : index
    %8 = vector.load %arg2[%c0_2, %c0_3] : memref<768x256xbf16, #tpu.memory_space<vmem>>, vector<768x256xbf16>
    %cst_4 = arith.constant dense<0.000000e+00> : vector<128x256xf32>
    %9 = tpu.matmul %7, %8, %cst_4 {dimension_numbers = #tpu.dot_dimension_numbers<[1], [0], [0], [1], [0, 0, 1, 1], [], []>} : vector<128x768xbf16>, vector<768x256xbf16>, vector<128x256xf32> -> vector<128x256xf32>
    %c0_5 = arith.constant 0 : index
    %c0_6 = arith.constant 0 : index
    %10 = vector.load %arg4[%c0_5, %c0_6] : memref<1x256xf32, #tpu.memory_space<vmem>>, vector<1x256xf32>
    %11 = vector.broadcast %10 : vector<1x256xf32> to vector<128x256xf32>
    %12 = arith.addf %9, %11 : vector<128x256xf32>
    %cst_7 = arith.constant 0.000000e+00 : f32
    %13 = vector.broadcast %cst_7 : f32 to vector<128x256xf32>
    %14 = arith.maximumf %12, %13 : vector<128x256xf32>
    %15 = arith.truncf %14 : vector<128x256xf32> to vector<128x256xbf16>
    %16 = vector.shape_cast %15 : vector<128x256xbf16> to vector<8x16x256xbf16>
    %cst_8 = arith.constant 0.000000e+00 : bf16
    %17 = vector.broadcast %cst_8 : bf16 to vector<8x1x256xbf16>
    %18 = vector.extract_strided_slice %16 {offsets = [0, 0, 0], sizes = [8, 15, 256], strides = [1, 1, 1]} : vector<8x16x256xbf16> to vector<8x15x256xbf16>
    %19 = tpu.concatenate %17, %18 in 1 : vector<8x1x256xbf16>, vector<8x15x256xbf16> -> vector<8x16x256xbf16>
    %20 = vector.extract_strided_slice %16 {offsets = [0, 1, 0], sizes = [8, 15, 256], strides = [1, 1, 1]} : vector<8x16x256xbf16> to vector<8x15x256xbf16>
    %21 = tpu.concatenate %20, %17 in 1 : vector<8x15x256xbf16>, vector<8x1x256xbf16> -> vector<8x16x256xbf16>
    %22 = tpu.concatenate %19, %16, %21 in 2 : vector<8x16x256xbf16>, vector<8x16x256xbf16>, vector<8x16x256xbf16> -> vector<8x16x768xbf16>
    %23 = vector.shape_cast %22 : vector<8x16x768xbf16> to vector<128x768xbf16>
    %c0_9 = arith.constant 0 : index
    %c0_10 = arith.constant 0 : index
    %24 = vector.load %arg3[%c0_9, %c0_10] : memref<768x256xbf16, #tpu.memory_space<vmem>>, vector<768x256xbf16>
    %cst_11 = arith.constant dense<0.000000e+00> : vector<128x256xf32>
    %25 = tpu.matmul %23, %24, %cst_11 {dimension_numbers = #tpu.dot_dimension_numbers<[1], [0], [0], [1], [0, 0, 1, 1], [], []>} : vector<128x768xbf16>, vector<768x256xbf16>, vector<128x256xf32> -> vector<128x256xf32>
    %c0_12 = arith.constant 0 : index
    %c0_13 = arith.constant 0 : index
    %26 = vector.load %arg5[%c0_12, %c0_13] : memref<1x256xf32, #tpu.memory_space<vmem>>, vector<1x256xf32>
    %27 = vector.broadcast %26 : vector<1x256xf32> to vector<128x256xf32>
    %28 = arith.addf %25, %27 : vector<128x256xf32>
    %29 = vector.shape_cast %0 : vector<8x16x256xbf16> to vector<128x256xbf16>
    %30 = arith.extf %29 : vector<128x256xbf16> to vector<128x256xf32>
    %31 = arith.addf %28, %30 : vector<128x256xf32>
    %cst_14 = arith.constant 0.000000e+00 : f32
    %32 = vector.broadcast %cst_14 : f32 to vector<128x256xf32>
    %33 = arith.maximumf %31, %32 : vector<128x256xf32>
    %34 = arith.truncf %33 : vector<128x256xf32> to vector<128x256xbf16>
    %35 = vector.shape_cast %34 : vector<128x256xbf16> to vector<8x16x256xbf16>
    %c0_15 = arith.constant 0 : index
    %c0_16 = arith.constant 0 : index
    %c0_17 = arith.constant 0 : index
    %36 = vector.load %arg6[%c0_15, %c0_16, %c0_17] : memref<8x16x256xbf16, #tpu.memory_space<vmem>>, vector<8x16x256xbf16>
    tpu.vector_store %arg6[%c0_15, %c0_16, %c0_17], %35 {strides = array<i32>} : memref<8x16x256xbf16, #tpu.memory_space<vmem>>, vector<8x16x256xbf16>,
    return
  }
  func.func @transform_0(%arg0: i32) -> (i32, i32, i32) {
    %c0_i32 = arith.constant 0 : i32
    %c0_i32_0 = arith.constant 0 : i32
    %c0_i32_1 = arith.constant 0 : i32
    return %arg0, %c0_i32, %c0_i32_0 : i32, i32, i32
  }
  func.func @transform_1(%arg0: i32) -> (i32, i32) {
    %c0_i32 = arith.constant 0 : i32
    %c0_i32_0 = arith.constant 0 : i32
    %c0_i32_1 = arith.constant 0 : i32
    return %c0_i32, %c0_i32_0 : i32, i32
  }
  func.func @transform_2(%arg0: i32) -> (i32, i32) {
    %c0_i32 = arith.constant 0 : i32
    %c0_i32_0 = arith.constant 0 : i32
    %c0_i32_1 = arith.constant 0 : i32
    return %c0_i32, %c0_i32_0 : i32, i32
  }
  func.func @transform_3(%arg0: i32) -> (i32, i32) {
    %c0_i32 = arith.constant 0 : i32
    %c0_i32_0 = arith.constant 0 : i32
    %c0_i32_1 = arith.constant 0 : i32
    return %c0_i32, %c0_i32_0 : i32, i32
  }
  func.func @transform_4(%arg0: i32) -> (i32, i32) {
    %c0_i32 = arith.constant 0 : i32
    %c0_i32_0 = arith.constant 0 : i32
    %c0_i32_1 = arith.constant 0 : i32
    return %c0_i32, %c0_i32_0 : i32, i32
  }
  func.func @transform_5(%arg0: i32) -> (i32, i32, i32) {
    %c0_i32 = arith.constant 0 : i32
    %c0_i32_0 = arith.constant 0 : i32
    %c0_i32_1 = arith.constant 0 : i32
    return %arg0, %c0_i32, %c0_i32_0 : i32, i32, i32
  }
}

module attributes {stable_mosaic.version = 11 : i64} {
  func.func @_basic_block_kernel(%arg0: i32, %arg1: memref<8x16x256xbf16, #tpu.memory_space<vmem>>, %arg2: memref<768x256xbf16, #tpu.memory_space<vmem>>, %arg3: memref<768x256xbf16, #tpu.memory_space<vmem>>, %arg4: memref<1x256xf32, #tpu.memory_space<vmem>>, %arg5: memref<1x256xf32, #tpu.memory_space<vmem>>, %arg6: memref<8x16x256xbf16, #tpu.memory_space<vmem>>) attributes {dimension_semantics = [#tpu.dimension_semantics<parallel>], iteration_bounds = array<i64: 1>, scalar_prefetch = 0 : i64, scratch_operands = 0 : i64, tpu.core_type = #tpu.core_type<tc>, window_params = [{transform_indices = @transform_0, window_bounds = array<i64: 8, 16, 256>}, {pipeline_mode = #tpu.pipeline_mode<synchronous>, transform_indices = @transform_1, window_bounds = array<i64: 768, 256>}, {pipeline_mode = #tpu.pipeline_mode<synchronous>, transform_indices = @transform_2, window_bounds = array<i64: 768, 256>}, {pipeline_mode = #tpu.pipeline_mode<synchronous>, transform_indices = @transform_3, window_bounds = array<i64: 1, 256>}, {pipeline_mode = #tpu.pipeline_mode<synchronous>, transform_indices = @transform_4, window_bounds = array<i64: 1, 256>}, {transform_indices = @transform_5, window_bounds = array<i64: 8, 16, 256>}]} {
    %c0 = arith.constant 0 : index
    %c0_0 = arith.constant 0 : index
    %c0_1 = arith.constant 0 : index
    %0 = vector.load %arg1[%c0, %c0_0, %c0_1] : memref<8x16x256xbf16, #tpu.memory_space<vmem>>, vector<8x16x256xbf16>
    %cst = arith.constant 0.000000e+00 : bf16
    %1 = vector.broadcast %cst : bf16 to vector<8x1x256xbf16>
    %2 = vector.extract_strided_slice %0 {offsets = [0, 0, 0], sizes = [8, 15, 256], strides = [1, 1, 1]} : vector<8x16x256xbf16> to vector<8x15x256xbf16>
    %3 = tpu.concatenate %1, %2 in 1 : vector<8x1x256xbf16>, vector<8x15x256xbf16> -> vector<8x16x256xbf16>
    %4 = vector.extract_strided_slice %0 {offsets = [0, 1, 0], sizes = [8, 15, 256], strides = [1, 1, 1]} : vector<8x16x256xbf16> to vector<8x15x256xbf16>
    %5 = tpu.concatenate %4, %1 in 1 : vector<8x15x256xbf16>, vector<8x1x256xbf16> -> vector<8x16x256xbf16>
    %6 = tpu.concatenate %3, %0, %5 in 2 : vector<8x16x256xbf16>, vector<8x16x256xbf16>, vector<8x16x256xbf16> -> vector<8x16x768xbf16>
    %7 = vector.shape_cast %6 : vector<8x16x768xbf16> to vector<128x768xbf16>
    %c0_2 = arith.constant 0 : index
    %c0_3 = arith.constant 0 : index
    %8 = vector.load %arg2[%c0_2, %c0_3] : memref<768x256xbf16, #tpu.memory_space<vmem>>, vector<768x256xbf16>
    %cst_4 = arith.constant dense<0.000000e+00> : vector<128x256xf32>
    %9 = tpu.matmul %7, %8, %cst_4 {dimension_numbers = #tpu.dot_dimension_numbers<[1], [0], [0], [1], [0, 0, 1, 1], [], []>} : vector<128x768xbf16>, vector<768x256xbf16>, vector<128x256xf32> -> vector<128x256xf32>
    %c0_5 = arith.constant 0 : index
    %c0_6 = arith.constant 0 : index
    %10 = vector.load %arg4[%c0_5, %c0_6] : memref<1x256xf32, #tpu.memory_space<vmem>>, vector<1x256xf32>
    %11 = vector.broadcast %10 : vector<1x256xf32> to vector<128x256xf32>
    %12 = arith.addf %9, %11 : vector<128x256xf32>
    %cst_7 = arith.constant 0.000000e+00 : f32
    %13 = vector.broadcast %cst_7 : f32 to vector<128x256xf32>
    %14 = arith.maximumf %12, %13 : vector<128x256xf32>
    %15 = arith.truncf %14 : vector<128x256xf32> to vector<128x256xbf16>
    %16 = vector.shape_cast %15 : vector<128x256xbf16> to vector<8x16x256xbf16>
    %cst_8 = arith.constant 0.000000e+00 : bf16
    %17 = vector.broadcast %cst_8 : bf16 to vector<8x1x256xbf16>
    %18 = vector.extract_strided_slice %16 {offsets = [0, 0, 0], sizes = [8, 15, 256], strides = [1, 1, 1]} : vector<8x16x256xbf16> to vector<8x15x256xbf16>
    %19 = tpu.concatenate %17, %18 in 1 : vector<8x1x256xbf16>, vector<8x15x256xbf16> -> vector<8x16x256xbf16>
    %20 = vector.extract_strided_slice %16 {offsets = [0, 1, 0], sizes = [8, 15, 256], strides = [1, 1, 1]} : vector<8x16x256xbf16> to vector<8x15x256xbf16>
    %21 = tpu.concatenate %20, %17 in 1 : vector<8x15x256xbf16>, vector<8x1x256xbf16> -> vector<8x16x256xbf16>
    %22 = tpu.concatenate %19, %16, %21 in 2 : vector<8x16x256xbf16>, vector<8x16x256xbf16>, vector<8x16x256xbf16> -> vector<8x16x768xbf16>
    %23 = vector.shape_cast %22 : vector<8x16x768xbf16> to vector<128x768xbf16>
    %c0_9 = arith.constant 0 : index
    %c0_10 = arith.constant 0 : index
    %24 = vector.load %arg3[%c0_9, %c0_10] : memref<768x256xbf16, #tpu.memory_space<vmem>>, vector<768x256xbf16>
    %cst_11 = arith.constant dense<0.000000e+00> : vector<128x256xf32>
    %25 = tpu.matmul %23, %24, %cst_11 {dimension_numbers = #tpu.dot_dimension_numbers<[1], [0], [0], [1], [0, 0, 1, 1], [], []>} : vector<128x768xbf16>, vector<768x256xbf16>, vector<128x256xf32> -> vector<128x256xf32>
    %c0_12 = arith.constant 0 : index
    %c0_13 = arith.constant 0 : index
    %26 = vector.load %arg5[%c0_12, %c0_13] : memref<1x256xf32, #tpu.memory_space<vmem>>, vector<1x256xf32>
    %27 = vector.broadcast %26 : vector<1x256xf32> to vector<128x256xf32>
    %28 = arith.addf %25, %27 : vector<128x256xf32>
    %29 = vector.shape_cast %0 : vector<8x16x256xbf16> to vector<128x256xbf16>
    %30 = arith.extf %29 : vector<128x256xbf16> to vector<128x256xf32>
    %31 = arith.addf %28, %30 : vector<128x256xf32>
    %cst_14 = arith.constant 0.000000e+00 : f32
    %32 = vector.broadcast %cst_14 : f32 to vector<128x256xf32>
    %33 = arith.maximumf %31, %32 : vector<128x256xf32>
    %34 = arith.truncf %33 : vector<128x256xf32> to vector<128x256xbf16>
    %35 = vector.shape_cast %34 : vector<128x256xbf16> to vector<8x16x256xbf16>
    %c0_15 = arith.constant 0 : index
    %c0_16 = arith.constant 0 : index
    %c0_17 = arith.constant 0 : index
    %36 = vector.load %arg6[%c0_15, %c0_16, %c0_17] : memref<8x16x256xbf16, #tpu.memory_space<vmem>>, vector<8x16x256xbf16>
    tpu.vector_store %arg6[%c0_15, %c0_16, %c0_17], %35 {strides = array<i32>} : memref<8x16x256xbf16, #tpu.memory_space<vmem>>, vector<8x16x256xbf16>,
    return
  }
  func.func @transform_0(%arg0: i32) -> (i32, i32, i32) {
    %c0_i32 = arith.constant 0 : i32
    %c0_i32_0 = arith.constant 0 : i32
    %c0_i32_1 = arith.constant 0 : i32
    return %arg0, %c0_i32, %c0_i32_0 : i32, i32, i32
  }
  func.func @transform_1(%arg0: i32) -> (i32, i32) {
    %c0_i32 = arith.constant 0 : i32
    %c0_i32_0 = arith.constant 0 : i32
    %c0_i32_1 = arith.constant 0 : i32
    return %c0_i32, %c0_i32_0 : i32, i32
  }
  func.func @transform_2(%arg0: i32) -> (i32, i32) {
    %c0_i32 = arith.constant 0 : i32
    %c0_i32_0 = arith.constant 0 : i32
    %c0_i32_1 = arith.constant 0 : i32
    return %c0_i32, %c0_i32_0 : i32, i32
  }
  func.func @transform_3(%arg0: i32) -> (i32, i32) {
    %c0_i32 = arith.constant 0 : i32
    %c0_i32_0 = arith.constant 0 : i32
    %c0_i32_1 = arith.constant 0 : i32
    return %c0_i32, %c0_i32_0 : i32, i32
  }
  func.func @transform_4(%arg0: i32) -> (i32, i32) {
    %c0_i32 = arith.constant 0 : i32
    %c0_i32_0 = arith.constant 0 : i32
    %c0_i32_1 = arith.constant 0 : i32
    return %c0_i32, %c0_i32_0 : i32, i32
  }
  func.func @transform_5(%arg0: i32) -> (i32, i32, i32) {
    %c0_i32 = arith.constant 0 : i32
    %c0_i32_0 = arith.constant 0 : i32
    %c0_i32_1 = arith.constant 0 : i32
    return %arg0, %c0_i32, %c0_i32_0 : i32, i32, i32
  }
}

</mosaic_0001>

<bundles_post_ra>
// kernel: tpu_custom_call.1
= control target key start
LH: loop header
LB: loop body
LE: loop exit
PB: predicated region body
PF: predicated region fallthrough
CT: control target
= control target key end

     0   :  { %10 = vsyncpa [#allocation3], 0  ;;  %s5614_s0 = inlined_call_operand.hbm [shape: bf16[8,16,256], index: 0, kind: input, shape index: {}]   ;;  %s5615_s1 = inlined_call_operand.hbm [shape: bf16[768,256], index: 1, kind: input, shape index: {}]   ;;  %s5616_s2 = inlined_call_operand.hbm [shape: bf16[768,256], index: 2, kind: input, shape index: {}]   ;;  %s5617_s3 = inlined_call_operand.vmem [shape: f32[1,256], index: 3, kind: input, shape index: {}]   ;;  %s5618_s4 = inlined_call_operand.hbm [shape: f32[1,256], index: 4, kind: input, shape index: {}]   ;;  %s5619_s5 = inlined_call_operand.hbm [shape: bf16[8,16,256], index: 5, kind: output, shape index: {}]  }
   0x1   :  { %11 = vsyncpa [#allocation6], 0 }
   0x2   :  { %12 = vsyncpa [#allocation9], 0 }
   0x3   :  { %13 = vsyncpa [#allocation4], 0  ;;  %s31_s20 = sshll.u32 %s5615_s1, 4  ;;  %s4393_s21 = smov [#allocation5]   ;;  %s32_s20 = int_to_ptr.hbm [resolvable:$true] %s31_s20 }
   0x4   :  { %s33_s22 = sshll.u32 %s4393_s21, 4  ;;  %s18_s25 = sshll.u32 %s5614_s0, 4  ;;  %s34_s22 = int_to_ptr.vmem [resolvable:$true] %s33_s22  ;;  %s19_s25 = int_to_ptr.hbm [resolvable:$true] %s18_s25 }
   0x5   :  { %s4394_s26 = smov 128   ;;  %s4395_s27 = smov 8  }
   0x6   :  { %39 = dma.hbm_to_vmem [thread:$0]  %s32_s20, 12288, %s34_s22, [#allocation6], %s4394_s26, %s4394_s26, %s4395_s27  }
   0x7   :  { %s4396_s28 = smov [#allocation2]   ;;  %s44_s1 = sshll.u32 %s5616_s2, 4  ;;  %s45_s1 = int_to_ptr.hbm [resolvable:$true] %s44_s1 }
   0x8   :  { %s20_s29 = sshll.u32 %s4396_s28, 4  ;;  %s60_s8 = sshll.u32 %s5618_s4, 4  ;;  %s21_s29 = int_to_ptr.vmem [resolvable:$true] %s20_s29  ;;  %s61_s8 = int_to_ptr.hbm [resolvable:$true] %s60_s8 }
   0x9   :  { %26 = dma.hbm_to_vmem [thread:$0]  %s19_s25, 2048, %s21_s29, [#allocation3], %s4394_s26, %s4394_s26, %s4395_s27  }
   0xa   :  { %s4397_s9 = smov [#allocation7]   ;;  %s4398_s11 = smov [#allocation8]  }
   0xb   :  { %s46_s10 = sshll.u32 %s4397_s9, 4  ;;  %s62_s2 = sshll.u32 %s4398_s11, 4  ;;  %s47_s10 = int_to_ptr.vmem [resolvable:$true] %s46_s10  ;;  %s63_s2 = int_to_ptr.vmem [resolvable:$true] %s62_s2 }
   0xc   :  { %52 = dma.hbm_to_vmem [thread:$0]  %s45_s1, 12288, %s47_s10, [#allocation6], %s4394_s26, %s4394_s26, %s4395_s27  }
   0xd   :  { %65 = dma.hbm_to_vmem [thread:$0]  %s61_s8, 32, %s63_s2, [#allocation9]  }
   0xe   :  { %4385 = dma.done.wait [#allocation3], 2048  }
   0xf   :  { %4386 = vsyncadd [#allocation3], 4294965248 }
  0x10   :  { %4387 = dma.done.wait [#allocation6], 24576  }
  0x11   :  { %4388 = vsyncadd [#allocation6], 4294942720 }
  0x12   :  { %4389 = dma.done.wait [#allocation9], 32  }
  0x13   :  { %4390 = vsyncadd [#allocation9], 4294967264  ;;  %v3340_v0 = vld [vmem:[#allocation5 + $0x70] sm:$0xf]  ;;  %v4081_v1 = vld [vmem:[#allocation5 + $0x74] sm:$0xf0] }
  0x14   :  { %v3404_v2 = vld [vmem:[#allocation5 + $0xf0] sm:$0xf]  ;;  %v3341_v3 = vor.u32 %v4081_v1, %v3340_v0  ;;  %v4097_v4 = vld [vmem:[#allocation5 + $0xf4] sm:$0xf0]  ;;  %v3332_v11 = vld [vmem:[#allocation5 + $0x60] sm:$0xf] }
  0x15   :  { %v3468_v5 = vld [vmem:[#allocation5 + $0x170] sm:$0xf]  ;;  %v4113_v6 = vld [vmem:[#allocation5 + $0x174] sm:$0xf0]  ;;  %v3405_v7 = vor.u32 %v4097_v4, %v3404_v2  ;;  %v4079_v13 = vld [vmem:[#allocation5 + $0x64] sm:$0xf0] }
  0x16   :  { %v3469_v8 = vor.u32 %v4113_v6, %v3468_v5  ;;  %v3532_v9 = vld [vmem:[#allocation5 + $0x1f0] sm:$0xf]  ;;  %v4129_v10 = vld [vmem:[#allocation5 + $0x1f4] sm:$0xf0]  ;;  %975 = vmatpush.bf16.msra.mxu0 %v3341_v3  ;;  %v3396_v14 = vld [vmem:[#allocation5 + $0xe0] sm:$0xf]  ;;  %v3333_v16 = vor.u32 %v4079_v13, %v3332_v11 }
  0x17   :  { %v3533_v12 = vor.u32 %v4129_v10, %v3532_v9  ;;  %v4095_v15 = vld [vmem:[#allocation5 + $0xe4] sm:$0xf0]  ;;  %1024 = vmatpush.bf16.msra.mxu1 %v3405_v7  ;;  %v3460_v18 = vld [vmem:[#allocation5 + $0x160] sm:$0xf]  ;;  %v3324_v23 = vld [vmem:[#allocation5 + $0x50] sm:$0xf] }
  0x18   :  { %1073 = vmatpush.bf16.msra.mxu2 %v3469_v8  ;;  %v3397_v17 = vor.u32 %v4095_v15, %v3396_v14  ;;  %v4111_v19 = vld [vmem:[#allocation5 + $0x164] sm:$0xf0]  ;;  %v3524_v20 = vld [vmem:[#allocation5 + $0x1e0] sm:$0xf]  ;;  %v4077_v24 = vld [vmem:[#allocation5 + $0x54] sm:$0xf0] }
  0x19   :  { %1122 = vmatpush.bf16.msra.mxu3 %v3533_v12  ;;  %v3461_v21 = vor.u32 %v4111_v19, %v3460_v18  ;;  %v4127_v22 = vld [vmem:[#allocation5 + $0x1e4] sm:$0xf0]  ;;  %v3388_v26 = vld [vmem:[#allocation5 + $0xd0] sm:$0xf]  ;;  %v4093_v27 = vld [vmem:[#allocation5 + $0xd4] sm:$0xf0]  ;;  %v3325_v29 = vor.u32 %v4077_v24, %v3324_v23 }
  0x1a   :  { %v3525_v25 = vor.u32 %v4127_v22, %v3524_v20  ;;  %v3452_v28 = vld [vmem:[#allocation5 + $0x150] sm:$0xf]  ;;  %976 = vmatpush.bf16.msra.mxu0 %v3333_v16  ;;  %v4109_v30 = vld [vmem:[#allocation5 + $0x154] sm:$0xf0]  ;;  %v3389_v33 = vor.u32 %v4093_v27, %v3388_v26  ;;  %v3316_v35 = vld [vmem:[#allocation5 + $0x40] sm:$0xf] }
  0x1b   :  { %v3516_v31 = vld [vmem:[#allocation5 + $0x1d0] sm:$0xf]  ;;  %v4125_v32 = vld [vmem:[#allocation5 + $0x1d4] sm:$0xf0]  ;;  %1025 = vmatpush.bf16.msra.mxu1 %v3397_v17  ;;  %v3453_v34 = vor.u32 %v4109_v30, %v3452_v28  ;;  %v4075_v36 = vld [vmem:[#allocation5 + $0x44] sm:$0xf0] }
  0x1c   :  { %1074 = vmatpush.bf16.msra.mxu2 %v3461_v21  ;;  %v3380_v37 = vld [vmem:[#allocation5 + $0xc0] sm:$0xf]  ;;  %v3517_v38 = vor.u32 %v4125_v32, %v3516_v31  ;;  %v4091_v39 = vld [vmem:[#allocation5 + $0xc4] sm:$0xf0]  ;;  %v3317_v44 = vor.u32 %v4075_v36, %v3316_v35  ;;  %v3308_v47 = vld [vmem:[#allocation5 + $0x30] sm:$0xf] }
  0x1d   :  { %1123 = vmatpush.bf16.msra.mxu3 %v3525_v25  ;;  %v3444_v40 = vld [vmem:[#allocation5 + $0x140] sm:$0xf]  ;;  %v4107_v41 = vld [vmem:[#allocation5 + $0x144] sm:$0xf0]  ;;  %v3381_v45 = vor.u32 %v4091_v39, %v3380_v37  ;;  %v4073_v48 = vld [vmem:[#allocation5 + $0x34] sm:$0xf0] }
  0x1e   :  { %v3508_v42 = vld [vmem:[#allocation5 + $0x1c0] sm:$0xf]  ;;  %v4123_v43 = vld [vmem:[#allocation5 + $0x1c4] sm:$0xf0]  ;;  %977 = vmatpush.bf16.msra.mxu0 %v3325_v29  ;;  %v3445_v46 = vor.u32 %v4107_v41, %v3444_v40  ;;  %v3372_v49 = vld [vmem:[#allocation5 + $0xb0] sm:$0xf]  ;;  %v3309_v56 = vor.u32 %v4073_v48, %v3308_v47 }
  0x1f   :  { %1026 = vmatpush.bf16.msra.mxu1 %v3389_v33  ;;  %v3509_v50 = vor.u32 %v4123_v43, %v3508_v42  ;;  %v4089_v51 = vld [vmem:[#allocation5 + $0xb4] sm:$0xf0]  ;;  %v3436_v52 = vld [vmem:[#allocation5 + $0x130] sm:$0xf]  ;;  %v3300_v59 = vld [vmem:[#allocation5 + $0x20] sm:$0xf] }
  0x20   :  { %1075 = vmatpush.bf16.msra.mxu2 %v3453_v34  ;;  %v4105_v53 = vld [vmem:[#allocation5 + $0x134] sm:$0xf0]  ;;  %v3500_v54 = vld [vmem:[#allocation5 + $0x1b0] sm:$0xf]  ;;  %v3373_v57 = vor.u32 %v4089_v51, %v3372_v49  ;;  %v4071_v60 = vld [vmem:[#allocation5 + $0x24] sm:$0xf0] }
  0x21   :  { %1124 = vmatpush.bf16.msra.mxu3 %v3517_v38  ;;  %v4121_v55 = vld [vmem:[#allocation5 + $0x1b4] sm:$0xf0]  ;;  %v3437_v58 = vor.u32 %v4105_v53, %v3436_v52  ;;  %v3364_v61 = vld [vmem:[#allocation5 + $0xa0] sm:$0xf]  ;;  %v4087_v63 = vld [vmem:[#allocation5 + $0xa4] sm:$0xf0]  ;;  %v3301_v5 = vor.u32 %v4071_v60, %v3300_v59 }
  0x22   :  { %978 = vmatpush.bf16.msra.mxu0 %v3317_v44  ;;  %v3501_v62 = vor.u32 %v4121_v55, %v3500_v54  ;;  %v3428_v0 = vld [vmem:[#allocation5 + $0x120] sm:$0xf]  ;;  %v4103_v1 = vld [vmem:[#allocation5 + $0x124] sm:$0xf0]  ;;  %v3292_v4 = vld [vmem:[#allocation5 + $0x10] sm:$0xf]  ;;  %v3365_v9 = vor.u32 %v4087_v63, %v3364_v61 }
  0x23   :  { %1027 = vmatpush.bf16.msra.mxu1 %v3381_v45  ;;  %v3492_v2 = vld [vmem:[#allocation5 + $0x1a0] sm:$0xf]  ;;  %v4119_v3 = vld [vmem:[#allocation5 + $0x1a4] sm:$0xf0]  ;;  %v4069_v6 = vld [vmem:[#allocation5 + $0x14] sm:$0xf0]  ;;  %v3429_v10 = vor.u32 %v4103_v1, %v3428_v0 }
  0x24   :  { %1076 = vmatpush.bf16.msra.mxu2 %v3445_v46  ;;  %v3356_v7 = vld [vmem:[#allocation5 + $0x90] sm:$0xf]  ;;  %v4085_v8 = vld [vmem:[#allocation5 + $0x94] sm:$0xf0]  ;;  %v3493_v14 = vor.u32 %v4119_v3, %v3492_v2  ;;  %v3220_v16 = vld [vmem:[#allocation2] sm:$0xf]  ;;  %v3293_v22 = vor.u32 %v4069_v6, %v3292_v4 }
  0x25   :  { %1125 = vmatpush.bf16.msra.mxu3 %v3509_v50  ;;  %v3420_v11 = vld [vmem:[#allocation5 + $0x110] sm:$0xf]  ;;  %v4101_v12 = vld [vmem:[#allocation5 + $0x114] sm:$0xf0]  ;;  %v4051_v17 = vld [vmem:[#allocation2 + $0x4] sm:$0xf0]  ;;  %v3357_v23 = vor.u32 %v4085_v8, %v3356_v7 }
  0x26   :  { %979 = vmatpush.bf16.msra.mxu0 %v3309_v56  ;;  %v3484_v13 = vld [vmem:[#allocation5 + $0x190] sm:$0xf]  ;;  %v4117_v15 = vld [vmem:[#allocation5 + $0x194] sm:$0xf0]  ;;  %v3284_v18 = vld [vmem:[#allocation5] sm:$0xf]  ;;  %v4451_v20 = vor.u32 %v4051_v17, %v3220_v16  ;;  %v3421_v29 = vor.u32 %v4101_v12, %v3420_v11 }
  0x27   :  { %1028 = vmatpush.bf16.msra.mxu1 %v3373_v57  ;;  %v4067_v19 = vld [vmem:[#allocation5 + $0x4] sm:$0xf0]  ;;  %v4050_v21 = vld [vmem:[#allocation2 + $0x4] sm:$0xf]  ;;  %v3348_v24 = vld [vmem:[#allocation5 + $0x80] sm:$0xf]  ;;  %v3485_v35 = vor.u32 %v4117_v15, %v3484_v13 }
  0x28   :  { %1077 = vmatpush.bf16.msra.mxu2 %v3437_v58  ;;  %v4083_v25 = vld [vmem:[#allocation5 + $0x84] sm:$0xf0]  ;;  %v3412_v26 = vld [vmem:[#allocation5 + $0x100] sm:$0xf]  ;;  %v3222_v28 = vld [vmem:[#allocation2 + $0x8] sm:$0xf0]  ;;  %v3285_v41 = vor.u32 %v4067_v19, %v3284_v18 }
  0x29   :  { %1126 = vmatpush.bf16.msra.mxu3 %v3501_v62  ;;  %v4099_v27 = vld [vmem:[#allocation5 + $0x104] sm:$0xf0]  ;;  %v3476_v30 = vld [vmem:[#allocation5 + $0x180] sm:$0xf]  ;;  %v164_v32 = vshrl.u32 %v4451_v20, 16  ;;  %v167_v33 = vshll.u32 %v4451_v20, 16  ;;  %v4455_v34 = vor.u32 %v4050_v21, %v3222_v28  ;;  %v3349_v46 = vor.u32 %v4083_v25, %v3348_v24 }
  0x2a   :  { %980 = vmatpush.bf16.msra.mxu0 %v3301_v5  ;;  %v4115_v31 = vld [vmem:[#allocation5 + $0x184] sm:$0xf0]  ;;  %vm291_vm0 = vcmask 1040384   ;;  %vm292_vm1 = vsmask.f32 256  ;;  %v3413_v47 = vor.u32 %v4099_v27, %v3412_v26  ;;  %v5649_v49 = vmov 0 }
  0x2b   :  { %1029 = vmatpush.bf16.msra.mxu1 %v3365_v9  ;;  %v4080_v36 = vld [vmem:[#allocation5 + $0x74] sm:$0xf]  ;;  %v166_v37 = vrot.slane %v164_v32, 7  ;;  %v171_v38 = vshrl.u32 %v4455_v34, 16  ;;  %v174_v39 = vshll.u32 %v4455_v34, 16  ;;  %vm4465_vm2 = vmand %vm291_vm0, %vm292_vm1  ;;  %v3477_v53 = vor.u32 %v4115_v31, %v3476_v30  ;;  %s3203_s16 = sshll.u32 %s5619_s5, 4  ;;  %s3204_s16 = int_to_ptr.hbm [resolvable:$true] %s3203_s16 }
  0x2c   :  { %1078 = vmatpush.bf16.msra.mxu2 %v3429_v10  ;;  %v3342_v40 = vld [vmem:[#allocation5 + $0x78] sm:$0xf0]  ;;  %v3596_v42 = vld [vmem:[#allocation5 + $0x270] sm:$0xf]  ;;  %v4145_v43 = vld [vmem:[#allocation5 + $0x274] sm:$0xf0] }
  0x2d   :  { %1127 = vmatpush.bf16.msra.mxu3 %v3493_v14  ;;  %v4096_v44 = vld [vmem:[#allocation5 + $0xf4] sm:$0xf]  ;;  %v3406_v45 = vld [vmem:[#allocation5 + $0xf8] sm:$0xf0]  ;;  %v169_v48 = vor.u32 %v167_v33, %v166_v37  ;;  %v5650_v49 = vsel %vm4465_vm2, 4294967295, %v5649_v49  ;;  %v173_v50 = vrot.slane %v171_v38, 7  ;;  %v3345_v54 = vor.u32 %v4080_v36, %v3342_v40 }
  0x2e   :  { %981 = vmatpush.bf16.msra.mxu0 %v3293_v22  ;;  %5651 = vst [vmem:[#allocation15_spill] sm:$0xff] %v5650_v49  ;;  %v3228_v51 = vld [vmem:[#allocation2 + $0x10] sm:$0xf]  ;;  %v4053_v52 = vld [vmem:[#allocation2 + $0x14] sm:$0xf0]  ;;  %v3409_v59 = vor.u32 %v4096_v44, %v3406_v45  ;;  %v3597_v4 = vor.u32 %v4145_v43, %v3596_v42  ;;  %vm358_vm3 = vcmask 1047552  }
  0x2f   :  { %1030 = vmatpush.bf16.msra.mxu1 %v3357_v23  ;;  %v3660_v55 = vld [vmem:[#allocation5 + $0x2f0] sm:$0xf]  ;;  %v4052_v56 = vld [vmem:[#allocation2 + $0x14] sm:$0xf]  ;;  %v3230_v57 = vld [vmem:[#allocation2 + $0x18] sm:$0xf0]  ;;  %v176_v58 = vor.u32 %v174_v39, %v173_v50  ;;  %v4477_v0 = vor.u32 %v4053_v52, %v3228_v51 }
  0x30   :  { %1079 = vmatpush.bf16.msra.mxu2 %v3421_v29  ;;  %v4161_v60 = vld [vmem:[#allocation5 + $0x2f4] sm:$0xf0]  ;;  %v4078_v61 = vld [vmem:[#allocation5 + $0x64] sm:$0xf]  ;;  %v3334_v62 = vld [vmem:[#allocation5 + $0x68] sm:$0xf0]  ;;  %v4483_v5 = vor.u32 %v4052_v56, %v3230_v57 }
  0x31   :  { %1128 = vmatpush.bf16.msra.mxu3 %v3485_v35  ;;  %v4475_v63 = vsel %vm4465_vm2, 0, %v169_v48  ;;  %v4094_v1 = vld [vmem:[#allocation5 + $0xe4] sm:$0xf]  ;;  %v3398_v2 = vld [vmem:[#allocation5 + $0xe8] sm:$0xf0]  ;;  %v4481_v3 = vsel %vm4465_vm2, 0, %v176_v58  ;;  %v3661_v6 = vor.u32 %v4161_v60, %v3660_v55  ;;  %v3337_v7 = vor.u32 %v4078_v61, %v3334_v62 }
  0x32   :  { %982 = vmatpush.bf16.msra.mxu0 %v3285_v41  ;;  %v3588_v8 = vld [vmem:[#allocation5 + $0x260] sm:$0xf]  ;;  %v4143_v9 = vld [vmem:[#allocation5 + $0x264] sm:$0xf0]  ;;  %v3401_v10 = vor.u32 %v4094_v1, %v3398_v2  ;;  %v178_v13 = vshrl.u32 %v4477_v0, 16  ;;  %v185_v14 = vshrl.u32 %v4483_v5, 16 }
  0x33   :  { %1031 = vmatpush.bf16.msra.mxu1 %v3349_v46  ;;  %v3652_v11 = vld [vmem:[#allocation5 + $0x2e0] sm:$0xf]  ;;  %v4159_v12 = vld [vmem:[#allocation5 + $0x2e4] sm:$0xf0]  ;;  %v3589_v15 = vor.u32 %v4143_v9, %v3588_v8  ;;  %v4076_v16 = vld [vmem:[#allocation5 + $0x54] sm:$0xf] }
  0x34   :  { %1080 = vmatpush.bf16.msra.mxu2 %v3413_v47  ;;  %v3653_v17 = vor.u32 %v4159_v12, %v3652_v11  ;;  %v3326_v18 = vld [vmem:[#allocation5 + $0x58] sm:$0xf0]  ;;  %v3580_v21 = vld [vmem:[#allocation5 + $0x250] sm:$0xf]  ;;  %v4141_v22 = vld [vmem:[#allocation5 + $0x254] sm:$0xf0] }
  0x35   :  { %1129 = vmatpush.bf16.msra.mxu3 %v3477_v53  ;;  %983 = vmatmul.bf16.vlgmr.msra.gmra.mxu0 %v4475_v63  ;;  %v3329_v19 = vor.u32 %v4076_v16, %v3326_v18  ;;  %v180_v23 = vrot.slane %v178_v13, 7  ;;  %v181_v24 = vshll.u32 %v4477_v0, 16  ;;  %v4092_v25 = vld [vmem:[#allocation5 + $0xd4] sm:$0xf]  ;;  %v3390_v26 = vld [vmem:[#allocation5 + $0xd8] sm:$0xf0]  ;;  %v3581_v29 = vor.u32 %v4141_v22, %v3580_v21 }
  0x36   :  { %1032 = vmatmul.bf16.vlgmr.msra.gmra.mxu1 %v4481_v3  ;;  %1171 = vmatpush.bf16.msrb.mxu0 %v3597_v4  ;;  %v187_v27 = vrot.slane %v185_v14, 7  ;;  %v188_v28 = vshll.u32 %v4483_v5, 16  ;;  %v3393_v30 = vor.u32 %v4092_v25, %v3390_v26  ;;  %v3644_v31 = vld [vmem:[#allocation5 + $0x2d0] sm:$0xf]  ;;  %v4157_v35 = vld [vmem:[#allocation5 + $0x2d4] sm:$0xf0] }
  0x37   :  { %1081 = vmatmul.bf16.vlgmr.msra.gmra.mxu2 %v4451_v20  ;;  %1220 = vmatpush.bf16.msrb.mxu1 %v3661_v6  ;;  %v3645_v36 = vor.u32 %v4157_v35, %v3644_v31  ;;  %v183_v37 = vor.u32 %v181_v24, %v180_v23  ;;  %v3236_v40 = vld [vmem:[#allocation2 + $0x20] sm:$0xf]  ;;  %v4055_v42 = vld [vmem:[#allocation2 + $0x24] sm:$0xf0]  ;;  %v4054_v43 = vld [vmem:[#allocation2 + $0x24] sm:$0xf] }
  0x38   :  { %1269 = vmatpush.bf16.msrb.mxu2 %v3345_v54  ;;  %1130 = vmatmul.bf16.vlgmr.msra.gmra.mxu3 %v4455_v34  ;;  %v190_v41 = vor.u32 %v188_v28, %v187_v27  ;;  %v3238_v44 = vld [vmem:[#allocation2 + $0x28] sm:$0xf0]  ;;  %v4505_v46 = vor.u32 %v4055_v42, %v3236_v40  ;;  %v4074_v52 = vld [vmem:[#allocation5 + $0x44] sm:$0xf]  ;;  %v3572_v54 = vld [vmem:[#allocation5 + $0x240] sm:$0xf] }
  0x39   :  { %1318 = vmatpush.bf16.msrb.mxu3 %v3409_v59  ;;  %v4503_v45 = vsel %vm4465_vm2, 0, %v183_v37  ;;  %v4507_v47 = vor.u32 %v4054_v43, %v3238_v44  ;;  %v3318_v53 = vld [vmem:[#allocation5 + $0x48] sm:$0xf0]  ;;  %v4139_v56 = vld [vmem:[#allocation5 + $0x244] sm:$0xf0] }
  0x3a   :  { %1172 = vmatpush.bf16.msrb.mxu0 %v3589_v15  ;;  %v4511_v48 = vsel %vm4465_vm2, 0, %v190_v41  ;;  %v192_v50 = vshrl.u32 %v4505_v46, 16  ;;  %v3321_v55 = vor.u32 %v4074_v52, %v3318_v53  ;;  %v4090_v57 = vld [vmem:[#allocation5 + $0xc4] sm:$0xf]  ;;  %v3382_v58 = vld [vmem:[#allocation5 + $0xc8] sm:$0xf0]  ;;  %v3573_v59 = vor.u32 %v4139_v56, %v3572_v54 }
  0x3b   :  { %1221 = vmatpush.bf16.msrb.mxu1 %v3653_v17  ;;  %v199_v51 = vshrl.u32 %v4507_v47, 16  ;;  %v3385_v60 = vor.u32 %v4090_v57, %v3382_v58  ;;  %v3636_v61 = vld [vmem:[#allocation5 + $0x2c0] sm:$0xf]  ;;  %v4155_v62 = vld [vmem:[#allocation5 + $0x2c4] sm:$0xf0]  ;;  %v195_v2 = vshll.u32 %v4505_v46, 16 }
  0x3c   :  { %1270 = vmatpush.bf16.msrb.mxu2 %v3337_v7  ;;  %v194_v1 = vrot.slane %v192_v50, 7  ;;  %v3637_v4 = vor.u32 %v4155_v62, %v3636_v61  ;;  %v202_v7 = vshll.u32 %v4507_v47, 16  ;;  %v3244_v9 = vld [vmem:[#allocation2 + $0x30] sm:$0xf]  ;;  %v4057_v11 = vld [vmem:[#allocation2 + $0x34] sm:$0xf0] }
  0x3d   :  { %1319 = vmatpush.bf16.msrb.mxu3 %v3401_v10  ;;  %v201_v6 = vrot.slane %v199_v51, 7  ;;  %v4056_v12 = vld [vmem:[#allocation2 + $0x34] sm:$0xf]  ;;  %v3246_v15 = vld [vmem:[#allocation2 + $0x38] sm:$0xf0]  ;;  %v4533_v17 = vor.u32 %v4057_v11, %v3244_v9 }
  0x3e   :  { %1173 = vmatpush.bf16.msrb.mxu0 %v3581_v29  ;;  %v197_v8 = vor.u32 %v195_v2, %v194_v1  ;;  %v4535_v18 = vor.u32 %v4056_v12, %v3246_v15  ;;  %v4072_v23 = vld [vmem:[#allocation5 + $0x34] sm:$0xf]  ;;  %v3310_v25 = vld [vmem:[#allocation5 + $0x38] sm:$0xf0]  ;;  %v3564_v26 = vld [vmem:[#allocation5 + $0x230] sm:$0xf] }
  0x3f   :  { %1222 = vmatpush.bf16.msrb.mxu1 %v3645_v36  ;;  %v204_v10 = vor.u32 %v202_v7, %v201_v6  ;;  %v5637_v21 = vshrl.u32 %v4533_v17, 16  ;;  %v3313_v27 = vor.u32 %v4072_v23, %v3310_v25  ;;  %v4137_v29 = vld [vmem:[#allocation5 + $0x234] sm:$0xf0]  ;;  %v3374_v31 = vld [vmem:[#allocation5 + $0xb8] sm:$0xf0]  ;;  %v209_v42 = vshll.u32 %v4533_v17, 16 }
  0x40   :  { %1271 = vmatpush.bf16.msrb.mxu2 %v3329_v19  ;;  %v4531_v16 = vsel %vm4465_vm2, 0, %v197_v8  ;;  %v5636_v22 = vshrl.u32 %v4535_v18, 16  ;;  %v3565_v35 = vor.u32 %v4137_v29, %v3564_v26  ;;  %v3628_v37 = vld [vmem:[#allocation5 + $0x2b0] sm:$0xf]  ;;  %v4153_v40 = vld [vmem:[#allocation5 + $0x2b4] sm:$0xf0] }
  0x41   :  { %1320 = vmatpush.bf16.msrb.mxu3 %v3393_v30  ;;  %v4539_v19 = vsel %vm4465_vm2, 0, %v204_v10  ;;  %v4088_v30 = vld [vmem:[#allocation5 + $0xb4] sm:$0xf]  ;;  %v208_v41 = vrot.slane %v5637_v21, 7  ;;  %v3629_v43 = vor.u32 %v4153_v40, %v3628_v37  ;;  %v216_v52 = vshll.u32 %v4535_v18, 16 }
  0x42   :  { %1174 = vmatpush.bf16.msrb.mxu0 %v3573_v59  ;;  %v3377_v36 = vor.u32 %v4088_v30, %v3374_v31  ;;  %v215_v44 = vrot.slane %v5636_v22, 7  ;;  %v3252_v54 = vld [vmem:[#allocation2 + $0x40] sm:$0xf]  ;;  %v4059_v56 = vld [vmem:[#allocation2 + $0x44] sm:$0xf0]  ;;  %v314_v22 = vrot.slane %v181_v24, 1 }
  0x43   :  { %1223 = vmatpush.bf16.msrb.mxu1 %v3637_v4  ;;  %v211_v53 = vor.u32 %v209_v42, %v208_v41  ;;  %v4058_v57 = vld [vmem:[#allocation2 + $0x44] sm:$0xf]  ;;  %v3254_v58 = vld [vmem:[#allocation2 + $0x48] sm:$0xf0]  ;;  %v3556_v9 = vld [vmem:[#allocation5 + $0x220] sm:$0xf] }
  0x44   :  { %1272 = vmatpush.bf16.msrb.mxu2 %v3321_v55  ;;  %v218_v55 = vor.u32 %v216_v52, %v215_v44  ;;  %v4563_v61 = vor.u32 %v4058_v57, %v3254_v58  ;;  %v4070_v6 = vld [vmem:[#allocation5 + $0x24] sm:$0xf]  ;;  %v3302_v8 = vld [vmem:[#allocation5 + $0x28] sm:$0xf0]  ;;  %v4135_v11 = vld [vmem:[#allocation5 + $0x224] sm:$0xf0] }
  0x45   :  { %988 = vmatmul.bf16.gmra.mxu0 %v4503_v45  ;;  %1321 = vmatpush.bf16.msrb.mxu3 %v3385_v60  ;;  %v4559_v59 = vsel %vm4465_vm2, 0, %v211_v53  ;;  %v4561_v60 = vor.u32 %v4059_v56, %v3252_v54  ;;  %v3305_v10 = vor.u32 %v4070_v6, %v3302_v8  ;;  %v4086_v12 = vld [vmem:[#allocation5 + $0xa4] sm:$0xf]  ;;  %v3366_v15 = vld [vmem:[#allocation5 + $0xa8] sm:$0xf0]  ;;  %v3557_v23 = vor.u32 %v4135_v11, %v3556_v9 }
  0x46   :  { %1037 = vmatmul.bf16.gmra.mxu1 %v4511_v48  ;;  %1175 = vmatpush.bf16.msrb.mxu0 %v3565_v35  ;;  %v4567_v62 = vsel %vm4465_vm2, 0, %v218_v55  ;;  %v5624_v4 = vshrl.u32 %v4563_v61, 16  ;;  %v3369_v25 = vor.u32 %v4086_v12, %v3366_v15  ;;  %v3620_v26 = vld [vmem:[#allocation5 + $0x2a0] sm:$0xf]  ;;  %v3260_v40 = vld [vmem:[#allocation2 + $0x50] sm:$0xf] }
  0x47   :  { %1086 = vmatmul.bf16.gmra.mxu2 %v4477_v0  ;;  %1224 = vmatpush.bf16.msrb.mxu1 %v3629_v43  ;;  %v5629_v1 = vshrl.u32 %v4561_v60, 16  ;;  %v5635_v30 = vshll.u32 %v4561_v60, 16  ;;  %v4061_v43 = vld [vmem:[#allocation2 + $0x54] sm:$0xf0]  ;;  %v4060_v44 = vld [vmem:[#allocation2 + $0x54] sm:$0xf] }
  0x48   :  { %1135 = vmatmul.bf16.gmra.mxu3 %v4483_v5  ;;  %1273 = vmatpush.bf16.msrb.mxu2 %v3313_v27  ;;  %v4151_v27 = vld [vmem:[#allocation5 + $0x2a4] sm:$0xf0]  ;;  %v229_v35 = vrot.slane %v5624_v4, 7  ;;  %v3262_v53 = vld [vmem:[#allocation2 + $0x58] sm:$0xf0]  ;;  %v4589_v55 = vor.u32 %v4061_v43, %v3260_v40  ;;  %v316_v21 = vrot.slane %v188_v28, 1 }
  0x49   :  { %1322 = vmatpush.bf16.msrb.mxu3 %v3377_v36  ;;  %v222_v29 = vrot.slane %v5629_v1, 7  ;;  %v3621_v31 = vor.u32 %v4151_v27, %v3620_v26  ;;  %v5630_v36 = vshll.u32 %v4563_v61, 16  ;;  %v4591_v56 = vor.u32 %v4060_v44, %v3262_v53  ;;  %v4068_v8 = vld [vmem:[#allocation5 + $0x14] sm:$0xf]  ;;  %v3294_v9 = vld [vmem:[#allocation5 + $0x18] sm:$0xf0] }
  0x4a   :  { %1176 = vmatpush.bf16.msrb.mxu0 %v3557_v23  ;;  %v5621_v58 = vshrl.u32 %v4589_v55, 16  ;;  %v3297_v11 = vor.u32 %v4068_v8, %v3294_v9  ;;  %v4133_v12 = vld [vmem:[#allocation5 + $0x214] sm:$0xf0]  ;;  %v4084_v15 = vld [vmem:[#allocation5 + $0x94] sm:$0xf]  ;;  %v317_v24 = vor.u32 %v316_v21, %v185_v14 }
  0x4b   :  { %1225 = vmatpush.bf16.msrb.mxu1 %v3621_v31  ;;  %v225_v37 = vor.u32 %v5635_v30, %v222_v29  ;;  %v232_v41 = vor.u32 %v5630_v36, %v229_v35  ;;  %v5620_v6 = vshrl.u32 %v4591_v56, 16  ;;  %v3358_v23 = vld [vmem:[#allocation5 + $0x98] sm:$0xf0]  ;;  %v3612_v27 = vld [vmem:[#allocation5 + $0x290] sm:$0xf]  ;;  %v5623_v35 = vshll.u32 %v4589_v55, 16 }
  0x4c   :  { %1274 = vmatpush.bf16.msrb.mxu2 %v3305_v10  ;;  %v3548_v10 = vld [vmem:[#allocation5 + $0x210] sm:$0xf]  ;;  %v3361_v26 = vor.u32 %v4084_v15, %v3358_v23  ;;  %v4149_v29 = vld [vmem:[#allocation5 + $0x294] sm:$0xf0]  ;;  %v236_v31 = vrot.slane %v5621_v58, 7 }
  0x4d   :  { %1323 = vmatpush.bf16.msrb.mxu3 %v3369_v25  ;;  %v4587_v54 = vsel %vm4465_vm2, 0, %v225_v37  ;;  %v4595_v57 = vsel %vm4465_vm2, 0, %v232_v41  ;;  %v3549_v25 = vor.u32 %v4133_v12, %v3548_v10  ;;  %v3613_v37 = vor.u32 %v4149_v29, %v3612_v27  ;;  %v3268_v44 = vld [vmem:[#allocation2 + $0x60] sm:$0xf]  ;;  %v4063_v8 = vld [vmem:[#allocation2 + $0x64] sm:$0xf0] }
  0x4e   :  { %v243_v40 = vrot.slane %v5620_v6, 7  ;;  %v5622_v41 = vshll.u32 %v4591_v56, 16  ;;  %v239_v43 = vor.u32 %v5623_v35, %v236_v31  ;;  %v4062_v9 = vld [vmem:[#allocation2 + $0x64] sm:$0xf]  ;;  %v3270_v10 = vld [vmem:[#allocation2 + $0x68] sm:$0xf0]  ;;  %v4617_v12 = vor.u32 %v4063_v8, %v3268_v44 }
  0x4f   :  { %1177 = vmatpush.bf16.msrb.mxu0 %v3549_v25  ;;  %1226 = vmatpush.bf16.msrb.mxu1 %v3613_v37  ;;  %v4619_v15 = vor.u32 %v4062_v9, %v3270_v10  ;;  %v4066_v27 = vld [vmem:[#allocation5 + $0x4] sm:$0xf]  ;;  %v3286_v29 = vld [vmem:[#allocation5 + $0x8] sm:$0xf0]  ;;  %v3540_v31 = vld [vmem:[#allocation5 + $0x200] sm:$0xf] }
  0x50   :  { %1275 = vmatpush.bf16.msrb.mxu2 %v3297_v11  ;;  %v246_v53 = vor.u32 %v5622_v41, %v243_v40  ;;  %v4615_v11 = vsel %vm4465_vm2, 0, %v239_v43  ;;  %v5626_v25 = vshrl.u32 %v4617_v12, 16  ;;  %v3289_v37 = vor.u32 %v4066_v27, %v3286_v29  ;;  %v4131_v40 = vld [vmem:[#allocation5 + $0x204] sm:$0xf0]  ;;  %v4082_v43 = vld [vmem:[#allocation5 + $0x84] sm:$0xf] }
  0x51   :  { %1324 = vmatpush.bf16.msrb.mxu3 %v3361_v26  ;;  %v5625_v26 = vshrl.u32 %v4619_v15, 16  ;;  %v3350_v44 = vld [vmem:[#allocation5 + $0x88] sm:$0xf0]  ;;  %v3604_v9 = vld [vmem:[#allocation5 + $0x280] sm:$0xf]  ;;  %v5628_v58 = vshll.u32 %v4617_v12, 16 }
  0x52   :  { %v4623_v23 = vsel %vm4465_vm2, 0, %v246_v53  ;;  %v3541_v53 = vor.u32 %v4131_v40, %v3540_v31  ;;  %v3353_v8 = vor.u32 %v4082_v43, %v3350_v44  ;;  %v4147_v10 = vld [vmem:[#allocation5 + $0x284] sm:$0xf0]  ;;  %v250_v6 = vrot.slane %v5626_v25, 7  ;;  %v3276_v29 = vld [vmem:[#allocation2 + $0x70] sm:$0xf] }
  0x53   :  { %v3605_v41 = vor.u32 %v4147_v10, %v3604_v9  ;;  %v257_v35 = vrot.slane %v5625_v26, 7  ;;  %v5627_v4 = vshll.u32 %v4619_v15, 16  ;;  %v4065_v40 = vld [vmem:[#allocation2 + $0x74] sm:$0xf0]  ;;  %v4064_v43 = vld [vmem:[#allocation2 + $0x74] sm:$0xf] }
  0x54   :  { %1276 = vmatpush.bf16.msrb.mxu2 %v3289_v37  ;;  %1178 = vmatpush.bf16.msrb.mxu0 %v3541_v53  ;;  %v253_v27 = vor.u32 %v5628_v58, %v250_v6  ;;  %v3278_v44 = vld [vmem:[#allocation2 + $0x78] sm:$0xf0]  ;;  %v4645_v9 = vor.u32 %v4065_v40, %v3276_v29  ;;  %v4144_v53 = vld [vmem:[#allocation5 + $0x274] sm:$0xf]  ;;  %vm359_vm4 = vsmask.f32 7424 }
  0x55   :  { %993 = vmatmul.bf16.gmra.mxu0 %v4531_v16  ;;  %1325 = vmatpush.bf16.msrb.mxu3 %v3353_v8  ;;  %v260_v31 = vor.u32 %v5627_v4, %v257_v35  ;;  %v4647_v10 = vor.u32 %v4064_v43, %v3278_v44  ;;  %v3598_v8 = vld [vmem:[#allocation5 + $0x278] sm:$0xf0]  ;;  %v4160_v43 = vld [vmem:[#allocation5 + $0x2f4] sm:$0xf]  ;;  %vm4695_vm5 = vmand %vm358_vm3, %vm359_vm4 }
  0x56   :  { %1042 = vmatmul.bf16.gmra.mxu1 %v4539_v19  ;;  %v4643_v37 = vsel %vm4465_vm2, 0, %v253_v27  ;;  %v5632_v6 = vshrl.u32 %v4645_v9, 16  ;;  %v4112_v27 = vld [vmem:[#allocation5 + $0x174] sm:$0xf]  ;;  %v3601_v29 = vor.u32 %v4144_v53, %v3598_v8  ;;  %v3470_v40 = vld [vmem:[#allocation5 + $0x178] sm:$0xf0] }
  0x57   :  { %1091 = vmatmul.bf16.gmra.mxu2 %v4505_v46  ;;  %1227 = vmatpush.bf16.msrb.mxu1 %v3605_v41  ;;  %v4651_v41 = vsel %vm4465_vm2, 0, %v260_v31  ;;  %v5631_v35 = vshrl.u32 %v4647_v10, 16  ;;  %v3662_v31 = vld [vmem:[#allocation5 + $0x2f8] sm:$0xf0]  ;;  %v3473_v44 = vor.u32 %v4112_v27, %v3470_v40  ;;  %v5634_v4 = vshll.u32 %v4645_v9, 16 }
  0x58   :  { %1140 = vmatmul.bf16.gmra.mxu3 %v4507_v47  ;;  %v3665_v26 = vor.u32 %v4160_v43, %v3662_v31  ;;  %v264_v25 = vrot.slane %v5632_v6, 7  ;;  %1465 = vmatpush.bf16.msra.mxu2 %v3601_v29  ;;  %v5633_v1 = vshll.u32 %v4647_v10, 16  ;;  %v4128_v36 = vld [vmem:[#allocation5 + $0x1f4] sm:$0xf]  ;;  %v3534_v53 = vld [vmem:[#allocation5 + $0x1f8] sm:$0xf0] }
  0x59   :  { %v271_v58 = vrot.slane %v5631_v35, 7  ;;  %1367 = vmatpush.bf16.msra.mxu0 %v3473_v44  ;;  %v3537_v8 = vor.u32 %v4128_v36, %v3534_v53  ;;  %v4142_v36 = vld [vmem:[#allocation5 + $0x264] sm:$0xf]  ;;  %v3462_v31 = vld [vmem:[#allocation5 + $0x168] sm:$0xf0]  ;;  %v312_v6 = vrot.slane %v174_v39, 1 }
  0x5a   :  { %1514 = vmatpush.bf16.msra.mxu3 %v3665_v26  ;;  %v267_v27 = vor.u32 %v5634_v4, %v264_v25  ;;  %v3590_v25 = vld [vmem:[#allocation5 + $0x268] sm:$0xf0]  ;;  %v4158_v44 = vld [vmem:[#allocation5 + $0x2e4] sm:$0xf]  ;;  %v4686_v35 = vld [vmem:[%s5617_s3] sm:$0x3] }
  0x5b   :  { %v274_v40 = vor.u32 %v5633_v1, %v271_v58  ;;  %1416 = vmatpush.bf16.msra.mxu1 %v3537_v8  ;;  %v4110_v58 = vld [vmem:[#allocation5 + $0x164] sm:$0xf]  ;;  %v3593_v26 = vor.u32 %v4142_v36, %v3590_v25  ;;  %v3654_v53 = vld [vmem:[#allocation5 + $0x2e8] sm:$0xf0]  ;;  %s4399_s3 = smov [#allocation10]  }
  0x5c   :  { %v4671_v29 = vsel %vm4465_vm2, 0, %v267_v27  ;;  %v3465_v8 = vor.u32 %v4110_v58, %v3462_v31  ;;  %v3657_v27 = vor.u32 %v4158_v44, %v3654_v53  ;;  %v4126_v36 = vld [vmem:[#allocation5 + $0x1e4] sm:$0xf]  ;;  %v3526_v25 = vld [vmem:[#allocation5 + $0x1e8] sm:$0xf0]  ;;  %v313_v44 = vor.u32 %v312_v6, %v171_v38  ;;  %s3201_s13 = sshll.u32 %s4399_s3, 4  ;;  %s3202_s13 = int_to_ptr.vmem [resolvable:$true] %s3201_s13 }
  0x5d   :  { %v4675_v43 = vsel %vm4465_vm2, 0, %v274_v40  ;;  %v310_v40 = vrot.slane %v167_v33, 1  ;;  %1466 = vmatpush.bf16.msra.mxu2 %v3593_v26  ;;  %v3529_v58 = vor.u32 %v4126_v36, %v3526_v25  ;;  %v4693_v33 = vperm.slane %v4686_v35, 0  ;;  %v4140_v38 = vld [vmem:[#allocation5 + $0x254] sm:$0xf] }
  0x5e   :  { %1368 = vmatpush.bf16.msra.mxu0 %v3465_v8  ;;  %1515 = vmatpush.bf16.msra.mxu3 %v3657_v27  ;;  %v5652_v26 = vmov 0  ;;  %v3582_v6 = vld [vmem:[#allocation5 + $0x258] sm:$0xf0]  ;;  %v4108_v36 = vld [vmem:[#allocation5 + $0x154] sm:$0xf] }
  0x5f   :  { %v311_v31 = vor.u32 %v310_v40, %v164_v32  ;;  %v5653_v26 = vsel %vm4695_vm5, 4294967295, %v5652_v26  ;;  %1417 = vmatpush.bf16.msra.mxu1 %v3529_v58  ;;  %v4708_v32 = vsel %vm4695_vm5, %v313_v44, 0  ;;  %v3585_v25 = vor.u32 %v4140_v38, %v3582_v6  ;;  %v3454_v58 = vld [vmem:[#allocation5 + $0x158] sm:$0xf0]  ;;  %v4124_v6 = vld [vmem:[#allocation5 + $0x1d4] sm:$0xf] }
  0x60   :  { %5654 = vst [vmem:[#allocation16_spill] sm:$0xff] %v5653_v26  ;;  %v3457_v4 = vor.u32 %v4108_v36, %v3454_v58  ;;  %v3518_v36 = vld [vmem:[#allocation5 + $0x1d8] sm:$0xf0]  ;;  %v4138_v14 = vld [vmem:[#allocation5 + $0x244] sm:$0xf] }
  0x61   :  { %v4703_v53 = vsel %vm4695_vm5, %v311_v31, 0  ;;  %v4156_v31 = vld [vmem:[#allocation5 + $0x2d4] sm:$0xf]  ;;  %1467 = vmatpush.bf16.msra.mxu2 %v3585_v25  ;;  %v3574_v21 = vld [vmem:[#allocation5 + $0x248] sm:$0xf0] }
  0x62   :  { %1369 = vmatpush.bf16.msra.mxu0 %v3457_v4 }
  0x65   :  { %998 = vmatmul.bf16.gmra.mxu0 %v4559_v59 }
  0x66   :  { %1047 = vmatmul.bf16.gmra.mxu1 %v4567_v62 }
  0x67   :  { %1096 = vmatmul.bf16.gmra.mxu2 %v4533_v17 }
  0x68   :  { %1145 = vmatmul.bf16.gmra.mxu3 %v4535_v18 }
  0x75   :  { %1003 = vmatmul.bf16.gmra.mxu0 %v4587_v54 }
  0x76   :  { %1052 = vmatmul.bf16.gmra.mxu1 %v4595_v57 }
  0x77   :  { %1101 = vmatmul.bf16.gmra.mxu2 %v4561_v60 }
  0x78   :  { %1150 = vmatmul.bf16.gmra.mxu3 %v4563_v61 }
  0x85   :  { %1008 = vmatmul.bf16.gmra.mxu0 %v4615_v11 }
  0x86   :  { %1057 = vmatmul.bf16.gmra.mxu1 %v4623_v23 }
  0x87   :  { %1106 = vmatmul.bf16.gmra.mxu2 %v4589_v55 }
  0x88   :  { %1155 = vmatmul.bf16.gmra.mxu3 %v4591_v56 }
  0x95   :  { %1013 = vmatmul.bf16.gmra.mxu0 %v4643_v37 }
  0x96   :  { %1062 = vmatmul.bf16.gmra.mxu1 %v4651_v41 }
  0x97   :  { %1111 = vmatmul.bf16.gmra.mxu2 %v4617_v12 }
  0x98   :  { %1160 = vmatmul.bf16.gmra.mxu3 %v4619_v15 }
  0xa5   :  { %1018 = vmatmul.bf16.gmra.mxu0 %v4671_v29 }
  0xa6   :  { %1067 = vmatmul.bf16.gmra.mxu1 %v4675_v43 }
  0xa7   :  { %1116 = vmatmul.bf16.gmra.mxu2 %v4645_v9 }
  0xa8   :  { %1165 = vmatmul.bf16.gmra.mxu3 %v4647_v10 }
  0xb2   :  { %v984_v39 = vpop.f32.mrf.mxu0 }
  0xb3   :  { %v985_v8 = vadd.f32 %v984_v39, %v4693_v33  ;;  %v1033_v27 = vpop.f32.mrf.mxu1  ;;  %v3646_v39 = vld [vmem:[#allocation5 + $0x2d8] sm:$0xf0] }
  0xb4   :  { %v3649_v44 = vor.u32 %v4156_v31, %v3646_v39 }
  0xb5   :  { %v1034_v40 = vadd.f32 %v1033_v27, %v985_v8  ;;  %1179 = vmatmul.bf16.vlgmr.msrb.gmra.mxu0 %v4703_v53 }
  0xb6   :  { %1228 = vmatmul.bf16.vlgmr.msrb.gmra.mxu1 %v4708_v32  ;;  %1516 = vmatpush.bf16.msra.mxu3 %v3649_v44  ;;  %v4732_v44 = vsel %vm4695_vm5, %v317_v24, 0 }
  0xb7   :  { %1277 = vmatmul.bf16.vlgmr.msrb.gmra.mxu2 %v4475_v63 }
  0xb8   :  { %1326 = vmatmul.bf16.vlgmr.msrb.gmra.mxu3 %v4481_v3 }
  0xba   :  { %v1082_v1 = vpop.f32.mrf.mxu2  ;;  %v986_v27 = vpop.f32.mrf.mxu0 }
  0xbb   :  { %v1083_v30 = vadd.f32 %v1082_v1, %v1034_v40  ;;  %v1131_v8 = vpop.f32.mrf.mxu3  ;;  %v987_v63 = vadd.f32 %v986_v27, %v4693_v33  ;;  %v1035_v3 = vpop.f32.mrf.mxu1  ;;  %v3521_v1 = vor.u32 %v4124_v6, %v3518_v36  ;;  %v315_v40 = vor.u32 %v314_v22, %v178_v13  ;;  %v4154_v6 = vld [vmem:[#allocation5 + $0x2c4] sm:$0xf]  ;;  %v3638_v36 = vld [vmem:[#allocation5 + $0x2c8] sm:$0xf0] }
  0xbd   :  { %v4719_v38 = vadd.f32 %v1131_v8, %v1083_v30  ;;  %v1036_v58 = vadd.f32 %v1035_v3, %v987_v63  ;;  %1418 = vmatpush.bf16.msra.mxu1 %v3521_v1  ;;  %v4727_v28 = vsel %vm4695_vm5, %v315_v40, 0  ;;  %v4106_v8 = vld [vmem:[#allocation5 + $0x144] sm:$0xf]  ;;  %v3577_v63 = vor.u32 %v4138_v14, %v3574_v21  ;;  %v3446_v3 = vld [vmem:[#allocation5 + $0x148] sm:$0xf0] }
  0xbe   :  { %v3449_v1 = vor.u32 %v4106_v8, %v3446_v3  ;;  %v3641_v40 = vor.u32 %v4154_v6, %v3638_v36  ;;  %v3510_v14 = vld [vmem:[#allocation5 + $0x1c8] sm:$0xf0] }
  0xbf   :  { %1468 = vmatpush.bf16.msra.mxu2 %v3577_v63 }
  0xc0   :  { %1370 = vmatpush.bf16.msra.mxu0 %v3449_v1  ;;  %1517 = vmatpush.bf16.msra.mxu3 %v3641_v40 }
  0xc2   :  { %v1084_v25 = vpop.f32.mrf.mxu2  ;;  %v989_v27 = vpop.f32.mrf.mxu0 }
  0xc3   :  { %v1085_v31 = vadd.f32 %v1084_v25, %v1036_v58  ;;  %v1133_v39 = vpop.f32.mrf.mxu3  ;;  %v990_v4 = vadd.f32 %v989_v27, %v4693_v33  ;;  %v1038_v30 = vpop.f32.mrf.mxu1  ;;  %v320_v27 = vrot.slane %v202_v7, 1 }
  0xc5   :  { %v4734_v13 = vadd.f32 %v1133_v39, %v1085_v31  ;;  %v1039_v22 = vadd.f32 %v1038_v30, %v990_v4  ;;  %1184 = vmatmul.bf16.gmra.mxu0 %v4727_v28  ;;  %v318_v39 = vrot.slane %v195_v2, 1  ;;  %v4122_v30 = vld [vmem:[#allocation5 + $0x1c4] sm:$0xf]  ;;  %v321_v2 = vor.u32 %v320_v27, %v199_v51  ;;  %v4136_v51 = vld [vmem:[#allocation5 + $0x234] sm:$0xf] }
  0xc6   :  { %1233 = vmatmul.bf16.gmra.mxu1 %v4732_v44  ;;  %v3630_v27 = vld [vmem:[#allocation5 + $0x2b8] sm:$0xf0] }
  0xc7   :  { %1282 = vmatmul.bf16.gmra.mxu2 %v4503_v45  ;;  %v319_v8 = vor.u32 %v318_v39, %v192_v50  ;;  %v4758_v40 = vsel %vm4695_vm5, %v321_v2, 0 }
  0xc8   :  { %1331 = vmatmul.bf16.gmra.mxu3 %v4511_v48 }
  0xc9   :  { %v4753_v7 = vsel %vm4695_vm5, %v319_v8, 0 }
  0xca   :  { %v1087_v58 = vpop.f32.mrf.mxu2  ;;  %v991_v31 = vpop.f32.mrf.mxu0 }
  0xcb   :  { %v1088_v24 = vadd.f32 %v1087_v58, %v1039_v22  ;;  %v1136_v25 = vpop.f32.mrf.mxu3  ;;  %v992_v45 = vadd.f32 %v991_v31, %v4693_v33  ;;  %v1040_v48 = vpop.f32.mrf.mxu1  ;;  %v3513_v22 = vor.u32 %v4122_v30, %v3510_v14  ;;  %v4104_v31 = vld [vmem:[#allocation5 + $0x134] sm:$0xf] }
  0xcd   :  { %v4745_v4 = vadd.f32 %v1136_v25, %v1088_v24  ;;  %v1041_v21 = vadd.f32 %v1040_v48, %v992_v45  ;;  %1419 = vmatpush.bf16.msra.mxu1 %v3513_v22  ;;  %v3566_v25 = vld [vmem:[#allocation5 + $0x238] sm:$0xf0]  ;;  %v4152_v48 = vld [vmem:[#allocation5 + $0x2b4] sm:$0xf] }
  0xce   :  { %v3569_v39 = vor.u32 %v4136_v51, %v3566_v25  ;;  %v3438_v45 = vld [vmem:[#allocation5 + $0x138] sm:$0xf0]  ;;  %v5655_v51 = vshrl.u32 %v4533_v17, 16 }
  0xcf   :  { %v3441_v14 = vor.u32 %v4104_v31, %v3438_v45 }
  0xd0   :  { %1469 = vmatpush.bf16.msra.mxu2 %v3569_v39 }
  0xd1   :  { %1371 = vmatpush.bf16.msra.mxu0 %v3441_v14 }
  0xd2   :  { %v1089_v63 = vpop.f32.mrf.mxu2  ;;  %v994_v36 = vpop.f32.mrf.mxu0 }
  0xd3   :  { %v1090_v3 = vadd.f32 %v1089_v63, %v1041_v21  ;;  %v1138_v6 = vpop.f32.mrf.mxu3  ;;  %v995_v58 = vadd.f32 %v994_v36, %v4693_v33  ;;  %v1043_v1 = vpop.f32.mrf.mxu1  ;;  %v3633_v21 = vor.u32 %v4152_v48, %v3630_v27  ;;  %v322_v63 = vrot.slane %v209_v42, 1  ;;  %v4120_v36 = vld [vmem:[#allocation5 + $0x1b4] sm:$0xf] }
  0xd4   :  { %v5656_v42 = vshrl.u32 %v4535_v18, 16 }
  0xd5   :  { %v4760_v50 = vadd.f32 %v1138_v6, %v1090_v3  ;;  %v1044_v24 = vadd.f32 %v1043_v1, %v995_v58  ;;  %1189 = vmatmul.bf16.gmra.mxu0 %v4753_v7  ;;  %v324_v3 = vrot.slane %v216_v52, 1  ;;  %1518 = vmatpush.bf16.msra.mxu3 %v3633_v21  ;;  %v3502_v58 = vld [vmem:[#allocation5 + $0x1b8] sm:$0xf0]  ;;  %v323_v25 = vor.u32 %v322_v63, %v5655_v51  ;;  %v3558_v63 = vld [vmem:[#allocation5 + $0x228] sm:$0xf0] }
  0xd6   :  { %1238 = vmatmul.bf16.gmra.mxu1 %v4758_v40 }
  0xd7   :  { %1287 = vmatmul.bf16.gmra.mxu2 %v4531_v16  ;;  %v325_v31 = vor.u32 %v324_v3, %v5656_v42  ;;  %v4779_v52 = vsel %vm4695_vm5, %v323_v25, 0  ;;  %v3430_v3 = vld [vmem:[#allocation5 + $0x128] sm:$0xf0] }
  0xd8   :  { %1336 = vmatmul.bf16.gmra.mxu3 %v4539_v19 }
  0xd9   :  { %v4784_v21 = vsel %vm4695_vm5, %v325_v31, 0 }
  0xda   :  { %v1092_v30 = vpop.f32.mrf.mxu2  ;;  %v996_v2 = vpop.f32.mrf.mxu0 }
  0xdb   :  { %v1093_v22 = vadd.f32 %v1092_v30, %v1044_v24  ;;  %v1141_v8 = vpop.f32.mrf.mxu3  ;;  %v997_v16 = vadd.f32 %v996_v2, %v4693_v33  ;;  %v1045_v19 = vpop.f32.mrf.mxu1  ;;  %v3505_v24 = vor.u32 %v4120_v36, %v3502_v58  ;;  %v4134_v2 = vld [vmem:[#allocation5 + $0x224] sm:$0xf]  ;;  %v3622_v58 = vld [vmem:[#allocation5 + $0x2a8] sm:$0xf0] }
  0xdc   :  { %v4150_v36 = vld [vmem:[#allocation5 + $0x2a4] sm:$0xf] }
  0xdd   :  { %v4771_v6 = vadd.f32 %v1141_v8, %v1093_v22  ;;  %v1046_v1 = vadd.f32 %v1045_v19, %v997_v16  ;;  %1420 = vmatpush.bf16.msra.mxu1 %v3505_v24  ;;  %v4102_v16 = vld [vmem:[#allocation5 + $0x124] sm:$0xf]  ;;  %v3561_v19 = vor.u32 %v4134_v2, %v3558_v63  ;;  %v3625_v51 = vor.u32 %v4150_v36, %v3622_v58  ;;  %v3494_v2 = vld [vmem:[#allocation5 + $0x1a8] sm:$0xf0] }
  0xde   :  { %v3433_v24 = vor.u32 %v4102_v16, %v3430_v3  ;;  %v5659_v16 = vshrl.u32 %v4561_v60, 16  ;;  %v5660_v36 = vshrl.u32 %v4563_v61, 16 }
  0xdf   :  { %1470 = vmatpush.bf16.msra.mxu2 %v3561_v19  ;;  %1519 = vmatpush.bf16.msra.mxu3 %v3625_v51 }
  0xe0   :  { %1372 = vmatpush.bf16.msra.mxu0 %v3433_v24 }
  0xe2   :  { %v1094_v39 = vpop.f32.mrf.mxu2  ;;  %v999_v27 = vpop.f32.mrf.mxu0 }
  0xe3   :  { %v1095_v45 = vadd.f32 %v1094_v39, %v1046_v1  ;;  %v1143_v48 = vpop.f32.mrf.mxu3  ;;  %v1000_v30 = vadd.f32 %v999_v27, %v4693_v33  ;;  %v1048_v14 = vpop.f32.mrf.mxu1  ;;  %v5657_v39 = vshll.u32 %v4561_v60, 16 }
  0xe5   :  { %v4786_v22 = vadd.f32 %v1143_v48, %v1095_v45  ;;  %v1049_v8 = vadd.f32 %v1048_v14, %v1000_v30  ;;  %1194 = vmatmul.bf16.gmra.mxu0 %v4779_v52  ;;  %v326_v45 = vrot.slane %v5657_v39, 1  ;;  %v5658_v48 = vshll.u32 %v4563_v61, 16  ;;  %v4118_v14 = vld [vmem:[#allocation5 + $0x1a4] sm:$0xf] }
  0xe6   :  { %1243 = vmatmul.bf16.gmra.mxu1 %v4784_v21 }
  0xe7   :  { %1292 = vmatmul.bf16.gmra.mxu2 %v4559_v59  ;;  %v328_v27 = vrot.slane %v5658_v48, 1  ;;  %v327_v3 = vor.u32 %v326_v45, %v5659_v16  ;;  %v3550_v48 = vld [vmem:[#allocation5 + $0x218] sm:$0xf0] }
  0xe8   :  { %1341 = vmatmul.bf16.gmra.mxu3 %v4567_v62 }
  0xe9   :  { %v329_v19 = vor.u32 %v328_v27, %v5660_v36  ;;  %v4805_v24 = vsel %vm4695_vm5, %v327_v3, 0  ;;  %v4100_v27 = vld [vmem:[#allocation5 + $0x114] sm:$0xf] }
  0xea   :  { %v1097_v1 = vpop.f32.mrf.mxu2  ;;  %v1001_v31 = vpop.f32.mrf.mxu0 }
  0xeb   :  { %v1098_v25 = vadd.f32 %v1097_v1, %v1049_v8  ;;  %v1146_v42 = vpop.f32.mrf.mxu3  ;;  %v1002_v59 = vadd.f32 %v1001_v31, %v4693_v33  ;;  %v1050_v62 = vpop.f32.mrf.mxu1  ;;  %v3497_v8 = vor.u32 %v4118_v14, %v3494_v2  ;;  %v3422_v2 = vld [vmem:[#allocation5 + $0x118] sm:$0xf0] }
  0xec   :  { %v3425_v3 = vor.u32 %v4100_v27, %v3422_v2  ;;  %v3486_v27 = vld [vmem:[#allocation5 + $0x198] sm:$0xf0] }
  0xed   :  { %v4797_v30 = vadd.f32 %v1146_v42, %v1098_v25  ;;  %v1051_v63 = vadd.f32 %v1050_v62, %v1002_v59  ;;  %1421 = vmatpush.bf16.msra.mxu1 %v3497_v8  ;;  %v4810_v42 = vsel %vm4695_vm5, %v329_v19, 0  ;;  %v4132_v62 = vld [vmem:[#allocation5 + $0x214] sm:$0xf]  ;;  %v3614_v8 = vld [vmem:[#allocation5 + $0x298] sm:$0xf0] }
  0xee   :  { %5661 = vst [vmem:[#allocation17_spill] sm:$0xff] %v4810_v42  ;;  %v3553_v14 = vor.u32 %v4132_v62, %v3550_v48  ;;  %1373 = vmatpush.bf16.msra.mxu0 %v3425_v3  ;;  %v4116_v48 = vld [vmem:[#allocation5 + $0x194] sm:$0xf] }
  0xf0   :  { %1471 = vmatpush.bf16.msra.mxu2 %v3553_v14 }
  0xf2   :  { %v1099_v58 = vpop.f32.mrf.mxu2  ;;  %v1004_v39 = vpop.f32.mrf.mxu0 }
  0xf3   :  { %v1100_v1 = vadd.f32 %v1099_v58, %v1051_v63  ;;  %v1148_v31 = vpop.f32.mrf.mxu3  ;;  %v1005_v51 = vadd.f32 %v1004_v39, %v4693_v33  ;;  %v1053_v25 = vpop.f32.mrf.mxu1  ;;  %v4148_v63 = vld [vmem:[#allocation5 + $0x294] sm:$0xf] }
  0xf4   :  { %v3617_v36 = vor.u32 %v4148_v63, %v3614_v8  ;;  %v5664_v63 = vshrl.u32 %v4589_v55, 16 }
  0xf5   :  { %v4812_v45 = vadd.f32 %v1148_v31, %v1100_v1  ;;  %v1054_v59 = vadd.f32 %v1053_v25, %v1005_v51  ;;  %1199 = vmatmul.bf16.gmra.mxu0 %v4805_v24  ;;  %v5662_v31 = vshll.u32 %v4589_v55, 16  ;;  %v5663_v51 = vshll.u32 %v4591_v56, 16 }
  0xf6   :  { %1248 = vmatmul.bf16.gmra.mxu1 %v4810_v42  ;;  %1520 = vmatpush.bf16.msra.mxu3 %v3617_v36 }
  0xf7   :  { %1297 = vmatmul.bf16.gmra.mxu2 %v4587_v54  ;;  %v330_v39 = vrot.slane %v5662_v31, 1  ;;  %v332_v25 = vrot.slane %v5663_v51, 1  ;;  %v3542_v51 = vld [vmem:[#allocation5 + $0x208] sm:$0xf0] }
  0xf8   :  { %1346 = vmatmul.bf16.gmra.mxu3 %v4595_v57 }
  0xf9   :  { %v331_v8 = vor.u32 %v330_v39, %v5664_v63 }
  0xfa   :  { %v1102_v16 = vpop.f32.mrf.mxu2  ;;  %v1006_v1 = vpop.f32.mrf.mxu0 }
  0xfb   :  { %v1103_v19 = vadd.f32 %v1102_v16, %v1054_v59  ;;  %v1151_v58 = vpop.f32.mrf.mxu3  ;;  %v1007_v54 = vadd.f32 %v1006_v1, %v4693_v33  ;;  %v1055_v57 = vpop.f32.mrf.mxu1  ;;  %v3489_v59 = vor.u32 %v4116_v48, %v3486_v27  ;;  %v5665_v16 = vshrl.u32 %v4591_v56, 16  ;;  %v3414_v48 = vld [vmem:[#allocation5 + $0x108] sm:$0xf0]  ;;  %v4146_v27 = vld [vmem:[#allocation5 + $0x284] sm:$0xf] }
  0xfc   :  { %v4831_v3 = vsel %vm4695_vm5, %v331_v8, 0 }
  0xfd   :  { %v4823_v62 = vadd.f32 %v1151_v58, %v1103_v19  ;;  %v1056_v2 = vadd.f32 %v1055_v57, %v1007_v54  ;;  %v333_v14 = vor.u32 %v332_v25, %v5665_v16  ;;  %1422 = vmatpush.bf16.msra.mxu1 %v3489_v59  ;;  %v4130_v57 = vld [vmem:[#allocation5 + $0x204] sm:$0xf] }
  0xfe   :  { %v4098_v25 = vld [vmem:[#allocation5 + $0x104] sm:$0xf] }
  0xff   :  { %v4836_v58 = vsel %vm4695_vm5, %v333_v14, 0  ;;  %v3417_v63 = vor.u32 %v4098_v25, %v3414_v48  ;;  %v3478_v25 = vld [vmem:[#allocation5 + $0x188] sm:$0xf0] }
 0x100   :  { %5666 = vst [vmem:[#allocation18_spill] sm:$0xff] %v4836_v58 }
 0x101   :  { %1374 = vmatpush.bf16.msra.mxu0 %v3417_v63 }
 0x102   :  { %v1104_v1 = vpop.f32.mrf.mxu2  ;;  %v1009_v42 = vpop.f32.mrf.mxu0 }
 0x103   :  { %v1105_v31 = vadd.f32 %v1104_v1, %v1056_v2  ;;  %v1153_v49 = vpop.f32.mrf.mxu3  ;;  %v1010_v36 = vadd.f32 %v1009_v42, %v4693_v33  ;;  %v1058_v19 = vpop.f32.mrf.mxu1  ;;  %v3545_v42 = vor.u32 %v4130_v57, %v3542_v51  ;;  %v3606_v2 = vld [vmem:[#allocation5 + $0x288] sm:$0xf0]  ;;  %v5668_v1 = vshll.u32 %v4617_v12, 16  ;;  %v4114_v51 = vld [vmem:[#allocation5 + $0x184] sm:$0xf] }
 0x105   :  { %v4838_v39 = vadd.f32 %v1153_v49, %v1105_v31  ;;  %v1059_v54 = vadd.f32 %v1058_v19, %v1010_v36  ;;  %1204 = vmatmul.bf16.gmra.mxu0 %v4831_v3  ;;  %v3609_v49 = vor.u32 %v4146_v27, %v3606_v2  ;;  %v334_v31 = vrot.slane %v5668_v1, 1  ;;  %1472 = vmatpush.bf16.msra.mxu2 %v3545_v42 }
 0x106   :  { %1253 = vmatmul.bf16.gmra.mxu1 %v4836_v58  ;;  %v5669_v36 = vshll.u32 %v4619_v15, 16  ;;  %v5670_v27 = vshrl.u32 %v4617_v12, 16 }
 0x107   :  { %5667 = vst [vmem:[#allocation19_spill] sm:$0xff] %v4838_v39  ;;  %1302 = vmatmul.bf16.gmra.mxu2 %v4615_v11  ;;  %1521 = vmatpush.bf16.msra.mxu3 %v3609_v49 }
 0x108   :  { %1351 = vmatmul.bf16.gmra.mxu3 %v4623_v23  ;;  %v336_v19 = vrot.slane %v5669_v36, 1  ;;  %v335_v2 = vor.u32 %v334_v31, %v5670_v27 }
 0x10a   :  { %v1107_v59 = vpop.f32.mrf.mxu2  ;;  %v1011_v14 = vpop.f32.mrf.mxu0  ;;  %v4857_v63 = vsel %vm4695_vm5, %v335_v2, 0 }
 0x10b   :  { %v1108_v8 = vadd.f32 %v1107_v59, %v1059_v54  ;;  %v1156_v16 = vpop.f32.mrf.mxu3  ;;  %v1012_v11 = vadd.f32 %v1011_v14, %v4693_v33  ;;  %v1060_v23 = vpop.f32.mrf.mxu1  ;;  %v3481_v54 = vor.u32 %v4114_v51, %v3478_v25  ;;  %v5671_v59 = vshrl.u32 %v4619_v15, 16 }
 0x10c   :  { %v5672_v51 = vshll.u32 %v4645_v9, 16 }
 0x10d   :  { %v4849_v57 = vadd.f32 %v1156_v16, %v1108_v8  ;;  %v1061_v48 = vadd.f32 %v1060_v23, %v1012_v11  ;;  %v337_v42 = vor.u32 %v336_v19, %v5671_v59  ;;  %1423 = vmatpush.bf16.msra.mxu1 %v3481_v54  ;;  %v5673_v54 = vshll.u32 %v4647_v10, 16 }
 0x10e   :  { %v338_v25 = vrot.slane %v5672_v51, 1 }
 0x10f   :  { %v4862_v16 = vsel %vm4695_vm5, %v337_v42, 0  ;;  %v340_v27 = vrot.slane %v5673_v54, 1 }
 0x112   :  { %v1109_v14 = vpop.f32.mrf.mxu2  ;;  %v1014_v58 = vpop.f32.mrf.mxu0 }
 0x113   :  { %v1110_v1 = vadd.f32 %v1109_v14, %v1061_v48  ;;  %v1158_v39 = vpop.f32.mrf.mxu3  ;;  %v1015_v49 = vadd.f32 %v1014_v58, %v4693_v33  ;;  %v1063_v8 = vpop.f32.mrf.mxu1 }
 0x115   :  { %v4864_v31 = vadd.f32 %v1158_v39, %v1110_v1  ;;  %v1064_v11 = vadd.f32 %v1063_v8, %v1015_v49  ;;  %1209 = vmatmul.bf16.gmra.mxu0 %v4857_v63 }
 0x116   :  { %1258 = vmatmul.bf16.gmra.mxu1 %v4862_v16 }
 0x117   :  { %1307 = vmatmul.bf16.gmra.mxu2 %v4643_v37  ;;  %v5674_v37 = vshrl.u32 %v4645_v9, 16 }
 0x118   :  { %1356 = vmatmul.bf16.gmra.mxu3 %v4651_v41  ;;  %v5675_v41 = vshrl.u32 %v4647_v10, 16 }
 0x119   :  { %v339_v42 = vor.u32 %v338_v25, %v5674_v37 }
 0x11a   :  { %v1112_v23 = vpop.f32.mrf.mxu2  ;;  %v1016_v58 = vpop.f32.mrf.mxu0  ;;  %v341_v14 = vor.u32 %v340_v27, %v5675_v41 }
 0x11b   :  { %v1113_v36 = vadd.f32 %v1112_v23, %v1064_v11  ;;  %v1161_v19 = vpop.f32.mrf.mxu3  ;;  %v1017_v48 = vadd.f32 %v1016_v58, %v4693_v33  ;;  %v1065_v39 = vpop.f32.mrf.mxu1  ;;  %v4883_v23 = vsel %vm4695_vm5, %v339_v42, 0 }
 0x11d   :  { %v4875_v2 = vadd.f32 %v1161_v19, %v1113_v36  ;;  %v1066_v59 = vadd.f32 %v1065_v39, %v1017_v48  ;;  %v4888_v36 = vsel %vm4695_vm5, %v341_v14, 0 }
 0x122   :  { %v1114_v1 = vpop.f32.mrf.mxu2  ;;  %v1019_v11 = vpop.f32.mrf.mxu0 }
 0x123   :  { %v1115_v49 = vadd.f32 %v1114_v1, %v1066_v59  ;;  %v1163_v8 = vpop.f32.mrf.mxu3  ;;  %v1020_v58 = vadd.f32 %v1019_v11, %v4693_v33  ;;  %v1068_v51 = vpop.f32.mrf.mxu1 }
 0x125   :  { %v4890_v19 = vadd.f32 %v1163_v8, %v1115_v49  ;;  %v1069_v25 = vadd.f32 %v1068_v51, %v1020_v58  ;;  %1214 = vmatmul.bf16.gmra.mxu0 %v4883_v23  ;;  %v3852_v51 = vld [vmem:[#allocation7 + $0x170] sm:$0xf] }
 0x126   :  { %1263 = vmatmul.bf16.gmra.mxu1 %v4888_v36 }
 0x127   :  { %1312 = vmatmul.bf16.gmra.mxu2 %v4671_v29 }
 0x128   :  { %1361 = vmatmul.bf16.gmra.mxu3 %v4675_v43 }
 0x12a   :  { %v1117_v48 = vpop.f32.mrf.mxu2  ;;  %v1021_v27 = vpop.f32.mrf.mxu0 }
 0x12b   :  { %v1118_v39 = vadd.f32 %v1117_v48, %v1069_v25  ;;  %v1166_v54 = vpop.f32.mrf.mxu3  ;;  %v1022_v59 = vadd.f32 %v1021_v27, %v4693_v33  ;;  %v1070_v37 = vpop.f32.mrf.mxu1  ;;  %v4908_v33 = vperm.slane %v4686_v35, 1  ;;  %v4209_v25 = vld [vmem:[#allocation7 + $0x174] sm:$0xf0] }
 0x12c   :  { %v3853_v48 = vor.u32 %v4209_v25, %v3852_v51 }
 0x12d   :  { %v4897_v42 = vadd.f32 %v1166_v54, %v1118_v39  ;;  %v1071_v41 = vadd.f32 %v1070_v37, %v1022_v59  ;;  %v4177_v39 = vld [vmem:[#allocation7 + $0x74] sm:$0xf0]  ;;  %v3916_v54 = vld [vmem:[#allocation7 + $0x1f0] sm:$0xf] }
 0x12e   :  { %v4225_v37 = vld [vmem:[#allocation7 + $0x1f4] sm:$0xf0]  ;;  %2579 = vmatpush.bf16.msrb.mxu2 %v3853_v48 }
 0x12f   :  { %v3917_v35 = vor.u32 %v4225_v37, %v3916_v54 }
 0x131   :  { %2628 = vmatpush.bf16.msrb.mxu3 %v3917_v35  ;;  %v3780_v35 = vld [vmem:[#allocation7 + $0xe0] sm:$0xf] }
 0x132   :  { %v1119_v14 = vpop.f32.mrf.mxu2  ;;  %v1180_v8 = vpop.f32.mrf.mxu0 }
 0x133   :  { %v1120_v1 = vadd.f32 %v1119_v14, %v1071_v41  ;;  %v1168_v49 = vpop.f32.mrf.mxu3  ;;  %v1181_v11 = vadd.f32 %v1180_v8, %v4719_v38  ;;  %v1229_v58 = vpop.f32.mrf.mxu1  ;;  %v3724_v38 = vld [vmem:[#allocation7 + $0x70] sm:$0xf] }
 0x134   :  { %v3725_v59 = vor.u32 %v4177_v39, %v3724_v38  ;;  %v3788_v41 = vld [vmem:[#allocation7 + $0xf0] sm:$0xf] }
 0x135   :  { %v4900_v29 = vadd.f32 %v1168_v49, %v1120_v1  ;;  %v4902_v43 = vadd.f32 %v1229_v58, %v1181_v11  ;;  %1375 = vmatmul.bf16.vlgmr.msra.gmra.mxu0 %v4451_v20  ;;  %v4193_v20 = vld [vmem:[#allocation7 + $0xf4] sm:$0xf0] }
 0x136   :  { %1424 = vmatmul.bf16.vlgmr.msra.gmra.mxu1 %v4455_v34  ;;  %v3789_v1 = vor.u32 %v4193_v20, %v3788_v41  ;;  %2481 = vmatpush.bf16.msrb.mxu0 %v3725_v59  ;;  %v4207_v59 = vld [vmem:[#allocation7 + $0x164] sm:$0xf0]  ;;  %v3716_v41 = vld [vmem:[#allocation7 + $0x60] sm:$0xf] }
 0x137   :  { %1473 = vmatmul.bf16.vlgmr.msra.gmra.mxu2 %v4703_v53  ;;  %v4175_v20 = vld [vmem:[#allocation7 + $0x64] sm:$0xf0] }
 0x138   :  { %1522 = vmatmul.bf16.vlgmr.msra.gmra.mxu3 %v4708_v32  ;;  %2530 = vmatpush.bf16.msrb.mxu1 %v3789_v1  ;;  %v4191_v1 = vld [vmem:[#allocation7 + $0xe4] sm:$0xf0] }
 0x13a   :  { %v1278_v27 = vpop.f32.mrf.mxu2  ;;  %v1182_v53 = vpop.f32.mrf.mxu0 }
 0x13b   :  { %v1279_v34 = vadd.f32 %v1278_v27, %v4908_v33  ;;  %v1327_v14 = vpop.f32.mrf.mxu3  ;;  %v1183_v32 = vadd.f32 %v1182_v53, %v4734_v13  ;;  %v1231_v49 = vpop.f32.mrf.mxu1  ;;  %v3844_v13 = vld [vmem:[#allocation7 + $0x160] sm:$0xf]  ;;  %v4223_v53 = vld [vmem:[#allocation7 + $0x1e4] sm:$0xf0] }
 0x13c   :  { %v3845_v37 = vor.u32 %v4207_v59, %v3844_v13 }
 0x13d   :  { %v4913_v8 = vadd.f32 %v1327_v14, %v1279_v34  ;;  %v4915_v11 = vadd.f32 %v1231_v49, %v1183_v32  ;;  %v3908_v34 = vld [vmem:[#allocation7 + $0x1e0] sm:$0xf]  ;;  %v3717_v14 = vor.u32 %v4175_v20, %v3716_v41 }
 0x13e   :  { %2580 = vmatpush.bf16.msrb.mxu2 %v3845_v37 }
 0x13f   :  { %2482 = vmatpush.bf16.msrb.mxu0 %v3717_v14  ;;  %v3708_v14 = vld [vmem:[#allocation7 + $0x50] sm:$0xf] }
 0x142   :  { %v1280_v58 = vpop.f32.mrf.mxu2  ;;  %v1185_v38 = vpop.f32.mrf.mxu0 }
 0x143   :  { %v1281_v51 = vadd.f32 %v1280_v58, %v4908_v33  ;;  %v1329_v25 = vpop.f32.mrf.mxu3  ;;  %v1186_v39 = vadd.f32 %v1185_v38, %v4745_v4  ;;  %v1234_v48 = vpop.f32.mrf.mxu1 }
 0x145   :  { %v4919_v54 = vadd.f32 %v1329_v25, %v1281_v51  ;;  %v4921_v27 = vadd.f32 %v1234_v48, %v1186_v39  ;;  %1380 = vmatmul.bf16.gmra.mxu0 %v4477_v0 }
 0x146   :  { %1429 = vmatmul.bf16.gmra.mxu1 %v4483_v5  ;;  %v3909_v5 = vor.u32 %v4223_v53, %v3908_v34  ;;  %v4205_v34 = vld [vmem:[#allocation7 + $0x154] sm:$0xf0] }
 0x147   :  { %1478 = vmatmul.bf16.gmra.mxu2 %v4727_v28  ;;  %v3781_v28 = vor.u32 %v4191_v1, %v3780_v35  ;;  %v4173_v53 = vld [vmem:[#allocation7 + $0x54] sm:$0xf0]  ;;  %v3900_v35 = vld [vmem:[#allocation7 + $0x1d0] sm:$0xf] }
 0x148   :  { %1527 = vmatmul.bf16.gmra.mxu3 %v4732_v44  ;;  %v3709_v1 = vor.u32 %v4173_v53, %v3708_v14  ;;  %v4203_v14 = vld [vmem:[#allocation7 + $0x144] sm:$0xf0] }
 0x149   :  { %2629 = vmatpush.bf16.msrb.mxu3 %v3909_v5  ;;  %2531 = vmatpush.bf16.msrb.mxu1 %v3781_v28 }
 0x14a   :  { %v1283_v4 = vpop.f32.mrf.mxu2  ;;  %v1187_v49 = vpop.f32.mrf.mxu0  ;;  %2483 = vmatpush.bf16.msrb.mxu0 %v3709_v1  ;;  %v3892_v1 = vld [vmem:[#allocation7 + $0x1c0] sm:$0xf] }
 0x14b   :  { %v1284_v32 = vadd.f32 %v1283_v4, %v4908_v33  ;;  %v1332_v0 = vpop.f32.mrf.mxu3  ;;  %v1188_v44 = vadd.f32 %v1187_v49, %v4760_v50  ;;  %v1236_v58 = vpop.f32.mrf.mxu1  ;;  %v3836_v50 = vld [vmem:[#allocation7 + $0x150] sm:$0xf]  ;;  %v4189_v49 = vld [vmem:[#allocation7 + $0xd4] sm:$0xf0] }
 0x14c   :  { %v3837_v4 = vor.u32 %v4205_v34, %v3836_v50 }
 0x14d   :  { %v4929_v51 = vadd.f32 %v1332_v0, %v1284_v32  ;;  %v4931_v25 = vadd.f32 %v1236_v58, %v1188_v44  ;;  %v4221_v32 = vld [vmem:[#allocation7 + $0x1d4] sm:$0xf0]  ;;  %v3772_v0 = vld [vmem:[#allocation7 + $0xd0] sm:$0xf] }
 0x14e   :  { %2581 = vmatpush.bf16.msrb.mxu2 %v3837_v4 }
 0x152   :  { %v1285_v38 = vpop.f32.mrf.mxu2  ;;  %v1190_v13 = vpop.f32.mrf.mxu0 }
 0x153   :  { %v1286_v39 = vadd.f32 %v1285_v38, %v4908_v33  ;;  %v1334_v48 = vpop.f32.mrf.mxu3  ;;  %v1191_v59 = vadd.f32 %v1190_v13, %v4771_v6  ;;  %v1239_v37 = vpop.f32.mrf.mxu1 }
 0x155   :  { %v4935_v41 = vadd.f32 %v1334_v48, %v1286_v39  ;;  %v4937_v20 = vadd.f32 %v1239_v37, %v1191_v59  ;;  %1385 = vmatmul.bf16.gmra.mxu0 %v4505_v46 }
 0x156   :  { %1434 = vmatmul.bf16.gmra.mxu1 %v4507_v47  ;;  %v3901_v47 = vor.u32 %v4221_v32, %v3900_v35  ;;  %v3700_v35 = vld [vmem:[#allocation7 + $0x40] sm:$0xf] }
 0x157   :  { %1483 = vmatmul.bf16.gmra.mxu2 %v4753_v7  ;;  %v3773_v7 = vor.u32 %v4189_v49, %v3772_v0  ;;  %v4219_v0 = vld [vmem:[#allocation7 + $0x1c4] sm:$0xf0]  ;;  %v3764_v49 = vld [vmem:[#allocation7 + $0xc0] sm:$0xf] }
 0x158   :  { %1532 = vmatmul.bf16.gmra.mxu3 %v4758_v40 }
 0x159   :  { %2630 = vmatpush.bf16.msrb.mxu3 %v3901_v47  ;;  %2532 = vmatpush.bf16.msrb.mxu1 %v3773_v7 }
 0x15a   :  { %v1288_v6 = vpop.f32.mrf.mxu2  ;;  %v1192_v28 = vpop.f32.mrf.mxu0 }
 0x15b   :  { %v1289_v5 = vadd.f32 %v1288_v6, %v4908_v33  ;;  %v1337_v46 = vpop.f32.mrf.mxu3  ;;  %v1193_v40 = vadd.f32 %v1192_v28, %v4786_v22  ;;  %v1241_v44 = vpop.f32.mrf.mxu1  ;;  %v3828_v22 = vld [vmem:[#allocation7 + $0x140] sm:$0xf]  ;;  %v4171_v6 = vld [vmem:[#allocation7 + $0x44] sm:$0xf0] }
 0x15c   :  { %v3829_v53 = vor.u32 %v4203_v14, %v3828_v22  ;;  %v3701_v32 = vor.u32 %v4171_v6, %v3700_v35  ;;  %v3820_v14 = vld [vmem:[#allocation7 + $0x130] sm:$0xf] }
 0x15d   :  { %v4945_v58 = vadd.f32 %v1337_v46, %v1289_v5  ;;  %v4947_v38 = vadd.f32 %v1241_v44, %v1193_v40  ;;  %v4187_v5 = vld [vmem:[#allocation7 + $0xc4] sm:$0xf0]  ;;  %v3692_v6 = vld [vmem:[#allocation7 + $0x30] sm:$0xf] }
 0x15e   :  { %2582 = vmatpush.bf16.msrb.mxu2 %v3829_v53  ;;  %2484 = vmatpush.bf16.msrb.mxu0 %v3701_v32  ;;  %v4201_v53 = vld [vmem:[#allocation7 + $0x134] sm:$0xf0] }
 0x15f   :  { %v3821_v35 = vor.u32 %v4201_v53, %v3820_v14  ;;  %v3684_v14 = vld [vmem:[#allocation7 + $0x20] sm:$0xf]  ;;  %v4167_v53 = vld [vmem:[#allocation7 + $0x24] sm:$0xf0] }
 0x162   :  { %v1290_v39 = vpop.f32.mrf.mxu2  ;;  %v1195_v59 = vpop.f32.mrf.mxu0  ;;  %2583 = vmatpush.bf16.msrb.mxu2 %v3821_v35  ;;  %v3876_v35 = vld [vmem:[#allocation7 + $0x1a0] sm:$0xf] }
 0x163   :  { %v1291_v48 = vadd.f32 %v1290_v39, %v4908_v33  ;;  %v1339_v13 = vpop.f32.mrf.mxu3  ;;  %v1196_v37 = vadd.f32 %v1195_v59, %v4797_v30  ;;  %v1244_v50 = vpop.f32.mrf.mxu1 }
 0x165   :  { %v4951_v34 = vadd.f32 %v1339_v13, %v1291_v48  ;;  %v4953_v4 = vadd.f32 %v1244_v50, %v1196_v37  ;;  %1390 = vmatmul.bf16.gmra.mxu0 %v4533_v17 }
 0x166   :  { %1439 = vmatmul.bf16.gmra.mxu1 %v4535_v18  ;;  %v3893_v18 = vor.u32 %v4219_v0, %v3892_v1  ;;  %v4169_v1 = vld [vmem:[#allocation7 + $0x34] sm:$0xf0] }
 0x167   :  { %1488 = vmatmul.bf16.gmra.mxu2 %v4779_v52  ;;  %v3765_v52 = vor.u32 %v4187_v5, %v3764_v49  ;;  %v3693_v32 = vor.u32 %v4169_v1, %v3692_v6  ;;  %v4217_v0 = vld [vmem:[#allocation7 + $0x1b4] sm:$0xf0]  ;;  %v3756_v49 = vld [vmem:[#allocation7 + $0xb0] sm:$0xf]  ;;  %v3685_v1 = vor.u32 %v4167_v53, %v3684_v14 }
 0x168   :  { %1537 = vmatmul.bf16.gmra.mxu3 %v4784_v21  ;;  %v4185_v5 = vld [vmem:[#allocation7 + $0xb4] sm:$0xf0]  ;;  %v3868_v14 = vld [vmem:[#allocation7 + $0x190] sm:$0xf] }
 0x169   :  { %2631 = vmatpush.bf16.msrb.mxu3 %v3893_v18  ;;  %2533 = vmatpush.bf16.msrb.mxu1 %v3765_v52  ;;  %v4213_v53 = vld [vmem:[#allocation7 + $0x194] sm:$0xf0] }
 0x16a   :  { %v1293_v30 = vpop.f32.mrf.mxu2  ;;  %v1197_v28 = vpop.f32.mrf.mxu0  ;;  %2485 = vmatpush.bf16.msrb.mxu0 %v3693_v32 }
 0x16b   :  { %v1294_v46 = vadd.f32 %v1293_v30, %v4908_v33  ;;  %v1342_v17 = vpop.f32.mrf.mxu3  ;;  %v1198_v21 = vadd.f32 %v1197_v28, %v4812_v45  ;;  %v1246_v47 = vpop.f32.mrf.mxu1  ;;  %v5676_v45 = vld [vmem:[#allocation17_spill] sm:$0xff] }
 0x16c   :  { %v3884_v30 = vld [vmem:[#allocation7 + $0x1b0] sm:$0xf] }
 0x16d   :  { %v4961_v7 = vadd.f32 %v1342_v17, %v1294_v46  ;;  %v4963_v40 = vadd.f32 %v1246_v47, %v1198_v21 }
 0x16e   :  { %2486 = vmatpush.bf16.msrb.mxu0 %v3685_v1  ;;  %v4181_v1 = vld [vmem:[#allocation7 + $0x94] sm:$0xf0] }
 0x172   :  { %v1295_v44 = vpop.f32.mrf.mxu2  ;;  %v1200_v13 = vpop.f32.mrf.mxu0 }
 0x173   :  { %v1296_v39 = vadd.f32 %v1295_v44, %v4908_v33  ;;  %v1344_v48 = vpop.f32.mrf.mxu3  ;;  %v1201_v59 = vadd.f32 %v1200_v13, %v4823_v62  ;;  %v1249_v37 = vpop.f32.mrf.mxu1  ;;  %v5677_v13 = vld [vmem:[#allocation18_spill] sm:$0xff] }
 0x175   :  { %v4967_v50 = vadd.f32 %v1344_v48, %v1296_v39  ;;  %v4969_v22 = vadd.f32 %v1249_v37, %v1201_v59  ;;  %1395 = vmatmul.bf16.gmra.mxu0 %v4561_v60  ;;  %v3812_v59 = vld [vmem:[#allocation7 + $0x120] sm:$0xf]  ;;  %v4199_v37 = vld [vmem:[#allocation7 + $0x124] sm:$0xf0] }
 0x176   :  { %1444 = vmatmul.bf16.gmra.mxu1 %v4563_v61  ;;  %v3885_v61 = vor.u32 %v4217_v0, %v3884_v30  ;;  %v3748_v30 = vld [vmem:[#allocation7 + $0xa0] sm:$0xf] }
 0x177   :  { %1493 = vmatmul.bf16.gmra.mxu2 %v4805_v24  ;;  %v3757_v24 = vor.u32 %v4185_v5, %v3756_v49 }
 0x178   :  { %1542 = vmatmul.bf16.gmra.mxu3 %v5676_v45  ;;  %v3813_v45 = vor.u32 %v4199_v37, %v3812_v59  ;;  %v3676_v59 = vld [vmem:[#allocation7 + $0x10] sm:$0xf] }
 0x179   :  { %2632 = vmatpush.bf16.msrb.mxu3 %v3885_v61  ;;  %2534 = vmatpush.bf16.msrb.mxu1 %v3757_v24 }
 0x17a   :  { %v1298_v62 = vpop.f32.mrf.mxu2  ;;  %v4976_v17 = vpop.f32.mrf.mxu0  ;;  %2584 = vmatpush.bf16.msrb.mxu2 %v3813_v45  ;;  %v4165_v45 = vld [vmem:[#allocation7 + $0x14] sm:$0xf0] }
 0x17b   :  { %v1299_v46 = vadd.f32 %v1298_v62, %v4908_v33  ;;  %v1347_v60 = vpop.f32.mrf.mxu3  ;;  %v4978_v28 = vpop.f32.mrf.mxu1  ;;  %v4183_v62 = vld [vmem:[#allocation7 + $0xa4] sm:$0xf0] }
 0x17d   :  { %v4980_v18 = vadd.f32 %v1347_v60, %v1299_v46 }
 0x182   :  { %v4982_v52 = vpop.f32.mrf.mxu2  ;;  %v1205_v47 = vpop.f32.mrf.mxu0 }
 0x183   :  { %v4984_v21 = vpop.f32.mrf.mxu3  ;;  %v1206_v44 = vadd.f32 %v1205_v47, %v4849_v57  ;;  %v1254_v39 = vpop.f32.mrf.mxu1  ;;  %v4215_v57 = vld [vmem:[#allocation7 + $0x1a4] sm:$0xf0] }
 0x185   :  { %v4987_v48 = vadd.f32 %v1254_v39, %v1206_v44  ;;  %1400 = vmatmul.bf16.gmra.mxu0 %v4589_v55  ;;  %v3804_v39 = vld [vmem:[#allocation7 + $0x110] sm:$0xf] }
 0x186   :  { %1449 = vmatmul.bf16.gmra.mxu1 %v4591_v56  ;;  %v3877_v56 = vor.u32 %v4215_v57, %v3876_v35  ;;  %v3677_v35 = vor.u32 %v4165_v45, %v3676_v59  ;;  %v3860_v59 = vld [vmem:[#allocation7 + $0x180] sm:$0xf] }
 0x187   :  { %1498 = vmatmul.bf16.gmra.mxu2 %v4831_v3  ;;  %v3749_v3 = vor.u32 %v4183_v62, %v3748_v30 }
 0x188   :  { %1547 = vmatmul.bf16.gmra.mxu3 %v5677_v13  ;;  %v4197_v13 = vld [vmem:[#allocation7 + $0x114] sm:$0xf0]  ;;  %2487 = vmatpush.bf16.msrb.mxu0 %v3677_v35 }
 0x189   :  { %2633 = vmatpush.bf16.msrb.mxu3 %v3877_v56  ;;  %2535 = vmatpush.bf16.msrb.mxu1 %v3749_v3  ;;  %v3805_v37 = vor.u32 %v4197_v13, %v3804_v39  ;;  %v3796_v39 = vld [vmem:[#allocation7 + $0x100] sm:$0xf]  ;;  %v4195_v13 = vld [vmem:[#allocation7 + $0x104] sm:$0xf0] }
 0x18a   :  { %v1303_v6 = vpop.f32.mrf.mxu2  ;;  %v4994_v0 = vpop.f32.mrf.mxu0 }
 0x18b   :  { %v1304_v32 = vadd.f32 %v1303_v6, %v4908_v33  ;;  %v1352_v55 = vpop.f32.mrf.mxu3  ;;  %v4996_v49 = vpop.f32.mrf.mxu1  ;;  %v3740_v6 = vld [vmem:[#allocation7 + $0x90] sm:$0xf]  ;;  %2585 = vmatpush.bf16.msrb.mxu2 %v3805_v37 }
 0x18c   :  { %v3741_v57 = vor.u32 %v4181_v1, %v3740_v6  ;;  %v4179_v1 = vld [vmem:[#allocation7 + $0x84] sm:$0xf0] }
 0x18d   :  { %v4998_v5 = vadd.f32 %v1352_v55, %v1304_v32 }
 0x18e   :  { %2536 = vmatpush.bf16.msrb.mxu1 %v3741_v57 }
 0x192   :  { %v5000_v46 = vpop.f32.mrf.mxu2  ;;  %v1210_v61 = vpop.f32.mrf.mxu0 }
 0x193   :  { %v5002_v60 = vpop.f32.mrf.mxu3  ;;  %v1211_v24 = vadd.f32 %v1210_v61, %v4875_v2  ;;  %v1259_v47 = vpop.f32.mrf.mxu1  ;;  %v3869_v2 = vor.u32 %v4213_v53, %v3868_v14  ;;  %v4211_v53 = vld [vmem:[#allocation7 + $0x184] sm:$0xf0] }
 0x195   :  { %v5005_v44 = vadd.f32 %v1259_v47, %v1211_v24  ;;  %1405 = vmatmul.bf16.gmra.mxu0 %v4617_v12  ;;  %2634 = vmatpush.bf16.msrb.mxu3 %v3869_v2 }
 0x196   :  { %1454 = vmatmul.bf16.gmra.mxu1 %v4619_v15 }
 0x197   :  { %1503 = vmatmul.bf16.gmra.mxu2 %v4857_v63 }
 0x198   :  { %1552 = vmatmul.bf16.gmra.mxu3 %v4862_v16 }
 0x19a   :  { %v1308_v12 = vpop.f32.mrf.mxu2  ;;  %v5012_v62 = vpop.f32.mrf.mxu0 }
 0x19b   :  { %v1309_v30 = vadd.f32 %v1308_v12, %v4908_v33  ;;  %v1357_v15 = vpop.f32.mrf.mxu3  ;;  %v5014_v63 = vpop.f32.mrf.mxu1 }
 0x19d   :  { %v5016_v32 = vadd.f32 %v1357_v15, %v1309_v30 }
 0x1a2   :  { %v5018_v16 = vpop.f32.mrf.mxu2  ;;  %v1215_v56 = vpop.f32.mrf.mxu0 }
 0x1a3   :  { %v5020_v55 = vpop.f32.mrf.mxu3  ;;  %v1216_v3 = vadd.f32 %v1215_v56, %v4897_v42  ;;  %v1264_v61 = vpop.f32.mrf.mxu1  ;;  %v3797_v42 = vor.u32 %v4195_v13, %v3796_v39 }
 0x1a5   :  { %v5023_v24 = vadd.f32 %v1264_v61, %v1216_v3  ;;  %1410 = vmatmul.bf16.gmra.mxu0 %v4645_v9  ;;  %v3861_v9 = vor.u32 %v4211_v53, %v3860_v59  ;;  %2586 = vmatpush.bf16.msrb.mxu2 %v3797_v42  ;;  %v3980_v42 = vld [vmem:[#allocation7 + $0x270] sm:$0xf] }
 0x1a6   :  { %1459 = vmatmul.bf16.gmra.mxu1 %v4647_v10  ;;  %v3668_v10 = vld [vmem:[#allocation7] sm:$0xf] }
 0x1a7   :  { %1508 = vmatmul.bf16.gmra.mxu2 %v4883_v23  ;;  %v4163_v23 = vld [vmem:[#allocation7 + $0x4] sm:$0xf0]  ;;  %2635 = vmatpush.bf16.msrb.mxu3 %v3861_v9 }
 0x1a8   :  { %1557 = vmatmul.bf16.gmra.mxu3 %v4888_v36  ;;  %v3732_v36 = vld [vmem:[#allocation7 + $0x80] sm:$0xf]  ;;  %v3669_v6 = vor.u32 %v4163_v23, %v3668_v10  ;;  %v4241_v10 = vld [vmem:[#allocation7 + $0x274] sm:$0xf0]  ;;  %v4192_v23 = vld [vmem:[#allocation7 + $0xf4] sm:$0xf] }
 0x1a9   :  { %v3733_v57 = vor.u32 %v4179_v1, %v3732_v36  ;;  %v3790_v36 = vld [vmem:[#allocation7 + $0xf8] sm:$0xf0] }
 0x1aa   :  { %v1313_v47 = vpop.f32.mrf.mxu2  ;;  %v5030_v14 = vpop.f32.mrf.mxu0  ;;  %2488 = vmatpush.bf16.msrb.mxu0 %v3669_v6  ;;  %v3793_v26 = vor.u32 %v4192_v23, %v3790_v36 }
 0x1ab   :  { %v1314_v37 = vadd.f32 %v1313_v47, %v4908_v33  ;;  %v1362_v45 = vpop.f32.mrf.mxu3  ;;  %5678 = vst [vmem:[#allocation17_spill] sm:$0xff] %v5030_v14  ;;  %v5032_v35 = vpop.f32.mrf.mxu1  ;;  %2537 = vmatpush.bf16.msrb.mxu1 %v3733_v57  ;;  %v3981_v57 = vor.u32 %v4241_v10, %v3980_v42  ;;  %v1565_v42 = vmax.f32 %v4915_v11, 0.0  ;;  %v4190_v11 = vld [vmem:[#allocation7 + $0xe4] sm:$0xf] }
 0x1ac   :  { %5679 = vst [vmem:[#allocation18_spill] sm:$0xff] %v5032_v35  ;;  %v4044_v35 = vld [vmem:[#allocation7 + $0x2f0] sm:$0xf]  ;;  %2824 = vmatpush.bf16.msra.mxu3 %v3793_v26 }
 0x1ad   :  { %v5034_v2 = vadd.f32 %v1362_v45, %v1314_v37  ;;  %v4176_v37 = vld [vmem:[#allocation7 + $0x74] sm:$0xf]  ;;  %v3726_v45 = vld [vmem:[#allocation7 + $0x78] sm:$0xf0] }
 0x1ae   :  { %v3729_v9 = vor.u32 %v4176_v37, %v3726_v45  ;;  %2677 = vmatpush.bf16.msra.mxu0 %v3981_v57 }
 0x1b0   :  { %2775 = vmatpush.bf16.msra.mxu2 %v3729_v9 }
 0x1b2   :  { %v5036_v12 = vpop.f32.mrf.mxu2  ;;  %v1376_v15 = vpop.f32.mrf.mxu0 }
 0x1b3   :  { %v5038_v30 = vpop.f32.mrf.mxu3  ;;  %v1425_v56 = vpop.f32.mrf.mxu1  ;;  %v1377_v3 = vadd.f32 %v1376_v15, %v4913_v8  ;;  %v4257_v8 = vld [vmem:[#allocation7 + $0x2f4] sm:$0xf0] }
 0x1b4   :  { %v4045_v15 = vor.u32 %v4257_v8, %v4044_v35  ;;  %v4174_v8 = vld [vmem:[#allocation7 + $0x64] sm:$0xf] }
 0x1b5   :  { %v1426_v61 = vadd.f32 %v1425_v56, %v1377_v3  ;;  %v1563_v56 = vmax.f32 %v4902_v43, 0.0 }
 0x1b6   :  { %2726 = vmatpush.bf16.msra.mxu1 %v4045_v15  ;;  %v3718_v15 = vld [vmem:[#allocation7 + $0x68] sm:$0xf0] }
 0x1ba   :  { %v1474_v47 = vpop.f32.mrf.mxu2  ;;  %v1378_v59 = vpop.f32.mrf.mxu0 }
 0x1bb   :  { %v1475_v39 = vadd.f32 %v1474_v47, %v1426_v61  ;;  %v1523_v13 = vpop.f32.mrf.mxu3  ;;  %v1427_v53 = vpop.f32.mrf.mxu1  ;;  %v1379_v1 = vadd.f32 %v1378_v59, %v4919_v54 }
 0x1bd   :  { %v1524_v6 = vadd.f32 %v1523_v13, %v1475_v39  ;;  %v1428_v47 = vadd.f32 %v1427_v53, %v1379_v1 }
 0x1bf   :  { %v1564_v3 = vmax.f32 %v1524_v6, 0.0 }
 0x1c1   :  { %v1595_v61 = vpack.c.bf16 %v1564_v3, %v1563_v56  ;;  %v3972_v56 = vld [vmem:[#allocation7 + $0x260] sm:$0xf] }
 0x1c2   :  { %v1476_v37 = vpop.f32.mrf.mxu2  ;;  %v1381_v39 = vpop.f32.mrf.mxu0 }
 0x1c3   :  { %v1477_v45 = vadd.f32 %v1476_v37, %v1428_v47  ;;  %v1525_v14 = vpop.f32.mrf.mxu3  ;;  %v1430_v13 = vpop.f32.mrf.mxu1  ;;  %v1382_v59 = vadd.f32 %v1381_v39, %v4929_v51  ;;  %v1627_v43 = vunpack.c.l.b16 %v1595_v61  ;;  %v1628_v36 = vunpack.c.h.b16 %v1595_v61  ;;  %v4239_v47 = vld [vmem:[#allocation7 + $0x264] sm:$0xf0]  ;;  %v3782_v37 = vld [vmem:[#allocation7 + $0xe8] sm:$0xf0] }
 0x1c4   :  { %v3721_v51 = vor.u32 %v4174_v8, %v3718_v15 }
 0x1c5   :  { %v1526_v54 = vadd.f32 %v1525_v14, %v1477_v45  ;;  %v1431_v10 = vadd.f32 %v1430_v13, %v1382_v59  ;;  %v3973_v13 = vor.u32 %v4239_v47, %v3972_v56  ;;  %v4255_v59 = vld [vmem:[#allocation7 + $0x2e4] sm:$0xf0] }
 0x1c6   :  { %2776 = vmatpush.bf16.msra.mxu2 %v3721_v51 }
 0x1c7   :  { %v1566_v9 = vmax.f32 %v1526_v54, 0.0  ;;  %v4036_v54 = vld [vmem:[#allocation7 + $0x2e0] sm:$0xf]  ;;  %2678 = vmatpush.bf16.msra.mxu0 %v3973_v13 }
 0x1c9   :  { %v1596_v35 = vpack.c.bf16 %v1566_v9, %v1565_v42  ;;  %v1567_v42 = vmax.f32 %v4921_v27, 0.0  ;;  %v3785_v9 = vor.u32 %v4190_v11, %v3782_v37 }
 0x1ca   :  { %v1479_v23 = vpop.f32.mrf.mxu2  ;;  %v1383_v1 = vpop.f32.mrf.mxu0 }
 0x1cb   :  { %v1629_v26 = vunpack.c.l.b16 %v1596_v35  ;;  %v1630_v6 = vunpack.c.h.b16 %v1596_v35  ;;  %v1480_v57 = vadd.f32 %v1479_v23, %v1431_v10  ;;  %v1528_v53 = vpop.f32.mrf.mxu3  ;;  %v1384_v14 = vadd.f32 %v1383_v1, %v4935_v41  ;;  %v1432_v3 = vpop.f32.mrf.mxu1  ;;  %2825 = vmatpush.bf16.msra.mxu3 %v3785_v9 }
 0x1cc   :  { %v4037_v35 = vor.u32 %v4255_v59, %v4036_v54  ;;  %v1569_v9 = vmax.f32 %v4931_v25, 0.0  ;;  %v5280_v54 = vld [vmem:[#allocation8] sm:$0x3] }
 0x1cd   :  { %v5046_v45 = vpack.c.b16 %v1629_v26, %v1627_v43  ;;  %v5048_v39 = vpack.c.b16 %v1630_v6, %v1628_v36  ;;  %v1529_v61 = vadd.f32 %v1528_v53, %v1480_v57  ;;  %v1433_v36 = vadd.f32 %v1432_v3, %v1384_v14 }
 0x1ce   :  { %2727 = vmatpush.bf16.msra.mxu1 %v4037_v35 }
 0x1cf   :  { %5680 = vst [vmem:[#allocation20_spill] sm:$0xff] %v5046_v45  ;;  %v1568_v10 = vmax.f32 %v1529_v61, 0.0  ;;  %2587 = vmatmul.bf16.vlgmr.msrb.gmra.mxu2 %v5046_v45  ;;  %2636 = vmatmul.bf16.vlgmr.msrb.gmra.mxu3 %v5048_v39  ;;  %v1676_v41 = vshrl.u32 %v5046_v45, 16  ;;  %v1679_v43 = vshll.u32 %v5046_v45, 16  ;;  %v1683_v23 = vshrl.u32 %v5048_v39, 16 }
 0x1d0   :  { %5681 = vst [vmem:[#allocation21_spill] sm:$0xff] %v5048_v39  ;;  %v1686_v26 = vshll.u32 %v5048_v39, 16 }
 0x1d1   :  { %v1597_v27 = vpack.c.bf16 %v1568_v10, %v1567_v42  ;;  %v1678_v6 = vrot.slane %v1676_v41, 7  ;;  %v1685_v57 = vrot.slane %v1683_v23, 7  ;;  %v1819_v53 = vrot.slane %v1679_v43, 1 }
 0x1d2   :  { %v1481_v1 = vpop.f32.mrf.mxu2  ;;  %v1821_v8 = vrot.slane %v1686_v26, 1  ;;  %v1386_v51 = vpop.f32.mrf.mxu0 }
 0x1d3   :  { %v1482_v15 = vadd.f32 %v1481_v1, %v1433_v36  ;;  %v1530_v56 = vpop.f32.mrf.mxu3  ;;  %v1681_v47 = vor.u32 %v1679_v43, %v1678_v6  ;;  %v1435_v11 = vpop.f32.mrf.mxu1  ;;  %v1688_v37 = vor.u32 %v1686_v26, %v1685_v57  ;;  %v5057_v61 = vor.u32 %v1819_v53, %v1676_v41  ;;  %v4172_v1 = vld [vmem:[#allocation7 + $0x54] sm:$0xf] }
 0x1d4   :  { %v5059_v14 = vor.u32 %v1821_v8, %v1683_v23  ;;  %v1387_v13 = vadd.f32 %v1386_v51, %v4945_v58  ;;  %v1631_v43 = vunpack.c.l.b16 %v1597_v27  ;;  %v1632_v58 = vunpack.c.h.b16 %v1597_v27  ;;  %v3710_v8 = vld [vmem:[#allocation7 + $0x58] sm:$0xf0] }
 0x1d5   :  { %v1531_v3 = vadd.f32 %v1530_v56, %v1482_v15  ;;  %v5064_v59 = vsel %vm4465_vm2, 0, %v1681_v47  ;;  %v5069_v42 = vsel %vm4465_vm2, 0, %v1688_v37  ;;  %v3964_v15 = vld [vmem:[#allocation7 + $0x250] sm:$0xf]  ;;  %v3713_v25 = vor.u32 %v4172_v1, %v3710_v8  ;;  %v4237_v47 = vld [vmem:[#allocation7 + $0x254] sm:$0xf0] }
 0x1d6   :  { %2489 = vmatmul.bf16.vlgmr.msrb.gmra.mxu0 %v5064_v59  ;;  %2538 = vmatmul.bf16.vlgmr.msrb.gmra.mxu1 %v5069_v42  ;;  %v1436_v41 = vadd.f32 %v1435_v11, %v1387_v13  ;;  %v4188_v37 = vld [vmem:[#allocation7 + $0xd4] sm:$0xf]  ;;  %v3965_v27 = vor.u32 %v4237_v47, %v3964_v15 }
 0x1d7   :  { %v1570_v35 = vmax.f32 %v1531_v3, 0.0  ;;  %v3774_v3 = vld [vmem:[#allocation7 + $0xd8] sm:$0xf0]  ;;  %2777 = vmatpush.bf16.msra.mxu2 %v3713_v25 }
 0x1d8   :  { %2679 = vmatpush.bf16.msra.mxu0 %v3965_v27 }
 0x1d9   :  { %v1598_v10 = vpack.c.bf16 %v1570_v35, %v1569_v9  ;;  %v4028_v35 = vld [vmem:[#allocation7 + $0x2d0] sm:$0xf] }
 0x1da   :  { %v1484_v23 = vpop.f32.mrf.mxu2  ;;  %v1388_v53 = vpop.f32.mrf.mxu0 }
 0x1db   :  { %v1633_v36 = vunpack.c.l.b16 %v1598_v10  ;;  %v1634_v26 = vunpack.c.h.b16 %v1598_v10  ;;  %v1485_v6 = vadd.f32 %v1484_v23, %v1436_v41  ;;  %v1533_v57 = vpop.f32.mrf.mxu3  ;;  %v1389_v56 = vadd.f32 %v1388_v53, %v4951_v34  ;;  %v1437_v51 = vpop.f32.mrf.mxu1  ;;  %v4253_v10 = vld [vmem:[#allocation7 + $0x2d4] sm:$0xf0] }
 0x1dc   :  { %v1571_v41 = vmax.f32 %v4937_v20, 0.0  ;;  %v3777_v23 = vor.u32 %v4188_v37, %v3774_v3  ;;  %v4029_v39 = vor.u32 %v4253_v10, %v4028_v35  ;;  %v1573_v10 = vmax.f32 %v4947_v38, 0.0 }
 0x1dd   :  { %v1534_v9 = vadd.f32 %v1533_v57, %v1485_v6  ;;  %v5074_v11 = vpack.c.b16 %v1633_v36, %v1631_v43  ;;  %v5076_v13 = vpack.c.b16 %v1634_v26, %v1632_v58  ;;  %v1438_v36 = vadd.f32 %v1437_v51, %v1389_v56 }
 0x1de   :  { %2826 = vmatpush.bf16.msra.mxu3 %v3777_v23  ;;  %2728 = vmatpush.bf16.msra.mxu1 %v4029_v39 }
 0x1df   :  { %5683 = vst [vmem:[#allocation15_spill] sm:$0xff] %v5074_v11  ;;  %v1572_v45 = vmax.f32 %v1534_v9, 0.0  ;;  %2592 = vmatmul.bf16.gmra.mxu2 %v5074_v11  ;;  %2641 = vmatmul.bf16.gmra.mxu3 %v5076_v13  ;;  %v1690_v34 = vshrl.u32 %v5074_v11, 16  ;;  %v1693_v43 = vshll.u32 %v5074_v11, 16  ;;  %v1697_v58 = vshrl.u32 %v5076_v13, 16 }
 0x1e0   :  { %5684 = vst [vmem:[#allocation22_spill] sm:$0xff] %v5076_v13  ;;  %v1700_v26 = vshll.u32 %v5076_v13, 16 }
 0x1e1   :  { %v1599_v20 = vpack.c.bf16 %v1572_v45, %v1571_v41  ;;  %v1692_v6 = vrot.slane %v1690_v34, 7  ;;  %v1699_v57 = vrot.slane %v1697_v58, 7  ;;  %v1823_v53 = vrot.slane %v1693_v43, 1 }
 0x1e2   :  { %v1486_v1 = vpop.f32.mrf.mxu2  ;;  %v1825_v8 = vrot.slane %v1700_v26, 1  ;;  %v1391_v47 = vpop.f32.mrf.mxu0 }
 0x1e3   :  { %v1487_v15 = vadd.f32 %v1486_v1, %v1438_v36  ;;  %v1535_v25 = vpop.f32.mrf.mxu3  ;;  %v1695_v37 = vor.u32 %v1693_v43, %v1692_v6  ;;  %v1440_v3 = vpop.f32.mrf.mxu1  ;;  %v1702_v9 = vor.u32 %v1700_v26, %v1699_v57  ;;  %v5085_v35 = vor.u32 %v1823_v53, %v1690_v34  ;;  %v4170_v1 = vld [vmem:[#allocation7 + $0x44] sm:$0xf] }
 0x1e4   :  { %v5087_v56 = vor.u32 %v1825_v8, %v1697_v58  ;;  %v1392_v27 = vadd.f32 %v1391_v47, %v4961_v7  ;;  %v1635_v43 = vunpack.c.l.b16 %v1599_v20  ;;  %v1636_v7 = vunpack.c.h.b16 %v1599_v20  ;;  %v3702_v8 = vld [vmem:[#allocation7 + $0x48] sm:$0xf0] }
 0x1e5   :  { %v1536_v51 = vadd.f32 %v1535_v25, %v1487_v15  ;;  %v5092_v45 = vsel %vm4465_vm2, 0, %v1695_v37  ;;  %v5097_v39 = vsel %vm4465_vm2, 0, %v1702_v9  ;;  %v3956_v15 = vld [vmem:[#allocation7 + $0x240] sm:$0xf]  ;;  %v3705_v38 = vor.u32 %v4170_v1, %v3702_v8  ;;  %v4235_v37 = vld [vmem:[#allocation7 + $0x244] sm:$0xf0] }
 0x1e6   :  { %2494 = vmatmul.bf16.gmra.mxu0 %v5092_v45  ;;  %2543 = vmatmul.bf16.gmra.mxu1 %v5097_v39  ;;  %v1441_v34 = vadd.f32 %v1440_v3, %v1392_v27  ;;  %v4186_v9 = vld [vmem:[#allocation7 + $0xc4] sm:$0xf]  ;;  %v3957_v20 = vor.u32 %v4235_v37, %v3956_v15 }
 0x1e7   :  { %v1574_v41 = vmax.f32 %v1536_v51, 0.0  ;;  %v3766_v51 = vld [vmem:[#allocation7 + $0xc8] sm:$0xf0]  ;;  %2778 = vmatpush.bf16.msra.mxu2 %v3705_v38 }
 0x1e8   :  { %2680 = vmatpush.bf16.msra.mxu0 %v3957_v20 }
 0x1e9   :  { %v1600_v23 = vpack.c.bf16 %v1574_v41, %v1573_v10  ;;  %v4020_v41 = vld [vmem:[#allocation7 + $0x2c0] sm:$0xf] }
 0x1ea   :  { %v1489_v58 = vpop.f32.mrf.mxu2  ;;  %v1393_v53 = vpop.f32.mrf.mxu0 }
 0x1eb   :  { %v1637_v36 = vunpack.c.l.b16 %v1600_v23  ;;  %v1638_v26 = vunpack.c.h.b16 %v1600_v23  ;;  %v1490_v6 = vadd.f32 %v1489_v58, %v1441_v34  ;;  %v1538_v57 = vpop.f32.mrf.mxu3  ;;  %v1394_v25 = vadd.f32 %v1393_v53, %v4967_v50  ;;  %v1442_v47 = vpop.f32.mrf.mxu1  ;;  %v4251_v23 = vld [vmem:[#allocation7 + $0x2c4] sm:$0xf0] }
 0x1ec   :  { %v1575_v34 = vmax.f32 %v4953_v4, 0.0  ;;  %v3769_v58 = vor.u32 %v4186_v9, %v3766_v51  ;;  %v4021_v13 = vor.u32 %v4251_v23, %v4020_v41 }
 0x1ed   :  { %v1539_v10 = vadd.f32 %v1538_v57, %v1490_v6  ;;  %v5102_v3 = vpack.c.b16 %v1637_v36, %v1635_v43  ;;  %v5104_v27 = vpack.c.b16 %v1638_v26, %v1636_v7  ;;  %v1443_v36 = vadd.f32 %v1442_v47, %v1394_v25 }
 0x1ee   :  { %2827 = vmatpush.bf16.msra.mxu3 %v3769_v58  ;;  %2729 = vmatpush.bf16.msra.mxu1 %v4021_v13  ;;  %v1301_v13 = vadd.f32 %v4982_v52, %v4908_v33 }
 0x1ef   :  { %v1576_v11 = vmax.f32 %v1539_v10, 0.0  ;;  %2597 = vmatmul.bf16.gmra.mxu2 %v5102_v3  ;;  %2646 = vmatmul.bf16.gmra.mxu3 %v5104_v27  ;;  %v1704_v50 = vshrl.u32 %v5102_v3, 16  ;;  %v1707_v43 = vshll.u32 %v5102_v3, 16  ;;  %v1711_v7 = vshrl.u32 %v5104_v27, 16 }
 0x1f0   :  { %v1714_v26 = vshll.u32 %v5104_v27, 16 }
 0x1f1   :  { %v1601_v4 = vpack.c.bf16 %v1576_v11, %v1575_v34  ;;  %v1706_v6 = vrot.slane %v1704_v50, 7  ;;  %v1713_v57 = vrot.slane %v1711_v7, 7  ;;  %v1827_v53 = vrot.slane %v1707_v43, 1 }
 0x1f2   :  { %v1491_v1 = vpop.f32.mrf.mxu2  ;;  %v1829_v8 = vrot.slane %v1714_v26, 1  ;;  %v1396_v37 = vpop.f32.mrf.mxu0  ;;  %v1577_v34 = vmax.f32 %v4963_v40, 0.0 }
 0x1f3   :  { %v1492_v15 = vadd.f32 %v1491_v1, %v1443_v36  ;;  %v1540_v38 = vpop.f32.mrf.mxu3  ;;  %v1709_v9 = vor.u32 %v1707_v43, %v1706_v6  ;;  %v1445_v51 = vpop.f32.mrf.mxu1  ;;  %v1716_v10 = vor.u32 %v1714_v26, %v1713_v57  ;;  %v5113_v41 = vor.u32 %v1827_v53, %v1704_v50 }
 0x1f4   :  { %v5115_v25 = vor.u32 %v1829_v8, %v1711_v7  ;;  %v1397_v20 = vadd.f32 %v1396_v37, %v4980_v18  ;;  %v1350_v43 = vadd.f32 %v4984_v21, %v1301_v13  ;;  %v1639_v7 = vunpack.c.l.b16 %v1601_v4  ;;  %v4168_v8 = vld [vmem:[#allocation7 + $0x34] sm:$0xf]  ;;  %v4012_v13 = vld [vmem:[#allocation7 + $0x2b0] sm:$0xf] }
 0x1f5   :  { %v1541_v47 = vadd.f32 %v1540_v38, %v1492_v15  ;;  %v5120_v11 = vsel %vm4465_vm2, 0, %v1709_v9  ;;  %v5127_v23 = vsel %vm4465_vm2, 0, %v1716_v10  ;;  %v1640_v26 = vunpack.c.h.b16 %v1601_v4  ;;  %v3694_v15 = vld [vmem:[#allocation7 + $0x38] sm:$0xf0]  ;;  %v3948_v38 = vld [vmem:[#allocation7 + $0x230] sm:$0xf] }
 0x1f6   :  { %2499 = vmatmul.bf16.gmra.mxu0 %v5120_v11  ;;  %2548 = vmatmul.bf16.gmra.mxu1 %v5127_v23  ;;  %v1446_v18 = vadd.f32 %v1445_v51, %v1397_v20  ;;  %v3697_v9 = vor.u32 %v4168_v8, %v3694_v15  ;;  %v4233_v10 = vld [vmem:[#allocation7 + $0x234] sm:$0xf0] }
 0x1f7   :  { %v1578_v58 = vmax.f32 %v1541_v47, 0.0  ;;  %v4184_v47 = vld [vmem:[#allocation7 + $0xb4] sm:$0xf]  ;;  %v3949_v4 = vor.u32 %v4233_v10, %v3948_v38 }
 0x1f8   :  { %2779 = vmatpush.bf16.msra.mxu2 %v3697_v9 }
 0x1f9   :  { %v1602_v50 = vpack.c.bf16 %v1578_v58, %v1577_v34  ;;  %v3758_v34 = vld [vmem:[#allocation7 + $0xb8] sm:$0xf0]  ;;  %v4249_v58 = vld [vmem:[#allocation7 + $0x2b4] sm:$0xf0]  ;;  %2681 = vmatpush.bf16.msra.mxu0 %v3949_v4 }
 0x1fa   :  { %v1494_v36 = vpop.f32.mrf.mxu2  ;;  %v1398_v1 = vpop.f32.mrf.mxu0 }
 0x1fb   :  { %v1641_v6 = vunpack.c.l.b16 %v1602_v50  ;;  %v1642_v52 = vunpack.c.h.b16 %v1602_v50  ;;  %v1495_v57 = vadd.f32 %v1494_v36, %v1446_v18  ;;  %v1543_v53 = vpop.f32.mrf.mxu3  ;;  %v1399_v37 = vadd.f32 %v1398_v1, %v1350_v43  ;;  %v1447_v40 = vpop.f32.mrf.mxu1  ;;  %v5685_v18 = vld [vmem:[#allocation19_spill] sm:$0xff] }
 0x1fc   :  { %v1579_v50 = vmax.f32 %v4969_v22, 0.0  ;;  %v1203_v36 = vadd.f32 %v4976_v17, %v5685_v18  ;;  %v3761_v43 = vor.u32 %v4184_v47, %v3758_v34  ;;  %v4013_v1 = vor.u32 %v4249_v58, %v4012_v13 }
 0x1fd   :  { %v1544_v51 = vadd.f32 %v1543_v53, %v1495_v57  ;;  %v5132_v20 = vpack.c.b16 %v1641_v6, %v1639_v7  ;;  %v5134_v21 = vpack.c.b16 %v1642_v52, %v1640_v26  ;;  %v1448_v52 = vadd.f32 %v1447_v40, %v1399_v37 }
 0x1fe   :  { %2828 = vmatpush.bf16.msra.mxu3 %v3761_v43  ;;  %2730 = vmatpush.bf16.msra.mxu1 %v4013_v1  ;;  %v1252_v10 = vadd.f32 %v4978_v28, %v1203_v36  ;;  %v1306_v28 = vadd.f32 %v5000_v46, %v4908_v33 }
 0x1ff   :  { %v1580_v8 = vmax.f32 %v1544_v51, 0.0  ;;  %2602 = vmatmul.bf16.gmra.mxu2 %v5132_v20  ;;  %2651 = vmatmul.bf16.gmra.mxu3 %v5134_v21  ;;  %v1718_v7 = vshrl.u32 %v5132_v20, 16  ;;  %v1721_v26 = vshll.u32 %v5132_v20, 16  ;;  %v1725_v6 = vshrl.u32 %v5134_v21, 16 }
 0x200   :  { %v1728_v22 = vshll.u32 %v5134_v21, 16  ;;  %v1581_v1 = vmax.f32 %v1252_v10, 0.0 }
 0x201   :  { %v1603_v17 = vpack.c.bf16 %v1580_v8, %v1579_v50  ;;  %v1720_v57 = vrot.slane %v1718_v7, 7  ;;  %v1727_v53 = vrot.slane %v1725_v6, 7  ;;  %v1831_v15 = vrot.slane %v1721_v26, 1 }
 0x202   :  { %v1496_v38 = vpop.f32.mrf.mxu2  ;;  %v1833_v9 = vrot.slane %v1728_v22, 1  ;;  %v1401_v51 = vpop.f32.mrf.mxu0 }
 0x203   :  { %v1497_v47 = vadd.f32 %v1496_v38, %v1448_v52  ;;  %v1545_v34 = vpop.f32.mrf.mxu3  ;;  %v1723_v13 = vor.u32 %v1721_v26, %v1720_v57  ;;  %v1450_v58 = vpop.f32.mrf.mxu1  ;;  %v1730_v18 = vor.u32 %v1728_v22, %v1727_v53  ;;  %v5146_v37 = vor.u32 %v1831_v15, %v1718_v7 }
 0x204   :  { %v5148_v40 = vor.u32 %v1833_v9, %v1725_v6  ;;  %v1402_v50 = vadd.f32 %v1401_v51, %v4998_v5  ;;  %v1355_v5 = vadd.f32 %v5002_v60, %v1306_v28  ;;  %v1643_v6 = vunpack.c.l.b16 %v1603_v17  ;;  %v4166_v9 = vld [vmem:[#allocation7 + $0x24] sm:$0xf]  ;;  %v4004_v28 = vld [vmem:[#allocation7 + $0x2a0] sm:$0xf] }
 0x205   :  { %v1546_v4 = vadd.f32 %v1545_v34, %v1497_v47  ;;  %v5153_v43 = vsel %vm4465_vm2, 0, %v1723_v13  ;;  %v5160_v36 = vsel %vm4465_vm2, 0, %v1730_v18  ;;  %v1644_v22 = vunpack.c.h.b16 %v1603_v17  ;;  %v3686_v47 = vld [vmem:[#allocation7 + $0x28] sm:$0xf0]  ;;  %v3940_v34 = vld [vmem:[#allocation7 + $0x220] sm:$0xf] }
 0x206   :  { %2504 = vmatmul.bf16.gmra.mxu0 %v5153_v43  ;;  %2553 = vmatmul.bf16.gmra.mxu1 %v5160_v36  ;;  %v1451_v26 = vadd.f32 %v1450_v58, %v1402_v50  ;;  %v3689_v13 = vor.u32 %v4166_v9, %v3686_v47  ;;  %v4231_v18 = vld [vmem:[#allocation7 + $0x224] sm:$0xf0] }
 0x207   :  { %v1582_v8 = vmax.f32 %v1546_v4, 0.0  ;;  %v4182_v4 = vld [vmem:[#allocation7 + $0xa4] sm:$0xf]  ;;  %v3941_v17 = vor.u32 %v4231_v18, %v3940_v34 }
 0x208   :  { %2780 = vmatpush.bf16.msra.mxu2 %v3689_v13 }
 0x209   :  { %v1604_v7 = vpack.c.bf16 %v1582_v8, %v1581_v1  ;;  %v3750_v1 = vld [vmem:[#allocation7 + $0xa8] sm:$0xf0]  ;;  %v4247_v8 = vld [vmem:[#allocation7 + $0x2a4] sm:$0xf0]  ;;  %2682 = vmatpush.bf16.msra.mxu0 %v3941_v17 }
 0x20a   :  { %v1499_v52 = vpop.f32.mrf.mxu2  ;;  %v1403_v38 = vpop.f32.mrf.mxu0 }
 0x20b   :  { %v1645_v57 = vunpack.c.l.b16 %v1604_v7  ;;  %v1646_v53 = vunpack.c.h.b16 %v1604_v7  ;;  %v1500_v46 = vadd.f32 %v1499_v52, %v1451_v26  ;;  %v1548_v15 = vpop.f32.mrf.mxu3  ;;  %v1404_v51 = vadd.f32 %v1403_v38, %v1355_v5  ;;  %v1452_v10 = vpop.f32.mrf.mxu1 }
 0x20c   :  { %v1583_v7 = vmax.f32 %v4987_v48, 0.0  ;;  %v1208_v26 = vadd.f32 %v4994_v0, %v4864_v31  ;;  %v3753_v5 = vor.u32 %v4182_v4, %v3750_v1  ;;  %v4005_v52 = vor.u32 %v4247_v8, %v4004_v28 }
 0x20d   :  { %v1549_v58 = vadd.f32 %v1548_v15, %v1500_v46  ;;  %v5164_v50 = vpack.c.b16 %v1645_v57, %v1643_v6  ;;  %v5166_v60 = vpack.c.b16 %v1646_v53, %v1644_v22  ;;  %v1453_v53 = vadd.f32 %v1452_v10, %v1404_v51 }
 0x20e   :  { %2829 = vmatpush.bf16.msra.mxu3 %v3753_v5  ;;  %2731 = vmatpush.bf16.msra.mxu1 %v4005_v52  ;;  %v1257_v34 = vadd.f32 %v4996_v49, %v1208_v26  ;;  %v1311_v49 = vadd.f32 %v5018_v16, %v4908_v33 }
 0x20f   :  { %v1584_v38 = vmax.f32 %v1549_v58, 0.0  ;;  %2607 = vmatmul.bf16.gmra.mxu2 %v5164_v50  ;;  %2656 = vmatmul.bf16.gmra.mxu3 %v5166_v60  ;;  %v1732_v6 = vshrl.u32 %v5164_v50, 16  ;;  %v1735_v22 = vshll.u32 %v5164_v50, 16  ;;  %v1739_v57 = vshrl.u32 %v5166_v60, 16 }
 0x210   :  { %v1742_v48 = vshll.u32 %v5166_v60, 16  ;;  %v1585_v5 = vmax.f32 %v1257_v34, 0.0 }
 0x211   :  { %v1605_v31 = vpack.c.bf16 %v1584_v38, %v1583_v7  ;;  %v1734_v0 = vrot.slane %v1732_v6, 7  ;;  %v1741_v46 = vrot.slane %v1739_v57, 7  ;;  %v1835_v15 = vrot.slane %v1735_v22, 1 }
 0x212   :  { %v1501_v9 = vpop.f32.mrf.mxu2  ;;  %v1837_v47 = vrot.slane %v1742_v48, 1  ;;  %v1406_v4 = vpop.f32.mrf.mxu0 }
 0x213   :  { %v1502_v13 = vadd.f32 %v1501_v9, %v1453_v53  ;;  %v1550_v18 = vpop.f32.mrf.mxu3  ;;  %v1737_v1 = vor.u32 %v1735_v22, %v1734_v0  ;;  %v1455_v58 = vpop.f32.mrf.mxu1  ;;  %v1744_v28 = vor.u32 %v1742_v48, %v1741_v46  ;;  %v5178_v51 = vor.u32 %v1835_v15, %v1732_v6  ;;  %v4164_v9 = vld [vmem:[#allocation7 + $0x14] sm:$0xf] }
 0x214   :  { %v5180_v10 = vor.u32 %v1837_v47, %v1739_v57  ;;  %v1407_v8 = vadd.f32 %v1406_v4, %v5016_v32  ;;  %v1360_v32 = vadd.f32 %v5020_v55, %v1311_v49  ;;  %v1647_v22 = vunpack.c.l.b16 %v1605_v31  ;;  %v3678_v47 = vld [vmem:[#allocation7 + $0x18] sm:$0xf0]  ;;  %v3996_v49 = vld [vmem:[#allocation7 + $0x290] sm:$0xf] }
 0x215   :  { %v1551_v17 = vadd.f32 %v1550_v18, %v1502_v13  ;;  %v5185_v7 = vsel %vm4465_vm2, 0, %v1737_v1  ;;  %v5192_v26 = vsel %vm4465_vm2, 0, %v1744_v28  ;;  %v1648_v53 = vunpack.c.h.b16 %v1605_v31  ;;  %v3932_v13 = vld [vmem:[#allocation7 + $0x210] sm:$0xf]  ;;  %v4229_v1 = vld [vmem:[#allocation7 + $0x214] sm:$0xf0] }
 0x216   :  { %2509 = vmatmul.bf16.gmra.mxu0 %v5185_v7  ;;  %2558 = vmatmul.bf16.gmra.mxu1 %v5192_v26  ;;  %v1456_v6 = vadd.f32 %v1455_v58, %v1407_v8  ;;  %v3681_v4 = vor.u32 %v4164_v9, %v3678_v47  ;;  %v4180_v28 = vld [vmem:[#allocation7 + $0x94] sm:$0xf]  ;;  %v3933_v31 = vor.u32 %v4229_v1, %v3932_v13 }
 0x217   :  { %v1586_v52 = vmax.f32 %v1551_v17, 0.0  ;;  %v3742_v17 = vld [vmem:[#allocation7 + $0x98] sm:$0xf0] }
 0x218   :  { %2781 = vmatpush.bf16.msra.mxu2 %v3681_v4  ;;  %2683 = vmatpush.bf16.msra.mxu0 %v3933_v31 }
 0x219   :  { %v1606_v38 = vpack.c.bf16 %v1586_v52, %v1585_v5  ;;  %v4245_v5 = vld [vmem:[#allocation7 + $0x294] sm:$0xf0]  ;;  %v1587_v52 = vmax.f32 %v5005_v44, 0.0 }
 0x21a   :  { %v1504_v57 = vpop.f32.mrf.mxu2  ;;  %v1408_v15 = vpop.f32.mrf.mxu0 }
 0x21b   :  { %v1649_v48 = vunpack.c.l.b16 %v1606_v38  ;;  %v1650_v0 = vunpack.c.h.b16 %v1606_v38  ;;  %v1505_v16 = vadd.f32 %v1504_v57, %v1456_v6  ;;  %v1553_v46 = vpop.f32.mrf.mxu3  ;;  %v1409_v18 = vadd.f32 %v1408_v15, %v1360_v32  ;;  %v1457_v34 = vpop.f32.mrf.mxu1 }
 0x21c   :  { %v1213_v38 = vadd.f32 %v5012_v62, %v4890_v19  ;;  %v3745_v6 = vor.u32 %v4180_v28, %v3742_v17  ;;  %v3997_v32 = vor.u32 %v4245_v5, %v3996_v49  ;;  %v3670_v19 = vld [vmem:[#allocation7 + $0x8] sm:$0xf0] }
 0x21d   :  { %v1554_v58 = vadd.f32 %v1553_v46, %v1505_v16  ;;  %v5196_v8 = vpack.c.b16 %v1649_v48, %v1647_v22  ;;  %v5198_v55 = vpack.c.b16 %v1650_v0, %v1648_v53  ;;  %v4162_v0 = vld [vmem:[#allocation7 + $0x4] sm:$0xf]  ;;  %v1458_v16 = vadd.f32 %v1457_v34, %v1409_v18 }
 0x21e   :  { %2830 = vmatpush.bf16.msra.mxu3 %v3745_v6  ;;  %2732 = vmatpush.bf16.msra.mxu1 %v3997_v32  ;;  %v3673_v9 = vor.u32 %v4162_v0, %v3670_v19  ;;  %v1262_v1 = vadd.f32 %v5014_v63, %v1213_v38  ;;  %v1316_v63 = vadd.f32 %v5036_v12, %v4908_v33  ;;  %v4178_v0 = vld [vmem:[#allocation7 + $0x84] sm:$0xf]  ;;  %v4243_v33 = vld [vmem:[#allocation7 + $0x284] sm:$0xf0] }
 0x21f   :  { %v1588_v57 = vmax.f32 %v1554_v58, 0.0  ;;  %2612 = vmatmul.bf16.gmra.mxu2 %v5196_v8  ;;  %2661 = vmatmul.bf16.gmra.mxu3 %v5198_v55  ;;  %v1746_v22 = vshrl.u32 %v5196_v8, 16  ;;  %v1749_v53 = vshll.u32 %v5196_v8, 16  ;;  %v1753_v48 = vshrl.u32 %v5198_v55, 16 }
 0x220   :  { %v1756_v44 = vshll.u32 %v5198_v55, 16  ;;  %2782 = vmatpush.bf16.msra.mxu2 %v3673_v9  ;;  %v1365_v12 = vadd.f32 %v5038_v30, %v1316_v63  ;;  %v1591_v30 = vmax.f32 %v5023_v24, 0.0 }
 0x221   :  { %v1607_v62 = vpack.c.bf16 %v1588_v57, %v1587_v52  ;;  %v1748_v46 = vrot.slane %v1746_v22, 7  ;;  %v1755_v15 = vrot.slane %v1753_v48, 7  ;;  %v1839_v13 = vrot.slane %v1749_v53, 1 }
 0x222   :  { %v1506_v47 = vpop.f32.mrf.mxu2  ;;  %v1841_v4 = vrot.slane %v1756_v44, 1  ;;  %v1411_v58 = vpop.f32.mrf.mxu0  ;;  %v1589_v57 = vmax.f32 %v1262_v1, 0.0 }
 0x223   :  { %v1507_v28 = vadd.f32 %v1506_v47, %v1458_v16  ;;  %v1555_v17 = vpop.f32.mrf.mxu3  ;;  %v1751_v49 = vor.u32 %v1749_v53, %v1748_v46  ;;  %v1758_v18 = vor.u32 %v1756_v44, %v1755_v15  ;;  %v5210_v34 = vor.u32 %v1839_v13, %v1746_v22  ;;  %v1460_v6 = vpop.f32.mrf.mxu1  ;;  %v3924_v53 = vld [vmem:[#allocation7 + $0x200] sm:$0xf]  ;;  %v3734_v16 = vld [vmem:[#allocation7 + $0x88] sm:$0xf0] }
 0x224   :  { %v5212_v31 = vor.u32 %v1841_v4, %v1753_v48  ;;  %v1412_v52 = vadd.f32 %v1411_v58, %v5034_v2  ;;  %v4227_v2 = vld [vmem:[#allocation7 + $0x204] sm:$0xf0]  ;;  %v3988_v44 = vld [vmem:[#allocation7 + $0x280] sm:$0xf]  ;;  %v3737_v15 = vor.u32 %v4178_v0, %v3734_v16  ;;  %v1651_v9 = vunpack.c.l.b16 %v1607_v62 }
 0x225   :  { %v1556_v5 = vadd.f32 %v1555_v17, %v1507_v28  ;;  %v5217_v32 = vsel %vm4465_vm2, 0, %v1751_v49  ;;  %v5224_v38 = vsel %vm4465_vm2, 0, %v1758_v18  ;;  %v3925_v48 = vor.u32 %v4227_v2, %v3924_v53 }
 0x226   :  { %2514 = vmatmul.bf16.gmra.mxu0 %v5217_v32  ;;  %2563 = vmatmul.bf16.gmra.mxu1 %v5224_v38  ;;  %v1461_v46 = vadd.f32 %v1460_v6, %v1412_v52  ;;  %v3989_v13 = vor.u32 %v4243_v33, %v3988_v44  ;;  %v1652_v4 = vunpack.c.h.b16 %v1607_v62  ;;  %v5686_v6 = vld [vmem:[#allocation17_spill] sm:$0xff]  ;;  %v5687_v33 = vld [vmem:[#allocation18_spill] sm:$0xff] }
 0x227   :  { %v1590_v22 = vmax.f32 %v1556_v5, 0.0  ;;  %2684 = vmatpush.bf16.msra.mxu0 %v3925_v48  ;;  %2831 = vmatpush.bf16.msra.mxu3 %v3737_v15  ;;  %v1218_v63 = vadd.f32 %v5686_v6, %v4900_v29  ;;  %v3982_v6 = vld [vmem:[#allocation7 + $0x278] sm:$0xf0] }
 0x228   :  { %2733 = vmatpush.bf16.msra.mxu1 %v3989_v13 }
 0x229   :  { %v1608_v19 = vpack.c.bf16 %v1590_v22, %v1589_v57 }
 0x22a   :  { %v1509_v47 = vpop.f32.mrf.mxu2  ;;  %v1413_v49 = vpop.f32.mrf.mxu0 }
 0x22b   :  { %v1653_v1 = vunpack.c.l.b16 %v1608_v19  ;;  %v1654_v28 = vunpack.c.h.b16 %v1608_v19  ;;  %v1510_v17 = vadd.f32 %v1509_v47, %v1461_v46  ;;  %v1558_v58 = vpop.f32.mrf.mxu3  ;;  %v1414_v18 = vadd.f32 %v1413_v49, %v1365_v12  ;;  %v1462_v62 = vpop.f32.mrf.mxu1 }
 0x22c   :  { %v1267_v12 = vadd.f32 %v5687_v33, %v1218_v63  ;;  %v4208_v63 = vld [vmem:[#allocation7 + $0x174] sm:$0xf] }
 0x22d   :  { %v1559_v5 = vadd.f32 %v1558_v58, %v1510_v17  ;;  %v5228_v57 = vpack.c.b16 %v1653_v1, %v1651_v9  ;;  %v5230_v52 = vpack.c.b16 %v1654_v28, %v1652_v4  ;;  %v1463_v0 = vadd.f32 %v1462_v62, %v1414_v18 }
 0x22e   :  { %v1593_v18 = vmax.f32 %v1267_v12, 0.0 }
 0x22f   :  { %v1592_v22 = vmax.f32 %v1559_v5, 0.0  ;;  %2617 = vmatmul.bf16.gmra.mxu2 %v5228_v57  ;;  %2666 = vmatmul.bf16.gmra.mxu3 %v5230_v52  ;;  %v1760_v53 = vshrl.u32 %v5228_v57, 16  ;;  %v1763_v2 = vshll.u32 %v5228_v57, 16  ;;  %v1767_v48 = vshrl.u32 %v5230_v52, 16 }
 0x230   :  { %v1770_v16 = vshll.u32 %v5230_v52, 16 }
 0x231   :  { %v1609_v44 = vpack.c.bf16 %v1592_v22, %v1591_v30  ;;  %v1762_v24 = vrot.slane %v1760_v53, 7  ;;  %v1769_v19 = vrot.slane %v1767_v48, 7  ;;  %v1843_v46 = vrot.slane %v1763_v2, 1  ;;  %v4240_v30 = vld [vmem:[#allocation7 + $0x274] sm:$0xf] }
 0x232   :  { %v1511_v29 = vpop.f32.mrf.mxu2  ;;  %v1845_v15 = vrot.slane %v1770_v16, 1  ;;  %v3985_v62 = vor.u32 %v4240_v30, %v3982_v6 }
 0x233   :  { %v1512_v9 = vadd.f32 %v1511_v29, %v1463_v0  ;;  %v1765_v47 = vor.u32 %v1763_v2, %v1762_v24  ;;  %v1560_v13 = vpop.f32.mrf.mxu3  ;;  %v1772_v4 = vor.u32 %v1770_v16, %v1769_v19  ;;  %v5242_v1 = vor.u32 %v1843_v46, %v1760_v53  ;;  %v3854_v53 = vld [vmem:[#allocation7 + $0x178] sm:$0xf0]  ;;  %v4256_v2 = vld [vmem:[#allocation7 + $0x2f4] sm:$0xf] }
 0x234   :  { %v5244_v28 = vor.u32 %v1845_v15, %v1767_v48  ;;  %v4046_v48 = vld [vmem:[#allocation7 + $0x2f8] sm:$0xf0]  ;;  %v1655_v0 = vunpack.c.l.b16 %v1609_v44  ;;  %v3857_v16 = vor.u32 %v4208_v63, %v3854_v53  ;;  %v4224_v19 = vld [vmem:[#allocation7 + $0x1f4] sm:$0xf]  ;;  %v1656_v29 = vunpack.c.h.b16 %v1609_v44  ;;  %2971 = vmatpush.bf16.msrb.mxu2 %v3985_v62 }
 0x235   :  { %v1561_v17 = vadd.f32 %v1560_v13, %v1512_v9  ;;  %v5248_v58 = vsel %vm4465_vm2, 0, %v1765_v47  ;;  %v5253_v49 = vsel %vm4465_vm2, 0, %v1772_v4  ;;  %v4049_v24 = vor.u32 %v4256_v2, %v4046_v48  ;;  %v3918_v46 = vld [vmem:[#allocation7 + $0x1f8] sm:$0xf0] }
 0x236   :  { %2519 = vmatmul.bf16.gmra.mxu0 %v5248_v58  ;;  %2568 = vmatmul.bf16.gmra.mxu1 %v5253_v49  ;;  %v3921_v12 = vor.u32 %v4224_v19, %v3918_v46  ;;  %v3846_v46 = vld [vmem:[#allocation7 + $0x168] sm:$0xf0] }
 0x237   :  { %v1594_v5 = vmax.f32 %v1561_v17, 0.0  ;;  %2873 = vmatpush.bf16.msrb.mxu0 %v3857_v16  ;;  %3020 = vmatpush.bf16.msrb.mxu3 %v4049_v24  ;;  %v3974_v16 = vld [vmem:[#allocation7 + $0x268] sm:$0xf0]  ;;  %v4206_v24 = vld [vmem:[#allocation7 + $0x164] sm:$0xf] }
 0x238   :  { %2922 = vmatpush.bf16.msrb.mxu1 %v3921_v12 }
 0x239   :  { %v1610_v22 = vpack.c.bf16 %v1594_v5, %v1593_v18 }
 0x23b   :  { %v1657_v15 = vunpack.c.l.b16 %v1610_v22  ;;  %v1658_v33 = vunpack.c.h.b16 %v1610_v22 }
 0x23d   :  { %v5256_v9 = vpack.c.b16 %v1657_v15, %v1655_v0  ;;  %v5258_v47 = vpack.c.b16 %v1658_v33, %v1656_v29  ;;  %v4238_v0 = vld [vmem:[#allocation7 + $0x264] sm:$0xf]  ;;  %v4038_v15 = vld [vmem:[#allocation7 + $0x2e8] sm:$0xf0]  ;;  %v3849_v33 = vor.u32 %v4206_v24, %v3846_v46  ;;  %v4236_v24 = vld [vmem:[#allocation7 + $0x254] sm:$0xf] }
 0x23e   :  { %v3977_v19 = vor.u32 %v4238_v0, %v3974_v16  ;;  %v4254_v29 = vld [vmem:[#allocation7 + $0x2e4] sm:$0xf]  ;;  %v5291_v0 = vsel %vm4695_vm5, %v5057_v61, 0  ;;  %v4204_v46 = vld [vmem:[#allocation7 + $0x154] sm:$0xf] }
 0x23f   :  { %5688 = vst [vmem:[#allocation19_spill] sm:$0xff] %v5258_v47  ;;  %2622 = vmatmul.bf16.gmra.mxu2 %v5256_v9  ;;  %2671 = vmatmul.bf16.gmra.mxu3 %v5258_v47  ;;  %v1774_v13 = vshrl.u32 %v5256_v9, 16  ;;  %v1777_v4 = vshll.u32 %v5256_v9, 16  ;;  %v1781_v44 = vshrl.u32 %v5258_v47, 16  ;;  %v1784_v17 = vshll.u32 %v5258_v47, 16 }
 0x240   :  { %v4041_v12 = vor.u32 %v4254_v29, %v4038_v15  ;;  %2972 = vmatpush.bf16.msrb.mxu2 %v3977_v19  ;;  %2874 = vmatpush.bf16.msrb.mxu0 %v3849_v33  ;;  %v3966_v19 = vld [vmem:[#allocation7 + $0x258] sm:$0xf0]  ;;  %v4252_v33 = vld [vmem:[#allocation7 + $0x2d4] sm:$0xf] }
 0x241   :  { %v1776_v18 = vrot.slane %v1774_v13, 7  ;;  %v1783_v5 = vrot.slane %v1781_v44, 7  ;;  %v1847_v30 = vrot.slane %v1777_v4, 1  ;;  %v1849_v6 = vrot.slane %v1784_v17, 1  ;;  %v3838_v15 = vld [vmem:[#allocation7 + $0x158] sm:$0xf0] }
 0x242   :  { %3021 = vmatpush.bf16.msrb.mxu3 %v4041_v12  ;;  %v3969_v29 = vor.u32 %v4236_v24, %v3966_v19  ;;  %v4030_v12 = vld [vmem:[#allocation7 + $0x2d8] sm:$0xf0] }
 0x243   :  { %v1779_v63 = vor.u32 %v1777_v4, %v1776_v18  ;;  %v1786_v22 = vor.u32 %v1784_v17, %v1783_v5  ;;  %v5266_v62 = vor.u32 %v1847_v30, %v1774_v13  ;;  %v5268_v53 = vor.u32 %v1849_v6, %v1781_v44  ;;  %v4222_v13 = vld [vmem:[#allocation7 + $0x1e4] sm:$0xf]  ;;  %v3910_v4 = vld [vmem:[#allocation7 + $0x1e8] sm:$0xf0] }
 0x244   :  { %v3913_v44 = vor.u32 %v4222_v13, %v3910_v4  ;;  %v5285_v17 = vperm.slane %v5280_v54, 0  ;;  %v3841_v4 = vor.u32 %v4204_v46, %v3838_v15  ;;  %2973 = vmatpush.bf16.msrb.mxu2 %v3969_v29 }
 0x245   :  { %v5272_v2 = vsel %vm4465_vm2, 0, %v1779_v63  ;;  %v5276_v48 = vsel %vm4465_vm2, 0, %v1786_v22  ;;  %v5446_v22 = vperm.slane %v5280_v54, 1 }
 0x246   :  { %2524 = vmatmul.bf16.gmra.mxu0 %v5272_v2  ;;  %2573 = vmatmul.bf16.gmra.mxu1 %v5276_v48 }
 0x247   :  { %2923 = vmatpush.bf16.msrb.mxu1 %v3913_v44  ;;  %v4033_v44 = vor.u32 %v4252_v33, %v4030_v12  ;;  %2875 = vmatpush.bf16.msrb.mxu0 %v3841_v4  ;;  %v5311_v12 = vsel %vm4695_vm5, %v5085_v35, 0  ;;  %v4202_v4 = vld [vmem:[#allocation7 + $0x144] sm:$0xf] }
 0x249   :  { %3022 = vmatpush.bf16.msrb.mxu3 %v4033_v44 }
 0x24f   :  { %2783 = vmatmul.bf16.vlgmr.msra.gmra.mxu2 %v5064_v59  ;;  %2832 = vmatmul.bf16.vlgmr.msra.gmra.mxu3 %v5069_v42  ;;  %v5297_v59 = vsel %vm4695_vm5, %v5059_v14, 0 }
 0x252   :  { %v2588_v18 = vpop.f32.mrf.mxu2  ;;  %v2637_v5 = vpop.f32.mrf.mxu3 }
 0x253   :  { %v2490_v30 = vpop.f32.mrf.mxu0  ;;  %v2539_v63 = vpop.f32.mrf.mxu1 }
 0x254   :  { %v2491_v6 = vadd.f32 %v2490_v30, %v5285_v17  ;;  %v4220_v30 = vld [vmem:[#allocation7 + $0x1d4] sm:$0xf] }
 0x256   :  { %v2540_v16 = vadd.f32 %v2539_v63, %v2491_v6  ;;  %2685 = vmatmul.bf16.vlgmr.msra.gmra.mxu0 %v5291_v0  ;;  %2734 = vmatmul.bf16.vlgmr.msra.gmra.mxu1 %v5297_v59  ;;  %v3902_v6 = vld [vmem:[#allocation7 + $0x1d8] sm:$0xf0] }
 0x257   :  { %v3905_v47 = vor.u32 %v4220_v30, %v3902_v6  ;;  %v3830_v30 = vld [vmem:[#allocation7 + $0x148] sm:$0xf0]  ;;  %v4250_v6 = vld [vmem:[#allocation7 + $0x2c4] sm:$0xf] }
 0x258   :  { %v2589_v42 = vadd.f32 %v2588_v18, %v2540_v16 }
 0x259   :  { %2924 = vmatpush.bf16.msrb.mxu1 %v3905_v47 }
 0x25a   :  { %v2590_v61 = vpop.f32.mrf.mxu2  ;;  %v2639_v13 = vpop.f32.mrf.mxu3  ;;  %v5300_v63 = vadd.f32 %v2637_v5, %v2589_v42 }
 0x25b   :  { %v2492_v14 = vpop.f32.mrf.mxu0  ;;  %v2541_v16 = vpop.f32.mrf.mxu1 }
 0x25c   :  { %v2493_v18 = vadd.f32 %v2492_v14, %v5285_v17  ;;  %v4022_v14 = vld [vmem:[#allocation7 + $0x2c8] sm:$0xf0] }
 0x25e   :  { %v2542_v24 = vadd.f32 %v2541_v16, %v2493_v18  ;;  %v3833_v16 = vor.u32 %v4202_v4, %v3830_v30 }
 0x25f   :  { %2788 = vmatmul.bf16.gmra.mxu2 %v5092_v45  ;;  %2837 = vmatmul.bf16.gmra.mxu3 %v5097_v39  ;;  %v5317_v45 = vsel %vm4695_vm5, %v5087_v56, 0 }
 0x260   :  { %v2591_v19 = vadd.f32 %v2590_v61, %v2542_v24  ;;  %v4234_v61 = vld [vmem:[#allocation7 + $0x244] sm:$0xf]  ;;  %v4025_v24 = vor.u32 %v4250_v6, %v4022_v14  ;;  %2876 = vmatpush.bf16.msrb.mxu0 %v3833_v16  ;;  %v5331_v14 = vsel %vm4695_vm5, %v5113_v41, 0 }
 0x262   :  { %v2593_v46 = vpop.f32.mrf.mxu2  ;;  %v2642_v15 = vpop.f32.mrf.mxu3  ;;  %v5305_v33 = vadd.f32 %v2639_v13, %v2591_v19  ;;  %v3958_v13 = vld [vmem:[#allocation7 + $0x248] sm:$0xf0]  ;;  %v4218_v19 = vld [vmem:[#allocation7 + $0x1c4] sm:$0xf]  ;;  %3023 = vmatpush.bf16.msrb.mxu3 %v4025_v24  ;;  %v4200_v24 = vld [vmem:[#allocation7 + $0x134] sm:$0xf] }
 0x263   :  { %v2495_v5 = vpop.f32.mrf.mxu0  ;;  %v2544_v29 = vpop.f32.mrf.mxu1  ;;  %v3961_v44 = vor.u32 %v4234_v61, %v3958_v13 }
 0x264   :  { %v2496_v42 = vadd.f32 %v2495_v5, %v5285_v17  ;;  %v3894_v5 = vld [vmem:[#allocation7 + $0x1c8] sm:$0xf0] }
 0x265   :  { %2974 = vmatpush.bf16.msrb.mxu2 %v3961_v44 }
 0x266   :  { %v2545_v47 = vadd.f32 %v2544_v29, %v2496_v42  ;;  %2690 = vmatmul.bf16.gmra.mxu0 %v5311_v12  ;;  %2739 = vmatmul.bf16.gmra.mxu1 %v5317_v45  ;;  %v3897_v29 = vor.u32 %v4218_v19, %v3894_v5  ;;  %v3822_v5 = vld [vmem:[#allocation7 + $0x138] sm:$0xf0] }
 0x268   :  { %v2594_v39 = vadd.f32 %v2593_v46, %v2545_v47  ;;  %2925 = vmatpush.bf16.msrb.mxu1 %v3897_v29  ;;  %v4014_v29 = vld [vmem:[#allocation7 + $0x2b8] sm:$0xf0] }
 0x26a   :  { %v2595_v35 = vpop.f32.mrf.mxu2  ;;  %v2644_v18 = vpop.f32.mrf.mxu3  ;;  %v5320_v42 = vadd.f32 %v2642_v15, %v2594_v39 }
 0x26b   :  { %v2497_v56 = vpop.f32.mrf.mxu0  ;;  %v2546_v47 = vpop.f32.mrf.mxu1 }
 0x26c   :  { %v2498_v46 = vadd.f32 %v2497_v56, %v5285_v17  ;;  %v4248_v56 = vld [vmem:[#allocation7 + $0x2b4] sm:$0xf] }
 0x26e   :  { %v2547_v61 = vadd.f32 %v2546_v47, %v2498_v46  ;;  %v3825_v47 = vor.u32 %v4200_v24, %v3822_v5 }
 0x26f   :  { %2793 = vmatmul.bf16.gmra.mxu2 %v5120_v11  ;;  %2842 = vmatmul.bf16.gmra.mxu3 %v5127_v23  ;;  %v5337_v11 = vsel %vm4695_vm5, %v5115_v25, 0 }
 0x270   :  { %v2596_v13 = vadd.f32 %v2595_v35, %v2547_v61  ;;  %v4232_v35 = vld [vmem:[#allocation7 + $0x234] sm:$0xf]  ;;  %v4017_v61 = vor.u32 %v4248_v56, %v4014_v29  ;;  %2877 = vmatpush.bf16.msrb.mxu0 %v3825_v47  ;;  %v5351_v29 = vsel %vm4695_vm5, %v5146_v37, 0 }
 0x272   :  { %v2598_v4 = vpop.f32.mrf.mxu2  ;;  %v2647_v30 = vpop.f32.mrf.mxu3  ;;  %v5325_v6 = vadd.f32 %v2644_v18, %v2596_v13  ;;  %v3950_v18 = vld [vmem:[#allocation7 + $0x238] sm:$0xf0]  ;;  %v4216_v13 = vld [vmem:[#allocation7 + $0x1b4] sm:$0xf]  ;;  %3024 = vmatpush.bf16.msrb.mxu3 %v4017_v61  ;;  %v4198_v61 = vld [vmem:[#allocation7 + $0x124] sm:$0xf] }
 0x273   :  { %v2500_v15 = vpop.f32.mrf.mxu0  ;;  %v2549_v44 = vpop.f32.mrf.mxu1  ;;  %v3953_v19 = vor.u32 %v4232_v35, %v3950_v18 }
 0x274   :  { %v2501_v39 = vadd.f32 %v2500_v15, %v5285_v17  ;;  %v3886_v15 = vld [vmem:[#allocation7 + $0x1b8] sm:$0xf0] }
 0x275   :  { %2975 = vmatpush.bf16.msrb.mxu2 %v3953_v19 }
 0x276   :  { %v2550_v16 = vadd.f32 %v2549_v44, %v2501_v39  ;;  %2695 = vmatmul.bf16.gmra.mxu0 %v5331_v14  ;;  %2744 = vmatmul.bf16.gmra.mxu1 %v5337_v11  ;;  %v3889_v44 = vor.u32 %v4216_v13, %v3886_v15  ;;  %v3814_v15 = vld [vmem:[#allocation7 + $0x128] sm:$0xf0] }
 0x278   :  { %v2599_v23 = vadd.f32 %v2598_v4, %v2550_v16  ;;  %2926 = vmatpush.bf16.msrb.mxu1 %v3889_v44  ;;  %v4006_v44 = vld [vmem:[#allocation7 + $0x2a8] sm:$0xf0] }
 0x27a   :  { %v2600_v41 = vpop.f32.mrf.mxu2  ;;  %v2649_v46 = vpop.f32.mrf.mxu3  ;;  %v5340_v39 = vadd.f32 %v2647_v30, %v2599_v23 }
 0x27b   :  { %v2502_v25 = vpop.f32.mrf.mxu0  ;;  %v2551_v16 = vpop.f32.mrf.mxu1 }
 0x27c   :  { %v2503_v4 = vadd.f32 %v2502_v25, %v5285_v17  ;;  %v4246_v25 = vld [vmem:[#allocation7 + $0x2a4] sm:$0xf] }
 0x27e   :  { %v2552_v35 = vadd.f32 %v2551_v16, %v2503_v4  ;;  %v3817_v16 = vor.u32 %v4198_v61, %v3814_v15 }
 0x27f   :  { %2798 = vmatmul.bf16.gmra.mxu2 %v5153_v43  ;;  %2847 = vmatmul.bf16.gmra.mxu3 %v5160_v36  ;;  %v5357_v43 = vsel %vm4695_vm5, %v5148_v40, 0 }
 0x280   :  { %v2601_v18 = vadd.f32 %v2600_v41, %v2552_v35  ;;  %v4230_v41 = vld [vmem:[#allocation7 + $0x224] sm:$0xf]  ;;  %v4009_v35 = vor.u32 %v4246_v25, %v4006_v44  ;;  %2878 = vmatpush.bf16.msrb.mxu0 %v3817_v16  ;;  %v5371_v44 = vsel %vm4695_vm5, %v5178_v51, 0 }
 0x282   :  { %v2603_v24 = vpop.f32.mrf.mxu2  ;;  %v2652_v5 = vpop.f32.mrf.mxu3  ;;  %v5345_v56 = vadd.f32 %v2649_v46, %v2601_v18  ;;  %v3942_v46 = vld [vmem:[#allocation7 + $0x228] sm:$0xf0]  ;;  %v4214_v18 = vld [vmem:[#allocation7 + $0x1a4] sm:$0xf]  ;;  %3025 = vmatpush.bf16.msrb.mxu3 %v4009_v35  ;;  %v4196_v35 = vld [vmem:[#allocation7 + $0x114] sm:$0xf] }
 0x283   :  { %v2505_v30 = vpop.f32.mrf.mxu0  ;;  %v2554_v19 = vpop.f32.mrf.mxu1  ;;  %v3945_v13 = vor.u32 %v4230_v41, %v3942_v46 }
 0x284   :  { %v2506_v23 = vadd.f32 %v2505_v30, %v5285_v17  ;;  %v3878_v30 = vld [vmem:[#allocation7 + $0x1a8] sm:$0xf0] }
 0x285   :  { %2976 = vmatpush.bf16.msrb.mxu2 %v3945_v13 }
 0x286   :  { %v2555_v47 = vadd.f32 %v2554_v19, %v2506_v23  ;;  %2700 = vmatmul.bf16.gmra.mxu0 %v5351_v29  ;;  %2749 = vmatmul.bf16.gmra.mxu1 %v5357_v43  ;;  %v3881_v19 = vor.u32 %v4214_v18, %v3878_v30  ;;  %v3806_v30 = vld [vmem:[#allocation7 + $0x118] sm:$0xf0] }
 0x288   :  { %v2604_v36 = vadd.f32 %v2603_v24, %v2555_v47  ;;  %2927 = vmatpush.bf16.msrb.mxu1 %v3881_v19  ;;  %v3998_v19 = vld [vmem:[#allocation7 + $0x298] sm:$0xf0] }
 0x28a   :  { %v2605_v37 = vpop.f32.mrf.mxu2  ;;  %v2654_v4 = vpop.f32.mrf.mxu3  ;;  %v5360_v23 = vadd.f32 %v2652_v5, %v2604_v36 }
 0x28b   :  { %v2507_v40 = vpop.f32.mrf.mxu0  ;;  %v2556_v47 = vpop.f32.mrf.mxu1 }
 0x28c   :  { %v2508_v24 = vadd.f32 %v2507_v40, %v5285_v17  ;;  %v4244_v40 = vld [vmem:[#allocation7 + $0x294] sm:$0xf] }
 0x28e   :  { %v2557_v41 = vadd.f32 %v2556_v47, %v2508_v24  ;;  %v3809_v47 = vor.u32 %v4196_v35, %v3806_v30 }
 0x28f   :  { %2803 = vmatmul.bf16.gmra.mxu2 %v5185_v7  ;;  %2852 = vmatmul.bf16.gmra.mxu3 %v5192_v26  ;;  %v5377_v7 = vsel %vm4695_vm5, %v5180_v10, 0 }
 0x290   :  { %v2606_v46 = vadd.f32 %v2605_v37, %v2557_v41  ;;  %v4228_v37 = vld [vmem:[#allocation7 + $0x214] sm:$0xf]  ;;  %v4001_v41 = vor.u32 %v4244_v40, %v3998_v19  ;;  %2879 = vmatpush.bf16.msrb.mxu0 %v3809_v47  ;;  %v5391_v19 = vsel %vm4695_vm5, %v5210_v34, 0 }
 0x292   :  { %v2608_v61 = vpop.f32.mrf.mxu2  ;;  %v2657_v15 = vpop.f32.mrf.mxu3  ;;  %v5365_v25 = vadd.f32 %v2654_v4, %v2606_v46  ;;  %v3934_v4 = vld [vmem:[#allocation7 + $0x218] sm:$0xf0]  ;;  %v4212_v46 = vld [vmem:[#allocation7 + $0x194] sm:$0xf]  ;;  %3026 = vmatpush.bf16.msrb.mxu3 %v4001_v41  ;;  %v4194_v41 = vld [vmem:[#allocation7 + $0x104] sm:$0xf] }
 0x293   :  { %v2510_v5 = vpop.f32.mrf.mxu0  ;;  %v2559_v13 = vpop.f32.mrf.mxu1  ;;  %v3937_v18 = vor.u32 %v4228_v37, %v3934_v4 }
 0x294   :  { %v2511_v36 = vadd.f32 %v2510_v5, %v5285_v17  ;;  %v3870_v5 = vld [vmem:[#allocation7 + $0x198] sm:$0xf0] }
 0x295   :  { %2977 = vmatpush.bf16.msrb.mxu2 %v3937_v18 }
 0x296   :  { %v2560_v16 = vadd.f32 %v2559_v13, %v2511_v36  ;;  %2705 = vmatmul.bf16.gmra.mxu0 %v5371_v44  ;;  %2754 = vmatmul.bf16.gmra.mxu1 %v5377_v7  ;;  %v3873_v13 = vor.u32 %v4212_v46, %v3870_v5  ;;  %v3798_v5 = vld [vmem:[#allocation7 + $0x108] sm:$0xf0] }
 0x298   :  { %v2609_v26 = vadd.f32 %v2608_v61, %v2560_v16  ;;  %2928 = vmatpush.bf16.msrb.mxu1 %v3873_v13  ;;  %v3990_v13 = vld [vmem:[#allocation7 + $0x288] sm:$0xf0] }
 0x29a   :  { %v2610_v51 = vpop.f32.mrf.mxu2  ;;  %v2659_v24 = vpop.f32.mrf.mxu3  ;;  %v5380_v36 = vadd.f32 %v2657_v15, %v2609_v26 }
 0x29b   :  { %v2512_v10 = vpop.f32.mrf.mxu0  ;;  %v2561_v16 = vpop.f32.mrf.mxu1 }
 0x29c   :  { %v2513_v61 = vadd.f32 %v2512_v10, %v5285_v17  ;;  %v4242_v10 = vld [vmem:[#allocation7 + $0x284] sm:$0xf] }
 0x29e   :  { %v2562_v37 = vadd.f32 %v2561_v16, %v2513_v61  ;;  %v3801_v16 = vor.u32 %v4194_v41, %v3798_v5 }
 0x29f   :  { %2808 = vmatmul.bf16.gmra.mxu2 %v5217_v32  ;;  %2857 = vmatmul.bf16.gmra.mxu3 %v5224_v38  ;;  %v5397_v32 = vsel %vm4695_vm5, %v5212_v31, 0 }
 0x2a0   :  { %v2611_v4 = vadd.f32 %v2610_v51, %v2562_v37  ;;  %v4226_v51 = vld [vmem:[#allocation7 + $0x204] sm:$0xf]  ;;  %v3993_v37 = vor.u32 %v4242_v10, %v3990_v13  ;;  %2880 = vmatpush.bf16.msrb.mxu0 %v3801_v16  ;;  %v5411_v13 = vsel %vm4695_vm5, %v5242_v1, 0 }
 0x2a2   :  { %v2613_v35 = vpop.f32.mrf.mxu2  ;;  %v2662_v30 = vpop.f32.mrf.mxu3  ;;  %v5385_v40 = vadd.f32 %v2659_v24, %v2611_v4  ;;  %v3926_v24 = vld [vmem:[#allocation7 + $0x208] sm:$0xf0]  ;;  %v4210_v4 = vld [vmem:[#allocation7 + $0x184] sm:$0xf]  ;;  %3027 = vmatpush.bf16.msrb.mxu3 %v3993_v37 }
 0x2a3   :  { %v2515_v15 = vpop.f32.mrf.mxu0  ;;  %v2564_v18 = vpop.f32.mrf.mxu1  ;;  %v3929_v46 = vor.u32 %v4226_v51, %v3926_v24 }
 0x2a4   :  { %v2516_v26 = vadd.f32 %v2515_v15, %v5285_v17  ;;  %v3862_v15 = vld [vmem:[#allocation7 + $0x188] sm:$0xf0] }
 0x2a5   :  { %2978 = vmatpush.bf16.msrb.mxu2 %v3929_v46 }
 0x2a6   :  { %v2565_v47 = vadd.f32 %v2564_v18, %v2516_v26  ;;  %2710 = vmatmul.bf16.gmra.mxu0 %v5391_v19  ;;  %2759 = vmatmul.bf16.gmra.mxu1 %v5397_v32  ;;  %v3865_v18 = vor.u32 %v4210_v4, %v3862_v15 }
 0x2a8   :  { %v2614_v38 = vadd.f32 %v2613_v35, %v2565_v47  ;;  %2929 = vmatpush.bf16.msrb.mxu1 %v3865_v18 }
 0x2aa   :  { %v2615_v34 = vpop.f32.mrf.mxu2  ;;  %v2664_v61 = vpop.f32.mrf.mxu3  ;;  %v5400_v26 = vadd.f32 %v2662_v30, %v2614_v38 }
 0x2ab   :  { %v2517_v31 = vpop.f32.mrf.mxu0  ;;  %v2566_v47 = vpop.f32.mrf.mxu1 }
 0x2ac   :  { %v2518_v35 = vadd.f32 %v2517_v31, %v5285_v17 }
 0x2ae   :  { %v2567_v51 = vadd.f32 %v2566_v47, %v2518_v35 }
 0x2af   :  { %2813 = vmatmul.bf16.gmra.mxu2 %v5248_v58  ;;  %2862 = vmatmul.bf16.gmra.mxu3 %v5253_v49  ;;  %v5417_v58 = vsel %vm4695_vm5, %v5244_v28, 0 }
 0x2b0   :  { %v2616_v24 = vadd.f32 %v2615_v34, %v2567_v51 }
 0x2b2   :  { %v2618_v41 = vpop.f32.mrf.mxu2  ;;  %v2667_v5 = vpop.f32.mrf.mxu3  ;;  %v5405_v10 = vadd.f32 %v2664_v61, %v2616_v24 }
 0x2b3   :  { %v2520_v30 = vpop.f32.mrf.mxu0  ;;  %v2569_v46 = vpop.f32.mrf.mxu1 }
 0x2b4   :  { %v2521_v38 = vadd.f32 %v2520_v30, %v5285_v17 }
 0x2b6   :  { %v2570_v16 = vadd.f32 %v2569_v46, %v2521_v38  ;;  %2715 = vmatmul.bf16.gmra.mxu0 %v5411_v13  ;;  %2764 = vmatmul.bf16.gmra.mxu1 %v5417_v58 }
 0x2b8   :  { %v2619_v49 = vadd.f32 %v2618_v41, %v2570_v16 }
 0x2ba   :  { %v2620_v34 = vpop.f32.mrf.mxu2  ;;  %v2669_v61 = vpop.f32.mrf.mxu3  ;;  %v5420_v37 = vadd.f32 %v2667_v5, %v2619_v49  ;;  %v5431_v5 = vsel %vm4695_vm5, %v5266_v62, 0 }
 0x2bb   :  { %v2522_v4 = vpop.f32.mrf.mxu0  ;;  %v2571_v1 = vpop.f32.mrf.mxu1 }
 0x2bc   :  { %v2523_v15 = vadd.f32 %v2522_v4, %v5285_v17 }
 0x2be   :  { %v2572_v31 = vadd.f32 %v2571_v1, %v2523_v15 }
 0x2bf   :  { %2818 = vmatmul.bf16.gmra.mxu2 %v5272_v2  ;;  %2867 = vmatmul.bf16.gmra.mxu3 %v5276_v48  ;;  %v5437_v2 = vsel %vm4695_vm5, %v5268_v53, 0 }
 0x2c0   :  { %v2621_v18 = vadd.f32 %v2620_v34, %v2572_v31 }
 0x2c2   :  { %v2623_v35 = vpop.f32.mrf.mxu2  ;;  %v2672_v28 = vpop.f32.mrf.mxu3  ;;  %v5425_v47 = vadd.f32 %v2669_v61, %v2621_v18 }
 0x2c3   :  { %v2525_v51 = vpop.f32.mrf.mxu0  ;;  %v2574_v41 = vpop.f32.mrf.mxu1 }
 0x2c4   :  { %v2526_v24 = vadd.f32 %v2525_v51, %v5285_v17 }
 0x2c6   :  { %v2575_v30 = vadd.f32 %v2574_v41, %v2526_v24  ;;  %2720 = vmatmul.bf16.gmra.mxu0 %v5431_v5  ;;  %2769 = vmatmul.bf16.gmra.mxu1 %v5437_v2 }
 0x2c8   :  { %v2624_v48 = vadd.f32 %v2623_v35, %v2575_v30 }
 0x2ca   :  { %v2625_v38 = vpop.f32.mrf.mxu2  ;;  %v2674_v46 = vpop.f32.mrf.mxu3  ;;  %v5440_v16 = vadd.f32 %v2672_v28, %v2624_v48 }
 0x2cb   :  { %v2527_v49 = vpop.f32.mrf.mxu0  ;;  %v2576_v62 = vpop.f32.mrf.mxu1 }
 0x2cc   :  { %v2528_v34 = vadd.f32 %v2527_v49, %v5285_v17 }
 0x2ce   :  { %v2577_v61 = vadd.f32 %v2576_v62, %v2528_v34 }
 0x2cf   :  { %2979 = vmatmul.bf16.vlgmr.msrb.gmra.mxu2 %v5291_v0  ;;  %3028 = vmatmul.bf16.vlgmr.msrb.gmra.mxu3 %v5297_v59  ;;  %v5690_v0 = vld [vmem:[#allocation20_spill] sm:$0xff]  ;;  %v5691_v59 = vld [vmem:[#allocation21_spill] sm:$0xff] }
 0x2d0   :  { %v2626_v53 = vadd.f32 %v2625_v38, %v2577_v61 }
 0x2d2   :  { %v2784_v4 = vpop.f32.mrf.mxu2  ;;  %v2833_v15 = vpop.f32.mrf.mxu3  ;;  %v5448_v1 = vadd.f32 %v2674_v46, %v2626_v53 }
 0x2d3   :  { %v2785_v31 = vadd.f32 %v2784_v4, %v5446_v22  ;;  %v2686_v18 = vpop.f32.mrf.mxu0  ;;  %v2735_v17 = vpop.f32.mrf.mxu1 }
 0x2d4   :  { %v2687_v35 = vadd.f32 %v2686_v18, %v5300_v63  ;;  %v5693_v18 = vld [vmem:[#allocation22_spill] sm:$0xff] }
 0x2d5   :  { %v5452_v28 = vadd.f32 %v2833_v15, %v2785_v31  ;;  %v5692_v31 = vld [vmem:[#allocation15_spill] sm:$0xff] }
 0x2d6   :  { %v5454_v51 = vadd.f32 %v2735_v17, %v2687_v35  ;;  %2881 = vmatmul.bf16.vlgmr.msrb.gmra.mxu0 %v5690_v0  ;;  %2930 = vmatmul.bf16.vlgmr.msrb.gmra.mxu1 %v5691_v59 }
 0x2da   :  { %v2786_v54 = vpop.f32.mrf.mxu2  ;;  %v2835_v24 = vpop.f32.mrf.mxu3 }
 0x2db   :  { %v2787_v41 = vadd.f32 %v2786_v54, %v5446_v22  ;;  %v2688_v30 = vpop.f32.mrf.mxu0  ;;  %v2737_v38 = vpop.f32.mrf.mxu1 }
 0x2dc   :  { %v2689_v48 = vadd.f32 %v2688_v30, %v5305_v33 }
 0x2dd   :  { %v5460_v46 = vadd.f32 %v2835_v24, %v2787_v41 }
 0x2de   :  { %v5462_v63 = vadd.f32 %v2737_v38, %v2689_v48 }
 0x2df   :  { %2984 = vmatmul.bf16.gmra.mxu2 %v5311_v12  ;;  %3033 = vmatmul.bf16.gmra.mxu3 %v5317_v45 }
 0x2e2   :  { %v2789_v49 = vpop.f32.mrf.mxu2  ;;  %v2838_v34 = vpop.f32.mrf.mxu3 }
 0x2e3   :  { %v2790_v62 = vadd.f32 %v2789_v49, %v5446_v22  ;;  %v2691_v61 = vpop.f32.mrf.mxu0  ;;  %v2740_v4 = vpop.f32.mrf.mxu1 }
 0x2e4   :  { %v2692_v53 = vadd.f32 %v2691_v61, %v5320_v42 }
 0x2e5   :  { %v5468_v15 = vadd.f32 %v2838_v34, %v2790_v62 }
 0x2e6   :  { %v5470_v33 = vadd.f32 %v2740_v4, %v2692_v53  ;;  %2886 = vmatmul.bf16.gmra.mxu0 %v5692_v31  ;;  %2935 = vmatmul.bf16.gmra.mxu1 %v5693_v18 }
 0x2ea   :  { %v2791_v35 = vpop.f32.mrf.mxu2  ;;  %v2840_v12 = vpop.f32.mrf.mxu3 }
 0x2eb   :  { %v2792_v45 = vadd.f32 %v2791_v35, %v5446_v22  ;;  %v2693_v17 = vpop.f32.mrf.mxu0  ;;  %v2742_v59 = vpop.f32.mrf.mxu1 }
 0x2ec   :  { %v2694_v0 = vadd.f32 %v2693_v17, %v5325_v6 }
 0x2ed   :  { %v5476_v54 = vadd.f32 %v2840_v12, %v2792_v45 }
 0x2ee   :  { %v5478_v42 = vadd.f32 %v2742_v59, %v2694_v0 }
 0x2ef   :  { %2989 = vmatmul.bf16.gmra.mxu2 %v5331_v14  ;;  %3038 = vmatmul.bf16.gmra.mxu3 %v5337_v11 }
 0x2f2   :  { %v2794_v24 = vpop.f32.mrf.mxu2  ;;  %v2843_v41 = vpop.f32.mrf.mxu3 }
 0x2f3   :  { %v2795_v30 = vadd.f32 %v2794_v24, %v5446_v22  ;;  %v2696_v48 = vpop.f32.mrf.mxu0  ;;  %v2745_v49 = vpop.f32.mrf.mxu1 }
 0x2f4   :  { %v2697_v38 = vadd.f32 %v2696_v48, %v5340_v39 }
 0x2f5   :  { %v5484_v34 = vadd.f32 %v2843_v41, %v2795_v30 }
 0x2f6   :  { %v5486_v6 = vadd.f32 %v2745_v49, %v2697_v38  ;;  %2891 = vmatmul.bf16.gmra.mxu0 %v5102_v3  ;;  %2940 = vmatmul.bf16.gmra.mxu1 %v5104_v27 }
 0x2fa   :  { %v2796_v62 = vpop.f32.mrf.mxu2  ;;  %v2845_v14 = vpop.f32.mrf.mxu3 }
 0x2fb   :  { %v2797_v11 = vadd.f32 %v2796_v62, %v5446_v22  ;;  %v2698_v61 = vpop.f32.mrf.mxu0  ;;  %v2747_v4 = vpop.f32.mrf.mxu1 }
 0x2fc   :  { %v2699_v53 = vadd.f32 %v2698_v61, %v5345_v56 }
 0x2fd   :  { %v5492_v31 = vadd.f32 %v2845_v14, %v2797_v11 }
 0x2fe   :  { %v5494_v39 = vadd.f32 %v2747_v4, %v2699_v53 }
 0x2ff   :  { %2994 = vmatmul.bf16.gmra.mxu2 %v5351_v29  ;;  %3043 = vmatmul.bf16.gmra.mxu3 %v5357_v43 }
 0x302   :  { %v2799_v18 = vpop.f32.mrf.mxu2  ;;  %v2848_v3 = vpop.f32.mrf.mxu3 }
 0x303   :  { %v2800_v27 = vadd.f32 %v2799_v18, %v5446_v22  ;;  %v2701_v35 = vpop.f32.mrf.mxu0  ;;  %v2750_v45 = vpop.f32.mrf.mxu1 }
 0x304   :  { %v2702_v12 = vadd.f32 %v2701_v35, %v5360_v23 }
 0x305   :  { %v5500_v17 = vadd.f32 %v2848_v3, %v2800_v27 }
 0x306   :  { %v5502_v56 = vadd.f32 %v2750_v45, %v2702_v12  ;;  %2896 = vmatmul.bf16.gmra.mxu0 %v5132_v20  ;;  %2945 = vmatmul.bf16.gmra.mxu1 %v5134_v21 }
 0x30a   :  { %v2801_v0 = vpop.f32.mrf.mxu2  ;;  %v2850_v29 = vpop.f32.mrf.mxu3 }
 0x30b   :  { %v2802_v43 = vadd.f32 %v2801_v0, %v5446_v22  ;;  %v2703_v59 = vpop.f32.mrf.mxu0  ;;  %v2752_v41 = vpop.f32.mrf.mxu1 }
 0x30c   :  { %v2704_v24 = vadd.f32 %v2703_v59, %v5365_v25 }
 0x30d   :  { %v5508_v30 = vadd.f32 %v2850_v29, %v2802_v43 }
 0x30e   :  { %v5510_v23 = vadd.f32 %v2752_v41, %v2704_v24 }
 0x30f   :  { %2999 = vmatmul.bf16.gmra.mxu2 %v5371_v44  ;;  %3048 = vmatmul.bf16.gmra.mxu3 %v5377_v7 }
 0x312   :  { %v2804_v48 = vpop.f32.mrf.mxu2  ;;  %v2853_v20 = vpop.f32.mrf.mxu3 }
 0x313   :  { %v2805_v21 = vadd.f32 %v2804_v48, %v5446_v22  ;;  %v2706_v38 = vpop.f32.mrf.mxu0  ;;  %v2755_v62 = vpop.f32.mrf.mxu1 }
 0x314   :  { %v2707_v49 = vadd.f32 %v2706_v38, %v5380_v36 }
 0x315   :  { %v5516_v14 = vadd.f32 %v2853_v20, %v2805_v21 }
 0x316   :  { %v5518_v25 = vadd.f32 %v2755_v62, %v2707_v49  ;;  %2901 = vmatmul.bf16.gmra.mxu0 %v5164_v50  ;;  %2950 = vmatmul.bf16.gmra.mxu1 %v5166_v60 }
 0x31a   :  { %v2806_v11 = vpop.f32.mrf.mxu2  ;;  %v2855_v44 = vpop.f32.mrf.mxu3 }
 0x31b   :  { %v2807_v7 = vadd.f32 %v2806_v11, %v5446_v22  ;;  %v2708_v61 = vpop.f32.mrf.mxu0  ;;  %v2757_v4 = vpop.f32.mrf.mxu1 }
 0x31c   :  { %v2709_v53 = vadd.f32 %v2708_v61, %v5385_v40 }
 0x31d   :  { %v5524_v18 = vadd.f32 %v2855_v44, %v2807_v7 }
 0x31e   :  { %v5526_v36 = vadd.f32 %v2757_v4, %v2709_v53 }
 0x31f   :  { %3004 = vmatmul.bf16.gmra.mxu2 %v5391_v19  ;;  %3053 = vmatmul.bf16.gmra.mxu3 %v5397_v32 }
 0x322   :  { %v2809_v3 = vpop.f32.mrf.mxu2  ;;  %v2858_v50 = vpop.f32.mrf.mxu3 }
 0x323   :  { %v2810_v60 = vadd.f32 %v2809_v3, %v5446_v22  ;;  %v2711_v27 = vpop.f32.mrf.mxu0  ;;  %v2760_v12 = vpop.f32.mrf.mxu1 }
 0x324   :  { %v2712_v35 = vadd.f32 %v2711_v27, %v5400_v26 }
 0x325   :  { %v5532_v45 = vadd.f32 %v2858_v50, %v2810_v60  ;;  %v5694_v60 = vld [vmem:[#allocation19_spill] sm:$0xff] }
 0x326   :  { %v5534_v40 = vadd.f32 %v2760_v12, %v2712_v35  ;;  %2906 = vmatmul.bf16.gmra.mxu0 %v5196_v8  ;;  %2955 = vmatmul.bf16.gmra.mxu1 %v5198_v55 }
 0x32a   :  { %v2811_v0 = vpop.f32.mrf.mxu2  ;;  %v2860_v19 = vpop.f32.mrf.mxu3 }
 0x32b   :  { %v2812_v32 = vadd.f32 %v2811_v0, %v5446_v22  ;;  %v2713_v29 = vpop.f32.mrf.mxu0  ;;  %v2762_v59 = vpop.f32.mrf.mxu1 }
 0x32c   :  { %v2714_v43 = vadd.f32 %v2713_v29, %v5405_v10 }
 0x32d   :  { %v5540_v24 = vadd.f32 %v2860_v19, %v2812_v32 }
 0x32e   :  { %v5542_v26 = vadd.f32 %v2762_v59, %v2714_v43  ;;  %v83_v43 = vld [vmem:[#allocation2] sm:$0xff] }
 0x32f   :  { %3009 = vmatmul.bf16.gmra.mxu2 %v5411_v13  ;;  %3058 = vmatmul.bf16.gmra.mxu3 %v5417_v58 }
 0x332   :  { %v2814_v41 = vpop.f32.mrf.mxu2  ;;  %v2863_v8 = vpop.f32.mrf.mxu3 }
 0x333   :  { %v2815_v55 = vadd.f32 %v2814_v41, %v5446_v22  ;;  %v2716_v48 = vpop.f32.mrf.mxu0  ;;  %v2765_v21 = vpop.f32.mrf.mxu1 }
 0x334   :  { %v2717_v20 = vadd.f32 %v2716_v48, %v5420_v37  ;;  %v3070_v48 = vunpack.c.h.bf16 %v83_v43 }
 0x335   :  { %v5548_v38 = vadd.f32 %v2863_v8, %v2815_v55  ;;  %v3069_v8 = vunpack.c.l.bf16 %v83_v43 }
 0x336   :  { %v5550_v10 = vadd.f32 %v2765_v21, %v2717_v20  ;;  %2911 = vmatmul.bf16.gmra.mxu0 %v5228_v57  ;;  %2960 = vmatmul.bf16.gmra.mxu1 %v5230_v52 }
 0x33a   :  { %v2816_v49 = vpop.f32.mrf.mxu2  ;;  %v2865_v13 = vpop.f32.mrf.mxu3 }
 0x33b   :  { %v2817_v58 = vadd.f32 %v2816_v49, %v5446_v22  ;;  %v2718_v62 = vpop.f32.mrf.mxu0  ;;  %v2767_v44 = vpop.f32.mrf.mxu1 }
 0x33c   :  { %v2719_v11 = vadd.f32 %v2718_v62, %v5425_v47 }
 0x33d   :  { %v5556_v7 = vadd.f32 %v2865_v13, %v2817_v58  ;;  %v84_v13 = vld [vmem:[#allocation2 + $0x8] sm:$0xff] }
 0x33e   :  { %v5558_v37 = vadd.f32 %v2767_v44, %v2719_v11 }
 0x33f   :  { %3014 = vmatmul.bf16.gmra.mxu2 %v5431_v5  ;;  %3063 = vmatmul.bf16.gmra.mxu3 %v5437_v2 }
 0x342   :  { %v2819_v61 = vpop.f32.mrf.mxu2  ;;  %v2868_v57 = vpop.f32.mrf.mxu3 }
 0x343   :  { %v2820_v52 = vadd.f32 %v2819_v61, %v5446_v22  ;;  %v2721_v53 = vpop.f32.mrf.mxu0  ;;  %v2770_v3 = vpop.f32.mrf.mxu1 }
 0x344   :  { %v2722_v4 = vadd.f32 %v2721_v53, %v5440_v16  ;;  %v3072_v53 = vunpack.c.h.bf16 %v84_v13 }
 0x345   :  { %v5564_v50 = vadd.f32 %v2868_v57, %v2820_v52  ;;  %v3071_v57 = vunpack.c.l.bf16 %v84_v13 }
 0x346   :  { %v5566_v47 = vadd.f32 %v2770_v3, %v2722_v4  ;;  %2916 = vmatmul.bf16.gmra.mxu0 %v5256_v9  ;;  %2965 = vmatmul.bf16.gmra.mxu1 %v5694_v60 }
 0x347   :  { %v3103_v60 = vadd.f32 %v3071_v57, %v5462_v63 }
 0x34a   :  { %v2821_v27 = vpop.f32.mrf.mxu2  ;;  %v2870_v5 = vpop.f32.mrf.mxu3 }
 0x34b   :  { %v2822_v2 = vadd.f32 %v2821_v27, %v5446_v22  ;;  %v2723_v35 = vpop.f32.mrf.mxu0  ;;  %v2772_v0 = vpop.f32.mrf.mxu1  ;;  %v3101_v22 = vadd.f32 %v3069_v8, %v5454_v51 }
 0x34c   :  { %v2724_v12 = vadd.f32 %v2723_v35, %v5448_v1 }
 0x34d   :  { %v5572_v19 = vadd.f32 %v2870_v5, %v2822_v2  ;;  %v3133_v61 = vmax.f32 %v3101_v22, 0.0  ;;  %v85_v2 = vld [vmem:[#allocation2 + $0x10] sm:$0xff]  ;;  %v86_v22 = vld [vmem:[#allocation2 + $0x18] sm:$0xff] }
 0x34e   :  { %v5574_v16 = vadd.f32 %v2772_v0, %v2724_v12 }
 0x352   :  { %v2980_v32 = vpop.f32.mrf.mxu2  ;;  %v3029_v29 = vpop.f32.mrf.mxu3 }
 0x353   :  { %v2882_v59 = vpop.f32.mrf.mxu0  ;;  %v2931_v41 = vpop.f32.mrf.mxu1 }
 0x354   :  { %v2883_v9 = vadd.f32 %v2882_v59, %v5452_v28 }
 0x356   :  { %v2932_v55 = vadd.f32 %v2931_v41, %v2883_v9  ;;  %v3074_v9 = vunpack.c.h.bf16 %v85_v2 }
 0x358   :  { %v2981_v20 = vadd.f32 %v2980_v32, %v2932_v55  ;;  %v3135_v32 = vmax.f32 %v3103_v60, 0.0 }
 0x35a   :  { %v3030_v21 = vadd.f32 %v3029_v29, %v2981_v20  ;;  %v2982_v1 = vpop.f32.mrf.mxu2  ;;  %v3031_v49 = vpop.f32.mrf.mxu3  ;;  %v3073_v29 = vunpack.c.l.bf16 %v85_v2 }
 0x35b   :  { %v2884_v58 = vpop.f32.mrf.mxu0  ;;  %v2933_v44 = vpop.f32.mrf.mxu1 }
 0x35c   :  { %v3102_v62 = vadd.f32 %v3070_v48, %v3030_v21  ;;  %v2885_v11 = vadd.f32 %v2884_v58, %v5460_v46  ;;  %v3105_v55 = vadd.f32 %v3073_v29, %v5470_v33  ;;  %v3075_v58 = vunpack.c.l.bf16 %v86_v22 }
 0x35e   :  { %v3134_v52 = vmax.f32 %v3102_v62, 0.0  ;;  %v2934_v28 = vadd.f32 %v2933_v44, %v2885_v11  ;;  %v3137_v13 = vmax.f32 %v3105_v55, 0.0  ;;  %v3076_v44 = vunpack.c.h.bf16 %v86_v22 }
 0x360   :  { %v3165_v4 = vpack.c.bf16 %v3134_v52, %v3133_v61  ;;  %v2983_v3 = vadd.f32 %v2982_v1, %v2934_v28  ;;  %v3107_v52 = vadd.f32 %v3075_v58, %v5478_v42  ;;  %v89_v58 = vld [vmem:[#allocation2 + $0x30] sm:$0xff] }
 0x362   :  { %3181 = vst [vmem:[#allocation10] sm:$0xff] %v3165_v4  ;;  %v3032_v51 = vadd.f32 %v3031_v49, %v2983_v3  ;;  %v2985_v27 = vpop.f32.mrf.mxu2  ;;  %v3034_v5 = vpop.f32.mrf.mxu3  ;;  %v87_v4 = vld [vmem:[#allocation2 + $0x20] sm:$0xff] }
 0x363   :  { %v2887_v35 = vpop.f32.mrf.mxu0  ;;  %v2936_v46 = vpop.f32.mrf.mxu1 }
 0x364   :  { %v3104_v12 = vadd.f32 %v3072_v53, %v3032_v51  ;;  %v2888_v0 = vadd.f32 %v2887_v35, %v5468_v15 }
 0x366   :  { %v3136_v43 = vmax.f32 %v3104_v12, 0.0  ;;  %v2937_v59 = vadd.f32 %v2936_v46, %v2888_v0  ;;  %v3078_v12 = vunpack.c.h.bf16 %v87_v4 }
 0x368   :  { %v3166_v41 = vpack.c.bf16 %v3136_v43, %v3135_v32  ;;  %v2986_v8 = vadd.f32 %v2985_v27, %v2937_v59  ;;  %v3139_v27 = vmax.f32 %v3107_v52, 0.0  ;;  %v88_v59 = vld [vmem:[#allocation2 + $0x28] sm:$0xff] }
 0x369   :  { %v3080_v22 = vunpack.c.h.bf16 %v88_v59 }
 0x36a   :  { %3182 = vst [vmem:[#allocation10 + $0x8] sm:$0xff] %v3166_v41  ;;  %v3035_v63 = vadd.f32 %v3034_v5, %v2986_v8  ;;  %v2987_v48 = vpop.f32.mrf.mxu2  ;;  %v3036_v20 = vpop.f32.mrf.mxu3  ;;  %v3077_v5 = vunpack.c.l.bf16 %v87_v4 }
 0x36b   :  { %v2889_v21 = vpop.f32.mrf.mxu0  ;;  %v2938_v15 = vpop.f32.mrf.mxu1 }
 0x36c   :  { %v3106_v1 = vadd.f32 %v3074_v9, %v3035_v63  ;;  %v2890_v49 = vadd.f32 %v2889_v21, %v5476_v54  ;;  %v3109_v32 = vadd.f32 %v3077_v5, %v5486_v6  ;;  %v3079_v63 = vunpack.c.l.bf16 %v88_v59 }
 0x36e   :  { %v3138_v62 = vmax.f32 %v3106_v1, 0.0  ;;  %v2939_v11 = vadd.f32 %v2938_v15, %v2890_v49  ;;  %v3141_v55 = vmax.f32 %v3109_v32, 0.0  ;;  %v3111_v49 = vadd.f32 %v3079_v63, %v5494_v39 }
 0x370   :  { %v3167_v61 = vpack.c.bf16 %v3138_v62, %v3137_v13  ;;  %v2988_v57 = vadd.f32 %v2987_v48, %v2939_v11 }
 0x372   :  { %3183 = vst [vmem:[#allocation10 + $0x10] sm:$0xff] %v3167_v61  ;;  %v3037_v33 = vadd.f32 %v3036_v20, %v2988_v57  ;;  %v2990_v28 = vpop.f32.mrf.mxu2  ;;  %v3039_v53 = vpop.f32.mrf.mxu3  ;;  %v3143_v61 = vmax.f32 %v3111_v49, 0.0  ;;  %v3081_v57 = vunpack.c.l.bf16 %v89_v58 }
 0x373   :  { %v2892_v3 = vpop.f32.mrf.mxu0  ;;  %v2941_v54 = vpop.f32.mrf.mxu1 }
 0x374   :  { %v3108_v60 = vadd.f32 %v3076_v44, %v3037_v33  ;;  %v2893_v51 = vadd.f32 %v2892_v3, %v5484_v34  ;;  %v3113_v3 = vadd.f32 %v3081_v57, %v5502_v56 }
 0x376   :  { %v3140_v2 = vmax.f32 %v3108_v60, 0.0  ;;  %v2942_v35 = vadd.f32 %v2941_v54, %v2893_v51  ;;  %v90_v54 = vld [vmem:[#allocation2 + $0x38] sm:$0xff] }
 0x377   :  { %v3084_v32 = vunpack.c.h.bf16 %v90_v54 }
 0x378   :  { %v3168_v0 = vpack.c.bf16 %v3140_v2, %v3139_v27  ;;  %v2991_v46 = vadd.f32 %v2990_v28, %v2942_v35  ;;  %v3082_v28 = vunpack.c.h.bf16 %v89_v58  ;;  %v3145_v35 = vmax.f32 %v3113_v3, 0.0  ;;  %v92_v58 = vld [vmem:[#allocation2 + $0x48] sm:$0xff] }
 0x37a   :  { %3184 = vst [vmem:[#allocation10 + $0x18] sm:$0xff] %v3168_v0  ;;  %v3040_v42 = vadd.f32 %v3039_v53, %v2991_v46  ;;  %v2992_v29 = vpop.f32.mrf.mxu2  ;;  %v3041_v43 = vpop.f32.mrf.mxu3 }
 0x37b   :  { %v2894_v9 = vpop.f32.mrf.mxu0  ;;  %v2943_v34 = vpop.f32.mrf.mxu1 }
 0x37c   :  { %v3110_v41 = vadd.f32 %v3078_v12, %v3040_v42  ;;  %v2895_v8 = vadd.f32 %v2894_v9, %v5492_v31  ;;  %v3083_v12 = vunpack.c.l.bf16 %v90_v54 }
 0x37e   :  { %v3142_v48 = vmax.f32 %v3110_v41, 0.0  ;;  %v2944_v20 = vadd.f32 %v2943_v34, %v2895_v8  ;;  %v91_v41 = vld [vmem:[#allocation2 + $0x40] sm:$0xff] }
 0x380   :  { %v3169_v21 = vpack.c.bf16 %v3142_v48, %v3141_v55  ;;  %v2993_v1 = vadd.f32 %v2992_v29, %v2944_v20  ;;  %v3085_v48 = vunpack.c.l.bf16 %v91_v41 }
 0x382   :  { %3185 = vst [vmem:[#allocation10 + $0x20] sm:$0xff] %v3169_v21  ;;  %v3042_v6 = vadd.f32 %v3041_v43, %v2993_v1  ;;  %v2995_v15 = vpop.f32.mrf.mxu2  ;;  %v3044_v13 = vpop.f32.mrf.mxu3  ;;  %v3115_v43 = vadd.f32 %v3083_v12, %v5510_v23  ;;  %v3086_v21 = vunpack.c.h.bf16 %v91_v41 }
 0x383   :  { %v2897_v62 = vpop.f32.mrf.mxu0  ;;  %v2946_v31 = vpop.f32.mrf.mxu1 }
 0x384   :  { %v3112_v11 = vadd.f32 %v3080_v22, %v3042_v6  ;;  %v2898_v44 = vadd.f32 %v2897_v62, %v5500_v17  ;;  %v3147_v63 = vmax.f32 %v3115_v43, 0.0  ;;  %v3117_v6 = vadd.f32 %v3085_v48, %v5518_v25  ;;  %v94_v43 = vld [vmem:[#allocation2 + $0x58] sm:$0xff] }
 0x386   :  { %v3144_v52 = vmax.f32 %v3112_v11, 0.0  ;;  %v2947_v33 = vadd.f32 %v2946_v31, %v2898_v44  ;;  %v3149_v31 = vmax.f32 %v3117_v6, 0.0 }
 0x388   :  { %v3170_v53 = vpack.c.bf16 %v3144_v52, %v3143_v61  ;;  %v2996_v4 = vadd.f32 %v2995_v15, %v2947_v33  ;;  %v3087_v61 = vunpack.c.l.bf16 %v92_v58  ;;  %v3088_v33 = vunpack.c.h.bf16 %v92_v58 }
 0x38a   :  { %3186 = vst [vmem:[#allocation10 + $0x28] sm:$0xff] %v3170_v53  ;;  %v3045_v39 = vadd.f32 %v3044_v13, %v2996_v4  ;;  %v2997_v60 = vpop.f32.mrf.mxu2  ;;  %v3046_v51 = vpop.f32.mrf.mxu3  ;;  %v3119_v4 = vadd.f32 %v3087_v61, %v5526_v36  ;;  %v96_v61 = vld [vmem:[#allocation2 + $0x68] sm:$0xff] }
 0x38b   :  { %v2899_v27 = vpop.f32.mrf.mxu0  ;;  %v2948_v17 = vpop.f32.mrf.mxu1 }
 0x38c   :  { %v3114_v5 = vadd.f32 %v3082_v28, %v3045_v39  ;;  %v2900_v2 = vadd.f32 %v2899_v27, %v5508_v30 }
 0x38e   :  { %v3146_v0 = vmax.f32 %v3114_v5, 0.0  ;;  %v2949_v46 = vadd.f32 %v2948_v17, %v2900_v2  ;;  %v3151_v5 = vmax.f32 %v3119_v4, 0.0 }
 0x390   :  { %v3171_v42 = vpack.c.bf16 %v3146_v0, %v3145_v35  ;;  %v2998_v29 = vadd.f32 %v2997_v60, %v2949_v46  ;;  %v93_v60 = vld [vmem:[#allocation2 + $0x50] sm:$0xff] }
 0x391   :  { %v3089_v2 = vunpack.c.l.bf16 %v93_v60  ;;  %v3090_v12 = vunpack.c.h.bf16 %v93_v60  ;;  %v3096_v60 = vunpack.c.h.bf16 %v96_v61 }
 0x392   :  { %3187 = vst [vmem:[#allocation10 + $0x30] sm:$0xff] %v3171_v42  ;;  %v3047_v56 = vadd.f32 %v3046_v51, %v2998_v29  ;;  %v3000_v59 = vpop.f32.mrf.mxu2  ;;  %v3049_v9 = vpop.f32.mrf.mxu3 }
 0x393   :  { %v2902_v8 = vpop.f32.mrf.mxu0  ;;  %v2951_v30 = vpop.f32.mrf.mxu1 }
 0x394   :  { %v3116_v34 = vadd.f32 %v3084_v32, %v3047_v56  ;;  %v2903_v55 = vadd.f32 %v2902_v8, %v5516_v14  ;;  %v3121_v32 = vadd.f32 %v3089_v2, %v5534_v40  ;;  %v3091_v8 = vunpack.c.l.bf16 %v94_v43 }
 0x396   :  { %v3148_v20 = vmax.f32 %v3116_v34, 0.0  ;;  %v2952_v22 = vadd.f32 %v2951_v30, %v2903_v55  ;;  %v3153_v41 = vmax.f32 %v3121_v32, 0.0  ;;  %v3092_v30 = vunpack.c.h.bf16 %v94_v43 }
 0x398   :  { %v3172_v1 = vpack.c.bf16 %v3148_v20, %v3147_v63  ;;  %v3001_v49 = vadd.f32 %v3000_v59, %v2952_v22  ;;  %v3123_v20 = vadd.f32 %v3091_v8, %v5542_v26 }
 0x39a   :  { %3188 = vst [vmem:[#allocation10 + $0x38] sm:$0xff] %v3172_v1  ;;  %v3050_v23 = vadd.f32 %v3049_v9, %v3001_v49  ;;  %v3002_v15 = vpop.f32.mrf.mxu2  ;;  %v3051_v13 = vpop.f32.mrf.mxu3 }
 0x39b   :  { %v2904_v62 = vpop.f32.mrf.mxu0  ;;  %v2953_v14 = vpop.f32.mrf.mxu1 }
 0x39c   :  { %v3118_v11 = vadd.f32 %v3086_v21, %v3050_v23  ;;  %v2905_v44 = vadd.f32 %v2904_v62, %v5524_v18  ;;  %v95_v21 = vld [vmem:[#allocation2 + $0x60] sm:$0xff] }
 0x39e   :  { %v3150_v57 = vmax.f32 %v3118_v11, 0.0  ;;  %v2954_v52 = vadd.f32 %v2953_v14, %v2905_v44  ;;  %v3094_v11 = vunpack.c.h.bf16 %v95_v21 }
 0x3a0   :  { %v3173_v28 = vpack.c.bf16 %v3150_v57, %v3149_v31  ;;  %v3003_v53 = vadd.f32 %v3002_v15, %v2954_v52  ;;  %v3155_v15 = vmax.f32 %v3123_v20, 0.0 }
 0x3a2   :  { %3189 = vst [vmem:[#allocation10 + $0x40] sm:$0xff] %v3173_v28  ;;  %v3052_v25 = vadd.f32 %v3051_v13, %v3003_v53  ;;  %v3005_v3 = vpop.f32.mrf.mxu2  ;;  %v3054_v39 = vpop.f32.mrf.mxu3  ;;  %v3093_v13 = vunpack.c.l.bf16 %v95_v21 }
 0x3a3   :  { %v2907_v51 = vpop.f32.mrf.mxu0  ;;  %v2956_v18 = vpop.f32.mrf.mxu1 }
 0x3a4   :  { %v3120_v54 = vadd.f32 %v3088_v33, %v3052_v25  ;;  %v2908_v27 = vadd.f32 %v2907_v51, %v5532_v45  ;;  %v3125_v31 = vadd.f32 %v3093_v13, %v5550_v10  ;;  %v3095_v25 = vunpack.c.l.bf16 %v96_v61 }
 0x3a6   :  { %v3152_v17 = vmax.f32 %v3120_v54, 0.0  ;;  %v2957_v35 = vadd.f32 %v2956_v18, %v2908_v27  ;;  %v3157_v4 = vmax.f32 %v3125_v31, 0.0  ;;  %v3127_v27 = vadd.f32 %v3095_v25, %v5558_v37  ;;  %v97_v18 = vld [vmem:[#allocation2 + $0x70] sm:$0xff] }
 0x3a8   :  { %v3174_v0 = vpack.c.bf16 %v3152_v17, %v3151_v5  ;;  %v3006_v46 = vadd.f32 %v3005_v3, %v2957_v35 }
 0x3aa   :  { %3190 = vst [vmem:[#allocation10 + $0x48] sm:$0xff] %v3174_v0  ;;  %v3055_v36 = vadd.f32 %v3054_v39, %v3006_v46  ;;  %v3007_v42 = vpop.f32.mrf.mxu2  ;;  %v3056_v29 = vpop.f32.mrf.mxu3  ;;  %v3097_v0 = vunpack.c.l.bf16 %v97_v18 }
 0x3ab   :  { %v2909_v56 = vpop.f32.mrf.mxu0  ;;  %v2958_v45 = vpop.f32.mrf.mxu1 }
 0x3ac   :  { %v3122_v59 = vadd.f32 %v3090_v12, %v3055_v36  ;;  %v2910_v9 = vadd.f32 %v2909_v56, %v5540_v24  ;;  %v3159_v12 = vmax.f32 %v3127_v27, 0.0  ;;  %v3129_v56 = vadd.f32 %v3097_v0, %v5566_v47 }
 0x3ae   :  { %v3154_v34 = vmax.f32 %v3122_v59, 0.0  ;;  %v2959_v55 = vadd.f32 %v2958_v45, %v2910_v9  ;;  %v98_v59 = vld [vmem:[#allocation2 + $0x78] sm:$0xff]  ;;  %v3161_v8 = vmax.f32 %v3129_v56, 0.0 }
 0x3b0   :  { %v3175_v63 = vpack.c.bf16 %v3154_v34, %v3153_v41  ;;  %v3008_v48 = vadd.f32 %v3007_v42, %v2959_v55  ;;  %v3098_v42 = vunpack.c.h.bf16 %v97_v18  ;;  %v3099_v34 = vunpack.c.l.bf16 %v98_v59 }
 0x3b2   :  { %3191 = vst [vmem:[#allocation10 + $0x50] sm:$0xff] %v3175_v63  ;;  %v3057_v40 = vadd.f32 %v3056_v29, %v3008_v48  ;;  %v3010_v22 = vpop.f32.mrf.mxu2  ;;  %v3059_v1 = vpop.f32.mrf.mxu3  ;;  %v3100_v48 = vunpack.c.h.bf16 %v98_v59  ;;  %v3131_v21 = vadd.f32 %v3099_v34, %v5574_v16 }
 0x3b3   :  { %v2912_v49 = vpop.f32.mrf.mxu0  ;;  %v2961_v24 = vpop.f32.mrf.mxu1 }
 0x3b4   :  { %v3124_v6 = vadd.f32 %v3092_v30, %v3057_v40  ;;  %v2913_v23 = vadd.f32 %v2912_v49, %v5548_v38 }
 0x3b6   :  { %v3156_v58 = vmax.f32 %v3124_v6, 0.0  ;;  %v2962_v62 = vadd.f32 %v2961_v24, %v2913_v23 }
 0x3b8   :  { %v3176_v44 = vpack.c.bf16 %v3156_v58, %v3155_v15  ;;  %v3011_v14 = vadd.f32 %v3010_v22, %v2962_v62 }
 0x3ba   :  { %3192 = vst [vmem:[#allocation10 + $0x58] sm:$0xff] %v3176_v44  ;;  %v3060_v26 = vadd.f32 %v3059_v1, %v3011_v14  ;;  %v3012_v57 = vpop.f32.mrf.mxu2  ;;  %v3061_v38 = vpop.f32.mrf.mxu3 }
 0x3bb   :  { %v2914_v52 = vpop.f32.mrf.mxu0  ;;  %v2963_v53 = vpop.f32.mrf.mxu1 }
 0x3bc   :  { %v3126_v33 = vadd.f32 %v3094_v11, %v3060_v26  ;;  %v2915_v28 = vadd.f32 %v2914_v52, %v5556_v7 }
 0x3be   :  { %v3158_v3 = vmax.f32 %v3126_v33, 0.0  ;;  %v2964_v39 = vadd.f32 %v2963_v53, %v2915_v28 }
 0x3c0   :  { %v3177_v51 = vpack.c.bf16 %v3158_v3, %v3157_v4  ;;  %v3013_v54 = vadd.f32 %v3012_v57, %v2964_v39 }
 0x3c2   :  { %3193 = vst [vmem:[#allocation10 + $0x60] sm:$0xff] %v3177_v51  ;;  %v3062_v10 = vadd.f32 %v3061_v38, %v3013_v54  ;;  %v3015_v7 = vpop.f32.mrf.mxu2  ;;  %v3064_v36 = vpop.f32.mrf.mxu3 }
 0x3c3   :  { %v2917_v5 = vpop.f32.mrf.mxu0  ;;  %v2966_v35 = vpop.f32.mrf.mxu1 }
 0x3c4   :  { %v3128_v2 = vadd.f32 %v3096_v60, %v3062_v10  ;;  %v2918_v17 = vadd.f32 %v2917_v5, %v5564_v50 }
 0x3c6   :  { %v3160_v46 = vmax.f32 %v3128_v2, 0.0  ;;  %v2967_v32 = vadd.f32 %v2966_v35, %v2918_v17 }
 0x3c8   :  { %v3178_v29 = vpack.c.bf16 %v3160_v46, %v3159_v12  ;;  %v3016_v43 = vadd.f32 %v3015_v7, %v2967_v32 }
 0x3ca   :  { %3194 = vst [vmem:[#allocation10 + $0x68] sm:$0xff] %v3178_v29  ;;  %v3065_v37 = vadd.f32 %v3064_v36, %v3016_v43  ;;  %v3017_v63 = vpop.f32.mrf.mxu2  ;;  %v3066_v22 = vpop.f32.mrf.mxu3 }
 0x3cb   :  { %v2919_v9 = vpop.f32.mrf.mxu0  ;;  %v2968_v50 = vpop.f32.mrf.mxu1 }
 0x3cc   :  { %v3130_v45 = vadd.f32 %v3098_v42, %v3065_v37  ;;  %v2920_v41 = vadd.f32 %v2919_v9, %v5572_v19  ;;  %v3163_v19 = vmax.f32 %v3131_v21, 0.0 }
 0x3ce   :  { %v3162_v55 = vmax.f32 %v3130_v45, 0.0  ;;  %v2969_v30 = vadd.f32 %v2968_v50, %v2920_v41 }
 0x3d0   :  { %v3179_v20 = vpack.c.bf16 %v3162_v55, %v3161_v8  ;;  %v3018_v40 = vadd.f32 %v3017_v63, %v2969_v30 }
 0x3d2   :  { %3195 = vst [vmem:[#allocation10 + $0x70] sm:$0xff] %v3179_v20  ;;  %v3067_v47 = vadd.f32 %v3066_v22, %v3018_v40 }
 0x3d4   :  { %v3132_v1 = vadd.f32 %v3100_v48, %v3067_v47 }
 0x3d6   :  { %v3164_v49 = vmax.f32 %v3132_v1, 0.0 }
 0x3d8   :  { %v3180_v6 = vpack.c.bf16 %v3164_v49, %v3163_v19 }
 0x3da   :  { %3196 = vst [vmem:[#allocation10 + $0x78] sm:$0xff] %v3180_v6 }
 0x3db   :  { %3209 = dma.vmem_to_hbm [thread:$0]  %s3202_s13, 2048, %s3204_s16, [#allocation4], %s4394_s26, %s4394_s26, %s4395_s27  }
 0x3dc   :  { %4391 = dma.done.wait [#allocation4], 2048  }
 0x3dd   :  { %4392 = vsyncadd [#allocation4], 4294965248 }
 0x3de   :  { %3214 = vsyncpa [#allocation3], 1 }
 0x3df   :  { %3215 = vsyncpa [#allocation6], 1 }
 0x3e0   :  { %3216 = vsyncpa [#allocation9], 1 }
 0x3e1   :  { %3217 = vsyncpa [#allocation4], 1 }

// kernel: tpu_custom_call.1
= control target key start
LH: loop header
LB: loop body
LE: loop exit
PB: predicated region body
PF: predicated region fallthrough
CT: control target
= control target key end

     0   :  { %10 = vsyncpa [#allocation3], 0  ;;  %s5614_s0 = inlined_call_operand.hbm [shape: bf16[8,16,256], index: 0, kind: input, shape index: {}]   ;;  %s5615_s1 = inlined_call_operand.hbm [shape: bf16[768,256], index: 1, kind: input, shape index: {}]   ;;  %s5616_s2 = inlined_call_operand.hbm [shape: bf16[768,256], index: 2, kind: input, shape index: {}]   ;;  %s5617_s3 = inlined_call_operand.vmem [shape: f32[1,256], index: 3, kind: input, shape index: {}]   ;;  %s5618_s4 = inlined_call_operand.hbm [shape: f32[1,256], index: 4, kind: input, shape index: {}]   ;;  %s5619_s5 = inlined_call_operand.hbm [shape: bf16[8,16,256], index: 5, kind: output, shape index: {}]  }
   0x1   :  { %11 = vsyncpa [#allocation6], 0 }
   0x2   :  { %12 = vsyncpa [#allocation9], 0 }
   0x3   :  { %13 = vsyncpa [#allocation4], 0  ;;  %s31_s20 = sshll.u32 %s5615_s1, 4  ;;  %s4393_s21 = smov [#allocation5]   ;;  %s32_s20 = int_to_ptr.hbm [resolvable:$true] %s31_s20 }
   0x4   :  { %s33_s22 = sshll.u32 %s4393_s21, 4  ;;  %s18_s25 = sshll.u32 %s5614_s0, 4  ;;  %s34_s22 = int_to_ptr.vmem [resolvable:$true] %s33_s22  ;;  %s19_s25 = int_to_ptr.hbm [resolvable:$true] %s18_s25 }
   0x5   :  { %s4394_s26 = smov 128   ;;  %s4395_s27 = smov 8  }
   0x6   :  { %39 = dma.hbm_to_vmem [thread:$0]  %s32_s20, 12288, %s34_s22, [#allocation6], %s4394_s26, %s4394_s26, %s4395_s27  }
   0x7   :  { %s4396_s28 = smov [#allocation2]   ;;  %s44_s1 = sshll.u32 %s5616_s2, 4  ;;  %s45_s1 = int_to_ptr.hbm [resolvable:$true] %s44_s1 }
   0x8   :  { %s20_s29 = sshll.u32 %s4396_s28, 4  ;;  %s60_s8 = sshll.u32 %s5618_s4, 4  ;;  %s21_s29 = int_to_ptr.vmem [resolvable:$true] %s20_s29  ;;  %s61_s8 = int_to_ptr.hbm [resolvable:$true] %s60_s8 }
   0x9   :  { %26 = dma.hbm_to_vmem [thread:$0]  %s19_s25, 2048, %s21_s29, [#allocation3], %s4394_s26, %s4394_s26, %s4395_s27  }
   0xa   :  { %s4397_s9 = smov [#allocation7]   ;;  %s4398_s11 = smov [#allocation8]  }
   0xb   :  { %s46_s10 = sshll.u32 %s4397_s9, 4  ;;  %s62_s2 = sshll.u32 %s4398_s11, 4  ;;  %s47_s10 = int_to_ptr.vmem [resolvable:$true] %s46_s10  ;;  %s63_s2 = int_to_ptr.vmem [resolvable:$true] %s62_s2 }
   0xc   :  { %52 = dma.hbm_to_vmem [thread:$0]  %s45_s1, 12288, %s47_s10, [#allocation6], %s4394_s26, %s4394_s26, %s4395_s27  }
   0xd   :  { %65 = dma.hbm_to_vmem [thread:$0]  %s61_s8, 32, %s63_s2, [#allocation9]  }
   0xe   :  { %4385 = dma.done.wait [#allocation3], 2048  }
   0xf   :  { %4386 = vsyncadd [#allocation3], 4294965248 }
  0x10   :  { %4387 = dma.done.wait [#allocation6], 24576  }
  0x11   :  { %4388 = vsyncadd [#allocation6], 4294942720 }
  0x12   :  { %4389 = dma.done.wait [#allocation9], 32  }
  0x13   :  { %4390 = vsyncadd [#allocation9], 4294967264  ;;  %v3340_v0 = vld [vmem:[#allocation5 + $0x70] sm:$0xf]  ;;  %v4081_v1 = vld [vmem:[#allocation5 + $0x74] sm:$0xf0] }
  0x14   :  { %v3404_v2 = vld [vmem:[#allocation5 + $0xf0] sm:$0xf]  ;;  %v3341_v3 = vor.u32 %v4081_v1, %v3340_v0  ;;  %v4097_v4 = vld [vmem:[#allocation5 + $0xf4] sm:$0xf0]  ;;  %v3332_v11 = vld [vmem:[#allocation5 + $0x60] sm:$0xf] }
  0x15   :  { %v3468_v5 = vld [vmem:[#allocation5 + $0x170] sm:$0xf]  ;;  %v4113_v6 = vld [vmem:[#allocation5 + $0x174] sm:$0xf0]  ;;  %v3405_v7 = vor.u32 %v4097_v4, %v3404_v2  ;;  %v4079_v13 = vld [vmem:[#allocation5 + $0x64] sm:$0xf0] }
  0x16   :  { %v3469_v8 = vor.u32 %v4113_v6, %v3468_v5  ;;  %v3532_v9 = vld [vmem:[#allocation5 + $0x1f0] sm:$0xf]  ;;  %v4129_v10 = vld [vmem:[#allocation5 + $0x1f4] sm:$0xf0]  ;;  %975 = vmatpush.bf16.msra.mxu0 %v3341_v3  ;;  %v3396_v14 = vld [vmem:[#allocation5 + $0xe0] sm:$0xf]  ;;  %v3333_v16 = vor.u32 %v4079_v13, %v3332_v11 }
  0x17   :  { %v3533_v12 = vor.u32 %v4129_v10, %v3532_v9  ;;  %v4095_v15 = vld [vmem:[#allocation5 + $0xe4] sm:$0xf0]  ;;  %1024 = vmatpush.bf16.msra.mxu1 %v3405_v7  ;;  %v3460_v18 = vld [vmem:[#allocation5 + $0x160] sm:$0xf]  ;;  %v3324_v23 = vld [vmem:[#allocation5 + $0x50] sm:$0xf] }
  0x18   :  { %1073 = vmatpush.bf16.msra.mxu2 %v3469_v8  ;;  %v3397_v17 = vor.u32 %v4095_v15, %v3396_v14  ;;  %v4111_v19 = vld [vmem:[#allocation5 + $0x164] sm:$0xf0]  ;;  %v3524_v20 = vld [vmem:[#allocation5 + $0x1e0] sm:$0xf]  ;;  %v4077_v24 = vld [vmem:[#allocation5 + $0x54] sm:$0xf0] }
  0x19   :  { %1122 = vmatpush.bf16.msra.mxu3 %v3533_v12  ;;  %v3461_v21 = vor.u32 %v4111_v19, %v3460_v18  ;;  %v4127_v22 = vld [vmem:[#allocation5 + $0x1e4] sm:$0xf0]  ;;  %v3388_v26 = vld [vmem:[#allocation5 + $0xd0] sm:$0xf]  ;;  %v4093_v27 = vld [vmem:[#allocation5 + $0xd4] sm:$0xf0]  ;;  %v3325_v29 = vor.u32 %v4077_v24, %v3324_v23 }
  0x1a   :  { %v3525_v25 = vor.u32 %v4127_v22, %v3524_v20  ;;  %v3452_v28 = vld [vmem:[#allocation5 + $0x150] sm:$0xf]  ;;  %976 = vmatpush.bf16.msra.mxu0 %v3333_v16  ;;  %v4109_v30 = vld [vmem:[#allocation5 + $0x154] sm:$0xf0]  ;;  %v3389_v33 = vor.u32 %v4093_v27, %v3388_v26  ;;  %v3316_v35 = vld [vmem:[#allocation5 + $0x40] sm:$0xf] }
  0x1b   :  { %v3516_v31 = vld [vmem:[#allocation5 + $0x1d0] sm:$0xf]  ;;  %v4125_v32 = vld [vmem:[#allocation5 + $0x1d4] sm:$0xf0]  ;;  %1025 = vmatpush.bf16.msra.mxu1 %v3397_v17  ;;  %v3453_v34 = vor.u32 %v4109_v30, %v3452_v28  ;;  %v4075_v36 = vld [vmem:[#allocation5 + $0x44] sm:$0xf0] }
  0x1c   :  { %1074 = vmatpush.bf16.msra.mxu2 %v3461_v21  ;;  %v3380_v37 = vld [vmem:[#allocation5 + $0xc0] sm:$0xf]  ;;  %v3517_v38 = vor.u32 %v4125_v32, %v3516_v31  ;;  %v4091_v39 = vld [vmem:[#allocation5 + $0xc4] sm:$0xf0]  ;;  %v3317_v44 = vor.u32 %v4075_v36, %v3316_v35  ;;  %v3308_v47 = vld [vmem:[#allocation5 + $0x30] sm:$0xf] }
  0x1d   :  { %1123 = vmatpush.bf16.msra.mxu3 %v3525_v25  ;;  %v3444_v40 = vld [vmem:[#allocation5 + $0x140] sm:$0xf]  ;;  %v4107_v41 = vld [vmem:[#allocation5 + $0x144] sm:$0xf0]  ;;  %v3381_v45 = vor.u32 %v4091_v39, %v3380_v37  ;;  %v4073_v48 = vld [vmem:[#allocation5 + $0x34] sm:$0xf0] }
  0x1e   :  { %v3508_v42 = vld [vmem:[#allocation5 + $0x1c0] sm:$0xf]  ;;  %v4123_v43 = vld [vmem:[#allocation5 + $0x1c4] sm:$0xf0]  ;;  %977 = vmatpush.bf16.msra.mxu0 %v3325_v29  ;;  %v3445_v46 = vor.u32 %v4107_v41, %v3444_v40  ;;  %v3372_v49 = vld [vmem:[#allocation5 + $0xb0] sm:$0xf]  ;;  %v3309_v56 = vor.u32 %v4073_v48, %v3308_v47 }
  0x1f   :  { %1026 = vmatpush.bf16.msra.mxu1 %v3389_v33  ;;  %v3509_v50 = vor.u32 %v4123_v43, %v3508_v42  ;;  %v4089_v51 = vld [vmem:[#allocation5 + $0xb4] sm:$0xf0]  ;;  %v3436_v52 = vld [vmem:[#allocation5 + $0x130] sm:$0xf]  ;;  %v3300_v59 = vld [vmem:[#allocation5 + $0x20] sm:$0xf] }
  0x20   :  { %1075 = vmatpush.bf16.msra.mxu2 %v3453_v34  ;;  %v4105_v53 = vld [vmem:[#allocation5 + $0x134] sm:$0xf0]  ;;  %v3500_v54 = vld [vmem:[#allocation5 + $0x1b0] sm:$0xf]  ;;  %v3373_v57 = vor.u32 %v4089_v51, %v3372_v49  ;;  %v4071_v60 = vld [vmem:[#allocation5 + $0x24] sm:$0xf0] }
  0x21   :  { %1124 = vmatpush.bf16.msra.mxu3 %v3517_v38  ;;  %v4121_v55 = vld [vmem:[#allocation5 + $0x1b4] sm:$0xf0]  ;;  %v3437_v58 = vor.u32 %v4105_v53, %v3436_v52  ;;  %v3364_v61 = vld [vmem:[#allocation5 + $0xa0] sm:$0xf]  ;;  %v4087_v63 = vld [vmem:[#allocation5 + $0xa4] sm:$0xf0]  ;;  %v3301_v5 = vor.u32 %v4071_v60, %v3300_v59 }
  0x22   :  { %978 = vmatpush.bf16.msra.mxu0 %v3317_v44  ;;  %v3501_v62 = vor.u32 %v4121_v55, %v3500_v54  ;;  %v3428_v0 = vld [vmem:[#allocation5 + $0x120] sm:$0xf]  ;;  %v4103_v1 = vld [vmem:[#allocation5 + $0x124] sm:$0xf0]  ;;  %v3292_v4 = vld [vmem:[#allocation5 + $0x10] sm:$0xf]  ;;  %v3365_v9 = vor.u32 %v4087_v63, %v3364_v61 }
  0x23   :  { %1027 = vmatpush.bf16.msra.mxu1 %v3381_v45  ;;  %v3492_v2 = vld [vmem:[#allocation5 + $0x1a0] sm:$0xf]  ;;  %v4119_v3 = vld [vmem:[#allocation5 + $0x1a4] sm:$0xf0]  ;;  %v4069_v6 = vld [vmem:[#allocation5 + $0x14] sm:$0xf0]  ;;  %v3429_v10 = vor.u32 %v4103_v1, %v3428_v0 }
  0x24   :  { %1076 = vmatpush.bf16.msra.mxu2 %v3445_v46  ;;  %v3356_v7 = vld [vmem:[#allocation5 + $0x90] sm:$0xf]  ;;  %v4085_v8 = vld [vmem:[#allocation5 + $0x94] sm:$0xf0]  ;;  %v3493_v14 = vor.u32 %v4119_v3, %v3492_v2  ;;  %v3220_v16 = vld [vmem:[#allocation2] sm:$0xf]  ;;  %v3293_v22 = vor.u32 %v4069_v6, %v3292_v4 }
  0x25   :  { %1125 = vmatpush.bf16.msra.mxu3 %v3509_v50  ;;  %v3420_v11 = vld [vmem:[#allocation5 + $0x110] sm:$0xf]  ;;  %v4101_v12 = vld [vmem:[#allocation5 + $0x114] sm:$0xf0]  ;;  %v4051_v17 = vld [vmem:[#allocation2 + $0x4] sm:$0xf0]  ;;  %v3357_v23 = vor.u32 %v4085_v8, %v3356_v7 }
  0x26   :  { %979 = vmatpush.bf16.msra.mxu0 %v3309_v56  ;;  %v3484_v13 = vld [vmem:[#allocation5 + $0x190] sm:$0xf]  ;;  %v4117_v15 = vld [vmem:[#allocation5 + $0x194] sm:$0xf0]  ;;  %v3284_v18 = vld [vmem:[#allocation5] sm:$0xf]  ;;  %v4451_v20 = vor.u32 %v4051_v17, %v3220_v16  ;;  %v3421_v29 = vor.u32 %v4101_v12, %v3420_v11 }
  0x27   :  { %1028 = vmatpush.bf16.msra.mxu1 %v3373_v57  ;;  %v4067_v19 = vld [vmem:[#allocation5 + $0x4] sm:$0xf0]  ;;  %v4050_v21 = vld [vmem:[#allocation2 + $0x4] sm:$0xf]  ;;  %v3348_v24 = vld [vmem:[#allocation5 + $0x80] sm:$0xf]  ;;  %v3485_v35 = vor.u32 %v4117_v15, %v3484_v13 }
  0x28   :  { %1077 = vmatpush.bf16.msra.mxu2 %v3437_v58  ;;  %v4083_v25 = vld [vmem:[#allocation5 + $0x84] sm:$0xf0]  ;;  %v3412_v26 = vld [vmem:[#allocation5 + $0x100] sm:$0xf]  ;;  %v3222_v28 = vld [vmem:[#allocation2 + $0x8] sm:$0xf0]  ;;  %v3285_v41 = vor.u32 %v4067_v19, %v3284_v18 }
  0x29   :  { %1126 = vmatpush.bf16.msra.mxu3 %v3501_v62  ;;  %v4099_v27 = vld [vmem:[#allocation5 + $0x104] sm:$0xf0]  ;;  %v3476_v30 = vld [vmem:[#allocation5 + $0x180] sm:$0xf]  ;;  %v164_v32 = vshrl.u32 %v4451_v20, 16  ;;  %v167_v33 = vshll.u32 %v4451_v20, 16  ;;  %v4455_v34 = vor.u32 %v4050_v21, %v3222_v28  ;;  %v3349_v46 = vor.u32 %v4083_v25, %v3348_v24 }
  0x2a   :  { %980 = vmatpush.bf16.msra.mxu0 %v3301_v5  ;;  %v4115_v31 = vld [vmem:[#allocation5 + $0x184] sm:$0xf0]  ;;  %vm291_vm0 = vcmask 1040384   ;;  %vm292_vm1 = vsmask.f32 256  ;;  %v3413_v47 = vor.u32 %v4099_v27, %v3412_v26  ;;  %v5649_v49 = vmov 0 }
  0x2b   :  { %1029 = vmatpush.bf16.msra.mxu1 %v3365_v9  ;;  %v4080_v36 = vld [vmem:[#allocation5 + $0x74] sm:$0xf]  ;;  %v166_v37 = vrot.slane %v164_v32, 7  ;;  %v171_v38 = vshrl.u32 %v4455_v34, 16  ;;  %v174_v39 = vshll.u32 %v4455_v34, 16  ;;  %vm4465_vm2 = vmand %vm291_vm0, %vm292_vm1  ;;  %v3477_v53 = vor.u32 %v4115_v31, %v3476_v30  ;;  %s3203_s16 = sshll.u32 %s5619_s5, 4  ;;  %s3204_s16 = int_to_ptr.hbm [resolvable:$true] %s3203_s16 }
  0x2c   :  { %1078 = vmatpush.bf16.msra.mxu2 %v3429_v10  ;;  %v3342_v40 = vld [vmem:[#allocation5 + $0x78] sm:$0xf0]  ;;  %v3596_v42 = vld [vmem:[#allocation5 + $0x270] sm:$0xf]  ;;  %v4145_v43 = vld [vmem:[#allocation5 + $0x274] sm:$0xf0] }
  0x2d   :  { %1127 = vmatpush.bf16.msra.mxu3 %v3493_v14  ;;  %v4096_v44 = vld [vmem:[#allocation5 + $0xf4] sm:$0xf]  ;;  %v3406_v45 = vld [vmem:[#allocation5 + $0xf8] sm:$0xf0]  ;;  %v169_v48 = vor.u32 %v167_v33, %v166_v37  ;;  %v5650_v49 = vsel %vm4465_vm2, 4294967295, %v5649_v49  ;;  %v173_v50 = vrot.slane %v171_v38, 7  ;;  %v3345_v54 = vor.u32 %v4080_v36, %v3342_v40 }
  0x2e   :  { %981 = vmatpush.bf16.msra.mxu0 %v3293_v22  ;;  %5651 = vst [vmem:[#allocation15_spill] sm:$0xff] %v5650_v49  ;;  %v3228_v51 = vld [vmem:[#allocation2 + $0x10] sm:$0xf]  ;;  %v4053_v52 = vld [vmem:[#allocation2 + $0x14] sm:$0xf0]  ;;  %v3409_v59 = vor.u32 %v4096_v44, %v3406_v45  ;;  %v3597_v4 = vor.u32 %v4145_v43, %v3596_v42  ;;  %vm358_vm3 = vcmask 1047552  }
  0x2f   :  { %1030 = vmatpush.bf16.msra.mxu1 %v3357_v23  ;;  %v3660_v55 = vld [vmem:[#allocation5 + $0x2f0] sm:$0xf]  ;;  %v4052_v56 = vld [vmem:[#allocation2 + $0x14] sm:$0xf]  ;;  %v3230_v57 = vld [vmem:[#allocation2 + $0x18] sm:$0xf0]  ;;  %v176_v58 = vor.u32 %v174_v39, %v173_v50  ;;  %v4477_v0 = vor.u32 %v4053_v52, %v3228_v51 }
  0x30   :  { %1079 = vmatpush.bf16.msra.mxu2 %v3421_v29  ;;  %v4161_v60 = vld [vmem:[#allocation5 + $0x2f4] sm:$0xf0]  ;;  %v4078_v61 = vld [vmem:[#allocation5 + $0x64] sm:$0xf]  ;;  %v3334_v62 = vld [vmem:[#allocation5 + $0x68] sm:$0xf0]  ;;  %v4483_v5 = vor.u32 %v4052_v56, %v3230_v57 }
  0x31   :  { %1128 = vmatpush.bf16.msra.mxu3 %v3485_v35  ;;  %v4475_v63 = vsel %vm4465_vm2, 0, %v169_v48  ;;  %v4094_v1 = vld [vmem:[#allocation5 + $0xe4] sm:$0xf]  ;;  %v3398_v2 = vld [vmem:[#allocation5 + $0xe8] sm:$0xf0]  ;;  %v4481_v3 = vsel %vm4465_vm2, 0, %v176_v58  ;;  %v3661_v6 = vor.u32 %v4161_v60, %v3660_v55  ;;  %v3337_v7 = vor.u32 %v4078_v61, %v3334_v62 }
  0x32   :  { %982 = vmatpush.bf16.msra.mxu0 %v3285_v41  ;;  %v3588_v8 = vld [vmem:[#allocation5 + $0x260] sm:$0xf]  ;;  %v4143_v9 = vld [vmem:[#allocation5 + $0x264] sm:$0xf0]  ;;  %v3401_v10 = vor.u32 %v4094_v1, %v3398_v2  ;;  %v178_v13 = vshrl.u32 %v4477_v0, 16  ;;  %v185_v14 = vshrl.u32 %v4483_v5, 16 }
  0x33   :  { %1031 = vmatpush.bf16.msra.mxu1 %v3349_v46  ;;  %v3652_v11 = vld [vmem:[#allocation5 + $0x2e0] sm:$0xf]  ;;  %v4159_v12 = vld [vmem:[#allocation5 + $0x2e4] sm:$0xf0]  ;;  %v3589_v15 = vor.u32 %v4143_v9, %v3588_v8  ;;  %v4076_v16 = vld [vmem:[#allocation5 + $0x54] sm:$0xf] }
  0x34   :  { %1080 = vmatpush.bf16.msra.mxu2 %v3413_v47  ;;  %v3653_v17 = vor.u32 %v4159_v12, %v3652_v11  ;;  %v3326_v18 = vld [vmem:[#allocation5 + $0x58] sm:$0xf0]  ;;  %v3580_v21 = vld [vmem:[#allocation5 + $0x250] sm:$0xf]  ;;  %v4141_v22 = vld [vmem:[#allocation5 + $0x254] sm:$0xf0] }
  0x35   :  { %1129 = vmatpush.bf16.msra.mxu3 %v3477_v53  ;;  %983 = vmatmul.bf16.vlgmr.msra.gmra.mxu0 %v4475_v63  ;;  %v3329_v19 = vor.u32 %v4076_v16, %v3326_v18  ;;  %v180_v23 = vrot.slane %v178_v13, 7  ;;  %v181_v24 = vshll.u32 %v4477_v0, 16  ;;  %v4092_v25 = vld [vmem:[#allocation5 + $0xd4] sm:$0xf]  ;;  %v3390_v26 = vld [vmem:[#allocation5 + $0xd8] sm:$0xf0]  ;;  %v3581_v29 = vor.u32 %v4141_v22, %v3580_v21 }
  0x36   :  { %1032 = vmatmul.bf16.vlgmr.msra.gmra.mxu1 %v4481_v3  ;;  %1171 = vmatpush.bf16.msrb.mxu0 %v3597_v4  ;;  %v187_v27 = vrot.slane %v185_v14, 7  ;;  %v188_v28 = vshll.u32 %v4483_v5, 16  ;;  %v3393_v30 = vor.u32 %v4092_v25, %v3390_v26  ;;  %v3644_v31 = vld [vmem:[#allocation5 + $0x2d0] sm:$0xf]  ;;  %v4157_v35 = vld [vmem:[#allocation5 + $0x2d4] sm:$0xf0] }
  0x37   :  { %1081 = vmatmul.bf16.vlgmr.msra.gmra.mxu2 %v4451_v20  ;;  %1220 = vmatpush.bf16.msrb.mxu1 %v3661_v6  ;;  %v3645_v36 = vor.u32 %v4157_v35, %v3644_v31  ;;  %v183_v37 = vor.u32 %v181_v24, %v180_v23  ;;  %v3236_v40 = vld [vmem:[#allocation2 + $0x20] sm:$0xf]  ;;  %v4055_v42 = vld [vmem:[#allocation2 + $0x24] sm:$0xf0]  ;;  %v4054_v43 = vld [vmem:[#allocation2 + $0x24] sm:$0xf] }
  0x38   :  { %1269 = vmatpush.bf16.msrb.mxu2 %v3345_v54  ;;  %1130 = vmatmul.bf16.vlgmr.msra.gmra.mxu3 %v4455_v34  ;;  %v190_v41 = vor.u32 %v188_v28, %v187_v27  ;;  %v3238_v44 = vld [vmem:[#allocation2 + $0x28] sm:$0xf0]  ;;  %v4505_v46 = vor.u32 %v4055_v42, %v3236_v40  ;;  %v4074_v52 = vld [vmem:[#allocation5 + $0x44] sm:$0xf]  ;;  %v3572_v54 = vld [vmem:[#allocation5 + $0x240] sm:$0xf] }
  0x39   :  { %1318 = vmatpush.bf16.msrb.mxu3 %v3409_v59  ;;  %v4503_v45 = vsel %vm4465_vm2, 0, %v183_v37  ;;  %v4507_v47 = vor.u32 %v4054_v43, %v3238_v44  ;;  %v3318_v53 = vld [vmem:[#allocation5 + $0x48] sm:$0xf0]  ;;  %v4139_v56 = vld [vmem:[#allocation5 + $0x244] sm:$0xf0] }
  0x3a   :  { %1172 = vmatpush.bf16.msrb.mxu0 %v3589_v15  ;;  %v4511_v48 = vsel %vm4465_vm2, 0, %v190_v41  ;;  %v192_v50 = vshrl.u32 %v4505_v46, 16  ;;  %v3321_v55 = vor.u32 %v4074_v52, %v3318_v53  ;;  %v4090_v57 = vld [vmem:[#allocation5 + $0xc4] sm:$0xf]  ;;  %v3382_v58 = vld [vmem:[#allocation5 + $0xc8] sm:$0xf0]  ;;  %v3573_v59 = vor.u32 %v4139_v56, %v3572_v54 }
  0x3b   :  { %1221 = vmatpush.bf16.msrb.mxu1 %v3653_v17  ;;  %v199_v51 = vshrl.u32 %v4507_v47, 16  ;;  %v3385_v60 = vor.u32 %v4090_v57, %v3382_v58  ;;  %v3636_v61 = vld [vmem:[#allocation5 + $0x2c0] sm:$0xf]  ;;  %v4155_v62 = vld [vmem:[#allocation5 + $0x2c4] sm:$0xf0]  ;;  %v195_v2 = vshll.u32 %v4505_v46, 16 }
  0x3c   :  { %1270 = vmatpush.bf16.msrb.mxu2 %v3337_v7  ;;  %v194_v1 = vrot.slane %v192_v50, 7  ;;  %v3637_v4 = vor.u32 %v4155_v62, %v3636_v61  ;;  %v202_v7 = vshll.u32 %v4507_v47, 16  ;;  %v3244_v9 = vld [vmem:[#allocation2 + $0x30] sm:$0xf]  ;;  %v4057_v11 = vld [vmem:[#allocation2 + $0x34] sm:$0xf0] }
  0x3d   :  { %1319 = vmatpush.bf16.msrb.mxu3 %v3401_v10  ;;  %v201_v6 = vrot.slane %v199_v51, 7  ;;  %v4056_v12 = vld [vmem:[#allocation2 + $0x34] sm:$0xf]  ;;  %v3246_v15 = vld [vmem:[#allocation2 + $0x38] sm:$0xf0]  ;;  %v4533_v17 = vor.u32 %v4057_v11, %v3244_v9 }
  0x3e   :  { %1173 = vmatpush.bf16.msrb.mxu0 %v3581_v29  ;;  %v197_v8 = vor.u32 %v195_v2, %v194_v1  ;;  %v4535_v18 = vor.u32 %v4056_v12, %v3246_v15  ;;  %v4072_v23 = vld [vmem:[#allocation5 + $0x34] sm:$0xf]  ;;  %v3310_v25 = vld [vmem:[#allocation5 + $0x38] sm:$0xf0]  ;;  %v3564_v26 = vld [vmem:[#allocation5 + $0x230] sm:$0xf] }
  0x3f   :  { %1222 = vmatpush.bf16.msrb.mxu1 %v3645_v36  ;;  %v204_v10 = vor.u32 %v202_v7, %v201_v6  ;;  %v5637_v21 = vshrl.u32 %v4533_v17, 16  ;;  %v3313_v27 = vor.u32 %v4072_v23, %v3310_v25  ;;  %v4137_v29 = vld [vmem:[#allocation5 + $0x234] sm:$0xf0]  ;;  %v3374_v31 = vld [vmem:[#allocation5 + $0xb8] sm:$0xf0]  ;;  %v209_v42 = vshll.u32 %v4533_v17, 16 }
  0x40   :  { %1271 = vmatpush.bf16.msrb.mxu2 %v3329_v19  ;;  %v4531_v16 = vsel %vm4465_vm2, 0, %v197_v8  ;;  %v5636_v22 = vshrl.u32 %v4535_v18, 16  ;;  %v3565_v35 = vor.u32 %v4137_v29, %v3564_v26  ;;  %v3628_v37 = vld [vmem:[#allocation5 + $0x2b0] sm:$0xf]  ;;  %v4153_v40 = vld [vmem:[#allocation5 + $0x2b4] sm:$0xf0] }
  0x41   :  { %1320 = vmatpush.bf16.msrb.mxu3 %v3393_v30  ;;  %v4539_v19 = vsel %vm4465_vm2, 0, %v204_v10  ;;  %v4088_v30 = vld [vmem:[#allocation5 + $0xb4] sm:$0xf]  ;;  %v208_v41 = vrot.slane %v5637_v21, 7  ;;  %v3629_v43 = vor.u32 %v4153_v40, %v3628_v37  ;;  %v216_v52 = vshll.u32 %v4535_v18, 16 }
  0x42   :  { %1174 = vmatpush.bf16.msrb.mxu0 %v3573_v59  ;;  %v3377_v36 = vor.u32 %v4088_v30, %v3374_v31  ;;  %v215_v44 = vrot.slane %v5636_v22, 7  ;;  %v3252_v54 = vld [vmem:[#allocation2 + $0x40] sm:$0xf]  ;;  %v4059_v56 = vld [vmem:[#allocation2 + $0x44] sm:$0xf0]  ;;  %v314_v22 = vrot.slane %v181_v24, 1 }
  0x43   :  { %1223 = vmatpush.bf16.msrb.mxu1 %v3637_v4  ;;  %v211_v53 = vor.u32 %v209_v42, %v208_v41  ;;  %v4058_v57 = vld [vmem:[#allocation2 + $0x44] sm:$0xf]  ;;  %v3254_v58 = vld [vmem:[#allocation2 + $0x48] sm:$0xf0]  ;;  %v3556_v9 = vld [vmem:[#allocation5 + $0x220] sm:$0xf] }
  0x44   :  { %1272 = vmatpush.bf16.msrb.mxu2 %v3321_v55  ;;  %v218_v55 = vor.u32 %v216_v52, %v215_v44  ;;  %v4563_v61 = vor.u32 %v4058_v57, %v3254_v58  ;;  %v4070_v6 = vld [vmem:[#allocation5 + $0x24] sm:$0xf]  ;;  %v3302_v8 = vld [vmem:[#allocation5 + $0x28] sm:$0xf0]  ;;  %v4135_v11 = vld [vmem:[#allocation5 + $0x224] sm:$0xf0] }
  0x45   :  { %988 = vmatmul.bf16.gmra.mxu0 %v4503_v45  ;;  %1321 = vmatpush.bf16.msrb.mxu3 %v3385_v60  ;;  %v4559_v59 = vsel %vm4465_vm2, 0, %v211_v53  ;;  %v4561_v60 = vor.u32 %v4059_v56, %v3252_v54  ;;  %v3305_v10 = vor.u32 %v4070_v6, %v3302_v8  ;;  %v4086_v12 = vld [vmem:[#allocation5 + $0xa4] sm:$0xf]  ;;  %v3366_v15 = vld [vmem:[#allocation5 + $0xa8] sm:$0xf0]  ;;  %v3557_v23 = vor.u32 %v4135_v11, %v3556_v9 }
  0x46   :  { %1037 = vmatmul.bf16.gmra.mxu1 %v4511_v48  ;;  %1175 = vmatpush.bf16.msrb.mxu0 %v3565_v35  ;;  %v4567_v62 = vsel %vm4465_vm2, 0, %v218_v55  ;;  %v5624_v4 = vshrl.u32 %v4563_v61, 16  ;;  %v3369_v25 = vor.u32 %v4086_v12, %v3366_v15  ;;  %v3620_v26 = vld [vmem:[#allocation5 + $0x2a0] sm:$0xf]  ;;  %v3260_v40 = vld [vmem:[#allocation2 + $0x50] sm:$0xf] }
  0x47   :  { %1086 = vmatmul.bf16.gmra.mxu2 %v4477_v0  ;;  %1224 = vmatpush.bf16.msrb.mxu1 %v3629_v43  ;;  %v5629_v1 = vshrl.u32 %v4561_v60, 16  ;;  %v5635_v30 = vshll.u32 %v4561_v60, 16  ;;  %v4061_v43 = vld [vmem:[#allocation2 + $0x54] sm:$0xf0]  ;;  %v4060_v44 = vld [vmem:[#allocation2 + $0x54] sm:$0xf] }
  0x48   :  { %1135 = vmatmul.bf16.gmra.mxu3 %v4483_v5  ;;  %1273 = vmatpush.bf16.msrb.mxu2 %v3313_v27  ;;  %v4151_v27 = vld [vmem:[#allocation5 + $0x2a4] sm:$0xf0]  ;;  %v229_v35 = vrot.slane %v5624_v4, 7  ;;  %v3262_v53 = vld [vmem:[#allocation2 + $0x58] sm:$0xf0]  ;;  %v4589_v55 = vor.u32 %v4061_v43, %v3260_v40  ;;  %v316_v21 = vrot.slane %v188_v28, 1 }
  0x49   :  { %1322 = vmatpush.bf16.msrb.mxu3 %v3377_v36  ;;  %v222_v29 = vrot.slane %v5629_v1, 7  ;;  %v3621_v31 = vor.u32 %v4151_v27, %v3620_v26  ;;  %v5630_v36 = vshll.u32 %v4563_v61, 16  ;;  %v4591_v56 = vor.u32 %v4060_v44, %v3262_v53  ;;  %v4068_v8 = vld [vmem:[#allocation5 + $0x14] sm:$0xf]  ;;  %v3294_v9 = vld [vmem:[#allocation5 + $0x18] sm:$0xf0] }
  0x4a   :  { %1176 = vmatpush.bf16.msrb.mxu0 %v3557_v23  ;;  %v5621_v58 = vshrl.u32 %v4589_v55, 16  ;;  %v3297_v11 = vor.u32 %v4068_v8, %v3294_v9  ;;  %v4133_v12 = vld [vmem:[#allocation5 + $0x214] sm:$0xf0]  ;;  %v4084_v15 = vld [vmem:[#allocation5 + $0x94] sm:$0xf]  ;;  %v317_v24 = vor.u32 %v316_v21, %v185_v14 }
  0x4b   :  { %1225 = vmatpush.bf16.msrb.mxu1 %v3621_v31  ;;  %v225_v37 = vor.u32 %v5635_v30, %v222_v29  ;;  %v232_v41 = vor.u32 %v5630_v36, %v229_v35  ;;  %v5620_v6 = vshrl.u32 %v4591_v56, 16  ;;  %v3358_v23 = vld [vmem:[#allocation5 + $0x98] sm:$0xf0]  ;;  %v3612_v27 = vld [vmem:[#allocation5 + $0x290] sm:$0xf]  ;;  %v5623_v35 = vshll.u32 %v4589_v55, 16 }
  0x4c   :  { %1274 = vmatpush.bf16.msrb.mxu2 %v3305_v10  ;;  %v3548_v10 = vld [vmem:[#allocation5 + $0x210] sm:$0xf]  ;;  %v3361_v26 = vor.u32 %v4084_v15, %v3358_v23  ;;  %v4149_v29 = vld [vmem:[#allocation5 + $0x294] sm:$0xf0]  ;;  %v236_v31 = vrot.slane %v5621_v58, 7 }
  0x4d   :  { %1323 = vmatpush.bf16.msrb.mxu3 %v3369_v25  ;;  %v4587_v54 = vsel %vm4465_vm2, 0, %v225_v37  ;;  %v4595_v57 = vsel %vm4465_vm2, 0, %v232_v41  ;;  %v3549_v25 = vor.u32 %v4133_v12, %v3548_v10  ;;  %v3613_v37 = vor.u32 %v4149_v29, %v3612_v27  ;;  %v3268_v44 = vld [vmem:[#allocation2 + $0x60] sm:$0xf]  ;;  %v4063_v8 = vld [vmem:[#allocation2 + $0x64] sm:$0xf0] }
  0x4e   :  { %v243_v40 = vrot.slane %v5620_v6, 7  ;;  %v5622_v41 = vshll.u32 %v4591_v56, 16  ;;  %v239_v43 = vor.u32 %v5623_v35, %v236_v31  ;;  %v4062_v9 = vld [vmem:[#allocation2 + $0x64] sm:$0xf]  ;;  %v3270_v10 = vld [vmem:[#allocation2 + $0x68] sm:$0xf0]  ;;  %v4617_v12 = vor.u32 %v4063_v8, %v3268_v44 }
  0x4f   :  { %1177 = vmatpush.bf16.msrb.mxu0 %v3549_v25  ;;  %1226 = vmatpush.bf16.msrb.mxu1 %v3613_v37  ;;  %v4619_v15 = vor.u32 %v4062_v9, %v3270_v10  ;;  %v4066_v27 = vld [vmem:[#allocation5 + $0x4] sm:$0xf]  ;;  %v3286_v29 = vld [vmem:[#allocation5 + $0x8] sm:$0xf0]  ;;  %v3540_v31 = vld [vmem:[#allocation5 + $0x200] sm:$0xf] }
  0x50   :  { %1275 = vmatpush.bf16.msrb.mxu2 %v3297_v11  ;;  %v246_v53 = vor.u32 %v5622_v41, %v243_v40  ;;  %v4615_v11 = vsel %vm4465_vm2, 0, %v239_v43  ;;  %v5626_v25 = vshrl.u32 %v4617_v12, 16  ;;  %v3289_v37 = vor.u32 %v4066_v27, %v3286_v29  ;;  %v4131_v40 = vld [vmem:[#allocation5 + $0x204] sm:$0xf0]  ;;  %v4082_v43 = vld [vmem:[#allocation5 + $0x84] sm:$0xf] }
  0x51   :  { %1324 = vmatpush.bf16.msrb.mxu3 %v3361_v26  ;;  %v5625_v26 = vshrl.u32 %v4619_v15, 16  ;;  %v3350_v44 = vld [vmem:[#allocation5 + $0x88] sm:$0xf0]  ;;  %v3604_v9 = vld [vmem:[#allocation5 + $0x280] sm:$0xf]  ;;  %v5628_v58 = vshll.u32 %v4617_v12, 16 }
  0x52   :  { %v4623_v23 = vsel %vm4465_vm2, 0, %v246_v53  ;;  %v3541_v53 = vor.u32 %v4131_v40, %v3540_v31  ;;  %v3353_v8 = vor.u32 %v4082_v43, %v3350_v44  ;;  %v4147_v10 = vld [vmem:[#allocation5 + $0x284] sm:$0xf0]  ;;  %v250_v6 = vrot.slane %v5626_v25, 7  ;;  %v3276_v29 = vld [vmem:[#allocation2 + $0x70] sm:$0xf] }
  0x53   :  { %v3605_v41 = vor.u32 %v4147_v10, %v3604_v9  ;;  %v257_v35 = vrot.slane %v5625_v26, 7  ;;  %v5627_v4 = vshll.u32 %v4619_v15, 16  ;;  %v4065_v40 = vld [vmem:[#allocation2 + $0x74] sm:$0xf0]  ;;  %v4064_v43 = vld [vmem:[#allocation2 + $0x74] sm:$0xf] }
  0x54   :  { %1276 = vmatpush.bf16.msrb.mxu2 %v3289_v37  ;;  %1178 = vmatpush.bf16.msrb.mxu0 %v3541_v53  ;;  %v253_v27 = vor.u32 %v5628_v58, %v250_v6  ;;  %v3278_v44 = vld [vmem:[#allocation2 + $0x78] sm:$0xf0]  ;;  %v4645_v9 = vor.u32 %v4065_v40, %v3276_v29  ;;  %v4144_v53 = vld [vmem:[#allocation5 + $0x274] sm:$0xf]  ;;  %vm359_vm4 = vsmask.f32 7424 }
  0x55   :  { %993 = vmatmul.bf16.gmra.mxu0 %v4531_v16  ;;  %1325 = vmatpush.bf16.msrb.mxu3 %v3353_v8  ;;  %v260_v31 = vor.u32 %v5627_v4, %v257_v35  ;;  %v4647_v10 = vor.u32 %v4064_v43, %v3278_v44  ;;  %v3598_v8 = vld [vmem:[#allocation5 + $0x278] sm:$0xf0]  ;;  %v4160_v43 = vld [vmem:[#allocation5 + $0x2f4] sm:$0xf]  ;;  %vm4695_vm5 = vmand %vm358_vm3, %vm359_vm4 }
  0x56   :  { %1042 = vmatmul.bf16.gmra.mxu1 %v4539_v19  ;;  %v4643_v37 = vsel %vm4465_vm2, 0, %v253_v27  ;;  %v5632_v6 = vshrl.u32 %v4645_v9, 16  ;;  %v4112_v27 = vld [vmem:[#allocation5 + $0x174] sm:$0xf]  ;;  %v3601_v29 = vor.u32 %v4144_v53, %v3598_v8  ;;  %v3470_v40 = vld [vmem:[#allocation5 + $0x178] sm:$0xf0] }
  0x57   :  { %1091 = vmatmul.bf16.gmra.mxu2 %v4505_v46  ;;  %1227 = vmatpush.bf16.msrb.mxu1 %v3605_v41  ;;  %v4651_v41 = vsel %vm4465_vm2, 0, %v260_v31  ;;  %v5631_v35 = vshrl.u32 %v4647_v10, 16  ;;  %v3662_v31 = vld [vmem:[#allocation5 + $0x2f8] sm:$0xf0]  ;;  %v3473_v44 = vor.u32 %v4112_v27, %v3470_v40  ;;  %v5634_v4 = vshll.u32 %v4645_v9, 16 }
  0x58   :  { %1140 = vmatmul.bf16.gmra.mxu3 %v4507_v47  ;;  %v3665_v26 = vor.u32 %v4160_v43, %v3662_v31  ;;  %v264_v25 = vrot.slane %v5632_v6, 7  ;;  %1465 = vmatpush.bf16.msra.mxu2 %v3601_v29  ;;  %v5633_v1 = vshll.u32 %v4647_v10, 16  ;;  %v4128_v36 = vld [vmem:[#allocation5 + $0x1f4] sm:$0xf]  ;;  %v3534_v53 = vld [vmem:[#allocation5 + $0x1f8] sm:$0xf0] }
  0x59   :  { %v271_v58 = vrot.slane %v5631_v35, 7  ;;  %1367 = vmatpush.bf16.msra.mxu0 %v3473_v44  ;;  %v3537_v8 = vor.u32 %v4128_v36, %v3534_v53  ;;  %v4142_v36 = vld [vmem:[#allocation5 + $0x264] sm:$0xf]  ;;  %v3462_v31 = vld [vmem:[#allocation5 + $0x168] sm:$0xf0]  ;;  %v312_v6 = vrot.slane %v174_v39, 1 }
  0x5a   :  { %1514 = vmatpush.bf16.msra.mxu3 %v3665_v26  ;;  %v267_v27 = vor.u32 %v5634_v4, %v264_v25  ;;  %v3590_v25 = vld [vmem:[#allocation5 + $0x268] sm:$0xf0]  ;;  %v4158_v44 = vld [vmem:[#allocation5 + $0x2e4] sm:$0xf]  ;;  %v4686_v35 = vld [vmem:[%s5617_s3] sm:$0x3] }
  0x5b   :  { %v274_v40 = vor.u32 %v5633_v1, %v271_v58  ;;  %1416 = vmatpush.bf16.msra.mxu1 %v3537_v8  ;;  %v4110_v58 = vld [vmem:[#allocation5 + $0x164] sm:$0xf]  ;;  %v3593_v26 = vor.u32 %v4142_v36, %v3590_v25  ;;  %v3654_v53 = vld [vmem:[#allocation5 + $0x2e8] sm:$0xf0]  ;;  %s4399_s3 = smov [#allocation10]  }
  0x5c   :  { %v4671_v29 = vsel %vm4465_vm2, 0, %v267_v27  ;;  %v3465_v8 = vor.u32 %v4110_v58, %v3462_v31  ;;  %v3657_v27 = vor.u32 %v4158_v44, %v3654_v53  ;;  %v4126_v36 = vld [vmem:[#allocation5 + $0x1e4] sm:$0xf]  ;;  %v3526_v25 = vld [vmem:[#allocation5 + $0x1e8] sm:$0xf0]  ;;  %v313_v44 = vor.u32 %v312_v6, %v171_v38  ;;  %s3201_s13 = sshll.u32 %s4399_s3, 4  ;;  %s3202_s13 = int_to_ptr.vmem [resolvable:$true] %s3201_s13 }
  0x5d   :  { %v4675_v43 = vsel %vm4465_vm2, 0, %v274_v40  ;;  %v310_v40 = vrot.slane %v167_v33, 1  ;;  %1466 = vmatpush.bf16.msra.mxu2 %v3593_v26  ;;  %v3529_v58 = vor.u32 %v4126_v36, %v3526_v25  ;;  %v4693_v33 = vperm.slane %v4686_v35, 0  ;;  %v4140_v38 = vld [vmem:[#allocation5 + $0x254] sm:$0xf] }
  0x5e   :  { %1368 = vmatpush.bf16.msra.mxu0 %v3465_v8  ;;  %1515 = vmatpush.bf16.msra.mxu3 %v3657_v27  ;;  %v5652_v26 = vmov 0  ;;  %v3582_v6 = vld [vmem:[#allocation5 + $0x258] sm:$0xf0]  ;;  %v4108_v36 = vld [vmem:[#allocation5 + $0x154] sm:$0xf] }
  0x5f   :  { %v311_v31 = vor.u32 %v310_v40, %v164_v32  ;;  %v5653_v26 = vsel %vm4695_vm5, 4294967295, %v5652_v26  ;;  %1417 = vmatpush.bf16.msra.mxu1 %v3529_v58  ;;  %v4708_v32 = vsel %vm4695_vm5, %v313_v44, 0  ;;  %v3585_v25 = vor.u32 %v4140_v38, %v3582_v6  ;;  %v3454_v58 = vld [vmem:[#allocation5 + $0x158] sm:$0xf0]  ;;  %v4124_v6 = vld [vmem:[#allocation5 + $0x1d4] sm:$0xf] }
  0x60   :  { %5654 = vst [vmem:[#allocation16_spill] sm:$0xff] %v5653_v26  ;;  %v3457_v4 = vor.u32 %v4108_v36, %v3454_v58  ;;  %v3518_v36 = vld [vmem:[#allocation5 + $0x1d8] sm:$0xf0]  ;;  %v4138_v14 = vld [vmem:[#allocation5 + $0x244] sm:$0xf] }
  0x61   :  { %v4703_v53 = vsel %vm4695_vm5, %v311_v31, 0  ;;  %v4156_v31 = vld [vmem:[#allocation5 + $0x2d4] sm:$0xf]  ;;  %1467 = vmatpush.bf16.msra.mxu2 %v3585_v25  ;;  %v3574_v21 = vld [vmem:[#allocation5 + $0x248] sm:$0xf0] }
  0x62   :  { %1369 = vmatpush.bf16.msra.mxu0 %v3457_v4 }
  0x65   :  { %998 = vmatmul.bf16.gmra.mxu0 %v4559_v59 }
  0x66   :  { %1047 = vmatmul.bf16.gmra.mxu1 %v4567_v62 }
  0x67   :  { %1096 = vmatmul.bf16.gmra.mxu2 %v4533_v17 }
  0x68   :  { %1145 = vmatmul.bf16.gmra.mxu3 %v4535_v18 }
  0x75   :  { %1003 = vmatmul.bf16.gmra.mxu0 %v4587_v54 }
  0x76   :  { %1052 = vmatmul.bf16.gmra.mxu1 %v4595_v57 }
  0x77   :  { %1101 = vmatmul.bf16.gmra.mxu2 %v4561_v60 }
  0x78   :  { %1150 = vmatmul.bf16.gmra.mxu3 %v4563_v61 }
  0x85   :  { %1008 = vmatmul.bf16.gmra.mxu0 %v4615_v11 }
  0x86   :  { %1057 = vmatmul.bf16.gmra.mxu1 %v4623_v23 }
  0x87   :  { %1106 = vmatmul.bf16.gmra.mxu2 %v4589_v55 }
  0x88   :  { %1155 = vmatmul.bf16.gmra.mxu3 %v4591_v56 }
  0x95   :  { %1013 = vmatmul.bf16.gmra.mxu0 %v4643_v37 }
  0x96   :  { %1062 = vmatmul.bf16.gmra.mxu1 %v4651_v41 }
  0x97   :  { %1111 = vmatmul.bf16.gmra.mxu2 %v4617_v12 }
  0x98   :  { %1160 = vmatmul.bf16.gmra.mxu3 %v4619_v15 }
  0xa5   :  { %1018 = vmatmul.bf16.gmra.mxu0 %v4671_v29 }
  0xa6   :  { %1067 = vmatmul.bf16.gmra.mxu1 %v4675_v43 }
  0xa7   :  { %1116 = vmatmul.bf16.gmra.mxu2 %v4645_v9 }
  0xa8   :  { %1165 = vmatmul.bf16.gmra.mxu3 %v4647_v10 }
  0xb2   :  { %v984_v39 = vpop.f32.mrf.mxu0 }
  0xb3   :  { %v985_v8 = vadd.f32 %v984_v39, %v4693_v33  ;;  %v1033_v27 = vpop.f32.mrf.mxu1  ;;  %v3646_v39 = vld [vmem:[#allocation5 + $0x2d8] sm:$0xf0] }
  0xb4   :  { %v3649_v44 = vor.u32 %v4156_v31, %v3646_v39 }
  0xb5   :  { %v1034_v40 = vadd.f32 %v1033_v27, %v985_v8  ;;  %1179 = vmatmul.bf16.vlgmr.msrb.gmra.mxu0 %v4703_v53 }
  0xb6   :  { %1228 = vmatmul.bf16.vlgmr.msrb.gmra.mxu1 %v4708_v32  ;;  %1516 = vmatpush.bf16.msra.mxu3 %v3649_v44  ;;  %v4732_v44 = vsel %vm4695_vm5, %v317_v24, 0 }
  0xb7   :  { %1277 = vmatmul.bf16.vlgmr.msrb.gmra.mxu2 %v4475_v63 }
  0xb8   :  { %1326 = vmatmul.bf16.vlgmr.msrb.gmra.mxu3 %v4481_v3 }
  0xba   :  { %v1082_v1 = vpop.f32.mrf.mxu2  ;;  %v986_v27 = vpop.f32.mrf.mxu0 }
  0xbb   :  { %v1083_v30 = vadd.f32 %v1082_v1, %v1034_v40  ;;  %v1131_v8 = vpop.f32.mrf.mxu3  ;;  %v987_v63 = vadd.f32 %v986_v27, %v4693_v33  ;;  %v1035_v3 = vpop.f32.mrf.mxu1  ;;  %v3521_v1 = vor.u32 %v4124_v6, %v3518_v36  ;;  %v315_v40 = vor.u32 %v314_v22, %v178_v13  ;;  %v4154_v6 = vld [vmem:[#allocation5 + $0x2c4] sm:$0xf]  ;;  %v3638_v36 = vld [vmem:[#allocation5 + $0x2c8] sm:$0xf0] }
  0xbd   :  { %v4719_v38 = vadd.f32 %v1131_v8, %v1083_v30  ;;  %v1036_v58 = vadd.f32 %v1035_v3, %v987_v63  ;;  %1418 = vmatpush.bf16.msra.mxu1 %v3521_v1  ;;  %v4727_v28 = vsel %vm4695_vm5, %v315_v40, 0  ;;  %v4106_v8 = vld [vmem:[#allocation5 + $0x144] sm:$0xf]  ;;  %v3577_v63 = vor.u32 %v4138_v14, %v3574_v21  ;;  %v3446_v3 = vld [vmem:[#allocation5 + $0x148] sm:$0xf0] }
  0xbe   :  { %v3449_v1 = vor.u32 %v4106_v8, %v3446_v3  ;;  %v3641_v40 = vor.u32 %v4154_v6, %v3638_v36  ;;  %v3510_v14 = vld [vmem:[#allocation5 + $0x1c8] sm:$0xf0] }
  0xbf   :  { %1468 = vmatpush.bf16.msra.mxu2 %v3577_v63 }
  0xc0   :  { %1370 = vmatpush.bf16.msra.mxu0 %v3449_v1  ;;  %1517 = vmatpush.bf16.msra.mxu3 %v3641_v40 }
  0xc2   :  { %v1084_v25 = vpop.f32.mrf.mxu2  ;;  %v989_v27 = vpop.f32.mrf.mxu0 }
  0xc3   :  { %v1085_v31 = vadd.f32 %v1084_v25, %v1036_v58  ;;  %v1133_v39 = vpop.f32.mrf.mxu3  ;;  %v990_v4 = vadd.f32 %v989_v27, %v4693_v33  ;;  %v1038_v30 = vpop.f32.mrf.mxu1  ;;  %v320_v27 = vrot.slane %v202_v7, 1 }
  0xc5   :  { %v4734_v13 = vadd.f32 %v1133_v39, %v1085_v31  ;;  %v1039_v22 = vadd.f32 %v1038_v30, %v990_v4  ;;  %1184 = vmatmul.bf16.gmra.mxu0 %v4727_v28  ;;  %v318_v39 = vrot.slane %v195_v2, 1  ;;  %v4122_v30 = vld [vmem:[#allocation5 + $0x1c4] sm:$0xf]  ;;  %v321_v2 = vor.u32 %v320_v27, %v199_v51  ;;  %v4136_v51 = vld [vmem:[#allocation5 + $0x234] sm:$0xf] }
  0xc6   :  { %1233 = vmatmul.bf16.gmra.mxu1 %v4732_v44  ;;  %v3630_v27 = vld [vmem:[#allocation5 + $0x2b8] sm:$0xf0] }
  0xc7   :  { %1282 = vmatmul.bf16.gmra.mxu2 %v4503_v45  ;;  %v319_v8 = vor.u32 %v318_v39, %v192_v50  ;;  %v4758_v40 = vsel %vm4695_vm5, %v321_v2, 0 }
  0xc8   :  { %1331 = vmatmul.bf16.gmra.mxu3 %v4511_v48 }
  0xc9   :  { %v4753_v7 = vsel %vm4695_vm5, %v319_v8, 0 }
  0xca   :  { %v1087_v58 = vpop.f32.mrf.mxu2  ;;  %v991_v31 = vpop.f32.mrf.mxu0 }
  0xcb   :  { %v1088_v24 = vadd.f32 %v1087_v58, %v1039_v22  ;;  %v1136_v25 = vpop.f32.mrf.mxu3  ;;  %v992_v45 = vadd.f32 %v991_v31, %v4693_v33  ;;  %v1040_v48 = vpop.f32.mrf.mxu1  ;;  %v3513_v22 = vor.u32 %v4122_v30, %v3510_v14  ;;  %v4104_v31 = vld [vmem:[#allocation5 + $0x134] sm:$0xf] }
  0xcd   :  { %v4745_v4 = vadd.f32 %v1136_v25, %v1088_v24  ;;  %v1041_v21 = vadd.f32 %v1040_v48, %v992_v45  ;;  %1419 = vmatpush.bf16.msra.mxu1 %v3513_v22  ;;  %v3566_v25 = vld [vmem:[#allocation5 + $0x238] sm:$0xf0]  ;;  %v4152_v48 = vld [vmem:[#allocation5 + $0x2b4] sm:$0xf] }
  0xce   :  { %v3569_v39 = vor.u32 %v4136_v51, %v3566_v25  ;;  %v3438_v45 = vld [vmem:[#allocation5 + $0x138] sm:$0xf0]  ;;  %v5655_v51 = vshrl.u32 %v4533_v17, 16 }
  0xcf   :  { %v3441_v14 = vor.u32 %v4104_v31, %v3438_v45 }
  0xd0   :  { %1469 = vmatpush.bf16.msra.mxu2 %v3569_v39 }
  0xd1   :  { %1371 = vmatpush.bf16.msra.mxu0 %v3441_v14 }
  0xd2   :  { %v1089_v63 = vpop.f32.mrf.mxu2  ;;  %v994_v36 = vpop.f32.mrf.mxu0 }
  0xd3   :  { %v1090_v3 = vadd.f32 %v1089_v63, %v1041_v21  ;;  %v1138_v6 = vpop.f32.mrf.mxu3  ;;  %v995_v58 = vadd.f32 %v994_v36, %v4693_v33  ;;  %v1043_v1 = vpop.f32.mrf.mxu1  ;;  %v3633_v21 = vor.u32 %v4152_v48, %v3630_v27  ;;  %v322_v63 = vrot.slane %v209_v42, 1  ;;  %v4120_v36 = vld [vmem:[#allocation5 + $0x1b4] sm:$0xf] }
  0xd4   :  { %v5656_v42 = vshrl.u32 %v4535_v18, 16 }
  0xd5   :  { %v4760_v50 = vadd.f32 %v1138_v6, %v1090_v3  ;;  %v1044_v24 = vadd.f32 %v1043_v1, %v995_v58  ;;  %1189 = vmatmul.bf16.gmra.mxu0 %v4753_v7  ;;  %v324_v3 = vrot.slane %v216_v52, 1  ;;  %1518 = vmatpush.bf16.msra.mxu3 %v3633_v21  ;;  %v3502_v58 = vld [vmem:[#allocation5 + $0x1b8] sm:$0xf0]  ;;  %v323_v25 = vor.u32 %v322_v63, %v5655_v51  ;;  %v3558_v63 = vld [vmem:[#allocation5 + $0x228] sm:$0xf0] }
  0xd6   :  { %1238 = vmatmul.bf16.gmra.mxu1 %v4758_v40 }
  0xd7   :  { %1287 = vmatmul.bf16.gmra.mxu2 %v4531_v16  ;;  %v325_v31 = vor.u32 %v324_v3, %v5656_v42  ;;  %v4779_v52 = vsel %vm4695_vm5, %v323_v25, 0  ;;  %v3430_v3 = vld [vmem:[#allocation5 + $0x128] sm:$0xf0] }
  0xd8   :  { %1336 = vmatmul.bf16.gmra.mxu3 %v4539_v19 }
  0xd9   :  { %v4784_v21 = vsel %vm4695_vm5, %v325_v31, 0 }
  0xda   :  { %v1092_v30 = vpop.f32.mrf.mxu2  ;;  %v996_v2 = vpop.f32.mrf.mxu0 }
  0xdb   :  { %v1093_v22 = vadd.f32 %v1092_v30, %v1044_v24  ;;  %v1141_v8 = vpop.f32.mrf.mxu3  ;;  %v997_v16 = vadd.f32 %v996_v2, %v4693_v33  ;;  %v1045_v19 = vpop.f32.mrf.mxu1  ;;  %v3505_v24 = vor.u32 %v4120_v36, %v3502_v58  ;;  %v4134_v2 = vld [vmem:[#allocation5 + $0x224] sm:$0xf]  ;;  %v3622_v58 = vld [vmem:[#allocation5 + $0x2a8] sm:$0xf0] }
  0xdc   :  { %v4150_v36 = vld [vmem:[#allocation5 + $0x2a4] sm:$0xf] }
  0xdd   :  { %v4771_v6 = vadd.f32 %v1141_v8, %v1093_v22  ;;  %v1046_v1 = vadd.f32 %v1045_v19, %v997_v16  ;;  %1420 = vmatpush.bf16.msra.mxu1 %v3505_v24  ;;  %v4102_v16 = vld [vmem:[#allocation5 + $0x124] sm:$0xf]  ;;  %v3561_v19 = vor.u32 %v4134_v2, %v3558_v63  ;;  %v3625_v51 = vor.u32 %v4150_v36, %v3622_v58  ;;  %v3494_v2 = vld [vmem:[#allocation5 + $0x1a8] sm:$0xf0] }
  0xde   :  { %v3433_v24 = vor.u32 %v4102_v16, %v3430_v3  ;;  %v5659_v16 = vshrl.u32 %v4561_v60, 16  ;;  %v5660_v36 = vshrl.u32 %v4563_v61, 16 }
  0xdf   :  { %1470 = vmatpush.bf16.msra.mxu2 %v3561_v19  ;;  %1519 = vmatpush.bf16.msra.mxu3 %v3625_v51 }
  0xe0   :  { %1372 = vmatpush.bf16.msra.mxu0 %v3433_v24 }
  0xe2   :  { %v1094_v39 = vpop.f32.mrf.mxu2  ;;  %v999_v27 = vpop.f32.mrf.mxu0 }
  0xe3   :  { %v1095_v45 = vadd.f32 %v1094_v39, %v1046_v1  ;;  %v1143_v48 = vpop.f32.mrf.mxu3  ;;  %v1000_v30 = vadd.f32 %v999_v27, %v4693_v33  ;;  %v1048_v14 = vpop.f32.mrf.mxu1  ;;  %v5657_v39 = vshll.u32 %v4561_v60, 16 }
  0xe5   :  { %v4786_v22 = vadd.f32 %v1143_v48, %v1095_v45  ;;  %v1049_v8 = vadd.f32 %v1048_v14, %v1000_v30  ;;  %1194 = vmatmul.bf16.gmra.mxu0 %v4779_v52  ;;  %v326_v45 = vrot.slane %v5657_v39, 1  ;;  %v5658_v48 = vshll.u32 %v4563_v61, 16  ;;  %v4118_v14 = vld [vmem:[#allocation5 + $0x1a4] sm:$0xf] }
  0xe6   :  { %1243 = vmatmul.bf16.gmra.mxu1 %v4784_v21 }
  0xe7   :  { %1292 = vmatmul.bf16.gmra.mxu2 %v4559_v59  ;;  %v328_v27 = vrot.slane %v5658_v48, 1  ;;  %v327_v3 = vor.u32 %v326_v45, %v5659_v16  ;;  %v3550_v48 = vld [vmem:[#allocation5 + $0x218] sm:$0xf0] }
  0xe8   :  { %1341 = vmatmul.bf16.gmra.mxu3 %v4567_v62 }
  0xe9   :  { %v329_v19 = vor.u32 %v328_v27, %v5660_v36  ;;  %v4805_v24 = vsel %vm4695_vm5, %v327_v3, 0  ;;  %v4100_v27 = vld [vmem:[#allocation5 + $0x114] sm:$0xf] }
  0xea   :  { %v1097_v1 = vpop.f32.mrf.mxu2  ;;  %v1001_v31 = vpop.f32.mrf.mxu0 }
  0xeb   :  { %v1098_v25 = vadd.f32 %v1097_v1, %v1049_v8  ;;  %v1146_v42 = vpop.f32.mrf.mxu3  ;;  %v1002_v59 = vadd.f32 %v1001_v31, %v4693_v33  ;;  %v1050_v62 = vpop.f32.mrf.mxu1  ;;  %v3497_v8 = vor.u32 %v4118_v14, %v3494_v2  ;;  %v3422_v2 = vld [vmem:[#allocation5 + $0x118] sm:$0xf0] }
  0xec   :  { %v3425_v3 = vor.u32 %v4100_v27, %v3422_v2  ;;  %v3486_v27 = vld [vmem:[#allocation5 + $0x198] sm:$0xf0] }
  0xed   :  { %v4797_v30 = vadd.f32 %v1146_v42, %v1098_v25  ;;  %v1051_v63 = vadd.f32 %v1050_v62, %v1002_v59  ;;  %1421 = vmatpush.bf16.msra.mxu1 %v3497_v8  ;;  %v4810_v42 = vsel %vm4695_vm5, %v329_v19, 0  ;;  %v4132_v62 = vld [vmem:[#allocation5 + $0x214] sm:$0xf]  ;;  %v3614_v8 = vld [vmem:[#allocation5 + $0x298] sm:$0xf0] }
  0xee   :  { %5661 = vst [vmem:[#allocation17_spill] sm:$0xff] %v4810_v42  ;;  %v3553_v14 = vor.u32 %v4132_v62, %v3550_v48  ;;  %1373 = vmatpush.bf16.msra.mxu0 %v3425_v3  ;;  %v4116_v48 = vld [vmem:[#allocation5 + $0x194] sm:$0xf] }
  0xf0   :  { %1471 = vmatpush.bf16.msra.mxu2 %v3553_v14 }
  0xf2   :  { %v1099_v58 = vpop.f32.mrf.mxu2  ;;  %v1004_v39 = vpop.f32.mrf.mxu0 }
  0xf3   :  { %v1100_v1 = vadd.f32 %v1099_v58, %v1051_v63  ;;  %v1148_v31 = vpop.f32.mrf.mxu3  ;;  %v1005_v51 = vadd.f32 %v1004_v39, %v4693_v33  ;;  %v1053_v25 = vpop.f32.mrf.mxu1  ;;  %v4148_v63 = vld [vmem:[#allocation5 + $0x294] sm:$0xf] }
  0xf4   :  { %v3617_v36 = vor.u32 %v4148_v63, %v3614_v8  ;;  %v5664_v63 = vshrl.u32 %v4589_v55, 16 }
  0xf5   :  { %v4812_v45 = vadd.f32 %v1148_v31, %v1100_v1  ;;  %v1054_v59 = vadd.f32 %v1053_v25, %v1005_v51  ;;  %1199 = vmatmul.bf16.gmra.mxu0 %v4805_v24  ;;  %v5662_v31 = vshll.u32 %v4589_v55, 16  ;;  %v5663_v51 = vshll.u32 %v4591_v56, 16 }
  0xf6   :  { %1248 = vmatmul.bf16.gmra.mxu1 %v4810_v42  ;;  %1520 = vmatpush.bf16.msra.mxu3 %v3617_v36 }
  0xf7   :  { %1297 = vmatmul.bf16.gmra.mxu2 %v4587_v54  ;;  %v330_v39 = vrot.slane %v5662_v31, 1  ;;  %v332_v25 = vrot.slane %v5663_v51, 1  ;;  %v3542_v51 = vld [vmem:[#allocation5 + $0x208] sm:$0xf0] }
  0xf8   :  { %1346 = vmatmul.bf16.gmra.mxu3 %v4595_v57 }
  0xf9   :  { %v331_v8 = vor.u32 %v330_v39, %v5664_v63 }
  0xfa   :  { %v1102_v16 = vpop.f32.mrf.mxu2  ;;  %v1006_v1 = vpop.f32.mrf.mxu0 }
  0xfb   :  { %v1103_v19 = vadd.f32 %v1102_v16, %v1054_v59  ;;  %v1151_v58 = vpop.f32.mrf.mxu3  ;;  %v1007_v54 = vadd.f32 %v1006_v1, %v4693_v33  ;;  %v1055_v57 = vpop.f32.mrf.mxu1  ;;  %v3489_v59 = vor.u32 %v4116_v48, %v3486_v27  ;;  %v5665_v16 = vshrl.u32 %v4591_v56, 16  ;;  %v3414_v48 = vld [vmem:[#allocation5 + $0x108] sm:$0xf0]  ;;  %v4146_v27 = vld [vmem:[#allocation5 + $0x284] sm:$0xf] }
  0xfc   :  { %v4831_v3 = vsel %vm4695_vm5, %v331_v8, 0 }
  0xfd   :  { %v4823_v62 = vadd.f32 %v1151_v58, %v1103_v19  ;;  %v1056_v2 = vadd.f32 %v1055_v57, %v1007_v54  ;;  %v333_v14 = vor.u32 %v332_v25, %v5665_v16  ;;  %1422 = vmatpush.bf16.msra.mxu1 %v3489_v59  ;;  %v4130_v57 = vld [vmem:[#allocation5 + $0x204] sm:$0xf] }
  0xfe   :  { %v4098_v25 = vld [vmem:[#allocation5 + $0x104] sm:$0xf] }
  0xff   :  { %v4836_v58 = vsel %vm4695_vm5, %v333_v14, 0  ;;  %v3417_v63 = vor.u32 %v4098_v25, %v3414_v48  ;;  %v3478_v25 = vld [vmem:[#allocation5 + $0x188] sm:$0xf0] }
 0x100   :  { %5666 = vst [vmem:[#allocation18_spill] sm:$0xff] %v4836_v58 }
 0x101   :  { %1374 = vmatpush.bf16.msra.mxu0 %v3417_v63 }
 0x102   :  { %v1104_v1 = vpop.f32.mrf.mxu2  ;;  %v1009_v42 = vpop.f32.mrf.mxu0 }
 0x103   :  { %v1105_v31 = vadd.f32 %v1104_v1, %v1056_v2  ;;  %v1153_v49 = vpop.f32.mrf.mxu3  ;;  %v1010_v36 = vadd.f32 %v1009_v42, %v4693_v33  ;;  %v1058_v19 = vpop.f32.mrf.mxu1  ;;  %v3545_v42 = vor.u32 %v4130_v57, %v3542_v51  ;;  %v3606_v2 = vld [vmem:[#allocation5 + $0x288] sm:$0xf0]  ;;  %v5668_v1 = vshll.u32 %v4617_v12, 16  ;;  %v4114_v51 = vld [vmem:[#allocation5 + $0x184] sm:$0xf] }
 0x105   :  { %v4838_v39 = vadd.f32 %v1153_v49, %v1105_v31  ;;  %v1059_v54 = vadd.f32 %v1058_v19, %v1010_v36  ;;  %1204 = vmatmul.bf16.gmra.mxu0 %v4831_v3  ;;  %v3609_v49 = vor.u32 %v4146_v27, %v3606_v2  ;;  %v334_v31 = vrot.slane %v5668_v1, 1  ;;  %1472 = vmatpush.bf16.msra.mxu2 %v3545_v42 }
 0x106   :  { %1253 = vmatmul.bf16.gmra.mxu1 %v4836_v58  ;;  %v5669_v36 = vshll.u32 %v4619_v15, 16  ;;  %v5670_v27 = vshrl.u32 %v4617_v12, 16 }
 0x107   :  { %5667 = vst [vmem:[#allocation19_spill] sm:$0xff] %v4838_v39  ;;  %1302 = vmatmul.bf16.gmra.mxu2 %v4615_v11  ;;  %1521 = vmatpush.bf16.msra.mxu3 %v3609_v49 }
 0x108   :  { %1351 = vmatmul.bf16.gmra.mxu3 %v4623_v23  ;;  %v336_v19 = vrot.slane %v5669_v36, 1  ;;  %v335_v2 = vor.u32 %v334_v31, %v5670_v27 }
 0x10a   :  { %v1107_v59 = vpop.f32.mrf.mxu2  ;;  %v1011_v14 = vpop.f32.mrf.mxu0  ;;  %v4857_v63 = vsel %vm4695_vm5, %v335_v2, 0 }
 0x10b   :  { %v1108_v8 = vadd.f32 %v1107_v59, %v1059_v54  ;;  %v1156_v16 = vpop.f32.mrf.mxu3  ;;  %v1012_v11 = vadd.f32 %v1011_v14, %v4693_v33  ;;  %v1060_v23 = vpop.f32.mrf.mxu1  ;;  %v3481_v54 = vor.u32 %v4114_v51, %v3478_v25  ;;  %v5671_v59 = vshrl.u32 %v4619_v15, 16 }
 0x10c   :  { %v5672_v51 = vshll.u32 %v4645_v9, 16 }
 0x10d   :  { %v4849_v57 = vadd.f32 %v1156_v16, %v1108_v8  ;;  %v1061_v48 = vadd.f32 %v1060_v23, %v1012_v11  ;;  %v337_v42 = vor.u32 %v336_v19, %v5671_v59  ;;  %1423 = vmatpush.bf16.msra.mxu1 %v3481_v54  ;;  %v5673_v54 = vshll.u32 %v4647_v10, 16 }
 0x10e   :  { %v338_v25 = vrot.slane %v5672_v51, 1 }
 0x10f   :  { %v4862_v16 = vsel %vm4695_vm5, %v337_v42, 0  ;;  %v340_v27 = vrot.slane %v5673_v54, 1 }
 0x112   :  { %v1109_v14 = vpop.f32.mrf.mxu2  ;;  %v1014_v58 = vpop.f32.mrf.mxu0 }
 0x113   :  { %v1110_v1 = vadd.f32 %v1109_v14, %v1061_v48  ;;  %v1158_v39 = vpop.f32.mrf.mxu3  ;;  %v1015_v49 = vadd.f32 %v1014_v58, %v4693_v33  ;;  %v1063_v8 = vpop.f32.mrf.mxu1 }
 0x115   :  { %v4864_v31 = vadd.f32 %v1158_v39, %v1110_v1  ;;  %v1064_v11 = vadd.f32 %v1063_v8, %v1015_v49  ;;  %1209 = vmatmul.bf16.gmra.mxu0 %v4857_v63 }
 0x116   :  { %1258 = vmatmul.bf16.gmra.mxu1 %v4862_v16 }
 0x117   :  { %1307 = vmatmul.bf16.gmra.mxu2 %v4643_v37  ;;  %v5674_v37 = vshrl.u32 %v4645_v9, 16 }
 0x118   :  { %1356 = vmatmul.bf16.gmra.mxu3 %v4651_v41  ;;  %v5675_v41 = vshrl.u32 %v4647_v10, 16 }
 0x119   :  { %v339_v42 = vor.u32 %v338_v25, %v5674_v37 }
 0x11a   :  { %v1112_v23 = vpop.f32.mrf.mxu2  ;;  %v1016_v58 = vpop.f32.mrf.mxu0  ;;  %v341_v14 = vor.u32 %v340_v27, %v5675_v41 }
 0x11b   :  { %v1113_v36 = vadd.f32 %v1112_v23, %v1064_v11  ;;  %v1161_v19 = vpop.f32.mrf.mxu3  ;;  %v1017_v48 = vadd.f32 %v1016_v58, %v4693_v33  ;;  %v1065_v39 = vpop.f32.mrf.mxu1  ;;  %v4883_v23 = vsel %vm4695_vm5, %v339_v42, 0 }
 0x11d   :  { %v4875_v2 = vadd.f32 %v1161_v19, %v1113_v36  ;;  %v1066_v59 = vadd.f32 %v1065_v39, %v1017_v48  ;;  %v4888_v36 = vsel %vm4695_vm5, %v341_v14, 0 }
 0x122   :  { %v1114_v1 = vpop.f32.mrf.mxu2  ;;  %v1019_v11 = vpop.f32.mrf.mxu0 }
 0x123   :  { %v1115_v49 = vadd.f32 %v1114_v1, %v1066_v59  ;;  %v1163_v8 = vpop.f32.mrf.mxu3  ;;  %v1020_v58 = vadd.f32 %v1019_v11, %v4693_v33  ;;  %v1068_v51 = vpop.f32.mrf.mxu1 }
 0x125   :  { %v4890_v19 = vadd.f32 %v1163_v8, %v1115_v49  ;;  %v1069_v25 = vadd.f32 %v1068_v51, %v1020_v58  ;;  %1214 = vmatmul.bf16.gmra.mxu0 %v4883_v23  ;;  %v3852_v51 = vld [vmem:[#allocation7 + $0x170] sm:$0xf] }
 0x126   :  { %1263 = vmatmul.bf16.gmra.mxu1 %v4888_v36 }
 0x127   :  { %1312 = vmatmul.bf16.gmra.mxu2 %v4671_v29 }
 0x128   :  { %1361 = vmatmul.bf16.gmra.mxu3 %v4675_v43 }
 0x12a   :  { %v1117_v48 = vpop.f32.mrf.mxu2  ;;  %v1021_v27 = vpop.f32.mrf.mxu0 }
 0x12b   :  { %v1118_v39 = vadd.f32 %v1117_v48, %v1069_v25  ;;  %v1166_v54 = vpop.f32.mrf.mxu3  ;;  %v1022_v59 = vadd.f32 %v1021_v27, %v4693_v33  ;;  %v1070_v37 = vpop.f32.mrf.mxu1  ;;  %v4908_v33 = vperm.slane %v4686_v35, 1  ;;  %v4209_v25 = vld [vmem:[#allocation7 + $0x174] sm:$0xf0] }
 0x12c   :  { %v3853_v48 = vor.u32 %v4209_v25, %v3852_v51 }
 0x12d   :  { %v4897_v42 = vadd.f32 %v1166_v54, %v1118_v39  ;;  %v1071_v41 = vadd.f32 %v1070_v37, %v1022_v59  ;;  %v4177_v39 = vld [vmem:[#allocation7 + $0x74] sm:$0xf0]  ;;  %v3916_v54 = vld [vmem:[#allocation7 + $0x1f0] sm:$0xf] }
 0x12e   :  { %v4225_v37 = vld [vmem:[#allocation7 + $0x1f4] sm:$0xf0]  ;;  %2579 = vmatpush.bf16.msrb.mxu2 %v3853_v48 }
 0x12f   :  { %v3917_v35 = vor.u32 %v4225_v37, %v3916_v54 }
 0x131   :  { %2628 = vmatpush.bf16.msrb.mxu3 %v3917_v35  ;;  %v3780_v35 = vld [vmem:[#allocation7 + $0xe0] sm:$0xf] }
 0x132   :  { %v1119_v14 = vpop.f32.mrf.mxu2  ;;  %v1180_v8 = vpop.f32.mrf.mxu0 }
 0x133   :  { %v1120_v1 = vadd.f32 %v1119_v14, %v1071_v41  ;;  %v1168_v49 = vpop.f32.mrf.mxu3  ;;  %v1181_v11 = vadd.f32 %v1180_v8, %v4719_v38  ;;  %v1229_v58 = vpop.f32.mrf.mxu1  ;;  %v3724_v38 = vld [vmem:[#allocation7 + $0x70] sm:$0xf] }
 0x134   :  { %v3725_v59 = vor.u32 %v4177_v39, %v3724_v38  ;;  %v3788_v41 = vld [vmem:[#allocation7 + $0xf0] sm:$0xf] }
 0x135   :  { %v4900_v29 = vadd.f32 %v1168_v49, %v1120_v1  ;;  %v4902_v43 = vadd.f32 %v1229_v58, %v1181_v11  ;;  %1375 = vmatmul.bf16.vlgmr.msra.gmra.mxu0 %v4451_v20  ;;  %v4193_v20 = vld [vmem:[#allocation7 + $0xf4] sm:$0xf0] }
 0x136   :  { %1424 = vmatmul.bf16.vlgmr.msra.gmra.mxu1 %v4455_v34  ;;  %v3789_v1 = vor.u32 %v4193_v20, %v3788_v41  ;;  %2481 = vmatpush.bf16.msrb.mxu0 %v3725_v59  ;;  %v4207_v59 = vld [vmem:[#allocation7 + $0x164] sm:$0xf0]  ;;  %v3716_v41 = vld [vmem:[#allocation7 + $0x60] sm:$0xf] }
 0x137   :  { %1473 = vmatmul.bf16.vlgmr.msra.gmra.mxu2 %v4703_v53  ;;  %v4175_v20 = vld [vmem:[#allocation7 + $0x64] sm:$0xf0] }
 0x138   :  { %1522 = vmatmul.bf16.vlgmr.msra.gmra.mxu3 %v4708_v32  ;;  %2530 = vmatpush.bf16.msrb.mxu1 %v3789_v1  ;;  %v4191_v1 = vld [vmem:[#allocation7 + $0xe4] sm:$0xf0] }
 0x13a   :  { %v1278_v27 = vpop.f32.mrf.mxu2  ;;  %v1182_v53 = vpop.f32.mrf.mxu0 }
 0x13b   :  { %v1279_v34 = vadd.f32 %v1278_v27, %v4908_v33  ;;  %v1327_v14 = vpop.f32.mrf.mxu3  ;;  %v1183_v32 = vadd.f32 %v1182_v53, %v4734_v13  ;;  %v1231_v49 = vpop.f32.mrf.mxu1  ;;  %v3844_v13 = vld [vmem:[#allocation7 + $0x160] sm:$0xf]  ;;  %v4223_v53 = vld [vmem:[#allocation7 + $0x1e4] sm:$0xf0] }
 0x13c   :  { %v3845_v37 = vor.u32 %v4207_v59, %v3844_v13 }
 0x13d   :  { %v4913_v8 = vadd.f32 %v1327_v14, %v1279_v34  ;;  %v4915_v11 = vadd.f32 %v1231_v49, %v1183_v32  ;;  %v3908_v34 = vld [vmem:[#allocation7 + $0x1e0] sm:$0xf]  ;;  %v3717_v14 = vor.u32 %v4175_v20, %v3716_v41 }
 0x13e   :  { %2580 = vmatpush.bf16.msrb.mxu2 %v3845_v37 }
 0x13f   :  { %2482 = vmatpush.bf16.msrb.mxu0 %v3717_v14  ;;  %v3708_v14 = vld [vmem:[#allocation7 + $0x50] sm:$0xf] }
 0x142   :  { %v1280_v58 = vpop.f32.mrf.mxu2  ;;  %v1185_v38 = vpop.f32.mrf.mxu0 }
 0x143   :  { %v1281_v51 = vadd.f32 %v1280_v58, %v4908_v33  ;;  %v1329_v25 = vpop.f32.mrf.mxu3  ;;  %v1186_v39 = vadd.f32 %v1185_v38, %v4745_v4  ;;  %v1234_v48 = vpop.f32.mrf.mxu1 }
 0x145   :  { %v4919_v54 = vadd.f32 %v1329_v25, %v1281_v51  ;;  %v4921_v27 = vadd.f32 %v1234_v48, %v1186_v39  ;;  %1380 = vmatmul.bf16.gmra.mxu0 %v4477_v0 }
 0x146   :  { %1429 = vmatmul.bf16.gmra.mxu1 %v4483_v5  ;;  %v3909_v5 = vor.u32 %v4223_v53, %v3908_v34  ;;  %v4205_v34 = vld [vmem:[#allocation7 + $0x154] sm:$0xf0] }
 0x147   :  { %1478 = vmatmul.bf16.gmra.mxu2 %v4727_v28  ;;  %v3781_v28 = vor.u32 %v4191_v1, %v3780_v35  ;;  %v4173_v53 = vld [vmem:[#allocation7 + $0x54] sm:$0xf0]  ;;  %v3900_v35 = vld [vmem:[#allocation7 + $0x1d0] sm:$0xf] }
 0x148   :  { %1527 = vmatmul.bf16.gmra.mxu3 %v4732_v44  ;;  %v3709_v1 = vor.u32 %v4173_v53, %v3708_v14  ;;  %v4203_v14 = vld [vmem:[#allocation7 + $0x144] sm:$0xf0] }
 0x149   :  { %2629 = vmatpush.bf16.msrb.mxu3 %v3909_v5  ;;  %2531 = vmatpush.bf16.msrb.mxu1 %v3781_v28 }
 0x14a   :  { %v1283_v4 = vpop.f32.mrf.mxu2  ;;  %v1187_v49 = vpop.f32.mrf.mxu0  ;;  %2483 = vmatpush.bf16.msrb.mxu0 %v3709_v1  ;;  %v3892_v1 = vld [vmem:[#allocation7 + $0x1c0] sm:$0xf] }
 0x14b   :  { %v1284_v32 = vadd.f32 %v1283_v4, %v4908_v33  ;;  %v1332_v0 = vpop.f32.mrf.mxu3  ;;  %v1188_v44 = vadd.f32 %v1187_v49, %v4760_v50  ;;  %v1236_v58 = vpop.f32.mrf.mxu1  ;;  %v3836_v50 = vld [vmem:[#allocation7 + $0x150] sm:$0xf]  ;;  %v4189_v49 = vld [vmem:[#allocation7 + $0xd4] sm:$0xf0] }
 0x14c   :  { %v3837_v4 = vor.u32 %v4205_v34, %v3836_v50 }
 0x14d   :  { %v4929_v51 = vadd.f32 %v1332_v0, %v1284_v32  ;;  %v4931_v25 = vadd.f32 %v1236_v58, %v1188_v44  ;;  %v4221_v32 = vld [vmem:[#allocation7 + $0x1d4] sm:$0xf0]  ;;  %v3772_v0 = vld [vmem:[#allocation7 + $0xd0] sm:$0xf] }
 0x14e   :  { %2581 = vmatpush.bf16.msrb.mxu2 %v3837_v4 }
 0x152   :  { %v1285_v38 = vpop.f32.mrf.mxu2  ;;  %v1190_v13 = vpop.f32.mrf.mxu0 }
 0x153   :  { %v1286_v39 = vadd.f32 %v1285_v38, %v4908_v33  ;;  %v1334_v48 = vpop.f32.mrf.mxu3  ;;  %v1191_v59 = vadd.f32 %v1190_v13, %v4771_v6  ;;  %v1239_v37 = vpop.f32.mrf.mxu1 }
 0x155   :  { %v4935_v41 = vadd.f32 %v1334_v48, %v1286_v39  ;;  %v4937_v20 = vadd.f32 %v1239_v37, %v1191_v59  ;;  %1385 = vmatmul.bf16.gmra.mxu0 %v4505_v46 }
 0x156   :  { %1434 = vmatmul.bf16.gmra.mxu1 %v4507_v47  ;;  %v3901_v47 = vor.u32 %v4221_v32, %v3900_v35  ;;  %v3700_v35 = vld [vmem:[#allocation7 + $0x40] sm:$0xf] }
 0x157   :  { %1483 = vmatmul.bf16.gmra.mxu2 %v4753_v7  ;;  %v3773_v7 = vor.u32 %v4189_v49, %v3772_v0  ;;  %v4219_v0 = vld [vmem:[#allocation7 + $0x1c4] sm:$0xf0]  ;;  %v3764_v49 = vld [vmem:[#allocation7 + $0xc0] sm:$0xf] }
 0x158   :  { %1532 = vmatmul.bf16.gmra.mxu3 %v4758_v40 }
 0x159   :  { %2630 = vmatpush.bf16.msrb.mxu3 %v3901_v47  ;;  %2532 = vmatpush.bf16.msrb.mxu1 %v3773_v7 }
 0x15a   :  { %v1288_v6 = vpop.f32.mrf.mxu2  ;;  %v1192_v28 = vpop.f32.mrf.mxu0 }
 0x15b   :  { %v1289_v5 = vadd.f32 %v1288_v6, %v4908_v33  ;;  %v1337_v46 = vpop.f32.mrf.mxu3  ;;  %v1193_v40 = vadd.f32 %v1192_v28, %v4786_v22  ;;  %v1241_v44 = vpop.f32.mrf.mxu1  ;;  %v3828_v22 = vld [vmem:[#allocation7 + $0x140] sm:$0xf]  ;;  %v4171_v6 = vld [vmem:[#allocation7 + $0x44] sm:$0xf0] }
 0x15c   :  { %v3829_v53 = vor.u32 %v4203_v14, %v3828_v22  ;;  %v3701_v32 = vor.u32 %v4171_v6, %v3700_v35  ;;  %v3820_v14 = vld [vmem:[#allocation7 + $0x130] sm:$0xf] }
 0x15d   :  { %v4945_v58 = vadd.f32 %v1337_v46, %v1289_v5  ;;  %v4947_v38 = vadd.f32 %v1241_v44, %v1193_v40  ;;  %v4187_v5 = vld [vmem:[#allocation7 + $0xc4] sm:$0xf0]  ;;  %v3692_v6 = vld [vmem:[#allocation7 + $0x30] sm:$0xf] }
 0x15e   :  { %2582 = vmatpush.bf16.msrb.mxu2 %v3829_v53  ;;  %2484 = vmatpush.bf16.msrb.mxu0 %v3701_v32  ;;  %v4201_v53 = vld [vmem:[#allocation7 + $0x134] sm:$0xf0] }
 0x15f   :  { %v3821_v35 = vor.u32 %v4201_v53, %v3820_v14  ;;  %v3684_v14 = vld [vmem:[#allocation7 + $0x20] sm:$0xf]  ;;  %v4167_v53 = vld [vmem:[#allocation7 + $0x24] sm:$0xf0] }
 0x162   :  { %v1290_v39 = vpop.f32.mrf.mxu2  ;;  %v1195_v59 = vpop.f32.mrf.mxu0  ;;  %2583 = vmatpush.bf16.msrb.mxu2 %v3821_v35  ;;  %v3876_v35 = vld [vmem:[#allocation7 + $0x1a0] sm:$0xf] }
 0x163   :  { %v1291_v48 = vadd.f32 %v1290_v39, %v4908_v33  ;;  %v1339_v13 = vpop.f32.mrf.mxu3  ;;  %v1196_v37 = vadd.f32 %v1195_v59, %v4797_v30  ;;  %v1244_v50 = vpop.f32.mrf.mxu1 }
 0x165   :  { %v4951_v34 = vadd.f32 %v1339_v13, %v1291_v48  ;;  %v4953_v4 = vadd.f32 %v1244_v50, %v1196_v37  ;;  %1390 = vmatmul.bf16.gmra.mxu0 %v4533_v17 }
 0x166   :  { %1439 = vmatmul.bf16.gmra.mxu1 %v4535_v18  ;;  %v3893_v18 = vor.u32 %v4219_v0, %v3892_v1  ;;  %v4169_v1 = vld [vmem:[#allocation7 + $0x34] sm:$0xf0] }
 0x167   :  { %1488 = vmatmul.bf16.gmra.mxu2 %v4779_v52  ;;  %v3765_v52 = vor.u32 %v4187_v5, %v3764_v49  ;;  %v3693_v32 = vor.u32 %v4169_v1, %v3692_v6  ;;  %v4217_v0 = vld [vmem:[#allocation7 + $0x1b4] sm:$0xf0]  ;;  %v3756_v49 = vld [vmem:[#allocation7 + $0xb0] sm:$0xf]  ;;  %v3685_v1 = vor.u32 %v4167_v53, %v3684_v14 }
 0x168   :  { %1537 = vmatmul.bf16.gmra.mxu3 %v4784_v21  ;;  %v4185_v5 = vld [vmem:[#allocation7 + $0xb4] sm:$0xf0]  ;;  %v3868_v14 = vld [vmem:[#allocation7 + $0x190] sm:$0xf] }
 0x169   :  { %2631 = vmatpush.bf16.msrb.mxu3 %v3893_v18  ;;  %2533 = vmatpush.bf16.msrb.mxu1 %v3765_v52  ;;  %v4213_v53 = vld [vmem:[#allocation7 + $0x194] sm:$0xf0] }
 0x16a   :  { %v1293_v30 = vpop.f32.mrf.mxu2  ;;  %v1197_v28 = vpop.f32.mrf.mxu0  ;;  %2485 = vmatpush.bf16.msrb.mxu0 %v3693_v32 }
 0x16b   :  { %v1294_v46 = vadd.f32 %v1293_v30, %v4908_v33  ;;  %v1342_v17 = vpop.f32.mrf.mxu3  ;;  %v1198_v21 = vadd.f32 %v1197_v28, %v4812_v45  ;;  %v1246_v47 = vpop.f32.mrf.mxu1  ;;  %v5676_v45 = vld [vmem:[#allocation17_spill] sm:$0xff] }
 0x16c   :  { %v3884_v30 = vld [vmem:[#allocation7 + $0x1b0] sm:$0xf] }
 0x16d   :  { %v4961_v7 = vadd.f32 %v1342_v17, %v1294_v46  ;;  %v4963_v40 = vadd.f32 %v1246_v47, %v1198_v21 }
 0x16e   :  { %2486 = vmatpush.bf16.msrb.mxu0 %v3685_v1  ;;  %v4181_v1 = vld [vmem:[#allocation7 + $0x94] sm:$0xf0] }
 0x172   :  { %v1295_v44 = vpop.f32.mrf.mxu2  ;;  %v1200_v13 = vpop.f32.mrf.mxu0 }
 0x173   :  { %v1296_v39 = vadd.f32 %v1295_v44, %v4908_v33  ;;  %v1344_v48 = vpop.f32.mrf.mxu3  ;;  %v1201_v59 = vadd.f32 %v1200_v13, %v4823_v62  ;;  %v1249_v37 = vpop.f32.mrf.mxu1  ;;  %v5677_v13 = vld [vmem:[#allocation18_spill] sm:$0xff] }
 0x175   :  { %v4967_v50 = vadd.f32 %v1344_v48, %v1296_v39  ;;  %v4969_v22 = vadd.f32 %v1249_v37, %v1201_v59  ;;  %1395 = vmatmul.bf16.gmra.mxu0 %v4561_v60  ;;  %v3812_v59 = vld [vmem:[#allocation7 + $0x120] sm:$0xf]  ;;  %v4199_v37 = vld [vmem:[#allocation7 + $0x124] sm:$0xf0] }
 0x176   :  { %1444 = vmatmul.bf16.gmra.mxu1 %v4563_v61  ;;  %v3885_v61 = vor.u32 %v4217_v0, %v3884_v30  ;;  %v3748_v30 = vld [vmem:[#allocation7 + $0xa0] sm:$0xf] }
 0x177   :  { %1493 = vmatmul.bf16.gmra.mxu2 %v4805_v24  ;;  %v3757_v24 = vor.u32 %v4185_v5, %v3756_v49 }
 0x178   :  { %1542 = vmatmul.bf16.gmra.mxu3 %v5676_v45  ;;  %v3813_v45 = vor.u32 %v4199_v37, %v3812_v59  ;;  %v3676_v59 = vld [vmem:[#allocation7 + $0x10] sm:$0xf] }
 0x179   :  { %2632 = vmatpush.bf16.msrb.mxu3 %v3885_v61  ;;  %2534 = vmatpush.bf16.msrb.mxu1 %v3757_v24 }
 0x17a   :  { %v1298_v62 = vpop.f32.mrf.mxu2  ;;  %v4976_v17 = vpop.f32.mrf.mxu0  ;;  %2584 = vmatpush.bf16.msrb.mxu2 %v3813_v45  ;;  %v4165_v45 = vld [vmem:[#allocation7 + $0x14] sm:$0xf0] }
 0x17b   :  { %v1299_v46 = vadd.f32 %v1298_v62, %v4908_v33  ;;  %v1347_v60 = vpop.f32.mrf.mxu3  ;;  %v4978_v28 = vpop.f32.mrf.mxu1  ;;  %v4183_v62 = vld [vmem:[#allocation7 + $0xa4] sm:$0xf0] }
 0x17d   :  { %v4980_v18 = vadd.f32 %v1347_v60, %v1299_v46 }
 0x182   :  { %v4982_v52 = vpop.f32.mrf.mxu2  ;;  %v1205_v47 = vpop.f32.mrf.mxu0 }
 0x183   :  { %v4984_v21 = vpop.f32.mrf.mxu3  ;;  %v1206_v44 = vadd.f32 %v1205_v47, %v4849_v57  ;;  %v1254_v39 = vpop.f32.mrf.mxu1  ;;  %v4215_v57 = vld [vmem:[#allocation7 + $0x1a4] sm:$0xf0] }
 0x185   :  { %v4987_v48 = vadd.f32 %v1254_v39, %v1206_v44  ;;  %1400 = vmatmul.bf16.gmra.mxu0 %v4589_v55  ;;  %v3804_v39 = vld [vmem:[#allocation7 + $0x110] sm:$0xf] }
 0x186   :  { %1449 = vmatmul.bf16.gmra.mxu1 %v4591_v56  ;;  %v3877_v56 = vor.u32 %v4215_v57, %v3876_v35  ;;  %v3677_v35 = vor.u32 %v4165_v45, %v3676_v59  ;;  %v3860_v59 = vld [vmem:[#allocation7 + $0x180] sm:$0xf] }
 0x187   :  { %1498 = vmatmul.bf16.gmra.mxu2 %v4831_v3  ;;  %v3749_v3 = vor.u32 %v4183_v62, %v3748_v30 }
 0x188   :  { %1547 = vmatmul.bf16.gmra.mxu3 %v5677_v13  ;;  %v4197_v13 = vld [vmem:[#allocation7 + $0x114] sm:$0xf0]  ;;  %2487 = vmatpush.bf16.msrb.mxu0 %v3677_v35 }
 0x189   :  { %2633 = vmatpush.bf16.msrb.mxu3 %v3877_v56  ;;  %2535 = vmatpush.bf16.msrb.mxu1 %v3749_v3  ;;  %v3805_v37 = vor.u32 %v4197_v13, %v3804_v39  ;;  %v3796_v39 = vld [vmem:[#allocation7 + $0x100] sm:$0xf]  ;;  %v4195_v13 = vld [vmem:[#allocation7 + $0x104] sm:$0xf0] }
 0x18a   :  { %v1303_v6 = vpop.f32.mrf.mxu2  ;;  %v4994_v0 = vpop.f32.mrf.mxu0 }
 0x18b   :  { %v1304_v32 = vadd.f32 %v1303_v6, %v4908_v33  ;;  %v1352_v55 = vpop.f32.mrf.mxu3  ;;  %v4996_v49 = vpop.f32.mrf.mxu1  ;;  %v3740_v6 = vld [vmem:[#allocation7 + $0x90] sm:$0xf]  ;;  %2585 = vmatpush.bf16.msrb.mxu2 %v3805_v37 }
 0x18c   :  { %v3741_v57 = vor.u32 %v4181_v1, %v3740_v6  ;;  %v4179_v1 = vld [vmem:[#allocation7 + $0x84] sm:$0xf0] }
 0x18d   :  { %v4998_v5 = vadd.f32 %v1352_v55, %v1304_v32 }
 0x18e   :  { %2536 = vmatpush.bf16.msrb.mxu1 %v3741_v57 }
 0x192   :  { %v5000_v46 = vpop.f32.mrf.mxu2  ;;  %v1210_v61 = vpop.f32.mrf.mxu0 }
 0x193   :  { %v5002_v60 = vpop.f32.mrf.mxu3  ;;  %v1211_v24 = vadd.f32 %v1210_v61, %v4875_v2  ;;  %v1259_v47 = vpop.f32.mrf.mxu1  ;;  %v3869_v2 = vor.u32 %v4213_v53, %v3868_v14  ;;  %v4211_v53 = vld [vmem:[#allocation7 + $0x184] sm:$0xf0] }
 0x195   :  { %v5005_v44 = vadd.f32 %v1259_v47, %v1211_v24  ;;  %1405 = vmatmul.bf16.gmra.mxu0 %v4617_v12  ;;  %2634 = vmatpush.bf16.msrb.mxu3 %v3869_v2 }
 0x196   :  { %1454 = vmatmul.bf16.gmra.mxu1 %v4619_v15 }
 0x197   :  { %1503 = vmatmul.bf16.gmra.mxu2 %v4857_v63 }
 0x198   :  { %1552 = vmatmul.bf16.gmra.mxu3 %v4862_v16 }
 0x19a   :  { %v1308_v12 = vpop.f32.mrf.mxu2  ;;  %v5012_v62 = vpop.f32.mrf.mxu0 }
 0x19b   :  { %v1309_v30 = vadd.f32 %v1308_v12, %v4908_v33  ;;  %v1357_v15 = vpop.f32.mrf.mxu3  ;;  %v5014_v63 = vpop.f32.mrf.mxu1 }
 0x19d   :  { %v5016_v32 = vadd.f32 %v1357_v15, %v1309_v30 }
 0x1a2   :  { %v5018_v16 = vpop.f32.mrf.mxu2  ;;  %v1215_v56 = vpop.f32.mrf.mxu0 }
 0x1a3   :  { %v5020_v55 = vpop.f32.mrf.mxu3  ;;  %v1216_v3 = vadd.f32 %v1215_v56, %v4897_v42  ;;  %v1264_v61 = vpop.f32.mrf.mxu1  ;;  %v3797_v42 = vor.u32 %v4195_v13, %v3796_v39 }
 0x1a5   :  { %v5023_v24 = vadd.f32 %v1264_v61, %v1216_v3  ;;  %1410 = vmatmul.bf16.gmra.mxu0 %v4645_v9  ;;  %v3861_v9 = vor.u32 %v4211_v53, %v3860_v59  ;;  %2586 = vmatpush.bf16.msrb.mxu2 %v3797_v42  ;;  %v3980_v42 = vld [vmem:[#allocation7 + $0x270] sm:$0xf] }
 0x1a6   :  { %1459 = vmatmul.bf16.gmra.mxu1 %v4647_v10  ;;  %v3668_v10 = vld [vmem:[#allocation7] sm:$0xf] }
 0x1a7   :  { %1508 = vmatmul.bf16.gmra.mxu2 %v4883_v23  ;;  %v4163_v23 = vld [vmem:[#allocation7 + $0x4] sm:$0xf0]  ;;  %2635 = vmatpush.bf16.msrb.mxu3 %v3861_v9 }
 0x1a8   :  { %1557 = vmatmul.bf16.gmra.mxu3 %v4888_v36  ;;  %v3732_v36 = vld [vmem:[#allocation7 + $0x80] sm:$0xf]  ;;  %v3669_v6 = vor.u32 %v4163_v23, %v3668_v10  ;;  %v4241_v10 = vld [vmem:[#allocation7 + $0x274] sm:$0xf0]  ;;  %v4192_v23 = vld [vmem:[#allocation7 + $0xf4] sm:$0xf] }
 0x1a9   :  { %v3733_v57 = vor.u32 %v4179_v1, %v3732_v36  ;;  %v3790_v36 = vld [vmem:[#allocation7 + $0xf8] sm:$0xf0] }
 0x1aa   :  { %v1313_v47 = vpop.f32.mrf.mxu2  ;;  %v5030_v14 = vpop.f32.mrf.mxu0  ;;  %2488 = vmatpush.bf16.msrb.mxu0 %v3669_v6  ;;  %v3793_v26 = vor.u32 %v4192_v23, %v3790_v36 }
 0x1ab   :  { %v1314_v37 = vadd.f32 %v1313_v47, %v4908_v33  ;;  %v1362_v45 = vpop.f32.mrf.mxu3  ;;  %5678 = vst [vmem:[#allocation17_spill] sm:$0xff] %v5030_v14  ;;  %v5032_v35 = vpop.f32.mrf.mxu1  ;;  %2537 = vmatpush.bf16.msrb.mxu1 %v3733_v57  ;;  %v3981_v57 = vor.u32 %v4241_v10, %v3980_v42  ;;  %v1565_v42 = vmax.f32 %v4915_v11, 0.0  ;;  %v4190_v11 = vld [vmem:[#allocation7 + $0xe4] sm:$0xf] }
 0x1ac   :  { %5679 = vst [vmem:[#allocation18_spill] sm:$0xff] %v5032_v35  ;;  %v4044_v35 = vld [vmem:[#allocation7 + $0x2f0] sm:$0xf]  ;;  %2824 = vmatpush.bf16.msra.mxu3 %v3793_v26 }
 0x1ad   :  { %v5034_v2 = vadd.f32 %v1362_v45, %v1314_v37  ;;  %v4176_v37 = vld [vmem:[#allocation7 + $0x74] sm:$0xf]  ;;  %v3726_v45 = vld [vmem:[#allocation7 + $0x78] sm:$0xf0] }
 0x1ae   :  { %v3729_v9 = vor.u32 %v4176_v37, %v3726_v45  ;;  %2677 = vmatpush.bf16.msra.mxu0 %v3981_v57 }
 0x1b0   :  { %2775 = vmatpush.bf16.msra.mxu2 %v3729_v9 }
 0x1b2   :  { %v5036_v12 = vpop.f32.mrf.mxu2  ;;  %v1376_v15 = vpop.f32.mrf.mxu0 }
 0x1b3   :  { %v5038_v30 = vpop.f32.mrf.mxu3  ;;  %v1425_v56 = vpop.f32.mrf.mxu1  ;;  %v1377_v3 = vadd.f32 %v1376_v15, %v4913_v8  ;;  %v4257_v8 = vld [vmem:[#allocation7 + $0x2f4] sm:$0xf0] }
 0x1b4   :  { %v4045_v15 = vor.u32 %v4257_v8, %v4044_v35  ;;  %v4174_v8 = vld [vmem:[#allocation7 + $0x64] sm:$0xf] }
 0x1b5   :  { %v1426_v61 = vadd.f32 %v1425_v56, %v1377_v3  ;;  %v1563_v56 = vmax.f32 %v4902_v43, 0.0 }
 0x1b6   :  { %2726 = vmatpush.bf16.msra.mxu1 %v4045_v15  ;;  %v3718_v15 = vld [vmem:[#allocation7 + $0x68] sm:$0xf0] }
 0x1ba   :  { %v1474_v47 = vpop.f32.mrf.mxu2  ;;  %v1378_v59 = vpop.f32.mrf.mxu0 }
 0x1bb   :  { %v1475_v39 = vadd.f32 %v1474_v47, %v1426_v61  ;;  %v1523_v13 = vpop.f32.mrf.mxu3  ;;  %v1427_v53 = vpop.f32.mrf.mxu1  ;;  %v1379_v1 = vadd.f32 %v1378_v59, %v4919_v54 }
 0x1bd   :  { %v1524_v6 = vadd.f32 %v1523_v13, %v1475_v39  ;;  %v1428_v47 = vadd.f32 %v1427_v53, %v1379_v1 }
 0x1bf   :  { %v1564_v3 = vmax.f32 %v1524_v6, 0.0 }
 0x1c1   :  { %v1595_v61 = vpack.c.bf16 %v1564_v3, %v1563_v56  ;;  %v3972_v56 = vld [vmem:[#allocation7 + $0x260] sm:$0xf] }
 0x1c2   :  { %v1476_v37 = vpop.f32.mrf.mxu2  ;;  %v1381_v39 = vpop.f32.mrf.mxu0 }
 0x1c3   :  { %v1477_v45 = vadd.f32 %v1476_v37, %v1428_v47  ;;  %v1525_v14 = vpop.f32.mrf.mxu3  ;;  %v1430_v13 = vpop.f32.mrf.mxu1  ;;  %v1382_v59 = vadd.f32 %v1381_v39, %v4929_v51  ;;  %v1627_v43 = vunpack.c.l.b16 %v1595_v61  ;;  %v1628_v36 = vunpack.c.h.b16 %v1595_v61  ;;  %v4239_v47 = vld [vmem:[#allocation7 + $0x264] sm:$0xf0]  ;;  %v3782_v37 = vld [vmem:[#allocation7 + $0xe8] sm:$0xf0] }
 0x1c4   :  { %v3721_v51 = vor.u32 %v4174_v8, %v3718_v15 }
 0x1c5   :  { %v1526_v54 = vadd.f32 %v1525_v14, %v1477_v45  ;;  %v1431_v10 = vadd.f32 %v1430_v13, %v1382_v59  ;;  %v3973_v13 = vor.u32 %v4239_v47, %v3972_v56  ;;  %v4255_v59 = vld [vmem:[#allocation7 + $0x2e4] sm:$0xf0] }
 0x1c6   :  { %2776 = vmatpush.bf16.msra.mxu2 %v3721_v51 }
 0x1c7   :  { %v1566_v9 = vmax.f32 %v1526_v54, 0.0  ;;  %v4036_v54 = vld [vmem:[#allocation7 + $0x2e0] sm:$0xf]  ;;  %2678 = vmatpush.bf16.msra.mxu0 %v3973_v13 }
 0x1c9   :  { %v1596_v35 = vpack.c.bf16 %v1566_v9, %v1565_v42  ;;  %v1567_v42 = vmax.f32 %v4921_v27, 0.0  ;;  %v3785_v9 = vor.u32 %v4190_v11, %v3782_v37 }
 0x1ca   :  { %v1479_v23 = vpop.f32.mrf.mxu2  ;;  %v1383_v1 = vpop.f32.mrf.mxu0 }
 0x1cb   :  { %v1629_v26 = vunpack.c.l.b16 %v1596_v35  ;;  %v1630_v6 = vunpack.c.h.b16 %v1596_v35  ;;  %v1480_v57 = vadd.f32 %v1479_v23, %v1431_v10  ;;  %v1528_v53 = vpop.f32.mrf.mxu3  ;;  %v1384_v14 = vadd.f32 %v1383_v1, %v4935_v41  ;;  %v1432_v3 = vpop.f32.mrf.mxu1  ;;  %2825 = vmatpush.bf16.msra.mxu3 %v3785_v9 }
 0x1cc   :  { %v4037_v35 = vor.u32 %v4255_v59, %v4036_v54  ;;  %v1569_v9 = vmax.f32 %v4931_v25, 0.0  ;;  %v5280_v54 = vld [vmem:[#allocation8] sm:$0x3] }
 0x1cd   :  { %v5046_v45 = vpack.c.b16 %v1629_v26, %v1627_v43  ;;  %v5048_v39 = vpack.c.b16 %v1630_v6, %v1628_v36  ;;  %v1529_v61 = vadd.f32 %v1528_v53, %v1480_v57  ;;  %v1433_v36 = vadd.f32 %v1432_v3, %v1384_v14 }
 0x1ce   :  { %2727 = vmatpush.bf16.msra.mxu1 %v4037_v35 }
 0x1cf   :  { %5680 = vst [vmem:[#allocation20_spill] sm:$0xff] %v5046_v45  ;;  %v1568_v10 = vmax.f32 %v1529_v61, 0.0  ;;  %2587 = vmatmul.bf16.vlgmr.msrb.gmra.mxu2 %v5046_v45  ;;  %2636 = vmatmul.bf16.vlgmr.msrb.gmra.mxu3 %v5048_v39  ;;  %v1676_v41 = vshrl.u32 %v5046_v45, 16  ;;  %v1679_v43 = vshll.u32 %v5046_v45, 16  ;;  %v1683_v23 = vshrl.u32 %v5048_v39, 16 }
 0x1d0   :  { %5681 = vst [vmem:[#allocation21_spill] sm:$0xff] %v5048_v39  ;;  %v1686_v26 = vshll.u32 %v5048_v39, 16 }
 0x1d1   :  { %v1597_v27 = vpack.c.bf16 %v1568_v10, %v1567_v42  ;;  %v1678_v6 = vrot.slane %v1676_v41, 7  ;;  %v1685_v57 = vrot.slane %v1683_v23, 7  ;;  %v1819_v53 = vrot.slane %v1679_v43, 1 }
 0x1d2   :  { %v1481_v1 = vpop.f32.mrf.mxu2  ;;  %v1821_v8 = vrot.slane %v1686_v26, 1  ;;  %v1386_v51 = vpop.f32.mrf.mxu0 }
 0x1d3   :  { %v1482_v15 = vadd.f32 %v1481_v1, %v1433_v36  ;;  %v1530_v56 = vpop.f32.mrf.mxu3  ;;  %v1681_v47 = vor.u32 %v1679_v43, %v1678_v6  ;;  %v1435_v11 = vpop.f32.mrf.mxu1  ;;  %v1688_v37 = vor.u32 %v1686_v26, %v1685_v57  ;;  %v5057_v61 = vor.u32 %v1819_v53, %v1676_v41  ;;  %v4172_v1 = vld [vmem:[#allocation7 + $0x54] sm:$0xf] }
 0x1d4   :  { %v5059_v14 = vor.u32 %v1821_v8, %v1683_v23  ;;  %v1387_v13 = vadd.f32 %v1386_v51, %v4945_v58  ;;  %v1631_v43 = vunpack.c.l.b16 %v1597_v27  ;;  %v1632_v58 = vunpack.c.h.b16 %v1597_v27  ;;  %v3710_v8 = vld [vmem:[#allocation7 + $0x58] sm:$0xf0] }
 0x1d5   :  { %v1531_v3 = vadd.f32 %v1530_v56, %v1482_v15  ;;  %v5064_v59 = vsel %vm4465_vm2, 0, %v1681_v47  ;;  %v5069_v42 = vsel %vm4465_vm2, 0, %v1688_v37  ;;  %v3964_v15 = vld [vmem:[#allocation7 + $0x250] sm:$0xf]  ;;  %v3713_v25 = vor.u32 %v4172_v1, %v3710_v8  ;;  %v4237_v47 = vld [vmem:[#allocation7 + $0x254] sm:$0xf0] }
 0x1d6   :  { %2489 = vmatmul.bf16.vlgmr.msrb.gmra.mxu0 %v5064_v59  ;;  %2538 = vmatmul.bf16.vlgmr.msrb.gmra.mxu1 %v5069_v42  ;;  %v1436_v41 = vadd.f32 %v1435_v11, %v1387_v13  ;;  %v4188_v37 = vld [vmem:[#allocation7 + $0xd4] sm:$0xf]  ;;  %v3965_v27 = vor.u32 %v4237_v47, %v3964_v15 }
 0x1d7   :  { %v1570_v35 = vmax.f32 %v1531_v3, 0.0  ;;  %v3774_v3 = vld [vmem:[#allocation7 + $0xd8] sm:$0xf0]  ;;  %2777 = vmatpush.bf16.msra.mxu2 %v3713_v25 }
 0x1d8   :  { %2679 = vmatpush.bf16.msra.mxu0 %v3965_v27 }
 0x1d9   :  { %v1598_v10 = vpack.c.bf16 %v1570_v35, %v1569_v9  ;;  %v4028_v35 = vld [vmem:[#allocation7 + $0x2d0] sm:$0xf] }
 0x1da   :  { %v1484_v23 = vpop.f32.mrf.mxu2  ;;  %v1388_v53 = vpop.f32.mrf.mxu0 }
 0x1db   :  { %v1633_v36 = vunpack.c.l.b16 %v1598_v10  ;;  %v1634_v26 = vunpack.c.h.b16 %v1598_v10  ;;  %v1485_v6 = vadd.f32 %v1484_v23, %v1436_v41  ;;  %v1533_v57 = vpop.f32.mrf.mxu3  ;;  %v1389_v56 = vadd.f32 %v1388_v53, %v4951_v34  ;;  %v1437_v51 = vpop.f32.mrf.mxu1  ;;  %v4253_v10 = vld [vmem:[#allocation7 + $0x2d4] sm:$0xf0] }
 0x1dc   :  { %v1571_v41 = vmax.f32 %v4937_v20, 0.0  ;;  %v3777_v23 = vor.u32 %v4188_v37, %v3774_v3  ;;  %v4029_v39 = vor.u32 %v4253_v10, %v4028_v35  ;;  %v1573_v10 = vmax.f32 %v4947_v38, 0.0 }
 0x1dd   :  { %v1534_v9 = vadd.f32 %v1533_v57, %v1485_v6  ;;  %v5074_v11 = vpack.c.b16 %v1633_v36, %v1631_v43  ;;  %v5076_v13 = vpack.c.b16 %v1634_v26, %v1632_v58  ;;  %v1438_v36 = vadd.f32 %v1437_v51, %v1389_v56 }
 0x1de   :  { %2826 = vmatpush.bf16.msra.mxu3 %v3777_v23  ;;  %2728 = vmatpush.bf16.msra.mxu1 %v4029_v39 }
 0x1df   :  { %5683 = vst [vmem:[#allocation15_spill] sm:$0xff] %v5074_v11  ;;  %v1572_v45 = vmax.f32 %v1534_v9, 0.0  ;;  %2592 = vmatmul.bf16.gmra.mxu2 %v5074_v11  ;;  %2641 = vmatmul.bf16.gmra.mxu3 %v5076_v13  ;;  %v1690_v34 = vshrl.u32 %v5074_v11, 16  ;;  %v1693_v43 = vshll.u32 %v5074_v11, 16  ;;  %v1697_v58 = vshrl.u32 %v5076_v13, 16 }
 0x1e0   :  { %5684 = vst [vmem:[#allocation22_spill] sm:$0xff] %v5076_v13  ;;  %v1700_v26 = vshll.u32 %v5076_v13, 16 }
 0x1e1   :  { %v1599_v20 = vpack.c.bf16 %v1572_v45, %v1571_v41  ;;  %v1692_v6 = vrot.slane %v1690_v34, 7  ;;  %v1699_v57 = vrot.slane %v1697_v58, 7  ;;  %v1823_v53 = vrot.slane %v1693_v43, 1 }
 0x1e2   :  { %v1486_v1 = vpop.f32.mrf.mxu2  ;;  %v1825_v8 = vrot.slane %v1700_v26, 1  ;;  %v1391_v47 = vpop.f32.mrf.mxu0 }
 0x1e3   :  { %v1487_v15 = vadd.f32 %v1486_v1, %v1438_v36  ;;  %v1535_v25 = vpop.f32.mrf.mxu3  ;;  %v1695_v37 = vor.u32 %v1693_v43, %v1692_v6  ;;  %v1440_v3 = vpop.f32.mrf.mxu1  ;;  %v1702_v9 = vor.u32 %v1700_v26, %v1699_v57  ;;  %v5085_v35 = vor.u32 %v1823_v53, %v1690_v34  ;;  %v4170_v1 = vld [vmem:[#allocation7 + $0x44] sm:$0xf] }
 0x1e4   :  { %v5087_v56 = vor.u32 %v1825_v8, %v1697_v58  ;;  %v1392_v27 = vadd.f32 %v1391_v47, %v4961_v7  ;;  %v1635_v43 = vunpack.c.l.b16 %v1599_v20  ;;  %v1636_v7 = vunpack.c.h.b16 %v1599_v20  ;;  %v3702_v8 = vld [vmem:[#allocation7 + $0x48] sm:$0xf0] }
 0x1e5   :  { %v1536_v51 = vadd.f32 %v1535_v25, %v1487_v15  ;;  %v5092_v45 = vsel %vm4465_vm2, 0, %v1695_v37  ;;  %v5097_v39 = vsel %vm4465_vm2, 0, %v1702_v9  ;;  %v3956_v15 = vld [vmem:[#allocation7 + $0x240] sm:$0xf]  ;;  %v3705_v38 = vor.u32 %v4170_v1, %v3702_v8  ;;  %v4235_v37 = vld [vmem:[#allocation7 + $0x244] sm:$0xf0] }
 0x1e6   :  { %2494 = vmatmul.bf16.gmra.mxu0 %v5092_v45  ;;  %2543 = vmatmul.bf16.gmra.mxu1 %v5097_v39  ;;  %v1441_v34 = vadd.f32 %v1440_v3, %v1392_v27  ;;  %v4186_v9 = vld [vmem:[#allocation7 + $0xc4] sm:$0xf]  ;;  %v3957_v20 = vor.u32 %v4235_v37, %v3956_v15 }
 0x1e7   :  { %v1574_v41 = vmax.f32 %v1536_v51, 0.0  ;;  %v3766_v51 = vld [vmem:[#allocation7 + $0xc8] sm:$0xf0]  ;;  %2778 = vmatpush.bf16.msra.mxu2 %v3705_v38 }
 0x1e8   :  { %2680 = vmatpush.bf16.msra.mxu0 %v3957_v20 }
 0x1e9   :  { %v1600_v23 = vpack.c.bf16 %v1574_v41, %v1573_v10  ;;  %v4020_v41 = vld [vmem:[#allocation7 + $0x2c0] sm:$0xf] }
 0x1ea   :  { %v1489_v58 = vpop.f32.mrf.mxu2  ;;  %v1393_v53 = vpop.f32.mrf.mxu0 }
 0x1eb   :  { %v1637_v36 = vunpack.c.l.b16 %v1600_v23  ;;  %v1638_v26 = vunpack.c.h.b16 %v1600_v23  ;;  %v1490_v6 = vadd.f32 %v1489_v58, %v1441_v34  ;;  %v1538_v57 = vpop.f32.mrf.mxu3  ;;  %v1394_v25 = vadd.f32 %v1393_v53, %v4967_v50  ;;  %v1442_v47 = vpop.f32.mrf.mxu1  ;;  %v4251_v23 = vld [vmem:[#allocation7 + $0x2c4] sm:$0xf0] }
 0x1ec   :  { %v1575_v34 = vmax.f32 %v4953_v4, 0.0  ;;  %v3769_v58 = vor.u32 %v4186_v9, %v3766_v51  ;;  %v4021_v13 = vor.u32 %v4251_v23, %v4020_v41 }
 0x1ed   :  { %v1539_v10 = vadd.f32 %v1538_v57, %v1490_v6  ;;  %v5102_v3 = vpack.c.b16 %v1637_v36, %v1635_v43  ;;  %v5104_v27 = vpack.c.b16 %v1638_v26, %v1636_v7  ;;  %v1443_v36 = vadd.f32 %v1442_v47, %v1394_v25 }
 0x1ee   :  { %2827 = vmatpush.bf16.msra.mxu3 %v3769_v58  ;;  %2729 = vmatpush.bf16.msra.mxu1 %v4021_v13  ;;  %v1301_v13 = vadd.f32 %v4982_v52, %v4908_v33 }
 0x1ef   :  { %v1576_v11 = vmax.f32 %v1539_v10, 0.0  ;;  %2597 = vmatmul.bf16.gmra.mxu2 %v5102_v3  ;;  %2646 = vmatmul.bf16.gmra.mxu3 %v5104_v27  ;;  %v1704_v50 = vshrl.u32 %v5102_v3, 16  ;;  %v1707_v43 = vshll.u32 %v5102_v3, 16  ;;  %v1711_v7 = vshrl.u32 %v5104_v27, 16 }
 0x1f0   :  { %v1714_v26 = vshll.u32 %v5104_v27, 16 }
 0x1f1   :  { %v1601_v4 = vpack.c.bf16 %v1576_v11, %v1575_v34  ;;  %v1706_v6 = vrot.slane %v1704_v50, 7  ;;  %v1713_v57 = vrot.slane %v1711_v7, 7  ;;  %v1827_v53 = vrot.slane %v1707_v43, 1 }
 0x1f2   :  { %v1491_v1 = vpop.f32.mrf.mxu2  ;;  %v1829_v8 = vrot.slane %v1714_v26, 1  ;;  %v1396_v37 = vpop.f32.mrf.mxu0  ;;  %v1577_v34 = vmax.f32 %v4963_v40, 0.0 }
 0x1f3   :  { %v1492_v15 = vadd.f32 %v1491_v1, %v1443_v36  ;;  %v1540_v38 = vpop.f32.mrf.mxu3  ;;  %v1709_v9 = vor.u32 %v1707_v43, %v1706_v6  ;;  %v1445_v51 = vpop.f32.mrf.mxu1  ;;  %v1716_v10 = vor.u32 %v1714_v26, %v1713_v57  ;;  %v5113_v41 = vor.u32 %v1827_v53, %v1704_v50 }
 0x1f4   :  { %v5115_v25 = vor.u32 %v1829_v8, %v1711_v7  ;;  %v1397_v20 = vadd.f32 %v1396_v37, %v4980_v18  ;;  %v1350_v43 = vadd.f32 %v4984_v21, %v1301_v13  ;;  %v1639_v7 = vunpack.c.l.b16 %v1601_v4  ;;  %v4168_v8 = vld [vmem:[#allocation7 + $0x34] sm:$0xf]  ;;  %v4012_v13 = vld [vmem:[#allocation7 + $0x2b0] sm:$0xf] }
 0x1f5   :  { %v1541_v47 = vadd.f32 %v1540_v38, %v1492_v15  ;;  %v5120_v11 = vsel %vm4465_vm2, 0, %v1709_v9  ;;  %v5127_v23 = vsel %vm4465_vm2, 0, %v1716_v10  ;;  %v1640_v26 = vunpack.c.h.b16 %v1601_v4  ;;  %v3694_v15 = vld [vmem:[#allocation7 + $0x38] sm:$0xf0]  ;;  %v3948_v38 = vld [vmem:[#allocation7 + $0x230] sm:$0xf] }
 0x1f6   :  { %2499 = vmatmul.bf16.gmra.mxu0 %v5120_v11  ;;  %2548 = vmatmul.bf16.gmra.mxu1 %v5127_v23  ;;  %v1446_v18 = vadd.f32 %v1445_v51, %v1397_v20  ;;  %v3697_v9 = vor.u32 %v4168_v8, %v3694_v15  ;;  %v4233_v10 = vld [vmem:[#allocation7 + $0x234] sm:$0xf0] }
 0x1f7   :  { %v1578_v58 = vmax.f32 %v1541_v47, 0.0  ;;  %v4184_v47 = vld [vmem:[#allocation7 + $0xb4] sm:$0xf]  ;;  %v3949_v4 = vor.u32 %v4233_v10, %v3948_v38 }
 0x1f8   :  { %2779 = vmatpush.bf16.msra.mxu2 %v3697_v9 }
 0x1f9   :  { %v1602_v50 = vpack.c.bf16 %v1578_v58, %v1577_v34  ;;  %v3758_v34 = vld [vmem:[#allocation7 + $0xb8] sm:$0xf0]  ;;  %v4249_v58 = vld [vmem:[#allocation7 + $0x2b4] sm:$0xf0]  ;;  %2681 = vmatpush.bf16.msra.mxu0 %v3949_v4 }
 0x1fa   :  { %v1494_v36 = vpop.f32.mrf.mxu2  ;;  %v1398_v1 = vpop.f32.mrf.mxu0 }
 0x1fb   :  { %v1641_v6 = vunpack.c.l.b16 %v1602_v50  ;;  %v1642_v52 = vunpack.c.h.b16 %v1602_v50  ;;  %v1495_v57 = vadd.f32 %v1494_v36, %v1446_v18  ;;  %v1543_v53 = vpop.f32.mrf.mxu3  ;;  %v1399_v37 = vadd.f32 %v1398_v1, %v1350_v43  ;;  %v1447_v40 = vpop.f32.mrf.mxu1  ;;  %v5685_v18 = vld [vmem:[#allocation19_spill] sm:$0xff] }
 0x1fc   :  { %v1579_v50 = vmax.f32 %v4969_v22, 0.0  ;;  %v1203_v36 = vadd.f32 %v4976_v17, %v5685_v18  ;;  %v3761_v43 = vor.u32 %v4184_v47, %v3758_v34  ;;  %v4013_v1 = vor.u32 %v4249_v58, %v4012_v13 }
 0x1fd   :  { %v1544_v51 = vadd.f32 %v1543_v53, %v1495_v57  ;;  %v5132_v20 = vpack.c.b16 %v1641_v6, %v1639_v7  ;;  %v5134_v21 = vpack.c.b16 %v1642_v52, %v1640_v26  ;;  %v1448_v52 = vadd.f32 %v1447_v40, %v1399_v37 }
 0x1fe   :  { %2828 = vmatpush.bf16.msra.mxu3 %v3761_v43  ;;  %2730 = vmatpush.bf16.msra.mxu1 %v4013_v1  ;;  %v1252_v10 = vadd.f32 %v4978_v28, %v1203_v36  ;;  %v1306_v28 = vadd.f32 %v5000_v46, %v4908_v33 }
 0x1ff   :  { %v1580_v8 = vmax.f32 %v1544_v51, 0.0  ;;  %2602 = vmatmul.bf16.gmra.mxu2 %v5132_v20  ;;  %2651 = vmatmul.bf16.gmra.mxu3 %v5134_v21  ;;  %v1718_v7 = vshrl.u32 %v5132_v20, 16  ;;  %v1721_v26 = vshll.u32 %v5132_v20, 16  ;;  %v1725_v6 = vshrl.u32 %v5134_v21, 16 }
 0x200   :  { %v1728_v22 = vshll.u32 %v5134_v21, 16  ;;  %v1581_v1 = vmax.f32 %v1252_v10, 0.0 }
 0x201   :  { %v1603_v17 = vpack.c.bf16 %v1580_v8, %v1579_v50  ;;  %v1720_v57 = vrot.slane %v1718_v7, 7  ;;  %v1727_v53 = vrot.slane %v1725_v6, 7  ;;  %v1831_v15 = vrot.slane %v1721_v26, 1 }
 0x202   :  { %v1496_v38 = vpop.f32.mrf.mxu2  ;;  %v1833_v9 = vrot.slane %v1728_v22, 1  ;;  %v1401_v51 = vpop.f32.mrf.mxu0 }
 0x203   :  { %v1497_v47 = vadd.f32 %v1496_v38, %v1448_v52  ;;  %v1545_v34 = vpop.f32.mrf.mxu3  ;;  %v1723_v13 = vor.u32 %v1721_v26, %v1720_v57  ;;  %v1450_v58 = vpop.f32.mrf.mxu1  ;;  %v1730_v18 = vor.u32 %v1728_v22, %v1727_v53  ;;  %v5146_v37 = vor.u32 %v1831_v15, %v1718_v7 }
 0x204   :  { %v5148_v40 = vor.u32 %v1833_v9, %v1725_v6  ;;  %v1402_v50 = vadd.f32 %v1401_v51, %v4998_v5  ;;  %v1355_v5 = vadd.f32 %v5002_v60, %v1306_v28  ;;  %v1643_v6 = vunpack.c.l.b16 %v1603_v17  ;;  %v4166_v9 = vld [vmem:[#allocation7 + $0x24] sm:$0xf]  ;;  %v4004_v28 = vld [vmem:[#allocation7 + $0x2a0] sm:$0xf] }
 0x205   :  { %v1546_v4 = vadd.f32 %v1545_v34, %v1497_v47  ;;  %v5153_v43 = vsel %vm4465_vm2, 0, %v1723_v13  ;;  %v5160_v36 = vsel %vm4465_vm2, 0, %v1730_v18  ;;  %v1644_v22 = vunpack.c.h.b16 %v1603_v17  ;;  %v3686_v47 = vld [vmem:[#allocation7 + $0x28] sm:$0xf0]  ;;  %v3940_v34 = vld [vmem:[#allocation7 + $0x220] sm:$0xf] }
 0x206   :  { %2504 = vmatmul.bf16.gmra.mxu0 %v5153_v43  ;;  %2553 = vmatmul.bf16.gmra.mxu1 %v5160_v36  ;;  %v1451_v26 = vadd.f32 %v1450_v58, %v1402_v50  ;;  %v3689_v13 = vor.u32 %v4166_v9, %v3686_v47  ;;  %v4231_v18 = vld [vmem:[#allocation7 + $0x224] sm:$0xf0] }
 0x207   :  { %v1582_v8 = vmax.f32 %v1546_v4, 0.0  ;;  %v4182_v4 = vld [vmem:[#allocation7 + $0xa4] sm:$0xf]  ;;  %v3941_v17 = vor.u32 %v4231_v18, %v3940_v34 }
 0x208   :  { %2780 = vmatpush.bf16.msra.mxu2 %v3689_v13 }
 0x209   :  { %v1604_v7 = vpack.c.bf16 %v1582_v8, %v1581_v1  ;;  %v3750_v1 = vld [vmem:[#allocation7 + $0xa8] sm:$0xf0]  ;;  %v4247_v8 = vld [vmem:[#allocation7 + $0x2a4] sm:$0xf0]  ;;  %2682 = vmatpush.bf16.msra.mxu0 %v3941_v17 }
 0x20a   :  { %v1499_v52 = vpop.f32.mrf.mxu2  ;;  %v1403_v38 = vpop.f32.mrf.mxu0 }
 0x20b   :  { %v1645_v57 = vunpack.c.l.b16 %v1604_v7  ;;  %v1646_v53 = vunpack.c.h.b16 %v1604_v7  ;;  %v1500_v46 = vadd.f32 %v1499_v52, %v1451_v26  ;;  %v1548_v15 = vpop.f32.mrf.mxu3  ;;  %v1404_v51 = vadd.f32 %v1403_v38, %v1355_v5  ;;  %v1452_v10 = vpop.f32.mrf.mxu1 }
 0x20c   :  { %v1583_v7 = vmax.f32 %v4987_v48, 0.0  ;;  %v1208_v26 = vadd.f32 %v4994_v0, %v4864_v31  ;;  %v3753_v5 = vor.u32 %v4182_v4, %v3750_v1  ;;  %v4005_v52 = vor.u32 %v4247_v8, %v4004_v28 }
 0x20d   :  { %v1549_v58 = vadd.f32 %v1548_v15, %v1500_v46  ;;  %v5164_v50 = vpack.c.b16 %v1645_v57, %v1643_v6  ;;  %v5166_v60 = vpack.c.b16 %v1646_v53, %v1644_v22  ;;  %v1453_v53 = vadd.f32 %v1452_v10, %v1404_v51 }
 0x20e   :  { %2829 = vmatpush.bf16.msra.mxu3 %v3753_v5  ;;  %2731 = vmatpush.bf16.msra.mxu1 %v4005_v52  ;;  %v1257_v34 = vadd.f32 %v4996_v49, %v1208_v26  ;;  %v1311_v49 = vadd.f32 %v5018_v16, %v4908_v33 }
 0x20f   :  { %v1584_v38 = vmax.f32 %v1549_v58, 0.0  ;;  %2607 = vmatmul.bf16.gmra.mxu2 %v5164_v50  ;;  %2656 = vmatmul.bf16.gmra.mxu3 %v5166_v60  ;;  %v1732_v6 = vshrl.u32 %v5164_v50, 16  ;;  %v1735_v22 = vshll.u32 %v5164_v50, 16  ;;  %v1739_v57 = vshrl.u32 %v5166_v60, 16 }
 0x210   :  { %v1742_v48 = vshll.u32 %v5166_v60, 16  ;;  %v1585_v5 = vmax.f32 %v1257_v34, 0.0 }
 0x211   :  { %v1605_v31 = vpack.c.bf16 %v1584_v38, %v1583_v7  ;;  %v1734_v0 = vrot.slane %v1732_v6, 7  ;;  %v1741_v46 = vrot.slane %v1739_v57, 7  ;;  %v1835_v15 = vrot.slane %v1735_v22, 1 }
 0x212   :  { %v1501_v9 = vpop.f32.mrf.mxu2  ;;  %v1837_v47 = vrot.slane %v1742_v48, 1  ;;  %v1406_v4 = vpop.f32.mrf.mxu0 }
 0x213   :  { %v1502_v13 = vadd.f32 %v1501_v9, %v1453_v53  ;;  %v1550_v18 = vpop.f32.mrf.mxu3  ;;  %v1737_v1 = vor.u32 %v1735_v22, %v1734_v0  ;;  %v1455_v58 = vpop.f32.mrf.mxu1  ;;  %v1744_v28 = vor.u32 %v1742_v48, %v1741_v46  ;;  %v5178_v51 = vor.u32 %v1835_v15, %v1732_v6  ;;  %v4164_v9 = vld [vmem:[#allocation7 + $0x14] sm:$0xf] }
 0x214   :  { %v5180_v10 = vor.u32 %v1837_v47, %v1739_v57  ;;  %v1407_v8 = vadd.f32 %v1406_v4, %v5016_v32  ;;  %v1360_v32 = vadd.f32 %v5020_v55, %v1311_v49  ;;  %v1647_v22 = vunpack.c.l.b16 %v1605_v31  ;;  %v3678_v47 = vld [vmem:[#allocation7 + $0x18] sm:$0xf0]  ;;  %v3996_v49 = vld [vmem:[#allocation7 + $0x290] sm:$0xf] }
 0x215   :  { %v1551_v17 = vadd.f32 %v1550_v18, %v1502_v13  ;;  %v5185_v7 = vsel %vm4465_vm2, 0, %v1737_v1  ;;  %v5192_v26 = vsel %vm4465_vm2, 0, %v1744_v28  ;;  %v1648_v53 = vunpack.c.h.b16 %v1605_v31  ;;  %v3932_v13 = vld [vmem:[#allocation7 + $0x210] sm:$0xf]  ;;  %v4229_v1 = vld [vmem:[#allocation7 + $0x214] sm:$0xf0] }
 0x216   :  { %2509 = vmatmul.bf16.gmra.mxu0 %v5185_v7  ;;  %2558 = vmatmul.bf16.gmra.mxu1 %v5192_v26  ;;  %v1456_v6 = vadd.f32 %v1455_v58, %v1407_v8  ;;  %v3681_v4 = vor.u32 %v4164_v9, %v3678_v47  ;;  %v4180_v28 = vld [vmem:[#allocation7 + $0x94] sm:$0xf]  ;;  %v3933_v31 = vor.u32 %v4229_v1, %v3932_v13 }
 0x217   :  { %v1586_v52 = vmax.f32 %v1551_v17, 0.0  ;;  %v3742_v17 = vld [vmem:[#allocation7 + $0x98] sm:$0xf0] }
 0x218   :  { %2781 = vmatpush.bf16.msra.mxu2 %v3681_v4  ;;  %2683 = vmatpush.bf16.msra.mxu0 %v3933_v31 }
 0x219   :  { %v1606_v38 = vpack.c.bf16 %v1586_v52, %v1585_v5  ;;  %v4245_v5 = vld [vmem:[#allocation7 + $0x294] sm:$0xf0]  ;;  %v1587_v52 = vmax.f32 %v5005_v44, 0.0 }
 0x21a   :  { %v1504_v57 = vpop.f32.mrf.mxu2  ;;  %v1408_v15 = vpop.f32.mrf.mxu0 }
 0x21b   :  { %v1649_v48 = vunpack.c.l.b16 %v1606_v38  ;;  %v1650_v0 = vunpack.c.h.b16 %v1606_v38  ;;  %v1505_v16 = vadd.f32 %v1504_v57, %v1456_v6  ;;  %v1553_v46 = vpop.f32.mrf.mxu3  ;;  %v1409_v18 = vadd.f32 %v1408_v15, %v1360_v32  ;;  %v1457_v34 = vpop.f32.mrf.mxu1 }
 0x21c   :  { %v1213_v38 = vadd.f32 %v5012_v62, %v4890_v19  ;;  %v3745_v6 = vor.u32 %v4180_v28, %v3742_v17  ;;  %v3997_v32 = vor.u32 %v4245_v5, %v3996_v49  ;;  %v3670_v19 = vld [vmem:[#allocation7 + $0x8] sm:$0xf0] }
 0x21d   :  { %v1554_v58 = vadd.f32 %v1553_v46, %v1505_v16  ;;  %v5196_v8 = vpack.c.b16 %v1649_v48, %v1647_v22  ;;  %v5198_v55 = vpack.c.b16 %v1650_v0, %v1648_v53  ;;  %v4162_v0 = vld [vmem:[#allocation7 + $0x4] sm:$0xf]  ;;  %v1458_v16 = vadd.f32 %v1457_v34, %v1409_v18 }
 0x21e   :  { %2830 = vmatpush.bf16.msra.mxu3 %v3745_v6  ;;  %2732 = vmatpush.bf16.msra.mxu1 %v3997_v32  ;;  %v3673_v9 = vor.u32 %v4162_v0, %v3670_v19  ;;  %v1262_v1 = vadd.f32 %v5014_v63, %v1213_v38  ;;  %v1316_v63 = vadd.f32 %v5036_v12, %v4908_v33  ;;  %v4178_v0 = vld [vmem:[#allocation7 + $0x84] sm:$0xf]  ;;  %v4243_v33 = vld [vmem:[#allocation7 + $0x284] sm:$0xf0] }
 0x21f   :  { %v1588_v57 = vmax.f32 %v1554_v58, 0.0  ;;  %2612 = vmatmul.bf16.gmra.mxu2 %v5196_v8  ;;  %2661 = vmatmul.bf16.gmra.mxu3 %v5198_v55  ;;  %v1746_v22 = vshrl.u32 %v5196_v8, 16  ;;  %v1749_v53 = vshll.u32 %v5196_v8, 16  ;;  %v1753_v48 = vshrl.u32 %v5198_v55, 16 }
 0x220   :  { %v1756_v44 = vshll.u32 %v5198_v55, 16  ;;  %2782 = vmatpush.bf16.msra.mxu2 %v3673_v9  ;;  %v1365_v12 = vadd.f32 %v5038_v30, %v1316_v63  ;;  %v1591_v30 = vmax.f32 %v5023_v24, 0.0 }
 0x221   :  { %v1607_v62 = vpack.c.bf16 %v1588_v57, %v1587_v52  ;;  %v1748_v46 = vrot.slane %v1746_v22, 7  ;;  %v1755_v15 = vrot.slane %v1753_v48, 7  ;;  %v1839_v13 = vrot.slane %v1749_v53, 1 }
 0x222   :  { %v1506_v47 = vpop.f32.mrf.mxu2  ;;  %v1841_v4 = vrot.slane %v1756_v44, 1  ;;  %v1411_v58 = vpop.f32.mrf.mxu0  ;;  %v1589_v57 = vmax.f32 %v1262_v1, 0.0 }
 0x223   :  { %v1507_v28 = vadd.f32 %v1506_v47, %v1458_v16  ;;  %v1555_v17 = vpop.f32.mrf.mxu3  ;;  %v1751_v49 = vor.u32 %v1749_v53, %v1748_v46  ;;  %v1758_v18 = vor.u32 %v1756_v44, %v1755_v15  ;;  %v5210_v34 = vor.u32 %v1839_v13, %v1746_v22  ;;  %v1460_v6 = vpop.f32.mrf.mxu1  ;;  %v3924_v53 = vld [vmem:[#allocation7 + $0x200] sm:$0xf]  ;;  %v3734_v16 = vld [vmem:[#allocation7 + $0x88] sm:$0xf0] }
 0x224   :  { %v5212_v31 = vor.u32 %v1841_v4, %v1753_v48  ;;  %v1412_v52 = vadd.f32 %v1411_v58, %v5034_v2  ;;  %v4227_v2 = vld [vmem:[#allocation7 + $0x204] sm:$0xf0]  ;;  %v3988_v44 = vld [vmem:[#allocation7 + $0x280] sm:$0xf]  ;;  %v3737_v15 = vor.u32 %v4178_v0, %v3734_v16  ;;  %v1651_v9 = vunpack.c.l.b16 %v1607_v62 }
 0x225   :  { %v1556_v5 = vadd.f32 %v1555_v17, %v1507_v28  ;;  %v5217_v32 = vsel %vm4465_vm2, 0, %v1751_v49  ;;  %v5224_v38 = vsel %vm4465_vm2, 0, %v1758_v18  ;;  %v3925_v48 = vor.u32 %v4227_v2, %v3924_v53 }
 0x226   :  { %2514 = vmatmul.bf16.gmra.mxu0 %v5217_v32  ;;  %2563 = vmatmul.bf16.gmra.mxu1 %v5224_v38  ;;  %v1461_v46 = vadd.f32 %v1460_v6, %v1412_v52  ;;  %v3989_v13 = vor.u32 %v4243_v33, %v3988_v44  ;;  %v1652_v4 = vunpack.c.h.b16 %v1607_v62  ;;  %v5686_v6 = vld [vmem:[#allocation17_spill] sm:$0xff]  ;;  %v5687_v33 = vld [vmem:[#allocation18_spill] sm:$0xff] }
 0x227   :  { %v1590_v22 = vmax.f32 %v1556_v5, 0.0  ;;  %2684 = vmatpush.bf16.msra.mxu0 %v3925_v48  ;;  %2831 = vmatpush.bf16.msra.mxu3 %v3737_v15  ;;  %v1218_v63 = vadd.f32 %v5686_v6, %v4900_v29  ;;  %v3982_v6 = vld [vmem:[#allocation7 + $0x278] sm:$0xf0] }
 0x228   :  { %2733 = vmatpush.bf16.msra.mxu1 %v3989_v13 }
 0x229   :  { %v1608_v19 = vpack.c.bf16 %v1590_v22, %v1589_v57 }
 0x22a   :  { %v1509_v47 = vpop.f32.mrf.mxu2  ;;  %v1413_v49 = vpop.f32.mrf.mxu0 }
 0x22b   :  { %v1653_v1 = vunpack.c.l.b16 %v1608_v19  ;;  %v1654_v28 = vunpack.c.h.b16 %v1608_v19  ;;  %v1510_v17 = vadd.f32 %v1509_v47, %v1461_v46  ;;  %v1558_v58 = vpop.f32.mrf.mxu3  ;;  %v1414_v18 = vadd.f32 %v1413_v49, %v1365_v12  ;;  %v1462_v62 = vpop.f32.mrf.mxu1 }
 0x22c   :  { %v1267_v12 = vadd.f32 %v5687_v33, %v1218_v63  ;;  %v4208_v63 = vld [vmem:[#allocation7 + $0x174] sm:$0xf] }
 0x22d   :  { %v1559_v5 = vadd.f32 %v1558_v58, %v1510_v17  ;;  %v5228_v57 = vpack.c.b16 %v1653_v1, %v1651_v9  ;;  %v5230_v52 = vpack.c.b16 %v1654_v28, %v1652_v4  ;;  %v1463_v0 = vadd.f32 %v1462_v62, %v1414_v18 }
 0x22e   :  { %v1593_v18 = vmax.f32 %v1267_v12, 0.0 }
 0x22f   :  { %v1592_v22 = vmax.f32 %v1559_v5, 0.0  ;;  %2617 = vmatmul.bf16.gmra.mxu2 %v5228_v57  ;;  %2666 = vmatmul.bf16.gmra.mxu3 %v5230_v52  ;;  %v1760_v53 = vshrl.u32 %v5228_v57, 16  ;;  %v1763_v2 = vshll.u32 %v5228_v57, 16  ;;  %v1767_v48 = vshrl.u32 %v5230_v52, 16 }
 0x230   :  { %v1770_v16 = vshll.u32 %v5230_v52, 16 }
 0x231   :  { %v1609_v44 = vpack.c.bf16 %v1592_v22, %v1591_v30  ;;  %v1762_v24 = vrot.slane %v1760_v53, 7  ;;  %v1769_v19 = vrot.slane %v1767_v48, 7  ;;  %v1843_v46 = vrot.slane %v1763_v2, 1  ;;  %v4240_v30 = vld [vmem:[#allocation7 + $0x274] sm:$0xf] }
 0x232   :  { %v1511_v29 = vpop.f32.mrf.mxu2  ;;  %v1845_v15 = vrot.slane %v1770_v16, 1  ;;  %v3985_v62 = vor.u32 %v4240_v30, %v3982_v6 }
 0x233   :  { %v1512_v9 = vadd.f32 %v1511_v29, %v1463_v0  ;;  %v1765_v47 = vor.u32 %v1763_v2, %v1762_v24  ;;  %v1560_v13 = vpop.f32.mrf.mxu3  ;;  %v1772_v4 = vor.u32 %v1770_v16, %v1769_v19  ;;  %v5242_v1 = vor.u32 %v1843_v46, %v1760_v53  ;;  %v3854_v53 = vld [vmem:[#allocation7 + $0x178] sm:$0xf0]  ;;  %v4256_v2 = vld [vmem:[#allocation7 + $0x2f4] sm:$0xf] }
 0x234   :  { %v5244_v28 = vor.u32 %v1845_v15, %v1767_v48  ;;  %v4046_v48 = vld [vmem:[#allocation7 + $0x2f8] sm:$0xf0]  ;;  %v1655_v0 = vunpack.c.l.b16 %v1609_v44  ;;  %v3857_v16 = vor.u32 %v4208_v63, %v3854_v53  ;;  %v4224_v19 = vld [vmem:[#allocation7 + $0x1f4] sm:$0xf]  ;;  %v1656_v29 = vunpack.c.h.b16 %v1609_v44  ;;  %2971 = vmatpush.bf16.msrb.mxu2 %v3985_v62 }
 0x235   :  { %v1561_v17 = vadd.f32 %v1560_v13, %v1512_v9  ;;  %v5248_v58 = vsel %vm4465_vm2, 0, %v1765_v47  ;;  %v5253_v49 = vsel %vm4465_vm2, 0, %v1772_v4  ;;  %v4049_v24 = vor.u32 %v4256_v2, %v4046_v48  ;;  %v3918_v46 = vld [vmem:[#allocation7 + $0x1f8] sm:$0xf0] }
 0x236   :  { %2519 = vmatmul.bf16.gmra.mxu0 %v5248_v58  ;;  %2568 = vmatmul.bf16.gmra.mxu1 %v5253_v49  ;;  %v3921_v12 = vor.u32 %v4224_v19, %v3918_v46  ;;  %v3846_v46 = vld [vmem:[#allocation7 + $0x168] sm:$0xf0] }
 0x237   :  { %v1594_v5 = vmax.f32 %v1561_v17, 0.0  ;;  %2873 = vmatpush.bf16.msrb.mxu0 %v3857_v16  ;;  %3020 = vmatpush.bf16.msrb.mxu3 %v4049_v24  ;;  %v3974_v16 = vld [vmem:[#allocation7 + $0x268] sm:$0xf0]  ;;  %v4206_v24 = vld [vmem:[#allocation7 + $0x164] sm:$0xf] }
 0x238   :  { %2922 = vmatpush.bf16.msrb.mxu1 %v3921_v12 }
 0x239   :  { %v1610_v22 = vpack.c.bf16 %v1594_v5, %v1593_v18 }
 0x23b   :  { %v1657_v15 = vunpack.c.l.b16 %v1610_v22  ;;  %v1658_v33 = vunpack.c.h.b16 %v1610_v22 }
 0x23d   :  { %v5256_v9 = vpack.c.b16 %v1657_v15, %v1655_v0  ;;  %v5258_v47 = vpack.c.b16 %v1658_v33, %v1656_v29  ;;  %v4238_v0 = vld [vmem:[#allocation7 + $0x264] sm:$0xf]  ;;  %v4038_v15 = vld [vmem:[#allocation7 + $0x2e8] sm:$0xf0]  ;;  %v3849_v33 = vor.u32 %v4206_v24, %v3846_v46  ;;  %v4236_v24 = vld [vmem:[#allocation7 + $0x254] sm:$0xf] }
 0x23e   :  { %v3977_v19 = vor.u32 %v4238_v0, %v3974_v16  ;;  %v4254_v29 = vld [vmem:[#allocation7 + $0x2e4] sm:$0xf]  ;;  %v5291_v0 = vsel %vm4695_vm5, %v5057_v61, 0  ;;  %v4204_v46 = vld [vmem:[#allocation7 + $0x154] sm:$0xf] }
 0x23f   :  { %5688 = vst [vmem:[#allocation19_spill] sm:$0xff] %v5258_v47  ;;  %2622 = vmatmul.bf16.gmra.mxu2 %v5256_v9  ;;  %2671 = vmatmul.bf16.gmra.mxu3 %v5258_v47  ;;  %v1774_v13 = vshrl.u32 %v5256_v9, 16  ;;  %v1777_v4 = vshll.u32 %v5256_v9, 16  ;;  %v1781_v44 = vshrl.u32 %v5258_v47, 16  ;;  %v1784_v17 = vshll.u32 %v5258_v47, 16 }
 0x240   :  { %v4041_v12 = vor.u32 %v4254_v29, %v4038_v15  ;;  %2972 = vmatpush.bf16.msrb.mxu2 %v3977_v19  ;;  %2874 = vmatpush.bf16.msrb.mxu0 %v3849_v33  ;;  %v3966_v19 = vld [vmem:[#allocation7 + $0x258] sm:$0xf0]  ;;  %v4252_v33 = vld [vmem:[#allocation7 + $0x2d4] sm:$0xf] }
 0x241   :  { %v1776_v18 = vrot.slane %v1774_v13, 7  ;;  %v1783_v5 = vrot.slane %v1781_v44, 7  ;;  %v1847_v30 = vrot.slane %v1777_v4, 1  ;;  %v1849_v6 = vrot.slane %v1784_v17, 1  ;;  %v3838_v15 = vld [vmem:[#allocation7 + $0x158] sm:$0xf0] }
 0x242   :  { %3021 = vmatpush.bf16.msrb.mxu3 %v4041_v12  ;;  %v3969_v29 = vor.u32 %v4236_v24, %v3966_v19  ;;  %v4030_v12 = vld [vmem:[#allocation7 + $0x2d8] sm:$0xf0] }
 0x243   :  { %v1779_v63 = vor.u32 %v1777_v4, %v1776_v18  ;;  %v1786_v22 = vor.u32 %v1784_v17, %v1783_v5  ;;  %v5266_v62 = vor.u32 %v1847_v30, %v1774_v13  ;;  %v5268_v53 = vor.u32 %v1849_v6, %v1781_v44  ;;  %v4222_v13 = vld [vmem:[#allocation7 + $0x1e4] sm:$0xf]  ;;  %v3910_v4 = vld [vmem:[#allocation7 + $0x1e8] sm:$0xf0] }
 0x244   :  { %v3913_v44 = vor.u32 %v4222_v13, %v3910_v4  ;;  %v5285_v17 = vperm.slane %v5280_v54, 0  ;;  %v3841_v4 = vor.u32 %v4204_v46, %v3838_v15  ;;  %2973 = vmatpush.bf16.msrb.mxu2 %v3969_v29 }
 0x245   :  { %v5272_v2 = vsel %vm4465_vm2, 0, %v1779_v63  ;;  %v5276_v48 = vsel %vm4465_vm2, 0, %v1786_v22  ;;  %v5446_v22 = vperm.slane %v5280_v54, 1 }
 0x246   :  { %2524 = vmatmul.bf16.gmra.mxu0 %v5272_v2  ;;  %2573 = vmatmul.bf16.gmra.mxu1 %v5276_v48 }
 0x247   :  { %2923 = vmatpush.bf16.msrb.mxu1 %v3913_v44  ;;  %v4033_v44 = vor.u32 %v4252_v33, %v4030_v12  ;;  %2875 = vmatpush.bf16.msrb.mxu0 %v3841_v4  ;;  %v5311_v12 = vsel %vm4695_vm5, %v5085_v35, 0  ;;  %v4202_v4 = vld [vmem:[#allocation7 + $0x144] sm:$0xf] }
 0x249   :  { %3022 = vmatpush.bf16.msrb.mxu3 %v4033_v44 }
 0x24f   :  { %2783 = vmatmul.bf16.vlgmr.msra.gmra.mxu2 %v5064_v59  ;;  %2832 = vmatmul.bf16.vlgmr.msra.gmra.mxu3 %v5069_v42  ;;  %v5297_v59 = vsel %vm4695_vm5, %v5059_v14, 0 }
 0x252   :  { %v2588_v18 = vpop.f32.mrf.mxu2  ;;  %v2637_v5 = vpop.f32.mrf.mxu3 }
 0x253   :  { %v2490_v30 = vpop.f32.mrf.mxu0  ;;  %v2539_v63 = vpop.f32.mrf.mxu1 }
 0x254   :  { %v2491_v6 = vadd.f32 %v2490_v30, %v5285_v17  ;;  %v4220_v30 = vld [vmem:[#allocation7 + $0x1d4] sm:$0xf] }
 0x256   :  { %v2540_v16 = vadd.f32 %v2539_v63, %v2491_v6  ;;  %2685 = vmatmul.bf16.vlgmr.msra.gmra.mxu0 %v5291_v0  ;;  %2734 = vmatmul.bf16.vlgmr.msra.gmra.mxu1 %v5297_v59  ;;  %v3902_v6 = vld [vmem:[#allocation7 + $0x1d8] sm:$0xf0] }
 0x257   :  { %v3905_v47 = vor.u32 %v4220_v30, %v3902_v6  ;;  %v3830_v30 = vld [vmem:[#allocation7 + $0x148] sm:$0xf0]  ;;  %v4250_v6 = vld [vmem:[#allocation7 + $0x2c4] sm:$0xf] }
 0x258   :  { %v2589_v42 = vadd.f32 %v2588_v18, %v2540_v16 }
 0x259   :  { %2924 = vmatpush.bf16.msrb.mxu1 %v3905_v47 }
 0x25a   :  { %v2590_v61 = vpop.f32.mrf.mxu2  ;;  %v2639_v13 = vpop.f32.mrf.mxu3  ;;  %v5300_v63 = vadd.f32 %v2637_v5, %v2589_v42 }
 0x25b   :  { %v2492_v14 = vpop.f32.mrf.mxu0  ;;  %v2541_v16 = vpop.f32.mrf.mxu1 }
 0x25c   :  { %v2493_v18 = vadd.f32 %v2492_v14, %v5285_v17  ;;  %v4022_v14 = vld [vmem:[#allocation7 + $0x2c8] sm:$0xf0] }
 0x25e   :  { %v2542_v24 = vadd.f32 %v2541_v16, %v2493_v18  ;;  %v3833_v16 = vor.u32 %v4202_v4, %v3830_v30 }
 0x25f   :  { %2788 = vmatmul.bf16.gmra.mxu2 %v5092_v45  ;;  %2837 = vmatmul.bf16.gmra.mxu3 %v5097_v39  ;;  %v5317_v45 = vsel %vm4695_vm5, %v5087_v56, 0 }
 0x260   :  { %v2591_v19 = vadd.f32 %v2590_v61, %v2542_v24  ;;  %v4234_v61 = vld [vmem:[#allocation7 + $0x244] sm:$0xf]  ;;  %v4025_v24 = vor.u32 %v4250_v6, %v4022_v14  ;;  %2876 = vmatpush.bf16.msrb.mxu0 %v3833_v16  ;;  %v5331_v14 = vsel %vm4695_vm5, %v5113_v41, 0 }
 0x262   :  { %v2593_v46 = vpop.f32.mrf.mxu2  ;;  %v2642_v15 = vpop.f32.mrf.mxu3  ;;  %v5305_v33 = vadd.f32 %v2639_v13, %v2591_v19  ;;  %v3958_v13 = vld [vmem:[#allocation7 + $0x248] sm:$0xf0]  ;;  %v4218_v19 = vld [vmem:[#allocation7 + $0x1c4] sm:$0xf]  ;;  %3023 = vmatpush.bf16.msrb.mxu3 %v4025_v24  ;;  %v4200_v24 = vld [vmem:[#allocation7 + $0x134] sm:$0xf] }
 0x263   :  { %v2495_v5 = vpop.f32.mrf.mxu0  ;;  %v2544_v29 = vpop.f32.mrf.mxu1  ;;  %v3961_v44 = vor.u32 %v4234_v61, %v3958_v13 }
 0x264   :  { %v2496_v42 = vadd.f32 %v2495_v5, %v5285_v17  ;;  %v3894_v5 = vld [vmem:[#allocation7 + $0x1c8] sm:$0xf0] }
 0x265   :  { %2974 = vmatpush.bf16.msrb.mxu2 %v3961_v44 }
 0x266   :  { %v2545_v47 = vadd.f32 %v2544_v29, %v2496_v42  ;;  %2690 = vmatmul.bf16.gmra.mxu0 %v5311_v12  ;;  %2739 = vmatmul.bf16.gmra.mxu1 %v5317_v45  ;;  %v3897_v29 = vor.u32 %v4218_v19, %v3894_v5  ;;  %v3822_v5 = vld [vmem:[#allocation7 + $0x138] sm:$0xf0] }
 0x268   :  { %v2594_v39 = vadd.f32 %v2593_v46, %v2545_v47  ;;  %2925 = vmatpush.bf16.msrb.mxu1 %v3897_v29  ;;  %v4014_v29 = vld [vmem:[#allocation7 + $0x2b8] sm:$0xf0] }
 0x26a   :  { %v2595_v35 = vpop.f32.mrf.mxu2  ;;  %v2644_v18 = vpop.f32.mrf.mxu3  ;;  %v5320_v42 = vadd.f32 %v2642_v15, %v2594_v39 }
 0x26b   :  { %v2497_v56 = vpop.f32.mrf.mxu0  ;;  %v2546_v47 = vpop.f32.mrf.mxu1 }
 0x26c   :  { %v2498_v46 = vadd.f32 %v2497_v56, %v5285_v17  ;;  %v4248_v56 = vld [vmem:[#allocation7 + $0x2b4] sm:$0xf] }
 0x26e   :  { %v2547_v61 = vadd.f32 %v2546_v47, %v2498_v46  ;;  %v3825_v47 = vor.u32 %v4200_v24, %v3822_v5 }
 0x26f   :  { %2793 = vmatmul.bf16.gmra.mxu2 %v5120_v11  ;;  %2842 = vmatmul.bf16.gmra.mxu3 %v5127_v23  ;;  %v5337_v11 = vsel %vm4695_vm5, %v5115_v25, 0 }
 0x270   :  { %v2596_v13 = vadd.f32 %v2595_v35, %v2547_v61  ;;  %v4232_v35 = vld [vmem:[#allocation7 + $0x234] sm:$0xf]  ;;  %v4017_v61 = vor.u32 %v4248_v56, %v4014_v29  ;;  %2877 = vmatpush.bf16.msrb.mxu0 %v3825_v47  ;;  %v5351_v29 = vsel %vm4695_vm5, %v5146_v37, 0 }
 0x272   :  { %v2598_v4 = vpop.f32.mrf.mxu2  ;;  %v2647_v30 = vpop.f32.mrf.mxu3  ;;  %v5325_v6 = vadd.f32 %v2644_v18, %v2596_v13  ;;  %v3950_v18 = vld [vmem:[#allocation7 + $0x238] sm:$0xf0]  ;;  %v4216_v13 = vld [vmem:[#allocation7 + $0x1b4] sm:$0xf]  ;;  %3024 = vmatpush.bf16.msrb.mxu3 %v4017_v61  ;;  %v4198_v61 = vld [vmem:[#allocation7 + $0x124] sm:$0xf] }
 0x273   :  { %v2500_v15 = vpop.f32.mrf.mxu0  ;;  %v2549_v44 = vpop.f32.mrf.mxu1  ;;  %v3953_v19 = vor.u32 %v4232_v35, %v3950_v18 }
 0x274   :  { %v2501_v39 = vadd.f32 %v2500_v15, %v5285_v17  ;;  %v3886_v15 = vld [vmem:[#allocation7 + $0x1b8] sm:$0xf0] }
 0x275   :  { %2975 = vmatpush.bf16.msrb.mxu2 %v3953_v19 }
 0x276   :  { %v2550_v16 = vadd.f32 %v2549_v44, %v2501_v39  ;;  %2695 = vmatmul.bf16.gmra.mxu0 %v5331_v14  ;;  %2744 = vmatmul.bf16.gmra.mxu1 %v5337_v11  ;;  %v3889_v44 = vor.u32 %v4216_v13, %v3886_v15  ;;  %v3814_v15 = vld [vmem:[#allocation7 + $0x128] sm:$0xf0] }
 0x278   :  { %v2599_v23 = vadd.f32 %v2598_v4, %v2550_v16  ;;  %2926 = vmatpush.bf16.msrb.mxu1 %v3889_v44  ;;  %v4006_v44 = vld [vmem:[#allocation7 + $0x2a8] sm:$0xf0] }
 0x27a   :  { %v2600_v41 = vpop.f32.mrf.mxu2  ;;  %v2649_v46 = vpop.f32.mrf.mxu3  ;;  %v5340_v39 = vadd.f32 %v2647_v30, %v2599_v23 }
 0x27b   :  { %v2502_v25 = vpop.f32.mrf.mxu0  ;;  %v2551_v16 = vpop.f32.mrf.mxu1 }
 0x27c   :  { %v2503_v4 = vadd.f32 %v2502_v25, %v5285_v17  ;;  %v4246_v25 = vld [vmem:[#allocation7 + $0x2a4] sm:$0xf] }
 0x27e   :  { %v2552_v35 = vadd.f32 %v2551_v16, %v2503_v4  ;;  %v3817_v16 = vor.u32 %v4198_v61, %v3814_v15 }
 0x27f   :  { %2798 = vmatmul.bf16.gmra.mxu2 %v5153_v43  ;;  %2847 = vmatmul.bf16.gmra.mxu3 %v5160_v36  ;;  %v5357_v43 = vsel %vm4695_vm5, %v5148_v40, 0 }
 0x280   :  { %v2601_v18 = vadd.f32 %v2600_v41, %v2552_v35  ;;  %v4230_v41 = vld [vmem:[#allocation7 + $0x224] sm:$0xf]  ;;  %v4009_v35 = vor.u32 %v4246_v25, %v4006_v44  ;;  %2878 = vmatpush.bf16.msrb.mxu0 %v3817_v16  ;;  %v5371_v44 = vsel %vm4695_vm5, %v5178_v51, 0 }
 0x282   :  { %v2603_v24 = vpop.f32.mrf.mxu2  ;;  %v2652_v5 = vpop.f32.mrf.mxu3  ;;  %v5345_v56 = vadd.f32 %v2649_v46, %v2601_v18  ;;  %v3942_v46 = vld [vmem:[#allocation7 + $0x228] sm:$0xf0]  ;;  %v4214_v18 = vld [vmem:[#allocation7 + $0x1a4] sm:$0xf]  ;;  %3025 = vmatpush.bf16.msrb.mxu3 %v4009_v35  ;;  %v4196_v35 = vld [vmem:[#allocation7 + $0x114] sm:$0xf] }
 0x283   :  { %v2505_v30 = vpop.f32.mrf.mxu0  ;;  %v2554_v19 = vpop.f32.mrf.mxu1  ;;  %v3945_v13 = vor.u32 %v4230_v41, %v3942_v46 }
 0x284   :  { %v2506_v23 = vadd.f32 %v2505_v30, %v5285_v17  ;;  %v3878_v30 = vld [vmem:[#allocation7 + $0x1a8] sm:$0xf0] }
 0x285   :  { %2976 = vmatpush.bf16.msrb.mxu2 %v3945_v13 }
 0x286   :  { %v2555_v47 = vadd.f32 %v2554_v19, %v2506_v23  ;;  %2700 = vmatmul.bf16.gmra.mxu0 %v5351_v29  ;;  %2749 = vmatmul.bf16.gmra.mxu1 %v5357_v43  ;;  %v3881_v19 = vor.u32 %v4214_v18, %v3878_v30  ;;  %v3806_v30 = vld [vmem:[#allocation7 + $0x118] sm:$0xf0] }
 0x288   :  { %v2604_v36 = vadd.f32 %v2603_v24, %v2555_v47  ;;  %2927 = vmatpush.bf16.msrb.mxu1 %v3881_v19  ;;  %v3998_v19 = vld [vmem:[#allocation7 + $0x298] sm:$0xf0] }
 0x28a   :  { %v2605_v37 = vpop.f32.mrf.mxu2  ;;  %v2654_v4 = vpop.f32.mrf.mxu3  ;;  %v5360_v23 = vadd.f32 %v2652_v5, %v2604_v36 }
 0x28b   :  { %v2507_v40 = vpop.f32.mrf.mxu0  ;;  %v2556_v47 = vpop.f32.mrf.mxu1 }
 0x28c   :  { %v2508_v24 = vadd.f32 %v2507_v40, %v5285_v17  ;;  %v4244_v40 = vld [vmem:[#allocation7 + $0x294] sm:$0xf] }
 0x28e   :  { %v2557_v41 = vadd.f32 %v2556_v47, %v2508_v24  ;;  %v3809_v47 = vor.u32 %v4196_v35, %v3806_v30 }
 0x28f   :  { %2803 = vmatmul.bf16.gmra.mxu2 %v5185_v7  ;;  %2852 = vmatmul.bf16.gmra.mxu3 %v5192_v26  ;;  %v5377_v7 = vsel %vm4695_vm5, %v5180_v10, 0 }
 0x290   :  { %v2606_v46 = vadd.f32 %v2605_v37, %v2557_v41  ;;  %v4228_v37 = vld [vmem:[#allocation7 + $0x214] sm:$0xf]  ;;  %v4001_v41 = vor.u32 %v4244_v40, %v3998_v19  ;;  %2879 = vmatpush.bf16.msrb.mxu0 %v3809_v47  ;;  %v5391_v19 = vsel %vm4695_vm5, %v5210_v34, 0 }
 0x292   :  { %v2608_v61 = vpop.f32.mrf.mxu2  ;;  %v2657_v15 = vpop.f32.mrf.mxu3  ;;  %v5365_v25 = vadd.f32 %v2654_v4, %v2606_v46  ;;  %v3934_v4 = vld [vmem:[#allocation7 + $0x218] sm:$0xf0]  ;;  %v4212_v46 = vld [vmem:[#allocation7 + $0x194] sm:$0xf]  ;;  %3026 = vmatpush.bf16.msrb.mxu3 %v4001_v41  ;;  %v4194_v41 = vld [vmem:[#allocation7 + $0x104] sm:$0xf] }
 0x293   :  { %v2510_v5 = vpop.f32.mrf.mxu0  ;;  %v2559_v13 = vpop.f32.mrf.mxu1  ;;  %v3937_v18 = vor.u32 %v4228_v37, %v3934_v4 }
 0x294   :  { %v2511_v36 = vadd.f32 %v2510_v5, %v5285_v17  ;;  %v3870_v5 = vld [vmem:[#allocation7 + $0x198] sm:$0xf0] }
 0x295   :  { %2977 = vmatpush.bf16.msrb.mxu2 %v3937_v18 }
 0x296   :  { %v2560_v16 = vadd.f32 %v2559_v13, %v2511_v36  ;;  %2705 = vmatmul.bf16.gmra.mxu0 %v5371_v44  ;;  %2754 = vmatmul.bf16.gmra.mxu1 %v5377_v7  ;;  %v3873_v13 = vor.u32 %v4212_v46, %v3870_v5  ;;  %v3798_v5 = vld [vmem:[#allocation7 + $0x108] sm:$0xf0] }
 0x298   :  { %v2609_v26 = vadd.f32 %v2608_v61, %v2560_v16  ;;  %2928 = vmatpush.bf16.msrb.mxu1 %v3873_v13  ;;  %v3990_v13 = vld [vmem:[#allocation7 + $0x288] sm:$0xf0] }
 0x29a   :  { %v2610_v51 = vpop.f32.mrf.mxu2  ;;  %v2659_v24 = vpop.f32.mrf.mxu3  ;;  %v5380_v36 = vadd.f32 %v2657_v15, %v2609_v26 }
 0x29b   :  { %v2512_v10 = vpop.f32.mrf.mxu0  ;;  %v2561_v16 = vpop.f32.mrf.mxu1 }
 0x29c   :  { %v2513_v61 = vadd.f32 %v2512_v10, %v5285_v17  ;;  %v4242_v10 = vld [vmem:[#allocation7 + $0x284] sm:$0xf] }
 0x29e   :  { %v2562_v37 = vadd.f32 %v2561_v16, %v2513_v61  ;;  %v3801_v16 = vor.u32 %v4194_v41, %v3798_v5 }
 0x29f   :  { %2808 = vmatmul.bf16.gmra.mxu2 %v5217_v32  ;;  %2857 = vmatmul.bf16.gmra.mxu3 %v5224_v38  ;;  %v5397_v32 = vsel %vm4695_vm5, %v5212_v31, 0 }
 0x2a0   :  { %v2611_v4 = vadd.f32 %v2610_v51, %v2562_v37  ;;  %v4226_v51 = vld [vmem:[#allocation7 + $0x204] sm:$0xf]  ;;  %v3993_v37 = vor.u32 %v4242_v10, %v3990_v13  ;;  %2880 = vmatpush.bf16.msrb.mxu0 %v3801_v16  ;;  %v5411_v13 = vsel %vm4695_vm5, %v5242_v1, 0 }
 0x2a2   :  { %v2613_v35 = vpop.f32.mrf.mxu2  ;;  %v2662_v30 = vpop.f32.mrf.mxu3  ;;  %v5385_v40 = vadd.f32 %v2659_v24, %v2611_v4  ;;  %v3926_v24 = vld [vmem:[#allocation7 + $0x208] sm:$0xf0]  ;;  %v4210_v4 = vld [vmem:[#allocation7 + $0x184] sm:$0xf]  ;;  %3027 = vmatpush.bf16.msrb.mxu3 %v3993_v37 }
 0x2a3   :  { %v2515_v15 = vpop.f32.mrf.mxu0  ;;  %v2564_v18 = vpop.f32.mrf.mxu1  ;;  %v3929_v46 = vor.u32 %v4226_v51, %v3926_v24 }
 0x2a4   :  { %v2516_v26 = vadd.f32 %v2515_v15, %v5285_v17  ;;  %v3862_v15 = vld [vmem:[#allocation7 + $0x188] sm:$0xf0] }
 0x2a5   :  { %2978 = vmatpush.bf16.msrb.mxu2 %v3929_v46 }
 0x2a6   :  { %v2565_v47 = vadd.f32 %v2564_v18, %v2516_v26  ;;  %2710 = vmatmul.bf16.gmra.mxu0 %v5391_v19  ;;  %2759 = vmatmul.bf16.gmra.mxu1 %v5397_v32  ;;  %v3865_v18 = vor.u32 %v4210_v4, %v3862_v15 }
 0x2a8   :  { %v2614_v38 = vadd.f32 %v2613_v35, %v2565_v47  ;;  %2929 = vmatpush.bf16.msrb.mxu1 %v3865_v18 }
 0x2aa   :  { %v2615_v34 = vpop.f32.mrf.mxu2  ;;  %v2664_v61 = vpop.f32.mrf.mxu3  ;;  %v5400_v26 = vadd.f32 %v2662_v30, %v2614_v38 }
 0x2ab   :  { %v2517_v31 = vpop.f32.mrf.mxu0  ;;  %v2566_v47 = vpop.f32.mrf.mxu1 }
 0x2ac   :  { %v2518_v35 = vadd.f32 %v2517_v31, %v5285_v17 }
 0x2ae   :  { %v2567_v51 = vadd.f32 %v2566_v47, %v2518_v35 }
 0x2af   :  { %2813 = vmatmul.bf16.gmra.mxu2 %v5248_v58  ;;  %2862 = vmatmul.bf16.gmra.mxu3 %v5253_v49  ;;  %v5417_v58 = vsel %vm4695_vm5, %v5244_v28, 0 }
 0x2b0   :  { %v2616_v24 = vadd.f32 %v2615_v34, %v2567_v51 }
 0x2b2   :  { %v2618_v41 = vpop.f32.mrf.mxu2  ;;  %v2667_v5 = vpop.f32.mrf.mxu3  ;;  %v5405_v10 = vadd.f32 %v2664_v61, %v2616_v24 }
 0x2b3   :  { %v2520_v30 = vpop.f32.mrf.mxu0  ;;  %v2569_v46 = vpop.f32.mrf.mxu1 }
 0x2b4   :  { %v2521_v38 = vadd.f32 %v2520_v30, %v5285_v17 }
 0x2b6   :  { %v2570_v16 = vadd.f32 %v2569_v46, %v2521_v38  ;;  %2715 = vmatmul.bf16.gmra.mxu0 %v5411_v13  ;;  %2764 = vmatmul.bf16.gmra.mxu1 %v5417_v58 }
 0x2b8   :  { %v2619_v49 = vadd.f32 %v2618_v41, %v2570_v16 }
 0x2ba   :  { %v2620_v34 = vpop.f32.mrf.mxu2  ;;  %v2669_v61 = vpop.f32.mrf.mxu3  ;;  %v5420_v37 = vadd.f32 %v2667_v5, %v2619_v49  ;;  %v5431_v5 = vsel %vm4695_vm5, %v5266_v62, 0 }
 0x2bb   :  { %v2522_v4 = vpop.f32.mrf.mxu0  ;;  %v2571_v1 = vpop.f32.mrf.mxu1 }
 0x2bc   :  { %v2523_v15 = vadd.f32 %v2522_v4, %v5285_v17 }
 0x2be   :  { %v2572_v31 = vadd.f32 %v2571_v1, %v2523_v15 }
 0x2bf   :  { %2818 = vmatmul.bf16.gmra.mxu2 %v5272_v2  ;;  %2867 = vmatmul.bf16.gmra.mxu3 %v5276_v48  ;;  %v5437_v2 = vsel %vm4695_vm5, %v5268_v53, 0 }
 0x2c0   :  { %v2621_v18 = vadd.f32 %v2620_v34, %v2572_v31 }
 0x2c2   :  { %v2623_v35 = vpop.f32.mrf.mxu2  ;;  %v2672_v28 = vpop.f32.mrf.mxu3  ;;  %v5425_v47 = vadd.f32 %v2669_v61, %v2621_v18 }
 0x2c3   :  { %v2525_v51 = vpop.f32.mrf.mxu0  ;;  %v2574_v41 = vpop.f32.mrf.mxu1 }
 0x2c4   :  { %v2526_v24 = vadd.f32 %v2525_v51, %v5285_v17 }
 0x2c6   :  { %v2575_v30 = vadd.f32 %v2574_v41, %v2526_v24  ;;  %2720 = vmatmul.bf16.gmra.mxu0 %v5431_v5  ;;  %2769 = vmatmul.bf16.gmra.mxu1 %v5437_v2 }
 0x2c8   :  { %v2624_v48 = vadd.f32 %v2623_v35, %v2575_v30 }
 0x2ca   :  { %v2625_v38 = vpop.f32.mrf.mxu2  ;;  %v2674_v46 = vpop.f32.mrf.mxu3  ;;  %v5440_v16 = vadd.f32 %v2672_v28, %v2624_v48 }
 0x2cb   :  { %v2527_v49 = vpop.f32.mrf.mxu0  ;;  %v2576_v62 = vpop.f32.mrf.mxu1 }
 0x2cc   :  { %v2528_v34 = vadd.f32 %v2527_v49, %v5285_v17 }
 0x2ce   :  { %v2577_v61 = vadd.f32 %v2576_v62, %v2528_v34 }
 0x2cf   :  { %2979 = vmatmul.bf16.vlgmr.msrb.gmra.mxu2 %v5291_v0  ;;  %3028 = vmatmul.bf16.vlgmr.msrb.gmra.mxu3 %v5297_v59  ;;  %v5690_v0 = vld [vmem:[#allocation20_spill] sm:$0xff]  ;;  %v5691_v59 = vld [vmem:[#allocation21_spill] sm:$0xff] }
 0x2d0   :  { %v2626_v53 = vadd.f32 %v2625_v38, %v2577_v61 }
 0x2d2   :  { %v2784_v4 = vpop.f32.mrf.mxu2  ;;  %v2833_v15 = vpop.f32.mrf.mxu3  ;;  %v5448_v1 = vadd.f32 %v2674_v46, %v2626_v53 }
 0x2d3   :  { %v2785_v31 = vadd.f32 %v2784_v4, %v5446_v22  ;;  %v2686_v18 = vpop.f32.mrf.mxu0  ;;  %v2735_v17 = vpop.f32.mrf.mxu1 }
 0x2d4   :  { %v2687_v35 = vadd.f32 %v2686_v18, %v5300_v63  ;;  %v5693_v18 = vld [vmem:[#allocation22_spill] sm:$0xff] }
 0x2d5   :  { %v5452_v28 = vadd.f32 %v2833_v15, %v2785_v31  ;;  %v5692_v31 = vld [vmem:[#allocation15_spill] sm:$0xff] }
 0x2d6   :  { %v5454_v51 = vadd.f32 %v2735_v17, %v2687_v35  ;;  %2881 = vmatmul.bf16.vlgmr.msrb.gmra.mxu0 %v5690_v0  ;;  %2930 = vmatmul.bf16.vlgmr.msrb.gmra.mxu1 %v5691_v59 }
 0x2da   :  { %v2786_v54 = vpop.f32.mrf.mxu2  ;;  %v2835_v24 = vpop.f32.mrf.mxu3 }
 0x2db   :  { %v2787_v41 = vadd.f32 %v2786_v54, %v5446_v22  ;;  %v2688_v30 = vpop.f32.mrf.mxu0  ;;  %v2737_v38 = vpop.f32.mrf.mxu1 }
 0x2dc   :  { %v2689_v48 = vadd.f32 %v2688_v30, %v5305_v33 }
 0x2dd   :  { %v5460_v46 = vadd.f32 %v2835_v24, %v2787_v41 }
 0x2de   :  { %v5462_v63 = vadd.f32 %v2737_v38, %v2689_v48 }
 0x2df   :  { %2984 = vmatmul.bf16.gmra.mxu2 %v5311_v12  ;;  %3033 = vmatmul.bf16.gmra.mxu3 %v5317_v45 }
 0x2e2   :  { %v2789_v49 = vpop.f32.mrf.mxu2  ;;  %v2838_v34 = vpop.f32.mrf.mxu3 }
 0x2e3   :  { %v2790_v62 = vadd.f32 %v2789_v49, %v5446_v22  ;;  %v2691_v61 = vpop.f32.mrf.mxu0  ;;  %v2740_v4 = vpop.f32.mrf.mxu1 }
 0x2e4   :  { %v2692_v53 = vadd.f32 %v2691_v61, %v5320_v42 }
 0x2e5   :  { %v5468_v15 = vadd.f32 %v2838_v34, %v2790_v62 }
 0x2e6   :  { %v5470_v33 = vadd.f32 %v2740_v4, %v2692_v53  ;;  %2886 = vmatmul.bf16.gmra.mxu0 %v5692_v31  ;;  %2935 = vmatmul.bf16.gmra.mxu1 %v5693_v18 }
 0x2ea   :  { %v2791_v35 = vpop.f32.mrf.mxu2  ;;  %v2840_v12 = vpop.f32.mrf.mxu3 }
 0x2eb   :  { %v2792_v45 = vadd.f32 %v2791_v35, %v5446_v22  ;;  %v2693_v17 = vpop.f32.mrf.mxu0  ;;  %v2742_v59 = vpop.f32.mrf.mxu1 }
 0x2ec   :  { %v2694_v0 = vadd.f32 %v2693_v17, %v5325_v6 }
 0x2ed   :  { %v5476_v54 = vadd.f32 %v2840_v12, %v2792_v45 }
 0x2ee   :  { %v5478_v42 = vadd.f32 %v2742_v59, %v2694_v0 }
 0x2ef   :  { %2989 = vmatmul.bf16.gmra.mxu2 %v5331_v14  ;;  %3038 = vmatmul.bf16.gmra.mxu3 %v5337_v11 }
 0x2f2   :  { %v2794_v24 = vpop.f32.mrf.mxu2  ;;  %v2843_v41 = vpop.f32.mrf.mxu3 }
 0x2f3   :  { %v2795_v30 = vadd.f32 %v2794_v24, %v5446_v22  ;;  %v2696_v48 = vpop.f32.mrf.mxu0  ;;  %v2745_v49 = vpop.f32.mrf.mxu1 }
 0x2f4   :  { %v2697_v38 = vadd.f32 %v2696_v48, %v5340_v39 }
 0x2f5   :  { %v5484_v34 = vadd.f32 %v2843_v41, %v2795_v30 }
 0x2f6   :  { %v5486_v6 = vadd.f32 %v2745_v49, %v2697_v38  ;;  %2891 = vmatmul.bf16.gmra.mxu0 %v5102_v3  ;;  %2940 = vmatmul.bf16.gmra.mxu1 %v5104_v27 }
 0x2fa   :  { %v2796_v62 = vpop.f32.mrf.mxu2  ;;  %v2845_v14 = vpop.f32.mrf.mxu3 }
 0x2fb   :  { %v2797_v11 = vadd.f32 %v2796_v62, %v5446_v22  ;;  %v2698_v61 = vpop.f32.mrf.mxu0  ;;  %v2747_v4 = vpop.f32.mrf.mxu1 }
 0x2fc   :  { %v2699_v53 = vadd.f32 %v2698_v61, %v5345_v56 }
 0x2fd   :  { %v5492_v31 = vadd.f32 %v2845_v14, %v2797_v11 }
 0x2fe   :  { %v5494_v39 = vadd.f32 %v2747_v4, %v2699_v53 }
 0x2ff   :  { %2994 = vmatmul.bf16.gmra.mxu2 %v5351_v29  ;;  %3043 = vmatmul.bf16.gmra.mxu3 %v5357_v43 }
 0x302   :  { %v2799_v18 = vpop.f32.mrf.mxu2  ;;  %v2848_v3 = vpop.f32.mrf.mxu3 }
 0x303   :  { %v2800_v27 = vadd.f32 %v2799_v18, %v5446_v22  ;;  %v2701_v35 = vpop.f32.mrf.mxu0  ;;  %v2750_v45 = vpop.f32.mrf.mxu1 }
 0x304   :  { %v2702_v12 = vadd.f32 %v2701_v35, %v5360_v23 }
 0x305   :  { %v5500_v17 = vadd.f32 %v2848_v3, %v2800_v27 }
 0x306   :  { %v5502_v56 = vadd.f32 %v2750_v45, %v2702_v12  ;;  %2896 = vmatmul.bf16.gmra.mxu0 %v5132_v20  ;;  %2945 = vmatmul.bf16.gmra.mxu1 %v5134_v21 }
 0x30a   :  { %v2801_v0 = vpop.f32.mrf.mxu2  ;;  %v2850_v29 = vpop.f32.mrf.mxu3 }
 0x30b   :  { %v2802_v43 = vadd.f32 %v2801_v0, %v5446_v22  ;;  %v2703_v59 = vpop.f32.mrf.mxu0  ;;  %v2752_v41 = vpop.f32.mrf.mxu1 }
 0x30c   :  { %v2704_v24 = vadd.f32 %v2703_v59, %v5365_v25 }
 0x30d   :  { %v5508_v30 = vadd.f32 %v2850_v29, %v2802_v43 }
 0x30e   :  { %v5510_v23 = vadd.f32 %v2752_v41, %v2704_v24 }
 0x30f   :  { %2999 = vmatmul.bf16.gmra.mxu2 %v5371_v44  ;;  %3048 = vmatmul.bf16.gmra.mxu3 %v5377_v7 }
 0x312   :  { %v2804_v48 = vpop.f32.mrf.mxu2  ;;  %v2853_v20 = vpop.f32.mrf.mxu3 }
 0x313   :  { %v2805_v21 = vadd.f32 %v2804_v48, %v5446_v22  ;;  %v2706_v38 = vpop.f32.mrf.mxu0  ;;  %v2755_v62 = vpop.f32.mrf.mxu1 }
 0x314   :  { %v2707_v49 = vadd.f32 %v2706_v38, %v5380_v36 }
 0x315   :  { %v5516_v14 = vadd.f32 %v2853_v20, %v2805_v21 }
 0x316   :  { %v5518_v25 = vadd.f32 %v2755_v62, %v2707_v49  ;;  %2901 = vmatmul.bf16.gmra.mxu0 %v5164_v50  ;;  %2950 = vmatmul.bf16.gmra.mxu1 %v5166_v60 }
 0x31a   :  { %v2806_v11 = vpop.f32.mrf.mxu2  ;;  %v2855_v44 = vpop.f32.mrf.mxu3 }
 0x31b   :  { %v2807_v7 = vadd.f32 %v2806_v11, %v5446_v22  ;;  %v2708_v61 = vpop.f32.mrf.mxu0  ;;  %v2757_v4 = vpop.f32.mrf.mxu1 }
 0x31c   :  { %v2709_v53 = vadd.f32 %v2708_v61, %v5385_v40 }
 0x31d   :  { %v5524_v18 = vadd.f32 %v2855_v44, %v2807_v7 }
 0x31e   :  { %v5526_v36 = vadd.f32 %v2757_v4, %v2709_v53 }
 0x31f   :  { %3004 = vmatmul.bf16.gmra.mxu2 %v5391_v19  ;;  %3053 = vmatmul.bf16.gmra.mxu3 %v5397_v32 }
 0x322   :  { %v2809_v3 = vpop.f32.mrf.mxu2  ;;  %v2858_v50 = vpop.f32.mrf.mxu3 }
 0x323   :  { %v2810_v60 = vadd.f32 %v2809_v3, %v5446_v22  ;;  %v2711_v27 = vpop.f32.mrf.mxu0  ;;  %v2760_v12 = vpop.f32.mrf.mxu1 }
 0x324   :  { %v2712_v35 = vadd.f32 %v2711_v27, %v5400_v26 }
 0x325   :  { %v5532_v45 = vadd.f32 %v2858_v50, %v2810_v60  ;;  %v5694_v60 = vld [vmem:[#allocation19_spill] sm:$0xff] }
 0x326   :  { %v5534_v40 = vadd.f32 %v2760_v12, %v2712_v35  ;;  %2906 = vmatmul.bf16.gmra.mxu0 %v5196_v8  ;;  %2955 = vmatmul.bf16.gmra.mxu1 %v5198_v55 }
 0x32a   :  { %v2811_v0 = vpop.f32.mrf.mxu2  ;;  %v2860_v19 = vpop.f32.mrf.mxu3 }
 0x32b   :  { %v2812_v32 = vadd.f32 %v2811_v0, %v5446_v22  ;;  %v2713_v29 = vpop.f32.mrf.mxu0  ;;  %v2762_v59 = vpop.f32.mrf.mxu1 }
 0x32c   :  { %v2714_v43 = vadd.f32 %v2713_v29, %v5405_v10 }
 0x32d   :  { %v5540_v24 = vadd.f32 %v2860_v19, %v2812_v32 }
 0x32e   :  { %v5542_v26 = vadd.f32 %v2762_v59, %v2714_v43  ;;  %v83_v43 = vld [vmem:[#allocation2] sm:$0xff] }
 0x32f   :  { %3009 = vmatmul.bf16.gmra.mxu2 %v5411_v13  ;;  %3058 = vmatmul.bf16.gmra.mxu3 %v5417_v58 }
 0x332   :  { %v2814_v41 = vpop.f32.mrf.mxu2  ;;  %v2863_v8 = vpop.f32.mrf.mxu3 }
 0x333   :  { %v2815_v55 = vadd.f32 %v2814_v41, %v5446_v22  ;;  %v2716_v48 = vpop.f32.mrf.mxu0  ;;  %v2765_v21 = vpop.f32.mrf.mxu1 }
 0x334   :  { %v2717_v20 = vadd.f32 %v2716_v48, %v5420_v37  ;;  %v3070_v48 = vunpack.c.h.bf16 %v83_v43 }
 0x335   :  { %v5548_v38 = vadd.f32 %v2863_v8, %v2815_v55  ;;  %v3069_v8 = vunpack.c.l.bf16 %v83_v43 }
 0x336   :  { %v5550_v10 = vadd.f32 %v2765_v21, %v2717_v20  ;;  %2911 = vmatmul.bf16.gmra.mxu0 %v5228_v57  ;;  %2960 = vmatmul.bf16.gmra.mxu1 %v5230_v52 }
 0x33a   :  { %v2816_v49 = vpop.f32.mrf.mxu2  ;;  %v2865_v13 = vpop.f32.mrf.mxu3 }
 0x33b   :  { %v2817_v58 = vadd.f32 %v2816_v49, %v5446_v22  ;;  %v2718_v62 = vpop.f32.mrf.mxu0  ;;  %v2767_v44 = vpop.f32.mrf.mxu1 }
 0x33c   :  { %v2719_v11 = vadd.f32 %v2718_v62, %v5425_v47 }
 0x33d   :  { %v5556_v7 = vadd.f32 %v2865_v13, %v2817_v58  ;;  %v84_v13 = vld [vmem:[#allocation2 + $0x8] sm:$0xff] }
 0x33e   :  { %v5558_v37 = vadd.f32 %v2767_v44, %v2719_v11 }
 0x33f   :  { %3014 = vmatmul.bf16.gmra.mxu2 %v5431_v5  ;;  %3063 = vmatmul.bf16.gmra.mxu3 %v5437_v2 }
 0x342   :  { %v2819_v61 = vpop.f32.mrf.mxu2  ;;  %v2868_v57 = vpop.f32.mrf.mxu3 }
 0x343   :  { %v2820_v52 = vadd.f32 %v2819_v61, %v5446_v22  ;;  %v2721_v53 = vpop.f32.mrf.mxu0  ;;  %v2770_v3 = vpop.f32.mrf.mxu1 }
 0x344   :  { %v2722_v4 = vadd.f32 %v2721_v53, %v5440_v16  ;;  %v3072_v53 = vunpack.c.h.bf16 %v84_v13 }
 0x345   :  { %v5564_v50 = vadd.f32 %v2868_v57, %v2820_v52  ;;  %v3071_v57 = vunpack.c.l.bf16 %v84_v13 }
 0x346   :  { %v5566_v47 = vadd.f32 %v2770_v3, %v2722_v4  ;;  %2916 = vmatmul.bf16.gmra.mxu0 %v5256_v9  ;;  %2965 = vmatmul.bf16.gmra.mxu1 %v5694_v60 }
 0x347   :  { %v3103_v60 = vadd.f32 %v3071_v57, %v5462_v63 }
 0x34a   :  { %v2821_v27 = vpop.f32.mrf.mxu2  ;;  %v2870_v5 = vpop.f32.mrf.mxu3 }
 0x34b   :  { %v2822_v2 = vadd.f32 %v2821_v27, %v5446_v22  ;;  %v2723_v35 = vpop.f32.mrf.mxu0  ;;  %v2772_v0 = vpop.f32.mrf.mxu1  ;;  %v3101_v22 = vadd.f32 %v3069_v8, %v5454_v51 }
 0x34c   :  { %v2724_v12 = vadd.f32 %v2723_v35, %v5448_v1 }
 0x34d   :  { %v5572_v19 = vadd.f32 %v2870_v5, %v2822_v2  ;;  %v3133_v61 = vmax.f32 %v3101_v22, 0.0  ;;  %v85_v2 = vld [vmem:[#allocation2 + $0x10] sm:$0xff]  ;;  %v86_v22 = vld [vmem:[#allocation2 + $0x18] sm:$0xff] }
 0x34e   :  { %v5574_v16 = vadd.f32 %v2772_v0, %v2724_v12 }
 0x352   :  { %v2980_v32 = vpop.f32.mrf.mxu2  ;;  %v3029_v29 = vpop.f32.mrf.mxu3 }
 0x353   :  { %v2882_v59 = vpop.f32.mrf.mxu0  ;;  %v2931_v41 = vpop.f32.mrf.mxu1 }
 0x354   :  { %v2883_v9 = vadd.f32 %v2882_v59, %v5452_v28 }
 0x356   :  { %v2932_v55 = vadd.f32 %v2931_v41, %v2883_v9  ;;  %v3074_v9 = vunpack.c.h.bf16 %v85_v2 }
 0x358   :  { %v2981_v20 = vadd.f32 %v2980_v32, %v2932_v55  ;;  %v3135_v32 = vmax.f32 %v3103_v60, 0.0 }
 0x35a   :  { %v3030_v21 = vadd.f32 %v3029_v29, %v2981_v20  ;;  %v2982_v1 = vpop.f32.mrf.mxu2  ;;  %v3031_v49 = vpop.f32.mrf.mxu3  ;;  %v3073_v29 = vunpack.c.l.bf16 %v85_v2 }
 0x35b   :  { %v2884_v58 = vpop.f32.mrf.mxu0  ;;  %v2933_v44 = vpop.f32.mrf.mxu1 }
 0x35c   :  { %v3102_v62 = vadd.f32 %v3070_v48, %v3030_v21  ;;  %v2885_v11 = vadd.f32 %v2884_v58, %v5460_v46  ;;  %v3105_v55 = vadd.f32 %v3073_v29, %v5470_v33  ;;  %v3075_v58 = vunpack.c.l.bf16 %v86_v22 }
 0x35e   :  { %v3134_v52 = vmax.f32 %v3102_v62, 0.0  ;;  %v2934_v28 = vadd.f32 %v2933_v44, %v2885_v11  ;;  %v3137_v13 = vmax.f32 %v3105_v55, 0.0  ;;  %v3076_v44 = vunpack.c.h.bf16 %v86_v22 }
 0x360   :  { %v3165_v4 = vpack.c.bf16 %v3134_v52, %v3133_v61  ;;  %v2983_v3 = vadd.f32 %v2982_v1, %v2934_v28  ;;  %v3107_v52 = vadd.f32 %v3075_v58, %v5478_v42  ;;  %v89_v58 = vld [vmem:[#allocation2 + $0x30] sm:$0xff] }
 0x362   :  { %3181 = vst [vmem:[#allocation10] sm:$0xff] %v3165_v4  ;;  %v3032_v51 = vadd.f32 %v3031_v49, %v2983_v3  ;;  %v2985_v27 = vpop.f32.mrf.mxu2  ;;  %v3034_v5 = vpop.f32.mrf.mxu3  ;;  %v87_v4 = vld [vmem:[#allocation2 + $0x20] sm:$0xff] }
 0x363   :  { %v2887_v35 = vpop.f32.mrf.mxu0  ;;  %v2936_v46 = vpop.f32.mrf.mxu1 }
 0x364   :  { %v3104_v12 = vadd.f32 %v3072_v53, %v3032_v51  ;;  %v2888_v0 = vadd.f32 %v2887_v35, %v5468_v15 }
 0x366   :  { %v3136_v43 = vmax.f32 %v3104_v12, 0.0  ;;  %v2937_v59 = vadd.f32 %v2936_v46, %v2888_v0  ;;  %v3078_v12 = vunpack.c.h.bf16 %v87_v4 }
 0x368   :  { %v3166_v41 = vpack.c.bf16 %v3136_v43, %v3135_v32  ;;  %v2986_v8 = vadd.f32 %v2985_v27, %v2937_v59  ;;  %v3139_v27 = vmax.f32 %v3107_v52, 0.0  ;;  %v88_v59 = vld [vmem:[#allocation2 + $0x28] sm:$0xff] }
 0x369   :  { %v3080_v22 = vunpack.c.h.bf16 %v88_v59 }
 0x36a   :  { %3182 = vst [vmem:[#allocation10 + $0x8] sm:$0xff] %v3166_v41  ;;  %v3035_v63 = vadd.f32 %v3034_v5, %v2986_v8  ;;  %v2987_v48 = vpop.f32.mrf.mxu2  ;;  %v3036_v20 = vpop.f32.mrf.mxu3  ;;  %v3077_v5 = vunpack.c.l.bf16 %v87_v4 }
 0x36b   :  { %v2889_v21 = vpop.f32.mrf.mxu0  ;;  %v2938_v15 = vpop.f32.mrf.mxu1 }
 0x36c   :  { %v3106_v1 = vadd.f32 %v3074_v9, %v3035_v63  ;;  %v2890_v49 = vadd.f32 %v2889_v21, %v5476_v54  ;;  %v3109_v32 = vadd.f32 %v3077_v5, %v5486_v6  ;;  %v3079_v63 = vunpack.c.l.bf16 %v88_v59 }
 0x36e   :  { %v3138_v62 = vmax.f32 %v3106_v1, 0.0  ;;  %v2939_v11 = vadd.f32 %v2938_v15, %v2890_v49  ;;  %v3141_v55 = vmax.f32 %v3109_v32, 0.0  ;;  %v3111_v49 = vadd.f32 %v3079_v63, %v5494_v39 }
 0x370   :  { %v3167_v61 = vpack.c.bf16 %v3138_v62, %v3137_v13  ;;  %v2988_v57 = vadd.f32 %v2987_v48, %v2939_v11 }
 0x372   :  { %3183 = vst [vmem:[#allocation10 + $0x10] sm:$0xff] %v3167_v61  ;;  %v3037_v33 = vadd.f32 %v3036_v20, %v2988_v57  ;;  %v2990_v28 = vpop.f32.mrf.mxu2  ;;  %v3039_v53 = vpop.f32.mrf.mxu3  ;;  %v3143_v61 = vmax.f32 %v3111_v49, 0.0  ;;  %v3081_v57 = vunpack.c.l.bf16 %v89_v58 }
 0x373   :  { %v2892_v3 = vpop.f32.mrf.mxu0  ;;  %v2941_v54 = vpop.f32.mrf.mxu1 }
 0x374   :  { %v3108_v60 = vadd.f32 %v3076_v44, %v3037_v33  ;;  %v2893_v51 = vadd.f32 %v2892_v3, %v5484_v34  ;;  %v3113_v3 = vadd.f32 %v3081_v57, %v5502_v56 }
 0x376   :  { %v3140_v2 = vmax.f32 %v3108_v60, 0.0  ;;  %v2942_v35 = vadd.f32 %v2941_v54, %v2893_v51  ;;  %v90_v54 = vld [vmem:[#allocation2 + $0x38] sm:$0xff] }
 0x377   :  { %v3084_v32 = vunpack.c.h.bf16 %v90_v54 }
 0x378   :  { %v3168_v0 = vpack.c.bf16 %v3140_v2, %v3139_v27  ;;  %v2991_v46 = vadd.f32 %v2990_v28, %v2942_v35  ;;  %v3082_v28 = vunpack.c.h.bf16 %v89_v58  ;;  %v3145_v35 = vmax.f32 %v3113_v3, 0.0  ;;  %v92_v58 = vld [vmem:[#allocation2 + $0x48] sm:$0xff] }
 0x37a   :  { %3184 = vst [vmem:[#allocation10 + $0x18] sm:$0xff] %v3168_v0  ;;  %v3040_v42 = vadd.f32 %v3039_v53, %v2991_v46  ;;  %v2992_v29 = vpop.f32.mrf.mxu2  ;;  %v3041_v43 = vpop.f32.mrf.mxu3 }
 0x37b   :  { %v2894_v9 = vpop.f32.mrf.mxu0  ;;  %v2943_v34 = vpop.f32.mrf.mxu1 }
 0x37c   :  { %v3110_v41 = vadd.f32 %v3078_v12, %v3040_v42  ;;  %v2895_v8 = vadd.f32 %v2894_v9, %v5492_v31  ;;  %v3083_v12 = vunpack.c.l.bf16 %v90_v54 }
 0x37e   :  { %v3142_v48 = vmax.f32 %v3110_v41, 0.0  ;;  %v2944_v20 = vadd.f32 %v2943_v34, %v2895_v8  ;;  %v91_v41 = vld [vmem:[#allocation2 + $0x40] sm:$0xff] }
 0x380   :  { %v3169_v21 = vpack.c.bf16 %v3142_v48, %v3141_v55  ;;  %v2993_v1 = vadd.f32 %v2992_v29, %v2944_v20  ;;  %v3085_v48 = vunpack.c.l.bf16 %v91_v41 }
 0x382   :  { %3185 = vst [vmem:[#allocation10 + $0x20] sm:$0xff] %v3169_v21  ;;  %v3042_v6 = vadd.f32 %v3041_v43, %v2993_v1  ;;  %v2995_v15 = vpop.f32.mrf.mxu2  ;;  %v3044_v13 = vpop.f32.mrf.mxu3  ;;  %v3115_v43 = vadd.f32 %v3083_v12, %v5510_v23  ;;  %v3086_v21 = vunpack.c.h.bf16 %v91_v41 }
 0x383   :  { %v2897_v62 = vpop.f32.mrf.mxu0  ;;  %v2946_v31 = vpop.f32.mrf.mxu1 }
 0x384   :  { %v3112_v11 = vadd.f32 %v3080_v22, %v3042_v6  ;;  %v2898_v44 = vadd.f32 %v2897_v62, %v5500_v17  ;;  %v3147_v63 = vmax.f32 %v3115_v43, 0.0  ;;  %v3117_v6 = vadd.f32 %v3085_v48, %v5518_v25  ;;  %v94_v43 = vld [vmem:[#allocation2 + $0x58] sm:$0xff] }
 0x386   :  { %v3144_v52 = vmax.f32 %v3112_v11, 0.0  ;;  %v2947_v33 = vadd.f32 %v2946_v31, %v2898_v44  ;;  %v3149_v31 = vmax.f32 %v3117_v6, 0.0 }
 0x388   :  { %v3170_v53 = vpack.c.bf16 %v3144_v52, %v3143_v61  ;;  %v2996_v4 = vadd.f32 %v2995_v15, %v2947_v33  ;;  %v3087_v61 = vunpack.c.l.bf16 %v92_v58  ;;  %v3088_v33 = vunpack.c.h.bf16 %v92_v58 }
 0x38a   :  { %3186 = vst [vmem:[#allocation10 + $0x28] sm:$0xff] %v3170_v53  ;;  %v3045_v39 = vadd.f32 %v3044_v13, %v2996_v4  ;;  %v2997_v60 = vpop.f32.mrf.mxu2  ;;  %v3046_v51 = vpop.f32.mrf.mxu3  ;;  %v3119_v4 = vadd.f32 %v3087_v61, %v5526_v36  ;;  %v96_v61 = vld [vmem:[#allocation2 + $0x68] sm:$0xff] }
 0x38b   :  { %v2899_v27 = vpop.f32.mrf.mxu0  ;;  %v2948_v17 = vpop.f32.mrf.mxu1 }
 0x38c   :  { %v3114_v5 = vadd.f32 %v3082_v28, %v3045_v39  ;;  %v2900_v2 = vadd.f32 %v2899_v27, %v5508_v30 }
 0x38e   :  { %v3146_v0 = vmax.f32 %v3114_v5, 0.0  ;;  %v2949_v46 = vadd.f32 %v2948_v17, %v2900_v2  ;;  %v3151_v5 = vmax.f32 %v3119_v4, 0.0 }
 0x390   :  { %v3171_v42 = vpack.c.bf16 %v3146_v0, %v3145_v35  ;;  %v2998_v29 = vadd.f32 %v2997_v60, %v2949_v46  ;;  %v93_v60 = vld [vmem:[#allocation2 + $0x50] sm:$0xff] }
 0x391   :  { %v3089_v2 = vunpack.c.l.bf16 %v93_v60  ;;  %v3090_v12 = vunpack.c.h.bf16 %v93_v60  ;;  %v3096_v60 = vunpack.c.h.bf16 %v96_v61 }
 0x392   :  { %3187 = vst [vmem:[#allocation10 + $0x30] sm:$0xff] %v3171_v42  ;;  %v3047_v56 = vadd.f32 %v3046_v51, %v2998_v29  ;;  %v3000_v59 = vpop.f32.mrf.mxu2  ;;  %v3049_v9 = vpop.f32.mrf.mxu3 }
 0x393   :  { %v2902_v8 = vpop.f32.mrf.mxu0  ;;  %v2951_v30 = vpop.f32.mrf.mxu1 }
 0x394   :  { %v3116_v34 = vadd.f32 %v3084_v32, %v3047_v56  ;;  %v2903_v55 = vadd.f32 %v2902_v8, %v5516_v14  ;;  %v3121_v32 = vadd.f32 %v3089_v2, %v5534_v40  ;;  %v3091_v8 = vunpack.c.l.bf16 %v94_v43 }
 0x396   :  { %v3148_v20 = vmax.f32 %v3116_v34, 0.0  ;;  %v2952_v22 = vadd.f32 %v2951_v30, %v2903_v55  ;;  %v3153_v41 = vmax.f32 %v3121_v32, 0.0  ;;  %v3092_v30 = vunpack.c.h.bf16 %v94_v43 }
 0x398   :  { %v3172_v1 = vpack.c.bf16 %v3148_v20, %v3147_v63  ;;  %v3001_v49 = vadd.f32 %v3000_v59, %v2952_v22  ;;  %v3123_v20 = vadd.f32 %v3091_v8, %v5542_v26 }
 0x39a   :  { %3188 = vst [vmem:[#allocation10 + $0x38] sm:$0xff] %v3172_v1  ;;  %v3050_v23 = vadd.f32 %v3049_v9, %v3001_v49  ;;  %v3002_v15 = vpop.f32.mrf.mxu2  ;;  %v3051_v13 = vpop.f32.mrf.mxu3 }
 0x39b   :  { %v2904_v62 = vpop.f32.mrf.mxu0  ;;  %v2953_v14 = vpop.f32.mrf.mxu1 }
 0x39c   :  { %v3118_v11 = vadd.f32 %v3086_v21, %v3050_v23  ;;  %v2905_v44 = vadd.f32 %v2904_v62, %v5524_v18  ;;  %v95_v21 = vld [vmem:[#allocation2 + $0x60] sm:$0xff] }
 0x39e   :  { %v3150_v57 = vmax.f32 %v3118_v11, 0.0  ;;  %v2954_v52 = vadd.f32 %v2953_v14, %v2905_v44  ;;  %v3094_v11 = vunpack.c.h.bf16 %v95_v21 }
 0x3a0   :  { %v3173_v28 = vpack.c.bf16 %v3150_v57, %v3149_v31  ;;  %v3003_v53 = vadd.f32 %v3002_v15, %v2954_v52  ;;  %v3155_v15 = vmax.f32 %v3123_v20, 0.0 }
 0x3a2   :  { %3189 = vst [vmem:[#allocation10 + $0x40] sm:$0xff] %v3173_v28  ;;  %v3052_v25 = vadd.f32 %v3051_v13, %v3003_v53  ;;  %v3005_v3 = vpop.f32.mrf.mxu2  ;;  %v3054_v39 = vpop.f32.mrf.mxu3  ;;  %v3093_v13 = vunpack.c.l.bf16 %v95_v21 }
 0x3a3   :  { %v2907_v51 = vpop.f32.mrf.mxu0  ;;  %v2956_v18 = vpop.f32.mrf.mxu1 }
 0x3a4   :  { %v3120_v54 = vadd.f32 %v3088_v33, %v3052_v25  ;;  %v2908_v27 = vadd.f32 %v2907_v51, %v5532_v45  ;;  %v3125_v31 = vadd.f32 %v3093_v13, %v5550_v10  ;;  %v3095_v25 = vunpack.c.l.bf16 %v96_v61 }
 0x3a6   :  { %v3152_v17 = vmax.f32 %v3120_v54, 0.0  ;;  %v2957_v35 = vadd.f32 %v2956_v18, %v2908_v27  ;;  %v3157_v4 = vmax.f32 %v3125_v31, 0.0  ;;  %v3127_v27 = vadd.f32 %v3095_v25, %v5558_v37  ;;  %v97_v18 = vld [vmem:[#allocation2 + $0x70] sm:$0xff] }
 0x3a8   :  { %v3174_v0 = vpack.c.bf16 %v3152_v17, %v3151_v5  ;;  %v3006_v46 = vadd.f32 %v3005_v3, %v2957_v35 }
 0x3aa   :  { %3190 = vst [vmem:[#allocation10 + $0x48] sm:$0xff] %v3174_v0  ;;  %v3055_v36 = vadd.f32 %v3054_v39, %v3006_v46  ;;  %v3007_v42 = vpop.f32.mrf.mxu2  ;;  %v3056_v29 = vpop.f32.mrf.mxu3  ;;  %v3097_v0 = vunpack.c.l.bf16 %v97_v18 }
 0x3ab   :  { %v2909_v56 = vpop.f32.mrf.mxu0  ;;  %v2958_v45 = vpop.f32.mrf.mxu1 }
 0x3ac   :  { %v3122_v59 = vadd.f32 %v3090_v12, %v3055_v36  ;;  %v2910_v9 = vadd.f32 %v2909_v56, %v5540_v24  ;;  %v3159_v12 = vmax.f32 %v3127_v27, 0.0  ;;  %v3129_v56 = vadd.f32 %v3097_v0, %v5566_v47 }
 0x3ae   :  { %v3154_v34 = vmax.f32 %v3122_v59, 0.0  ;;  %v2959_v55 = vadd.f32 %v2958_v45, %v2910_v9  ;;  %v98_v59 = vld [vmem:[#allocation2 + $0x78] sm:$0xff]  ;;  %v3161_v8 = vmax.f32 %v3129_v56, 0.0 }
 0x3b0   :  { %v3175_v63 = vpack.c.bf16 %v3154_v34, %v3153_v41  ;;  %v3008_v48 = vadd.f32 %v3007_v42, %v2959_v55  ;;  %v3098_v42 = vunpack.c.h.bf16 %v97_v18  ;;  %v3099_v34 = vunpack.c.l.bf16 %v98_v59 }
 0x3b2   :  { %3191 = vst [vmem:[#allocation10 + $0x50] sm:$0xff] %v3175_v63  ;;  %v3057_v40 = vadd.f32 %v3056_v29, %v3008_v48  ;;  %v3010_v22 = vpop.f32.mrf.mxu2  ;;  %v3059_v1 = vpop.f32.mrf.mxu3  ;;  %v3100_v48 = vunpack.c.h.bf16 %v98_v59  ;;  %v3131_v21 = vadd.f32 %v3099_v34, %v5574_v16 }
 0x3b3   :  { %v2912_v49 = vpop.f32.mrf.mxu0  ;;  %v2961_v24 = vpop.f32.mrf.mxu1 }
 0x3b4   :  { %v3124_v6 = vadd.f32 %v3092_v30, %v3057_v40  ;;  %v2913_v23 = vadd.f32 %v2912_v49, %v5548_v38 }
 0x3b6   :  { %v3156_v58 = vmax.f32 %v3124_v6, 0.0  ;;  %v2962_v62 = vadd.f32 %v2961_v24, %v2913_v23 }
 0x3b8   :  { %v3176_v44 = vpack.c.bf16 %v3156_v58, %v3155_v15  ;;  %v3011_v14 = vadd.f32 %v3010_v22, %v2962_v62 }
 0x3ba   :  { %3192 = vst [vmem:[#allocation10 + $0x58] sm:$0xff] %v3176_v44  ;;  %v3060_v26 = vadd.f32 %v3059_v1, %v3011_v14  ;;  %v3012_v57 = vpop.f32.mrf.mxu2  ;;  %v3061_v38 = vpop.f32.mrf.mxu3 }
 0x3bb   :  { %v2914_v52 = vpop.f32.mrf.mxu0  ;;  %v2963_v53 = vpop.f32.mrf.mxu1 }
 0x3bc   :  { %v3126_v33 = vadd.f32 %v3094_v11, %v3060_v26  ;;  %v2915_v28 = vadd.f32 %v2914_v52, %v5556_v7 }
 0x3be   :  { %v3158_v3 = vmax.f32 %v3126_v33, 0.0  ;;  %v2964_v39 = vadd.f32 %v2963_v53, %v2915_v28 }
 0x3c0   :  { %v3177_v51 = vpack.c.bf16 %v3158_v3, %v3157_v4  ;;  %v3013_v54 = vadd.f32 %v3012_v57, %v2964_v39 }
 0x3c2   :  { %3193 = vst [vmem:[#allocation10 + $0x60] sm:$0xff] %v3177_v51  ;;  %v3062_v10 = vadd.f32 %v3061_v38, %v3013_v54  ;;  %v3015_v7 = vpop.f32.mrf.mxu2  ;;  %v3064_v36 = vpop.f32.mrf.mxu3 }
 0x3c3   :  { %v2917_v5 = vpop.f32.mrf.mxu0  ;;  %v2966_v35 = vpop.f32.mrf.mxu1 }
 0x3c4   :  { %v3128_v2 = vadd.f32 %v3096_v60, %v3062_v10  ;;  %v2918_v17 = vadd.f32 %v2917_v5, %v5564_v50 }
 0x3c6   :  { %v3160_v46 = vmax.f32 %v3128_v2, 0.0  ;;  %v2967_v32 = vadd.f32 %v2966_v35, %v2918_v17 }
 0x3c8   :  { %v3178_v29 = vpack.c.bf16 %v3160_v46, %v3159_v12  ;;  %v3016_v43 = vadd.f32 %v3015_v7, %v2967_v32 }
 0x3ca   :  { %3194 = vst [vmem:[#allocation10 + $0x68] sm:$0xff] %v3178_v29  ;;  %v3065_v37 = vadd.f32 %v3064_v36, %v3016_v43  ;;  %v3017_v63 = vpop.f32.mrf.mxu2  ;;  %v3066_v22 = vpop.f32.mrf.mxu3 }
 0x3cb   :  { %v2919_v9 = vpop.f32.mrf.mxu0  ;;  %v2968_v50 = vpop.f32.mrf.mxu1 }
 0x3cc   :  { %v3130_v45 = vadd.f32 %v3098_v42, %v3065_v37  ;;  %v2920_v41 = vadd.f32 %v2919_v9, %v5572_v19  ;;  %v3163_v19 = vmax.f32 %v3131_v21, 0.0 }
 0x3ce   :  { %v3162_v55 = vmax.f32 %v3130_v45, 0.0  ;;  %v2969_v30 = vadd.f32 %v2968_v50, %v2920_v41 }
 0x3d0   :  { %v3179_v20 = vpack.c.bf16 %v3162_v55, %v3161_v8  ;;  %v3018_v40 = vadd.f32 %v3017_v63, %v2969_v30 }
 0x3d2   :  { %3195 = vst [vmem:[#allocation10 + $0x70] sm:$0xff] %v3179_v20  ;;  %v3067_v47 = vadd.f32 %v3066_v22, %v3018_v40 }
 0x3d4   :  { %v3132_v1 = vadd.f32 %v3100_v48, %v3067_v47 }
 0x3d6   :  { %v3164_v49 = vmax.f32 %v3132_v1, 0.0 }
 0x3d8   :  { %v3180_v6 = vpack.c.bf16 %v3164_v49, %v3163_v19 }
 0x3da   :  { %3196 = vst [vmem:[#allocation10 + $0x78] sm:$0xff] %v3180_v6 }
 0x3db   :  { %3209 = dma.vmem_to_hbm [thread:$0]  %s3202_s13, 2048, %s3204_s16, [#allocation4], %s4394_s26, %s4394_s26, %s4395_s27  }
 0x3dc   :  { %4391 = dma.done.wait [#allocation4], 2048  }
 0x3dd   :  { %4392 = vsyncadd [#allocation4], 4294965248 }
 0x3de   :  { %3214 = vsyncpa [#allocation3], 1 }
 0x3df   :  { %3215 = vsyncpa [#allocation6], 1 }
 0x3e0   :  { %3216 = vsyncpa [#allocation9], 1 }
 0x3e1   :  { %3217 = vsyncpa [#allocation4], 1 }

</bundles_post_ra>
